<compile_context>
chip_gen: v6e
topology: v6e:2x2x1
jax: 0.10.0
libtpu: 0.0.40
codegen_flags: <defaults>
</compile_context>

<pallas_src>
import functools
import math

import jax
import jax.numpy as jnp
import numpy as np
from jax import lax
from jax.experimental import pallas as pl
from jax.experimental.pallas import tpu as pltpu

EMB = 64      # model width
HID = 1024    # value_linear hidden width
LN_EPS = 1e-5


# ----------------------------------------------------------------------------
# helpers used inside kernels (trace-time jnp)
# ----------------------------------------------------------------------------
def _layernorm(x, g, b):
    mu = jnp.mean(x, axis=-1, keepdims=True)
    var = jnp.mean(jnp.square(x - mu), axis=-1, keepdims=True)
    return (x - mu) * lax.rsqrt(var + LN_EPS) * g + b


def _gelu(x):
    # exact GELU (PyTorch nn.GELU default, erf-based)
    return x * 0.5 * (1.0 + lax.erf(x * np.float32(1.0 / math.sqrt(2.0))))


# ----------------------------------------------------------------------------
# fused kernel: one batch element per grid step (both attention stages)
# ----------------------------------------------------------------------------
def _fused_kernel(
    x_ref,
    s_ref, st_ref, ek_ref, hk_ref, hv_ref, pv_ref,
    # stage 1 (agent attention, v3) params
    g0_ref, b0_ref, we_ref, be_ref,
    gq_ref, bq0_ref, wq_ref, bq_ref,
    wkv_ref, bkv_ref,
    gvn_ref, bvn_ref,
    wl1_ref, bl1_ref, wl2_ref, bl2_ref,
    gvln_ref, bvln_ref,
    # stage 2 (time transformer, v2) params
    tg0_ref, tb0_ref, twe_ref, tbe_ref, tg1_ref, tb1_ref,
    twq_ref, tbq_ref, twkv_ref, tbkv_ref,
    tgvn_ref, tbvn_ref,
    twl1_ref, tbl1_ref, twl2_ref, tbl2_ref,
    tgvln_ref, tbvln_ref,
    twm1_ref, tbm1_ref, twm2_ref, tbm2_ref,
    # outputs
    rew_ref, attw_ref,
    *, T, A, H,
):
    dk = EMB // H
    inv_sqrt_dk = np.float32(1.0 / math.sqrt(dk))
    f32 = jnp.float32
    bf16 = jnp.bfloat16

    def xdot(a, b):
        # structural matmuls against 0/1 selection matrices: keep (near-)exact
        return jnp.dot(a, b, preferred_element_type=f32,
                       precision=lax.Precision.HIGHEST)

    def wdot(a, w):
        # weight matmuls: bf16 inputs, f32 accumulation (single MXU pass)
        return jnp.dot(a.astype(bf16), w, preferred_element_type=f32)

    S = s_ref[...]        # (T, T*A)   sum over agents within a timestep
    ST = st_ref[...]      # (T*A, T)   broadcast per-timestep value back to agents
    Ek = ek_ref[...]      # (E, 2E)    embed a (., E) array into the key lanes of (., 2E)
    Hk = hk_ref[...]      # (2E, H)    per-head sum over key lanes
    Hv = hv_ref[...]      # (H, 2E)    per-head broadcast into val lanes
    Pv = pv_ref[...]      # (2E, E)    project val lanes back to (., E)

    xf = x_ref[0].astype(f32)                                        # (T*A, obs)

    # ------------------- stage 1: agent-level attention (v3) -------------------
    emb = _gelu(wdot(_layernorm(xf, g0_ref[...], b0_ref[...]), we_ref[...])
                + be_ref[...])                                       # (T*A, E)

    sum_emb = xdot(S, emb)                                           # (T, E)
    mean_emb = sum_emb * np.float32(1.0 / A)

    q = wdot(_layernorm(sum_emb, gq_ref[...], bq0_ref[...]), wq_ref[...]) + bq_ref[...]
    kv = wdot(emb, wkv_ref[...]) + bkv_ref[...]                      # (T*A, 2E) = [key|val]

    q_ext = xdot(ST, xdot(q, Ek))                                    # (T*A, 2E), q in key lanes
    scores = xdot(q_ext * kv, Hk) * inv_sqrt_dk                      # (T*A, H)
    scores = scores - jnp.max(scores)       # single global shift; softmax-invariant per group
    e = jnp.exp(scores)
    den = xdot(ST, xdot(S, e))                                       # per-(timestep,head) denom
    w = e / den                                                      # softmax over agents
    w_ext = xdot(w, Hv)                                              # (T*A, 2E), weights in val lanes
    att_val = xdot(xdot(S, w_ext * kv), Pv)                          # (T, E)

    av1 = _layernorm(att_val + mean_emb, gvn_ref[...], bvn_ref[...])
    h1 = _gelu(wdot(av1, wl1_ref[...]) + bl1_ref[...])               # (T, HID)
    h2 = wdot(h1, wl2_ref[...]) + bl2_ref[...]                       # (T, E)
    out1 = _layernorm(h2 + av1, gvln_ref[...], bvln_ref[...])        # (T, E)

    # --------------- stage 2: time transformer (v2), per-batch ---------------
    emb2 = _layernorm(
        _gelu(wdot(_layernorm(out1, tg0_ref[...], tb0_ref[...]), twe_ref[...]) + tbe_ref[...]),
        tg1_ref[...], tb1_ref[...])                                  # (T, E)

    sum2 = jnp.sum(emb2, axis=0, keepdims=True)                      # (1, E)
    mean2 = sum2 * np.float32(1.0 / T)

    q2 = wdot(sum2, twq_ref[...]) + tbq_ref[...]                     # (1, E)
    kv2 = wdot(emb2, twkv_ref[...]) + tbkv_ref[...]                  # (T, 2E)

    s2 = xdot(xdot(q2, Ek) * kv2, Hk) * inv_sqrt_dk                  # (T, H)
    s2 = s2 - jnp.max(s2, axis=0, keepdims=True)
    e2 = jnp.exp(s2)
    w2 = e2 / jnp.sum(e2, axis=0, keepdims=True)                     # (T, H) time attn weights

    w2_ext = xdot(w2, Hv)                                            # (T, 2E)
    att2 = xdot(jnp.sum(w2_ext * kv2, axis=0, keepdims=True), Pv)    # (1, E)

    av2 = _layernorm(att2 + mean2, tgvn_ref[...], tbvn_ref[...])
    u1 = _gelu(wdot(av2, twl1_ref[...]) + tbl1_ref[...])             # (1, HID)
    u2 = wdot(u1, twl2_ref[...]) + tbl2_ref[...]                     # (1, E)
    out2 = _layernorm(u2 + av2, tgvln_ref[...], tbvln_ref[...])

    m1 = _gelu(wdot(out2, twm1_ref[...]) + tbm1_ref[...])            # (1, E)
    rew = wdot(m1, twm2_ref[...]) + tbm2_ref[...]                    # (1, 1)

    rew_ref[0] = rew.astype(rew_ref.dtype)
    attw_ref[0] = w2.astype(attw_ref.dtype)


# ----------------------------------------------------------------------------
# wrapper
# ----------------------------------------------------------------------------
def transformer_reward_predictor_v3(states, p1, p2, num_heads):
    B, T, A, obs = states.shape
    H = num_heads
    dk = EMB // H
    E2 = 2 * EMB

    x_flat = states.reshape(B, T * A, obs)   # keep caller dtype, cast inside kernel

    # constant 0/1 selection matrices (DMA'd once, VMEM-resident across the grid)
    s_np = (np.arange(T * A)[None, :] // A == np.arange(T)[:, None]).astype(np.float32)
    lane = np.arange(E2)
    hk_np = ((lane[:, None] < EMB) &
             (lane[:, None] // dk == np.arange(H)[None, :])).astype(np.float32)          # (2E, H)
    hv_np = ((lane[None, :] >= EMB) &
             ((lane[None, :] - EMB) // dk == np.arange(H)[:, None])).astype(np.float32)  # (H, 2E)
    ek_np = np.concatenate([np.eye(EMB), np.zeros((EMB, EMB))], axis=1).astype(np.float32)  # (E, 2E)
    pv_np = np.concatenate([np.zeros((EMB, EMB)), np.eye(EMB)], axis=0).astype(np.float32)  # (2E, E)
    consts = [jnp.asarray(s_np), jnp.asarray(np.ascontiguousarray(s_np.T)),
              jnp.asarray(ek_np), jnp.asarray(hk_np), jnp.asarray(hv_np), jnp.asarray(pv_np)]

    bf = lambda w: w.astype(jnp.bfloat16)    # weight matrices -> bf16 (f32 accumulate in-kernel)
    w1 = [
        p1["g0"], p1["b0"], bf(p1["We"]), p1["be"],
        p1["gq"], p1["bq_ln"], bf(p1["Wq"]), p1["bq"],
        bf(jnp.concatenate([p1["Wk"], p1["Wv"]], axis=1)),            # fused KV weight (E, 2E)
        jnp.concatenate([p1["bk"], p1["bv"]], axis=1),
        p1["gvn"], p1["bvn"],
        bf(p1["Wl1"]), p1["bl1"], bf(p1["Wl2"]), p1["bl2"],
        p1["gvln"], p1["bvln"],
    ]
    w2 = [
        p2["g0"], p2["b0"], bf(p2["We"]), p2["be"], p2["g1"], p2["b1"],
        bf(p2["Wq"]), p2["bq"],
        bf(jnp.concatenate([p2["Wk"], p2["Wv"]], axis=1)),
        jnp.concatenate([p2["bk"], p2["bv"]], axis=1),
        p2["gvn"], p2["bvn"],
        bf(p2["Wl1"]), p2["bl1"], bf(p2["Wl2"]), p2["bl2"],
        p2["gvln"], p2["bvln"],
        bf(p2["Wm1"]), p2["bm1"], bf(p2["Wm2"]), p2["bm2"],
    ]
    flat = consts + w1 + w2                                           # all 2-D arrays

    rew, attw = pl.pallas_call(
        functools.partial(_fused_kernel, T=T, A=A, H=H),
        out_shape=(jax.ShapeDtypeStruct((B, 1, 1), jnp.float32),
                   jax.ShapeDtypeStruct((B, T, H), jnp.float32)),
        grid=(B,),
        in_specs=[pl.BlockSpec((1, T * A, obs), lambda b: (b, 0, 0))]
        + [pl.BlockSpec(w.shape, lambda b: (0, 0)) for w in flat],
        out_specs=(pl.BlockSpec((1, 1, 1), lambda b: (b, 0, 0)),
                   pl.BlockSpec((1, T, H), lambda b: (b, 0, 0))),
        compiler_params=pltpu.CompilerParams(dimension_semantics=("parallel",)),
    )(x_flat, *flat)

    return rew.reshape(B, 1), jnp.transpose(attw, (0, 2, 1))[:, :, None, :]


# ----------------------------------------------------------------------------
# deterministic synthetic parameters (shapes from the module __init__)
# ----------------------------------------------------------------------------
def make_params(key, obs_dim):
    kit = iter(jax.random.split(key, 16))

    def linear_w(shape, gain):
        return (gain / math.sqrt(shape[0])) * jax.random.normal(next(kit), shape, jnp.float32)

    g_relu, g_small = math.sqrt(2.0), 0.01
    ones = lambda n: jnp.ones((1, n), jnp.float32)
    zeros = lambda n: jnp.zeros((1, n), jnp.float32)

    p1 = {
        "g0": ones(obs_dim), "b0": zeros(obs_dim),
        "We": linear_w((obs_dim, EMB), g_relu), "be": zeros(EMB),
        "gq": ones(EMB), "bq_ln": zeros(EMB),
        "Wq": linear_w((EMB, EMB), g_small), "bq": zeros(EMB),
        "Wk": linear_w((EMB, EMB), g_small), "bk": zeros(EMB),
        "Wv": linear_w((EMB, EMB), g_small), "bv": zeros(EMB),
        "gvn": ones(EMB), "bvn": zeros(EMB),
        "Wl1": linear_w((EMB, HID), g_relu), "bl1": zeros(HID),
        "Wl2": linear_w((HID, EMB), g_small), "bl2": zeros(EMB),
        "gvln": ones(EMB), "bvln": zeros(EMB),
    }
    p2 = {
        "g0": ones(EMB), "b0": zeros(EMB),
        "We": linear_w((EMB, EMB), g_relu), "be": zeros(EMB),
        "g1": ones(EMB), "b1": zeros(EMB),
        "Wq": linear_w((EMB, EMB), g_small), "bq": zeros(EMB),
        "Wk": linear_w((EMB, EMB), g_small), "bk": zeros(EMB),
        "Wv": linear_w((EMB, EMB), g_small), "bv": zeros(EMB),
        "gvn": ones(EMB), "bvn": zeros(EMB),
        "Wl1": linear_w((EMB, HID), g_relu), "bl1": zeros(HID),
        "Wl2": linear_w((HID, EMB), g_small), "bl2": zeros(EMB),
        "gvln": ones(EMB), "bvln": zeros(EMB),
        "Wm1": linear_w((EMB, EMB), g_relu), "bm1": zeros(EMB),
        "Wm2": linear_w((EMB, 1), g_small), "bm2": zeros(1),
    }
    return p1, p2


# ----------------------------------------------------------------------------
# pure-JAX reference (mirrors the PyTorch forward) for a sanity check
# ----------------------------------------------------------------------------
def reference_forward(states, p1, p2, H):
    B, T, A, _ = states.shape
    dk = EMB // H
    x = states.astype(jnp.float32)
    emb = _gelu(_layernorm(x, p1["g0"], p1["b0"]) @ p1["We"] + p1["be"])      # (B,T,A,E)
    sum_emb, mean_emb = emb.sum(axis=2), emb.mean(axis=2)
    q = _layernorm(sum_emb, p1["gq"], p1["bq_ln"]) @ p1["Wq"] + p1["bq"]
    k = emb @ p1["Wk"] + p1["bk"]
    v = emb @ p1["Wv"] + p1["bv"]
    qh = q.reshape(B, T, 1, H, dk).transpose(0, 1, 3, 2, 4)
    kh = k.reshape(B, T, A, H, dk).transpose(0, 1, 3, 2, 4)
    vh = v.reshape(B, T, A, H, dk).transpose(0, 1, 3, 2, 4)
    aw = jax.nn.softmax(jnp.einsum("bthqd,bthad->bthqa", qh, kh) / math.sqrt(dk), axis=-1)
    av = jnp.einsum("bthqa,bthad->bthqd", aw, vh)[:, :, :, 0, :].reshape(B, T, EMB)
    av_ = _layernorm(av + mean_emb, p1["gvn"], p1["bvn"])
    h2 = _gelu(av_ @ p1["Wl1"] + p1["bl1"]) @ p1["Wl2"] + p1["bl2"]
    out1 = _layernorm(h2 + av_, p1["gvln"], p1["bvln"])                       # (B,T,E)

    e2 = _layernorm(_gelu(_layernorm(out1, p2["g0"], p2["b0"]) @ p2["We"] + p2["be"]),
                    p2["g1"], p2["b1"])
    s2, m2 = e2.sum(axis=1), e2.mean(axis=1)
    q2 = s2 @ p2["Wq"] + p2["bq"]
    k2 = e2 @ p2["Wk"] + p2["bk"]
    v2 = e2 @ p2["Wv"] + p2["bv"]
    q2h = q2.reshape(B, 1, H, dk).transpose(0, 2, 1, 3)
    k2h = k2.reshape(B, T, H, dk).transpose(0, 2, 1, 3)
    v2h = v2.reshape(B, T, H, dk).transpose(0, 2, 1, 3)
    aw2 = jax.nn.softmax(jnp.einsum("bhqd,bhtd->bhqt", q2h, k2h) / math.sqrt(dk), axis=-1)
    av2 = jnp.einsum("bhqt,bhtd->bhqd", aw2, v2h)[:, :, 0, :].reshape(B, EMB)
    av2_ = _layernorm(av2 + m2, p2["gvn"], p2["bvn"])
    hh2 = _gelu(av2_ @ p2["Wl1"] + p2["bl1"]) @ p2["Wl2"] + p2["bl2"]
    o2 = _layernorm(hh2 + av2_, p2["gvln"], p2["bvln"])
    rew = _gelu(o2 @ p2["Wm1"] + p2["bm1"]) @ p2["Wm2"] + p2["bm2"]
    return rew, aw2


if __name__ == "__main__":
    B, T, A, OBS, H = 2, 8, 4, 16, 4   # batch, num_steps, n_agents, obs_dim, heads
    key = jax.random.PRNGKey(0)
    k_x, k_p = jax.random.split(key)
    states = jax.random.normal(k_x, (B, T, A, OBS), jnp.float32)
    p1, p2 = make_params(k_p, OBS)

    fwd = jax.jit(functools.partial(transformer_reward_predictor_v3, num_heads=H))
    ep_reward, attn_weights = fwd(states, p1, p2)
    jax.block_until_ready((ep_reward, attn_weights))

    assert ep_reward.shape == (B, 1)
    assert attn_weights.shape == (B, H, 1, T)

    rew_ref, attw_ref = reference_forward(states, p1, p2, H)
    np.testing.assert_allclose(np.asarray(ep_reward), np.asarray(rew_ref), rtol=2e-2, atol=2e-3)
    np.testing.assert_allclose(np.asarray(attn_weights), np.asarray(attw_ref), rtol=2e-2, atol=2e-3)

    print("KERNEL_OK")
</pallas_src>

<mosaic_0001>
module attributes {stable_mosaic.version = 11 : i64} {
  func.func @_fused_kernel(%arg0: i32, %arg1: memref<1x32x16xf32, #tpu.memory_space<vmem>>, %arg2: memref<8x32xf32, #tpu.memory_space<vmem>>, %arg3: memref<32x8xf32, #tpu.memory_space<vmem>>, %arg4: memref<64x128xf32, #tpu.memory_space<vmem>>, %arg5: memref<128x4xf32, #tpu.memory_space<vmem>>, %arg6: memref<4x128xf32, #tpu.memory_space<vmem>>, %arg7: memref<128x64xf32, #tpu.memory_space<vmem>>, %arg8: memref<1x16xf32, #tpu.memory_space<vmem>>, %arg9: memref<1x16xf32, #tpu.memory_space<vmem>>, %arg10: memref<16x64xbf16, #tpu.memory_space<vmem>>, %arg11: memref<1x64xf32, #tpu.memory_space<vmem>>, %arg12: memref<1x64xf32, #tpu.memory_space<vmem>>, %arg13: memref<1x64xf32, #tpu.memory_space<vmem>>, %arg14: memref<64x64xbf16, #tpu.memory_space<vmem>>, %arg15: memref<1x64xf32, #tpu.memory_space<vmem>>, %arg16: memref<64x128xbf16, #tpu.memory_space<vmem>>, %arg17: memref<1x128xf32, #tpu.memory_space<vmem>>, %arg18: memref<1x64xf32, #tpu.memory_space<vmem>>, %arg19: memref<1x64xf32, #tpu.memory_space<vmem>>, %arg20: memref<64x1024xbf16, #tpu.memory_space<vmem>>, %arg21: memref<1x1024xf32, #tpu.memory_space<vmem>>, %arg22: memref<1024x64xbf16, #tpu.memory_space<vmem>>, %arg23: memref<1x64xf32, #tpu.memory_space<vmem>>, %arg24: memref<1x64xf32, #tpu.memory_space<vmem>>, %arg25: memref<1x64xf32, #tpu.memory_space<vmem>>, %arg26: memref<1x64xf32, #tpu.memory_space<vmem>>, %arg27: memref<1x64xf32, #tpu.memory_space<vmem>>, %arg28: memref<64x64xbf16, #tpu.memory_space<vmem>>, %arg29: memref<1x64xf32, #tpu.memory_space<vmem>>, %arg30: memref<1x64xf32, #tpu.memory_space<vmem>>, %arg31: memref<1x64xf32, #tpu.memory_space<vmem>>, %arg32: memref<64x64xbf16, #tpu.memory_space<vmem>>, %arg33: memref<1x64xf32, #tpu.memory_space<vmem>>, %arg34: memref<64x128xbf16, #tpu.memory_space<vmem>>, %arg35: memref<1x128xf32, #tpu.memory_space<vmem>>, %arg36: memref<1x64xf32, #tpu.memory_space<vmem>>, %arg37: memref<1x64xf32, #tpu.memory_space<vmem>>, %arg38: memref<64x1024xbf16, #tpu.memory_space<vmem>>, %arg39: memref<1x1024xf32, #tpu.memory_space<vmem>>, %arg40: memref<1024x64xbf16, #tpu.memory_space<vmem>>, %arg41: memref<1x64xf32, #tpu.memory_space<vmem>>, %arg42: memref<1x64xf32, #tpu.memory_space<vmem>>, %arg43: memref<1x64xf32, #tpu.memory_space<vmem>>, %arg44: memref<64x64xbf16, #tpu.memory_space<vmem>>, %arg45: memref<1x64xf32, #tpu.memory_space<vmem>>, %arg46: memref<64x1xbf16, #tpu.memory_space<vmem>>, %arg47: memref<1x1xf32, #tpu.memory_space<vmem>>, %arg48: memref<1x1x1xf32, #tpu.memory_space<vmem>>, %arg49: memref<1x8x4xf32, #tpu.memory_space<vmem>>) attributes {dimension_semantics = [#tpu.dimension_semantics<parallel>], iteration_bounds = array<i64: 2>, scalar_prefetch = 0 : i64, scratch_operands = 0 : i64, tpu.core_type = #tpu.core_type<tc>, window_params = [{transform_indices = @transform_0, window_bounds = array<i64: 1, 32, 16>}, {pipeline_mode = #tpu.pipeline_mode<synchronous>, transform_indices = @transform_1, window_bounds = array<i64: 8, 32>}, {pipeline_mode = #tpu.pipeline_mode<synchronous>, transform_indices = @transform_2, window_bounds = array<i64: 32, 8>}, {pipeline_mode = #tpu.pipeline_mode<synchronous>, transform_indices = @transform_3, window_bounds = array<i64: 64, 128>}, {pipeline_mode = #tpu.pipeline_mode<synchronous>, transform_indices = @transform_4, window_bounds = array<i64: 128, 4>}, {pipeline_mode = #tpu.pipeline_mode<synchronous>, transform_indices = @transform_5, window_bounds = array<i64: 4, 128>}, {pipeline_mode = #tpu.pipeline_mode<synchronous>, transform_indices = @transform_6, window_bounds = array<i64: 128, 64>}, {pipeline_mode = #tpu.pipeline_mode<synchronous>, transform_indices = @transform_7, window_bounds = array<i64: 1, 16>}, {pipeline_mode = #tpu.pipeline_mode<synchronous>, transform_indices = @transform_8, window_bounds = array<i64: 1, 16>}, {pipeline_mode = #tpu.pipeline_mode<synchronous>, transform_indices = @transform_9, window_bounds = array<i64: 16, 64>}, {pipeline_mode = #tpu.pipeline_mode<synchronous>, transform_indices = @transform_10, window_bounds = array<i64: 1, 64>}, {pipeline_mode = #tpu.pipeline_mode<synchronous>, transform_indices = @transform_11, window_bounds = array<i64: 1, 64>}, {pipeline_mode = #tpu.pipeline_mode<synchronous>, transform_indices = @transform_12, window_bounds = array<i64: 1, 64>}, {pipeline_mode = #tpu.pipeline_mode<synchronous>, transform_indices = @transform_13, window_bounds = array<i64: 64, 64>}, {pipeline_mode = #tpu.pipeline_mode<synchronous>, transform_indices = @transform_14, window_bounds = array<i64: 1, 64>}, {pipeline_mode = #tpu.pipeline_mode<synchronous>, transform_indices = @transform_15, window_bounds = array<i64: 64, 128>}, {pipeline_mode = #tpu.pipeline_mode<synchronous>, transform_indices = @transform_16, window_bounds = array<i64: 1, 128>}, {pipeline_mode = #tpu.pipeline_mode<synchronous>, transform_indices = @transform_17, window_bounds = array<i64: 1, 64>}, {pipeline_mode = #tpu.pipeline_mode<synchronous>, transform_indices = @transform_18, window_bounds = array<i64: 1, 64>}, {pipeline_mode = #tpu.pipeline_mode<synchronous>, transform_indices = @transform_19, window_bounds = array<i64: 64, 1024>}, {pipeline_mode = #tpu.pipeline_mode<synchronous>, transform_indices = @transform_20, window_bounds = array<i64: 1, 1024>}, {pipeline_mode = #tpu.pipeline_mode<synchronous>, transform_indices = @transform_21, window_bounds = array<i64: 1024, 64>}, {pipeline_mode = #tpu.pipeline_mode<synchronous>, transform_indices = @transform_22, window_bounds = array<i64: 1, 64>}, {pipeline_mode = #tpu.pipeline_mode<synchronous>, transform_indices = @transform_23, window_bounds = array<i64: 1, 64>}, {pipeline_mode = #tpu.pipeline_mode<synchronous>, transform_indices = @transform_24, window_bounds = array<i64: 1, 64>}, {pipeline_mode = #tpu.pipeline_mode<synchronous>, transform_indices = @transform_25, window_bounds = array<i64: 1, 64>}, {pipeline_mode = #tpu.pipeline_mode<synchronous>, transform_indices = @transform_26, window_bounds = array<i64: 1, 64>}, {pipeline_mode = #tpu.pipeline_mode<synchronous>, transform_indices = @transform_27, window_bounds = array<i64: 64, 64>}, {pipeline_mode = #tpu.pipeline_mode<synchronous>, transform_indices = @transform_28, window_bounds = array<i64: 1, 64>}, {pipeline_mode = #tpu.pipeline_mode<synchronous>, transform_indices = @transform_29, window_bounds = array<i64: 1, 64>}, {pipeline_mode = #tpu.pipeline_mode<synchronous>, transform_indices = @transform_30, window_bounds = array<i64: 1, 64>}, {pipeline_mode = #tpu.pipeline_mode<synchronous>, transform_indices = @transform_31, window_bounds = array<i64: 64, 64>}, {pipeline_mode = #tpu.pipeline_mode<synchronous>, transform_indices = @transform_32, window_bounds = array<i64: 1, 64>}, {pipeline_mode = #tpu.pipeline_mode<synchronous>, transform_indices = @transform_33, window_bounds = array<i64: 64, 128>}, {pipeline_mode = #tpu.pipeline_mode<synchronous>, transform_indices = @transform_34, window_bounds = array<i64: 1, 128>}, {pipeline_mode = #tpu.pipeline_mode<synchronous>, transform_indices = @transform_35, window_bounds = array<i64: 1, 64>}, {pipeline_mode = #tpu.pipeline_mode<synchronous>, transform_indices = @transform_36, window_bounds = array<i64: 1, 64>}, {pipeline_mode = #tpu.pipeline_mode<synchronous>, transform_indices = @transform_37, window_bounds = array<i64: 64, 1024>}, {pipeline_mode = #tpu.pipeline_mode<synchronous>, transform_indices = @transform_38, window_bounds = array<i64: 1, 1024>}, {pipeline_mode = #tpu.pipeline_mode<synchronous>, transform_indices = @transform_39, window_bounds = array<i64: 1024, 64>}, {pipeline_mode = #tpu.pipeline_mode<synchronous>, transform_indices = @transform_40, window_bounds = array<i64: 1, 64>}, {pipeline_mode = #tpu.pipeline_mode<synchronous>, transform_indices = @transform_41, window_bounds = array<i64: 1, 64>}, {pipeline_mode = #tpu.pipeline_mode<synchronous>, transform_indices = @transform_42, window_bounds = array<i64: 1, 64>}, {pipeline_mode = #tpu.pipeline_mode<synchronous>, transform_indices = @transform_43, window_bounds = array<i64: 64, 64>}, {pipeline_mode = #tpu.pipeline_mode<synchronous>, transform_indices = @transform_44, window_bounds = array<i64: 1, 64>}, {pipeline_mode = #tpu.pipeline_mode<synchronous>, transform_indices = @transform_45, window_bounds = array<i64: 64, 1>}, {pipeline_mode = #tpu.pipeline_mode<synchronous>, transform_indices = @transform_46, window_bounds = array<i64: 1, 1>}, {transform_indices = @transform_47, window_bounds = array<i64: 1, 1, 1>}, {transform_indices = @transform_48, window_bounds = array<i64: 1, 8, 4>}]} {
    %c0 = arith.constant 0 : index
    %c0_0 = arith.constant 0 : index
    %0 = vector.load %arg2[%c0, %c0_0] : memref<8x32xf32, #tpu.memory_space<vmem>>, vector<8x32xf32>
    %c0_1 = arith.constant 0 : index
    %c0_2 = arith.constant 0 : index
    %1 = vector.load %arg3[%c0_1, %c0_2] : memref<32x8xf32, #tpu.memory_space<vmem>>, vector<32x8xf32>
    %c0_3 = arith.constant 0 : index
    %c0_4 = arith.constant 0 : index
    %2 = vector.load %arg4[%c0_3, %c0_4] : memref<64x128xf32, #tpu.memory_space<vmem>>, vector<64x128xf32>
    %c0_5 = arith.constant 0 : index
    %c0_6 = arith.constant 0 : index
    %3 = vector.load %arg5[%c0_5, %c0_6] : memref<128x4xf32, #tpu.memory_space<vmem>>, vector<128x4xf32>
    %c0_7 = arith.constant 0 : index
    %c0_8 = arith.constant 0 : index
    %4 = vector.load %arg6[%c0_7, %c0_8] : memref<4x128xf32, #tpu.memory_space<vmem>>, vector<4x128xf32>
    %c0_9 = arith.constant 0 : index
    %c0_10 = arith.constant 0 : index
    %5 = vector.load %arg7[%c0_9, %c0_10] : memref<128x64xf32, #tpu.memory_space<vmem>>, vector<128x64xf32>
    %c0_11 = arith.constant 0 : index
    %c0_12 = arith.constant 0 : index
    %c0_13 = arith.constant 0 : index
    %6 = vector.load %arg1[%c0_11, %c0_12, %c0_13] : memref<1x32x16xf32, #tpu.memory_space<vmem>>, vector<1x32x16xf32>
    %7 = vector.shape_cast %6 : vector<1x32x16xf32> to vector<32x16xf32>
    %c0_14 = arith.constant 0 : index
    %c0_15 = arith.constant 0 : index
    %8 = vector.load %arg8[%c0_14, %c0_15] : memref<1x16xf32, #tpu.memory_space<vmem>>, vector<1x16xf32>
    %c0_16 = arith.constant 0 : index
    %c0_17 = arith.constant 0 : index
    %9 = vector.load %arg9[%c0_16, %c0_17] : memref<1x16xf32, #tpu.memory_space<vmem>>, vector<1x16xf32>
    %cst = arith.constant dense<0.000000e+00> : vector<32xf32>
    %10 = vector.multi_reduction <add>, %7, %cst [1] : vector<32x16xf32> to vector<32xf32>
    %11 = vector.shape_cast %10 : vector<32xf32> to vector<32x1xf32>
    %cst_18 = arith.constant 1.600000e+01 : f32
    %12 = vector.broadcast %cst_18 : f32 to vector<32x1xf32>
    %13 = arith.divf %11, %12 : vector<32x1xf32>
    %14 = vector.broadcast %13 : vector<32x1xf32> to vector<32x16xf32>
    %15 = arith.subf %7, %14 : vector<32x16xf32>
    %16 = arith.mulf %15, %15 : vector<32x16xf32>
    %cst_19 = arith.constant dense<0.000000e+00> : vector<32xf32>
    %17 = vector.multi_reduction <add>, %16, %cst_19 [1] : vector<32x16xf32> to vector<32xf32>
    %18 = vector.shape_cast %17 : vector<32xf32> to vector<32x1xf32>
    %cst_20 = arith.constant 1.600000e+01 : f32
    %19 = vector.broadcast %cst_20 : f32 to vector<32x1xf32>
    %20 = arith.divf %18, %19 : vector<32x1xf32>
    %21 = vector.broadcast %13 : vector<32x1xf32> to vector<32x16xf32>
    %22 = arith.subf %7, %21 : vector<32x16xf32>
    %cst_21 = arith.constant 9.99999974E-6 : f32
    %23 = vector.broadcast %cst_21 : f32 to vector<32x1xf32>
    %24 = arith.addf %20, %23 : vector<32x1xf32>
    %25 = math.rsqrt %24 : vector<32x1xf32>
    %26 = vector.broadcast %25 : vector<32x1xf32> to vector<32x16xf32>
    %27 = arith.mulf %22, %26 : vector<32x16xf32>
    %28 = vector.broadcast %8 : vector<1x16xf32> to vector<32x16xf32>
    %29 = arith.mulf %27, %28 : vector<32x16xf32>
    %30 = vector.broadcast %9 : vector<1x16xf32> to vector<32x16xf32>
    %31 = arith.addf %29, %30 : vector<32x16xf32>
    %c0_22 = arith.constant 0 : index
    %c0_23 = arith.constant 0 : index
    %32 = vector.load %arg10[%c0_22, %c0_23] : memref<16x64xbf16, #tpu.memory_space<vmem>>, vector<16x64xbf16>
    %33 = arith.truncf %31 : vector<32x16xf32> to vector<32x16xbf16>
    %cst_24 = arith.constant dense<0.000000e+00> : vector<32x64xf32>
    %34 = tpu.matmul %33, %32, %cst_24 {dimension_numbers = #tpu.dot_dimension_numbers<[1], [0], [0], [1], [0, 0, 1, 1], [], []>} : vector<32x16xbf16>, vector<16x64xbf16>, vector<32x64xf32> -> vector<32x64xf32>
    %c0_25 = arith.constant 0 : index
    %c0_26 = arith.constant 0 : index
    %35 = vector.load %arg11[%c0_25, %c0_26] : memref<1x64xf32, #tpu.memory_space<vmem>>, vector<1x64xf32>
    %36 = vector.broadcast %35 : vector<1x64xf32> to vector<32x64xf32>
    %37 = arith.addf %34, %36 : vector<32x64xf32>
    %cst_27 = arith.constant 5.000000e-01 : f32
    %38 = vector.broadcast %cst_27 : f32 to vector<32x64xf32>
    %39 = arith.mulf %37, %38 : vector<32x64xf32>
    %cst_28 = arith.constant 0.707106769 : f32
    %40 = vector.broadcast %cst_28 : f32 to vector<32x64xf32>
    %41 = arith.mulf %37, %40 : vector<32x64xf32>
    %42 = math.erf %41 : vector<32x64xf32>
    %cst_29 = arith.constant 1.000000e+00 : f32
    %43 = vector.broadcast %cst_29 : f32 to vector<32x64xf32>
    %44 = arith.addf %43, %42 : vector<32x64xf32>
    %45 = arith.mulf %39, %44 : vector<32x64xf32>
    %cst_30 = arith.constant dense<0.000000e+00> : vector<8x64xf32>
    %46 = tpu.matmul %0, %45, %cst_30 {dimension_numbers = #tpu.dot_dimension_numbers<[1], [0], [0], [1], [0, 0, 1, 1], [], []>, precision = #tpu.contract_precision<fp32>} : vector<8x32xf32>, vector<32x64xf32>, vector<8x64xf32> -> vector<8x64xf32>
    %cst_31 = arith.constant 2.500000e-01 : f32
    %47 = vector.broadcast %cst_31 : f32 to vector<8x64xf32>
    %48 = arith.mulf %46, %47 : vector<8x64xf32>
    %c0_32 = arith.constant 0 : index
    %c0_33 = arith.constant 0 : index
    %49 = vector.load %arg12[%c0_32, %c0_33] : memref<1x64xf32, #tpu.memory_space<vmem>>, vector<1x64xf32>
    %c0_34 = arith.constant 0 : index
    %c0_35 = arith.constant 0 : index
    %50 = vector.load %arg13[%c0_34, %c0_35] : memref<1x64xf32, #tpu.memory_space<vmem>>, vector<1x64xf32>
    %cst_36 = arith.constant dense<0.000000e+00> : vector<8xf32>
    %51 = vector.multi_reduction <add>, %46, %cst_36 [1] : vector<8x64xf32> to vector<8xf32>
    %52 = vector.shape_cast %51 : vector<8xf32> to vector<8x1xf32>
    %cst_37 = arith.constant 6.400000e+01 : f32
    %53 = vector.broadcast %cst_37 : f32 to vector<8x1xf32>
    %54 = arith.divf %52, %53 : vector<8x1xf32>
    %55 = vector.broadcast %54 : vector<8x1xf32> to vector<8x64xf32>
    %56 = arith.subf %46, %55 : vector<8x64xf32>
    %57 = arith.mulf %56, %56 : vector<8x64xf32>
    %cst_38 = arith.constant dense<0.000000e+00> : vector<8xf32>
    %58 = vector.multi_reduction <add>, %57, %cst_38 [1] : vector<8x64xf32> to vector<8xf32>
    %59 = vector.shape_cast %58 : vector<8xf32> to vector<8x1xf32>
    %cst_39 = arith.constant 6.400000e+01 : f32
    %60 = vector.broadcast %cst_39 : f32 to vector<8x1xf32>
    %61 = arith.divf %59, %60 : vector<8x1xf32>
    %62 = vector.broadcast %54 : vector<8x1xf32> to vector<8x64xf32>
    %63 = arith.subf %46, %62 : vector<8x64xf32>
    %cst_40 = arith.constant 9.99999974E-6 : f32
    %64 = vector.broadcast %cst_40 : f32 to vector<8x1xf32>
    %65 = arith.addf %61, %64 : vector<8x1xf32>
    %66 = math.rsqrt %65 : vector<8x1xf32>
    %67 = vector.broadcast %66 : vector<8x1xf32> to vector<8x64xf32>
    %68 = arith.mulf %63, %67 : vector<8x64xf32>
    %69 = vector.broadcast %49 : vector<1x64xf32> to vector<8x64xf32>
    %70 = arith.mulf %68, %69 : vector<8x64xf32>
    %71 = vector.broadcast %50 : vector<1x64xf32> to vector<8x64xf32>
    %72 = arith.addf %70, %71 : vector<8x64xf32>
    %c0_41 = arith.constant 0 : index
    %c0_42 = arith.constant 0 : index
    %73 = vector.load %arg14[%c0_41, %c0_42] : memref<64x64xbf16, #tpu.memory_space<vmem>>, vector<64x64xbf16>
    %74 = arith.truncf %72 : vector<8x64xf32> to vector<8x64xbf16>
    %cst_43 = arith.constant dense<0.000000e+00> : vector<8x64xf32>
    %75 = tpu.matmul %74, %73, %cst_43 {dimension_numbers = #tpu.dot_dimension_numbers<[1], [0], [0], [1], [0, 0, 1, 1], [], []>} : vector<8x64xbf16>, vector<64x64xbf16>, vector<8x64xf32> -> vector<8x64xf32>
    %c0_44 = arith.constant 0 : index
    %c0_45 = arith.constant 0 : index
    %76 = vector.load %arg15[%c0_44, %c0_45] : memref<1x64xf32, #tpu.memory_space<vmem>>, vector<1x64xf32>
    %77 = vector.broadcast %76 : vector<1x64xf32> to vector<8x64xf32>
    %78 = arith.addf %75, %77 : vector<8x64xf32>
    %c0_46 = arith.constant 0 : index
    %c0_47 = arith.constant 0 : index
    %79 = vector.load %arg16[%c0_46, %c0_47] : memref<64x128xbf16, #tpu.memory_space<vmem>>, vector<64x128xbf16>
    %80 = arith.truncf %45 : vector<32x64xf32> to vector<32x64xbf16>
    %cst_48 = arith.constant dense<0.000000e+00> : vector<32x128xf32>
    %81 = tpu.matmul %80, %79, %cst_48 {dimension_numbers = #tpu.dot_dimension_numbers<[1], [0], [0], [1], [0, 0, 1, 1], [], []>} : vector<32x64xbf16>, vector<64x128xbf16>, vector<32x128xf32> -> vector<32x128xf32>
    %c0_49 = arith.constant 0 : index
    %c0_50 = arith.constant 0 : index
    %82 = vector.load %arg17[%c0_49, %c0_50] : memref<1x128xf32, #tpu.memory_space<vmem>>, vector<1x128xf32>
    %83 = vector.broadcast %82 : vector<1x128xf32> to vector<32x128xf32>
    %84 = arith.addf %81, %83 : vector<32x128xf32>
    %cst_51 = arith.constant dense<0.000000e+00> : vector<8x128xf32>
    %85 = tpu.matmul %78, %2, %cst_51 {dimension_numbers = #tpu.dot_dimension_numbers<[1], [0], [0], [1], [0, 0, 1, 1], [], []>, precision = #tpu.contract_precision<fp32>} : vector<8x64xf32>, vector<64x128xf32>, vector<8x128xf32> -> vector<8x128xf32>
    %cst_52 = arith.constant dense<0.000000e+00> : vector<32x128xf32>
    %86 = tpu.matmul %1, %85, %cst_52 {dimension_numbers = #tpu.dot_dimension_numbers<[1], [0], [0], [1], [0, 0, 1, 1], [], []>, precision = #tpu.contract_precision<fp32>} : vector<32x8xf32>, vector<8x128xf32>, vector<32x128xf32> -> vector<32x128xf32>
    %87 = arith.mulf %86, %84 : vector<32x128xf32>
    %cst_53 = arith.constant dense<0.000000e+00> : vector<32x4xf32>
    %88 = tpu.matmul %87, %3, %cst_53 {dimension_numbers = #tpu.dot_dimension_numbers<[1], [0], [0], [1], [0, 0, 1, 1], [], []>, precision = #tpu.contract_precision<fp32>} : vector<32x128xf32>, vector<128x4xf32>, vector<32x4xf32> -> vector<32x4xf32>
    %cst_54 = arith.constant 2.500000e-01 : f32
    %89 = vector.broadcast %cst_54 : f32 to vector<32x4xf32>
    %90 = arith.mulf %88, %89 : vector<32x4xf32>
    %91 = vector.shape_cast %90 : vector<32x4xf32> to vector<1x32x4xf32>
    %cst_55 = arith.constant dense<0xFF800000> : vector<1xf32>
    %92 = vector.multi_reduction <maximumf>, %91, %cst_55 [1, 2] : vector<1x32x4xf32> to vector<1xf32>
    %93 = vector.shape_cast %92 : vector<1xf32> to vector<1x1x1xf32>
    %94 = vector.extract %93[0, 0, 0] : f32 from vector<1x1x1xf32>
    %95 = vector.broadcast %94 : f32 to vector<32x4xf32>
    %96 = arith.subf %90, %95 : vector<32x4xf32>
    %97 = math.exp %96 : vector<32x4xf32>
    %cst_56 = arith.constant dense<0.000000e+00> : vector<8x4xf32>
    %98 = tpu.matmul %0, %97, %cst_56 {dimension_numbers = #tpu.dot_dimension_numbers<[1], [0], [0], [1], [0, 0, 1, 1], [], []>, precision = #tpu.contract_precision<fp32>} : vector<8x32xf32>, vector<32x4xf32>, vector<8x4xf32> -> vector<8x4xf32>
    %cst_57 = arith.constant dense<0.000000e+00> : vector<32x4xf32>
    %99 = tpu.matmul %1, %98, %cst_57 {dimension_numbers = #tpu.dot_dimension_numbers<[1], [0], [0], [1], [0, 0, 1, 1], [], []>, precision = #tpu.contract_precision<fp32>} : vector<32x8xf32>, vector<8x4xf32>, vector<32x4xf32> -> vector<32x4xf32>
    %100 = arith.divf %97, %99 : vector<32x4xf32>
    %cst_58 = arith.constant dense<0.000000e+00> : vector<32x128xf32>
    %101 = tpu.matmul %100, %4, %cst_58 {dimension_numbers = #tpu.dot_dimension_numbers<[1], [0], [0], [1], [0, 0, 1, 1], [], []>, precision = #tpu.contract_precision<fp32>} : vector<32x4xf32>, vector<4x128xf32>, vector<32x128xf32> -> vector<32x128xf32>
    %102 = arith.mulf %101, %84 : vector<32x128xf32>
    %cst_59 = arith.constant dense<0.000000e+00> : vector<8x128xf32>
    %103 = tpu.matmul %0, %102, %cst_59 {dimension_numbers = #tpu.dot_dimension_numbers<[1], [0], [0], [1], [0, 0, 1, 1], [], []>, precision = #tpu.contract_precision<fp32>} : vector<8x32xf32>, vector<32x128xf32>, vector<8x128xf32> -> vector<8x128xf32>
    %cst_60 = arith.constant dense<0.000000e+00> : vector<8x64xf32>
    %104 = tpu.matmul %103, %5, %cst_60 {dimension_numbers = #tpu.dot_dimension_numbers<[1], [0], [0], [1], [0, 0, 1, 1], [], []>, precision = #tpu.contract_precision<fp32>} : vector<8x128xf32>, vector<128x64xf32>, vector<8x64xf32> -> vector<8x64xf32>
    %105 = arith.addf %104, %48 : vector<8x64xf32>
    %c0_61 = arith.constant 0 : index
    %c0_62 = arith.constant 0 : index
    %106 = vector.load %arg18[%c0_61, %c0_62] : memref<1x64xf32, #tpu.memory_space<vmem>>, vector<1x64xf32>
    %c0_63 = arith.constant 0 : index
    %c0_64 = arith.constant 0 : index
    %107 = vector.load %arg19[%c0_63, %c0_64] : memref<1x64xf32, #tpu.memory_space<vmem>>, vector<1x64xf32>
    %cst_65 = arith.constant dense<0.000000e+00> : vector<8xf32>
    %108 = vector.multi_reduction <add>, %105, %cst_65 [1] : vector<8x64xf32> to vector<8xf32>
    %109 = vector.shape_cast %108 : vector<8xf32> to vector<8x1xf32>
    %cst_66 = arith.constant 6.400000e+01 : f32
    %110 = vector.broadcast %cst_66 : f32 to vector<8x1xf32>
    %111 = arith.divf %109, %110 : vector<8x1xf32>
    %112 = vector.broadcast %111 : vector<8x1xf32> to vector<8x64xf32>
    %113 = arith.subf %105, %112 : vector<8x64xf32>
    %114 = arith.mulf %113, %113 : vector<8x64xf32>
    %cst_67 = arith.constant dense<0.000000e+00> : vector<8xf32>
    %115 = vector.multi_reduction <add>, %114, %cst_67 [1] : vector<8x64xf32> to vector<8xf32>
    %116 = vector.shape_cast %115 : vector<8xf32> to vector<8x1xf32>
    %cst_68 = arith.constant 6.400000e+01 : f32
    %117 = vector.broadcast %cst_68 : f32 to vector<8x1xf32>
    %118 = arith.divf %116, %117 : vector<8x1xf32>
    %119 = vector.broadcast %111 : vector<8x1xf32> to vector<8x64xf32>
    %120 = arith.subf %105, %119 : vector<8x64xf32>
    %cst_69 = arith.constant 9.99999974E-6 : f32
    %121 = vector.broadcast %cst_69 : f32 to vector<8x1xf32>
    %122 = arith.addf %118, %121 : vector<8x1xf32>
    %123 = math.rsqrt %122 : vector<8x1xf32>
    %124 = vector.broadcast %123 : vector<8x1xf32> to vector<8x64xf32>
    %125 = arith.mulf %120, %124 : vector<8x64xf32>
    %126 = vector.broadcast %106 : vector<1x64xf32> to vector<8x64xf32>
    %127 = arith.mulf %125, %126 : vector<8x64xf32>
    %128 = vector.broadcast %107 : vector<1x64xf32> to vector<8x64xf32>
    %129 = arith.addf %127, %128 : vector<8x64xf32>
    %c0_70 = arith.constant 0 : index
    %c0_71 = arith.constant 0 : index
    %130 = vector.load %arg20[%c0_70, %c0_71] : memref<64x1024xbf16, #tpu.memory_space<vmem>>, vector<64x1024xbf16>
    %131 = arith.truncf %129 : vector<8x64xf32> to vector<8x64xbf16>
    %cst_72 = arith.constant dense<0.000000e+00> : vector<8x1024xf32>
    %132 = tpu.matmul %131, %130, %cst_72 {dimension_numbers = #tpu.dot_dimension_numbers<[1], [0], [0], [1], [0, 0, 1, 1], [], []>} : vector<8x64xbf16>, vector<64x1024xbf16>, vector<8x1024xf32> -> vector<8x1024xf32>
    %c0_73 = arith.constant 0 : index
    %c0_74 = arith.constant 0 : index
    %133 = vector.load %arg21[%c0_73, %c0_74] : memref<1x1024xf32, #tpu.memory_space<vmem>>, vector<1x1024xf32>
    %134 = vector.broadcast %133 : vector<1x1024xf32> to vector<8x1024xf32>
    %135 = arith.addf %132, %134 : vector<8x1024xf32>
    %cst_75 = arith.constant 5.000000e-01 : f32
    %136 = vector.broadcast %cst_75 : f32 to vector<8x1024xf32>
    %137 = arith.mulf %135, %136 : vector<8x1024xf32>
    %cst_76 = arith.constant 0.707106769 : f32
    %138 = vector.broadcast %cst_76 : f32 to vector<8x1024xf32>
    %139 = arith.mulf %135, %138 : vector<8x1024xf32>
    %140 = math.erf %139 : vector<8x1024xf32>
    %cst_77 = arith.constant 1.000000e+00 : f32
    %141 = vector.broadcast %cst_77 : f32 to vector<8x1024xf32>
    %142 = arith.addf %141, %140 : vector<8x1024xf32>
    %143 = arith.mulf %137, %142 : vector<8x1024xf32>
    %c0_78 = arith.constant 0 : index
    %c0_79 = arith.constant 0 : index
    %144 = vector.load %arg22[%c0_78, %c0_79] : memref<1024x64xbf16, #tpu.memory_space<vmem>>, vector<1024x64xbf16>
    %145 = arith.truncf %143 : vector<8x1024xf32> to vector<8x1024xbf16>
    %cst_80 = arith.constant dense<0.000000e+00> : vector<8x64xf32>
    %146 = tpu.matmul %145, %144, %cst_80 {dimension_numbers = #tpu.dot_dimension_numbers<[1], [0], [0], [1], [0, 0, 1, 1], [], []>} : vector<8x1024xbf16>, vector<1024x64xbf16>, vector<8x64xf32> -> vector<8x64xf32>
    %c0_81 = arith.constant 0 : index
    %c0_82 = arith.constant 0 : index
    %147 = vector.load %arg23[%c0_81, %c0_82] : memref<1x64xf32, #tpu.memory_space<vmem>>, vector<1x64xf32>
    %148 = vector.broadcast %147 : vector<1x64xf32> to vector<8x64xf32>
    %149 = arith.addf %146, %148 : vector<8x64xf32>
    %150 = arith.addf %149, %129 : vector<8x64xf32>
    %c0_83 = arith.constant 0 : index
    %c0_84 = arith.constant 0 : index
    %151 = vector.load %arg24[%c0_83, %c0_84] : memref<1x64xf32, #tpu.memory_space<vmem>>, vector<1x64xf32>
    %c0_85 = arith.constant 0 : index
    %c0_86 = arith.constant 0 : index
    %152 = vector.load %arg25[%c0_85, %c0_86] : memref<1x64xf32, #tpu.memory_space<vmem>>, vector<1x64xf32>
    %cst_87 = arith.constant dense<0.000000e+00> : vector<8xf32>
    %153 = vector.multi_reduction <add>, %150, %cst_87 [1] : vector<8x64xf32> to vector<8xf32>
    %154 = vector.shape_cast %153 : vector<8xf32> to vector<8x1xf32>
    %cst_88 = arith.constant 6.400000e+01 : f32
    %155 = vector.broadcast %cst_88 : f32 to vector<8x1xf32>
    %156 = arith.divf %154, %155 : vector<8x1xf32>
    %157 = vector.broadcast %156 : vector<8x1xf32> to vector<8x64xf32>
    %158 = arith.subf %150, %157 : vector<8x64xf32>
    %159 = arith.mulf %158, %158 : vector<8x64xf32>
    %cst_89 = arith.constant dense<0.000000e+00> : vector<8xf32>
    %160 = vector.multi_reduction <add>, %159, %cst_89 [1] : vector<8x64xf32> to vector<8xf32>
    %161 = vector.shape_cast %160 : vector<8xf32> to vector<8x1xf32>
    %cst_90 = arith.constant 6.400000e+01 : f32
    %162 = vector.broadcast %cst_90 : f32 to vector<8x1xf32>
    %163 = arith.divf %161, %162 : vector<8x1xf32>
    %164 = vector.broadcast %156 : vector<8x1xf32> to vector<8x64xf32>
    %165 = arith.subf %150, %164 : vector<8x64xf32>
    %cst_91 = arith.constant 9.99999974E-6 : f32
    %166 = vector.broadcast %cst_91 : f32 to vector<8x1xf32>
    %167 = arith.addf %163, %166 : vector<8x1xf32>
    %168 = math.rsqrt %167 : vector<8x1xf32>
    %169 = vector.broadcast %168 : vector<8x1xf32> to vector<8x64xf32>
    %170 = arith.mulf %165, %169 : vector<8x64xf32>
    %171 = vector.broadcast %151 : vector<1x64xf32> to vector<8x64xf32>
    %172 = arith.mulf %170, %171 : vector<8x64xf32>
    %173 = vector.broadcast %152 : vector<1x64xf32> to vector<8x64xf32>
    %174 = arith.addf %172, %173 : vector<8x64xf32>
    %c0_92 = arith.constant 0 : index
    %c0_93 = arith.constant 0 : index
    %175 = vector.load %arg26[%c0_92, %c0_93] : memref<1x64xf32, #tpu.memory_space<vmem>>, vector<1x64xf32>
    %c0_94 = arith.constant 0 : index
    %c0_95 = arith.constant 0 : index
    %176 = vector.load %arg27[%c0_94, %c0_95] : memref<1x64xf32, #tpu.memory_space<vmem>>, vector<1x64xf32>
    %cst_96 = arith.constant dense<0.000000e+00> : vector<8xf32>
    %177 = vector.multi_reduction <add>, %174, %cst_96 [1] : vector<8x64xf32> to vector<8xf32>
    %178 = vector.shape_cast %177 : vector<8xf32> to vector<8x1xf32>
    %cst_97 = arith.constant 6.400000e+01 : f32
    %179 = vector.broadcast %cst_97 : f32 to vector<8x1xf32>
    %180 = arith.divf %178, %179 : vector<8x1xf32>
    %181 = vector.broadcast %180 : vector<8x1xf32> to vector<8x64xf32>
    %182 = arith.subf %174, %181 : vector<8x64xf32>
    %183 = arith.mulf %182, %182 : vector<8x64xf32>
    %cst_98 = arith.constant dense<0.000000e+00> : vector<8xf32>
    %184 = vector.multi_reduction <add>, %183, %cst_98 [1] : vector<8x64xf32> to vector<8xf32>
    %185 = vector.shape_cast %184 : vector<8xf32> to vector<8x1xf32>
    %cst_99 = arith.constant 6.400000e+01 : f32
    %186 = vector.broadcast %cst_99 : f32 to vector<8x1xf32>
    %187 = arith.divf %185, %186 : vector<8x1xf32>
    %188 = vector.broadcast %180 : vector<8x1xf32> to vector<8x64xf32>
    %189 = arith.subf %174, %188 : vector<8x64xf32>
    %cst_100 = arith.constant 9.99999974E-6 : f32
    %190 = vector.broadcast %cst_100 : f32 to vector<8x1xf32>
    %191 = arith.addf %187, %190 : vector<8x1xf32>
    %192 = math.rsqrt %191 : vector<8x1xf32>
    %193 = vector.broadcast %192 : vector<8x1xf32> to vector<8x64xf32>
    %194 = arith.mulf %189, %193 : vector<8x64xf32>
    %195 = vector.broadcast %175 : vector<1x64xf32> to vector<8x64xf32>
    %196 = arith.mulf %194, %195 : vector<8x64xf32>
    %197 = vector.broadcast %176 : vector<1x64xf32> to vector<8x64xf32>
    %198 = arith.addf %196, %197 : vector<8x64xf32>
    %c0_101 = arith.constant 0 : index
    %c0_102 = arith.constant 0 : index
    %199 = vector.load %arg28[%c0_101, %c0_102] : memref<64x64xbf16, #tpu.memory_space<vmem>>, vector<64x64xbf16>
    %200 = arith.truncf %198 : vector<8x64xf32> to vector<8x64xbf16>
    %cst_103 = arith.constant dense<0.000000e+00> : vector<8x64xf32>
    %201 = tpu.matmul %200, %199, %cst_103 {dimension_numbers = #tpu.dot_dimension_numbers<[1], [0], [0], [1], [0, 0, 1, 1], [], []>} : vector<8x64xbf16>, vector<64x64xbf16>, vector<8x64xf32> -> vector<8x64xf32>
    %c0_104 = arith.constant 0 : index
    %c0_105 = arith.constant 0 : index
    %202 = vector.load %arg29[%c0_104, %c0_105] : memref<1x64xf32, #tpu.memory_space<vmem>>, vector<1x64xf32>
    %203 = vector.broadcast %202 : vector<1x64xf32> to vector<8x64xf32>
    %204 = arith.addf %201, %203 : vector<8x64xf32>
    %cst_106 = arith.constant 5.000000e-01 : f32
    %205 = vector.broadcast %cst_106 : f32 to vector<8x64xf32>
    %206 = arith.mulf %204, %205 : vector<8x64xf32>
    %cst_107 = arith.constant 0.707106769 : f32
    %207 = vector.broadcast %cst_107 : f32 to vector<8x64xf32>
    %208 = arith.mulf %204, %207 : vector<8x64xf32>
    %209 = math.erf %208 : vector<8x64xf32>
    %cst_108 = arith.constant 1.000000e+00 : f32
    %210 = vector.broadcast %cst_108 : f32 to vector<8x64xf32>
    %211 = arith.addf %210, %209 : vector<8x64xf32>
    %212 = arith.mulf %206, %211 : vector<8x64xf32>
    %c0_109 = arith.constant 0 : index
    %c0_110 = arith.constant 0 : index
    %213 = vector.load %arg30[%c0_109, %c0_110] : memref<1x64xf32, #tpu.memory_space<vmem>>, vector<1x64xf32>
    %c0_111 = arith.constant 0 : index
    %c0_112 = arith.constant 0 : index
    %214 = vector.load %arg31[%c0_111, %c0_112] : memref<1x64xf32, #tpu.memory_space<vmem>>, vector<1x64xf32>
    %cst_113 = arith.constant dense<0.000000e+00> : vector<8xf32>
    %215 = vector.multi_reduction <add>, %212, %cst_113 [1] : vector<8x64xf32> to vector<8xf32>
    %216 = vector.shape_cast %215 : vector<8xf32> to vector<8x1xf32>
    %cst_114 = arith.constant 6.400000e+01 : f32
    %217 = vector.broadcast %cst_114 : f32 to vector<8x1xf32>
    %218 = arith.divf %216, %217 : vector<8x1xf32>
    %219 = vector.broadcast %218 : vector<8x1xf32> to vector<8x64xf32>
    %220 = arith.subf %212, %219 : vector<8x64xf32>
    %221 = arith.mulf %220, %220 : vector<8x64xf32>
    %cst_115 = arith.constant dense<0.000000e+00> : vector<8xf32>
    %222 = vector.multi_reduction <add>, %221, %cst_115 [1] : vector<8x64xf32> to vector<8xf32>
    %223 = vector.shape_cast %222 : vector<8xf32> to vector<8x1xf32>
    %cst_116 = arith.constant 6.400000e+01 : f32
    %224 = vector.broadcast %cst_116 : f32 to vector<8x1xf32>
    %225 = arith.divf %223, %224 : vector<8x1xf32>
    %226 = vector.broadcast %218 : vector<8x1xf32> to vector<8x64xf32>
    %227 = arith.subf %212, %226 : vector<8x64xf32>
    %cst_117 = arith.constant 9.99999974E-6 : f32
    %228 = vector.broadcast %cst_117 : f32 to vector<8x1xf32>
    %229 = arith.addf %225, %228 : vector<8x1xf32>
    %230 = math.rsqrt %229 : vector<8x1xf32>
    %231 = vector.broadcast %230 : vector<8x1xf32> to vector<8x64xf32>
    %232 = arith.mulf %227, %231 : vector<8x64xf32>
    %233 = vector.broadcast %213 : vector<1x64xf32> to vector<8x64xf32>
    %234 = arith.mulf %232, %233 : vector<8x64xf32>
    %235 = vector.broadcast %214 : vector<1x64xf32> to vector<8x64xf32>
    %236 = arith.addf %234, %235 : vector<8x64xf32>
    %cst_118 = arith.constant dense<0.000000e+00> : vector<64xf32>
    %237 = vector.multi_reduction <add>, %236, %cst_118 [0] : vector<8x64xf32> to vector<64xf32>
    %238 = vector.shape_cast %237 : vector<64xf32> to vector<1x64xf32>
    %cst_119 = arith.constant 1.250000e-01 : f32
    %239 = vector.broadcast %cst_119 : f32 to vector<1x64xf32>
    %240 = arith.mulf %238, %239 : vector<1x64xf32>
    %c0_120 = arith.constant 0 : index
    %c0_121 = arith.constant 0 : index
    %241 = vector.load %arg32[%c0_120, %c0_121] : memref<64x64xbf16, #tpu.memory_space<vmem>>, vector<64x64xbf16>
    %242 = arith.truncf %238 : vector<1x64xf32> to vector<1x64xbf16>
    %cst_122 = arith.constant dense<0.000000e+00> : vector<1x64xf32>
    %243 = tpu.matmul %242, %241, %cst_122 {dimension_numbers = #tpu.dot_dimension_numbers<[1], [0], [0], [1], [0, 0, 1, 1], [], []>} : vector<1x64xbf16>, vector<64x64xbf16>, vector<1x64xf32> -> vector<1x64xf32>
    %c0_123 = arith.constant 0 : index
    %c0_124 = arith.constant 0 : index
    %244 = vector.load %arg33[%c0_123, %c0_124] : memref<1x64xf32, #tpu.memory_space<vmem>>, vector<1x64xf32>
    %245 = arith.addf %243, %244 : vector<1x64xf32>
    %c0_125 = arith.constant 0 : index
    %c0_126 = arith.constant 0 : index
    %246 = vector.load %arg34[%c0_125, %c0_126] : memref<64x128xbf16, #tpu.memory_space<vmem>>, vector<64x128xbf16>
    %247 = arith.truncf %236 : vector<8x64xf32> to vector<8x64xbf16>
    %cst_127 = arith.constant dense<0.000000e+00> : vector<8x128xf32>
    %248 = tpu.matmul %247, %246, %cst_127 {dimension_numbers = #tpu.dot_dimension_numbers<[1], [0], [0], [1], [0, 0, 1, 1], [], []>} : vector<8x64xbf16>, vector<64x128xbf16>, vector<8x128xf32> -> vector<8x128xf32>
    %c0_128 = arith.constant 0 : index
    %c0_129 = arith.constant 0 : index
    %249 = vector.load %arg35[%c0_128, %c0_129] : memref<1x128xf32, #tpu.memory_space<vmem>>, vector<1x128xf32>
    %250 = vector.broadcast %249 : vector<1x128xf32> to vector<8x128xf32>
    %251 = arith.addf %248, %250 : vector<8x128xf32>
    %cst_130 = arith.constant dense<0.000000e+00> : vector<1x128xf32>
    %252 = tpu.matmul %245, %2, %cst_130 {dimension_numbers = #tpu.dot_dimension_numbers<[1], [0], [0], [1], [0, 0, 1, 1], [], []>, precision = #tpu.contract_precision<fp32>} : vector<1x64xf32>, vector<64x128xf32>, vector<1x128xf32> -> vector<1x128xf32>
    %253 = vector.broadcast %252 : vector<1x128xf32> to vector<8x128xf32>
    %254 = arith.mulf %253, %251 : vector<8x128xf32>
    %cst_131 = arith.constant dense<0.000000e+00> : vector<8x4xf32>
    %255 = tpu.matmul %254, %3, %cst_131 {dimension_numbers = #tpu.dot_dimension_numbers<[1], [0], [0], [1], [0, 0, 1, 1], [], []>, precision = #tpu.contract_precision<fp32>} : vector<8x128xf32>, vector<128x4xf32>, vector<8x4xf32> -> vector<8x4xf32>
    %cst_132 = arith.constant 2.500000e-01 : f32
    %256 = vector.broadcast %cst_132 : f32 to vector<8x4xf32>
    %257 = arith.mulf %255, %256 : vector<8x4xf32>
    %cst_133 = arith.constant dense<0xFF800000> : vector<4xf32>
    %258 = vector.multi_reduction <maximumf>, %257, %cst_133 [0] : vector<8x4xf32> to vector<4xf32>
    %259 = vector.shape_cast %258 : vector<4xf32> to vector<1x4xf32>
    %260 = vector.broadcast %259 : vector<1x4xf32> to vector<8x4xf32>
    %261 = arith.subf %257, %260 : vector<8x4xf32>
    %262 = math.exp %261 : vector<8x4xf32>
    %cst_134 = arith.constant dense<0.000000e+00> : vector<4xf32>
    %263 = vector.multi_reduction <add>, %262, %cst_134 [0] : vector<8x4xf32> to vector<4xf32>
    %264 = vector.shape_cast %263 : vector<4xf32> to vector<1x4xf32>
    %265 = vector.broadcast %264 : vector<1x4xf32> to vector<8x4xf32>
    %266 = arith.divf %262, %265 : vector<8x4xf32>
    %cst_135 = arith.constant dense<0.000000e+00> : vector<8x128xf32>
    %267 = tpu.matmul %266, %4, %cst_135 {dimension_numbers = #tpu.dot_dimension_numbers<[1], [0], [0], [1], [0, 0, 1, 1], [], []>, precision = #tpu.contract_precision<fp32>} : vector<8x4xf32>, vector<4x128xf32>, vector<8x128xf32> -> vector<8x128xf32>
    %268 = arith.mulf %267, %251 : vector<8x128xf32>
    %cst_136 = arith.constant dense<0.000000e+00> : vector<128xf32>
    %269 = vector.multi_reduction <add>, %268, %cst_136 [0] : vector<8x128xf32> to vector<128xf32>
    %270 = vector.shape_cast %269 : vector<128xf32> to vector<1x128xf32>
    %cst_137 = arith.constant dense<0.000000e+00> : vector<1x64xf32>
    %271 = tpu.matmul %270, %5, %cst_137 {dimension_numbers = #tpu.dot_dimension_numbers<[1], [0], [0], [1], [0, 0, 1, 1], [], []>, precision = #tpu.contract_precision<fp32>} : vector<1x128xf32>, vector<128x64xf32>, vector<1x64xf32> -> vector<1x64xf32>
    %272 = arith.addf %271, %240 : vector<1x64xf32>
    %c0_138 = arith.constant 0 : index
    %c0_139 = arith.constant 0 : index
    %273 = vector.load %arg36[%c0_138, %c0_139] : memref<1x64xf32, #tpu.memory_space<vmem>>, vector<1x64xf32>
    %c0_140 = arith.constant 0 : index
    %c0_141 = arith.constant 0 : index
    %274 = vector.load %arg37[%c0_140, %c0_141] : memref<1x64xf32, #tpu.memory_space<vmem>>, vector<1x64xf32>
    %cst_142 = arith.constant dense<0.000000e+00> : vector<1xf32>
    %275 = vector.multi_reduction <add>, %272, %cst_142 [1] : vector<1x64xf32> to vector<1xf32>
    %276 = vector.shape_cast %275 : vector<1xf32> to vector<1x1xf32>
    %cst_143 = arith.constant 6.400000e+01 : f32
    %277 = vector.broadcast %cst_143 : f32 to vector<1x1xf32>
    %278 = arith.divf %276, %277 : vector<1x1xf32>
    %279 = vector.broadcast %278 : vector<1x1xf32> to vector<1x64xf32>
    %280 = arith.subf %272, %279 : vector<1x64xf32>
    %281 = arith.mulf %280, %280 : vector<1x64xf32>
    %cst_144 = arith.constant dense<0.000000e+00> : vector<1xf32>
    %282 = vector.multi_reduction <add>, %281, %cst_144 [1] : vector<1x64xf32> to vector<1xf32>
    %283 = vector.shape_cast %282 : vector<1xf32> to vector<1x1xf32>
    %cst_145 = arith.constant 6.400000e+01 : f32
    %284 = vector.broadcast %cst_145 : f32 to vector<1x1xf32>
    %285 = arith.divf %283, %284 : vector<1x1xf32>
    %286 = vector.broadcast %278 : vector<1x1xf32> to vector<1x64xf32>
    %287 = arith.subf %272, %286 : vector<1x64xf32>
    %cst_146 = arith.constant 9.99999974E-6 : f32
    %288 = vector.broadcast %cst_146 : f32 to vector<1x1xf32>
    %289 = arith.addf %285, %288 : vector<1x1xf32>
    %290 = math.rsqrt %289 : vector<1x1xf32>
    %291 = vector.broadcast %290 : vector<1x1xf32> to vector<1x64xf32>
    %292 = arith.mulf %287, %291 : vector<1x64xf32>
    %293 = arith.mulf %292, %273 : vector<1x64xf32>
    %294 = arith.addf %293, %274 : vector<1x64xf32>
    %c0_147 = arith.constant 0 : index
    %c0_148 = arith.constant 0 : index
    %295 = vector.load %arg38[%c0_147, %c0_148] : memref<64x1024xbf16, #tpu.memory_space<vmem>>, vector<64x1024xbf16>
    %296 = arith.truncf %294 : vector<1x64xf32> to vector<1x64xbf16>
    %cst_149 = arith.constant dense<0.000000e+00> : vector<1x1024xf32>
    %297 = tpu.matmul %296, %295, %cst_149 {dimension_numbers = #tpu.dot_dimension_numbers<[1], [0], [0], [1], [0, 0, 1, 1], [], []>} : vector<1x64xbf16>, vector<64x1024xbf16>, vector<1x1024xf32> -> vector<1x1024xf32>
    %c0_150 = arith.constant 0 : index
    %c0_151 = arith.constant 0 : index
    %298 = vector.load %arg39[%c0_150, %c0_151] : memref<1x1024xf32, #tpu.memory_space<vmem>>, vector<1x1024xf32>
    %299 = arith.addf %297, %298 : vector<1x1024xf32>
    %cst_152 = arith.constant 5.000000e-01 : f32
    %300 = vector.broadcast %cst_152 : f32 to vector<1x1024xf32>
    %301 = arith.mulf %299, %300 : vector<1x1024xf32>
    %cst_153 = arith.constant 0.707106769 : f32
    %302 = vector.broadcast %cst_153 : f32 to vector<1x1024xf32>
    %303 = arith.mulf %299, %302 : vector<1x1024xf32>
    %304 = math.erf %303 : vector<1x1024xf32>
    %cst_154 = arith.constant 1.000000e+00 : f32
    %305 = vector.broadcast %cst_154 : f32 to vector<1x1024xf32>
    %306 = arith.addf %305, %304 : vector<1x1024xf32>
    %307 = arith.mulf %301, %306 : vector<1x1024xf32>
    %c0_155 = arith.constant 0 : index
    %c0_156 = arith.constant 0 : index
    %308 = vector.load %arg40[%c0_155, %c0_156] : memref<1024x64xbf16, #tpu.memory_space<vmem>>, vector<1024x64xbf16>
    %309 = arith.truncf %307 : vector<1x1024xf32> to vector<1x1024xbf16>
    %cst_157 = arith.constant dense<0.000000e+00> : vector<1x64xf32>
    %310 = tpu.matmul %309, %308, %cst_157 {dimension_numbers = #tpu.dot_dimension_numbers<[1], [0], [0], [1], [0, 0, 1, 1], [], []>} : vector<1x1024xbf16>, vector<1024x64xbf16>, vector<1x64xf32> -> vector<1x64xf32>
    %c0_158 = arith.constant 0 : index
    %c0_159 = arith.constant 0 : index
    %311 = vector.load %arg41[%c0_158, %c0_159] : memref<1x64xf32, #tpu.memory_space<vmem>>, vector<1x64xf32>
    %312 = arith.addf %310, %311 : vector<1x64xf32>
    %313 = arith.addf %312, %294 : vector<1x64xf32>
    %c0_160 = arith.constant 0 : index
    %c0_161 = arith.constant 0 : index
    %314 = vector.load %arg42[%c0_160, %c0_161] : memref<1x64xf32, #tpu.memory_space<vmem>>, vector<1x64xf32>
    %c0_162 = arith.constant 0 : index
    %c0_163 = arith.constant 0 : index
    %315 = vector.load %arg43[%c0_162, %c0_163] : memref<1x64xf32, #tpu.memory_space<vmem>>, vector<1x64xf32>
    %cst_164 = arith.constant dense<0.000000e+00> : vector<1xf32>
    %316 = vector.multi_reduction <add>, %313, %cst_164 [1] : vector<1x64xf32> to vector<1xf32>
    %317 = vector.shape_cast %316 : vector<1xf32> to vector<1x1xf32>
    %cst_165 = arith.constant 6.400000e+01 : f32
    %318 = vector.broadcast %cst_165 : f32 to vector<1x1xf32>
    %319 = arith.divf %317, %318 : vector<1x1xf32>
    %320 = vector.broadcast %319 : vector<1x1xf32> to vector<1x64xf32>
    %321 = arith.subf %313, %320 : vector<1x64xf32>
    %322 = arith.mulf %321, %321 : vector<1x64xf32>
    %cst_166 = arith.constant dense<0.000000e+00> : vector<1xf32>
    %323 = vector.multi_reduction <add>, %322, %cst_166 [1] : vector<1x64xf32> to vector<1xf32>
    %324 = vector.shape_cast %323 : vector<1xf32> to vector<1x1xf32>
    %cst_167 = arith.constant 6.400000e+01 : f32
    %325 = vector.broadcast %cst_167 : f32 to vector<1x1xf32>
    %326 = arith.divf %324, %325 : vector<1x1xf32>
    %327 = vector.broadcast %319 : vector<1x1xf32> to vector<1x64xf32>
    %328 = arith.subf %313, %327 : vector<1x64xf32>
    %cst_168 = arith.constant 9.99999974E-6 : f32
    %329 = vector.broadcast %cst_168 : f32 to vector<1x1xf32>
    %330 = arith.addf %326, %329 : vector<1x1xf32>
    %331 = math.rsqrt %330 : vector<1x1xf32>
    %332 = vector.broadcast %331 : vector<1x1xf32> to vector<1x64xf32>
    %333 = arith.mulf %328, %332 : vector<1x64xf32>
    %334 = arith.mulf %333, %314 : vector<1x64xf32>
    %335 = arith.addf %334, %315 : vector<1x64xf32>
    %c0_169 = arith.constant 0 : index
    %c0_170 = arith.constant 0 : index
    %336 = vector.load %arg44[%c0_169, %c0_170] : memref<64x64xbf16, #tpu.memory_space<vmem>>, vector<64x64xbf16>
    %337 = arith.truncf %335 : vector<1x64xf32> to vector<1x64xbf16>
    %cst_171 = arith.constant dense<0.000000e+00> : vector<1x64xf32>
    %338 = tpu.matmul %337, %336, %cst_171 {dimension_numbers = #tpu.dot_dimension_numbers<[1], [0], [0], [1], [0, 0, 1, 1], [], []>} : vector<1x64xbf16>, vector<64x64xbf16>, vector<1x64xf32> -> vector<1x64xf32>
    %c0_172 = arith.constant 0 : index
    %c0_173 = arith.constant 0 : index
    %339 = vector.load %arg45[%c0_172, %c0_173] : memref<1x64xf32, #tpu.memory_space<vmem>>, vector<1x64xf32>
    %340 = arith.addf %338, %339 : vector<1x64xf32>
    %cst_174 = arith.constant 5.000000e-01 : f32
    %341 = vector.broadcast %cst_174 : f32 to vector<1x64xf32>
    %342 = arith.mulf %340, %341 : vector<1x64xf32>
    %cst_175 = arith.constant 0.707106769 : f32
    %343 = vector.broadcast %cst_175 : f32 to vector<1x64xf32>
    %344 = arith.mulf %340, %343 : vector<1x64xf32>
    %345 = math.erf %344 : vector<1x64xf32>
    %cst_176 = arith.constant 1.000000e+00 : f32
    %346 = vector.broadcast %cst_176 : f32 to vector<1x64xf32>
    %347 = arith.addf %346, %345 : vector<1x64xf32>
    %348 = arith.mulf %342, %347 : vector<1x64xf32>
    %c0_177 = arith.constant 0 : index
    %c0_178 = arith.constant 0 : index
    %349 = vector.load %arg46[%c0_177, %c0_178] : memref<64x1xbf16, #tpu.memory_space<vmem>>, vector<64x1xbf16>
    %350 = arith.truncf %348 : vector<1x64xf32> to vector<1x64xbf16>
    %cst_179 = arith.constant dense<0.000000e+00> : vector<1x1xf32>
    %351 = tpu.matmul %350, %349, %cst_179 {dimension_numbers = #tpu.dot_dimension_numbers<[1], [0], [0], [1], [0, 0, 1, 1], [], []>} : vector<1x64xbf16>, vector<64x1xbf16>, vector<1x1xf32> -> vector<1x1xf32>
    %c0_180 = arith.constant 0 : index
    %c0_181 = arith.constant 0 : index
    %352 = vector.load %arg47[%c0_180, %c0_181] : memref<1x1xf32, #tpu.memory_space<vmem>>, vector<1x1xf32>
    %353 = arith.addf %351, %352 : vector<1x1xf32>
    %c0_182 = arith.constant 0 : index
    %c0_183 = arith.constant 0 : index
    %c0_184 = arith.constant 0 : index
    %354 = vector.load %arg48[%c0_182, %c0_183, %c0_184] : memref<1x1x1xf32, #tpu.memory_space<vmem>>, vector<1x1x1xf32>
    %355 = vector.shape_cast %354 : vector<1x1x1xf32> to vector<1x1xf32>
    %356 = vector.shape_cast %353 : vector<1x1xf32> to vector<1x1x1xf32>
    tpu.vector_store %arg48[%c0_182, %c0_183, %c0_184], %356 {strides = array<i32>} : memref<1x1x1xf32, #tpu.memory_space<vmem>>, vector<1x1x1xf32>,
    %c0_185 = arith.constant 0 : index
    %c0_186 = arith.constant 0 : index
    %c0_187 = arith.constant 0 : index
    %357 = vector.load %arg49[%c0_185, %c0_186, %c0_187] : memref<1x8x4xf32, #tpu.memory_space<vmem>>, vector<1x8x4xf32>
    %358 = vector.shape_cast %357 : vector<1x8x4xf32> to vector<8x4xf32>
    %359 = vector.shape_cast %266 : vector<8x4xf32> to vector<1x8x4xf32>
    tpu.vector_store %arg49[%c0_185, %c0_186, %c0_187], %359 {strides = array<i32>} : memref<1x8x4xf32, #tpu.memory_space<vmem>>, vector<1x8x4xf32>,
    return
  }
  func.func @transform_0(%arg0: i32) -> (i32, i32, i32) {
    %c0_i32 = arith.constant 0 : i32
    %c0_i32_0 = arith.constant 0 : i32
    %c0_i32_1 = arith.constant 0 : i32
    return %arg0, %c0_i32, %c0_i32_0 : i32, i32, i32
  }
  func.func @transform_1(%arg0: i32) -> (i32, i32) {
    %c0_i32 = arith.constant 0 : i32
    %c0_i32_0 = arith.constant 0 : i32
    %c0_i32_1 = arith.constant 0 : i32
    return %c0_i32, %c0_i32_0 : i32, i32
  }
  func.func @transform_2(%arg0: i32) -> (i32, i32) {
    %c0_i32 = arith.constant 0 : i32
    %c0_i32_0 = arith.constant 0 : i32
    %c0_i32_1 = arith.constant 0 : i32
    return %c0_i32, %c0_i32_0 : i32, i32
  }
  func.func @transform_3(%arg0: i32) -> (i32, i32) {
    %c0_i32 = arith.constant 0 : i32
    %c0_i32_0 = arith.constant 0 : i32
    %c0_i32_1 = arith.constant 0 : i32
    return %c0_i32, %c0_i32_0 : i32, i32
  }
  func.func @transform_4(%arg0: i32) -> (i32, i32) {
    %c0_i32 = arith.constant 0 : i32
    %c0_i32_0 = arith.constant 0 : i32
    %c0_i32_1 = arith.constant 0 : i32
    return %c0_i32, %c0_i32_0 : i32, i32
  }
  func.func @transform_5(%arg0: i32) -> (i32, i32) {
    %c0_i32 = arith.constant 0 : i32
    %c0_i32_0 = arith.constant 0 : i32
    %c0_i32_1 = arith.constant 0 : i32
    return %c0_i32, %c0_i32_0 : i32, i32
  }
  func.func @transform_6(%arg0: i32) -> (i32, i32) {
    %c0_i32 = arith.constant 0 : i32
    %c0_i32_0 = arith.constant 0 : i32
    %c0_i32_1 = arith.constant 0 : i32
    return %c0_i32, %c0_i32_0 : i32, i32
  }
  func.func @transform_7(%arg0: i32) -> (i32, i32) {
    %c0_i32 = arith.constant 0 : i32
    %c0_i32_0 = arith.constant 0 : i32
    %c0_i32_1 = arith.constant 0 : i32
    return %c0_i32, %c0_i32_0 : i32, i32
  }
  func.func @transform_8(%arg0: i32) -> (i32, i32) {
    %c0_i32 = arith.constant 0 : i32
    %c0_i32_0 = arith.constant 0 : i32
    %c0_i32_1 = arith.constant 0 : i32
    return %c0_i32, %c0_i32_0 : i32, i32
  }
  func.func @transform_9(%arg0: i32) -> (i32, i32) {
    %c0_i32 = arith.constant 0 : i32
    %c0_i32_0 = arith.constant 0 : i32
    %c0_i32_1 = arith.constant 0 : i32
    return %c0_i32, %c0_i32_0 : i32, i32
  }
  func.func @transform_10(%arg0: i32) -> (i32, i32) {
    %c0_i32 = arith.constant 0 : i32
    %c0_i32_0 = arith.constant 0 : i32
    %c0_i32_1 = arith.constant 0 : i32
    return %c0_i32, %c0_i32_0 : i32, i32
  }
  func.func @transform_11(%arg0: i32) -> (i32, i32) {
    %c0_i32 = arith.constant 0 : i32
    %c0_i32_0 = arith.constant 0 : i32
    %c0_i32_1 = arith.constant 0 : i32
    return %c0_i32, %c0_i32_0 : i32, i32
  }
  func.func @transform_12(%arg0: i32) -> (i32, i32) {
    %c0_i32 = arith.constant 0 : i32
    %c0_i32_0 = arith.constant 0 : i32
    %c0_i32_1 = arith.constant 0 : i32
    return %c0_i32, %c0_i32_0 : i32, i32
  }
  func.func @transform_13(%arg0: i32) -> (i32, i32) {
    %c0_i32 = arith.constant 0 : i32
    %c0_i32_0 = arith.constant 0 : i32
    %c0_i32_1 = arith.constant 0 : i32
    return %c0_i32, %c0_i32_0 : i32, i32
  }
  func.func @transform_14(%arg0: i32) -> (i32, i32) {
    %c0_i32 = arith.constant 0 : i32
    %c0_i32_0 = arith.constant 0 : i32
    %c0_i32_1 = arith.constant 0 : i32
    return %c0_i32, %c0_i32_0 : i32, i32
  }
  func.func @transform_15(%arg0: i32) -> (i32, i32) {
    %c0_i32 = arith.constant 0 : i32
    %c0_i32_0 = arith.constant 0 : i32
    %c0_i32_1 = arith.constant 0 : i32
    return %c0_i32, %c0_i32_0 : i32, i32
  }
  func.func @transform_16(%arg0: i32) -> (i32, i32) {
    %c0_i32 = arith.constant 0 : i32
    %c0_i32_0 = arith.constant 0 : i32
    %c0_i32_1 = arith.constant 0 : i32
    return %c0_i32, %c0_i32_0 : i32, i32
  }
  func.func @transform_17(%arg0: i32) -> (i32, i32) {
    %c0_i32 = arith.constant 0 : i32
    %c0_i32_0 = arith.constant 0 : i32
    %c0_i32_1 = arith.constant 0 : i32
    return %c0_i32, %c0_i32_0 : i32, i32
  }
  func.func @transform_18(%arg0: i32) -> (i32, i32) {
    %c0_i32 = arith.constant 0 : i32
    %c0_i32_0 = arith.constant 0 : i32
    %c0_i32_1 = arith.constant 0 : i32
    return %c0_i32, %c0_i32_0 : i32, i32
  }
  func.func @transform_19(%arg0: i32) -> (i32, i32) {
    %c0_i32 = arith.constant 0 : i32
    %c0_i32_0 = arith.constant 0 : i32
    %c0_i32_1 = arith.constant 0 : i32
    return %c0_i32, %c0_i32_0 : i32, i32
  }
  func.func @transform_20(%arg0: i32) -> (i32, i32) {
    %c0_i32 = arith.constant 0 : i32
    %c0_i32_0 = arith.constant 0 : i32
    %c0_i32_1 = arith.constant 0 : i32
    return %c0_i32, %c0_i32_0 : i32, i32
  }
  func.func @transform_21(%arg0: i32) -> (i32, i32) {
    %c0_i32 = arith.constant 0 : i32
    %c0_i32_0 = arith.constant 0 : i32
    %c0_i32_1 = arith.constant 0 : i32
    return %c0_i32, %c0_i32_0 : i32, i32
  }
  func.func @transform_22(%arg0: i32) -> (i32, i32) {
    %c0_i32 = arith.constant 0 : i32
    %c0_i32_0 = arith.constant 0 : i32
    %c0_i32_1 = arith.constant 0 : i32
    return %c0_i32, %c0_i32_0 : i32, i32
  }
  func.func @transform_23(%arg0: i32) -> (i32, i32) {
    %c0_i32 = arith.constant 0 : i32
    %c0_i32_0 = arith.constant 0 : i32
    %c0_i32_1 = arith.constant 0 : i32
    return %c0_i32, %c0_i32_0 : i32, i32
  }
  func.func @transform_24(%arg0: i32) -> (i32, i32) {
    %c0_i32 = arith.constant 0 : i32
    %c0_i32_0 = arith.constant 0 : i32
    %c0_i32_1 = arith.constant 0 : i32
    return %c0_i32, %c0_i32_0 : i32, i32
  }
  func.func @transform_25(%arg0: i32) -> (i32, i32) {
    %c0_i32 = arith.constant 0 : i32
    %c0_i32_0 = arith.constant 0 : i32
    %c0_i32_1 = arith.constant 0 : i32
    return %c0_i32, %c0_i32_0 : i32, i32
  }
  func.func @transform_26(%arg0: i32) -> (i32, i32) {
    %c0_i32 = arith.constant 0 : i32
    %c0_i32_0 = arith.constant 0 : i32
    %c0_i32_1 = arith.constant 0 : i32
    return %c0_i32, %c0_i32_0 : i32, i32
  }
  func.func @transform_27(%arg0: i32) -> (i32, i32) {
    %c0_i32 = arith.constant 0 : i32
    %c0_i32_0 = arith.constant 0 : i32
    %c0_i32_1 = arith.constant 0 : i32
    return %c0_i32, %c0_i32_0 : i32, i32
  }
  func.func @transform_28(%arg0: i32) -> (i32, i32) {
    %c0_i32 = arith.constant 0 : i32
    %c0_i32_0 = arith.constant 0 : i32
    %c0_i32_1 = arith.constant 0 : i32
    return %c0_i32, %c0_i32_0 : i32, i32
  }
  func.func @transform_29(%arg0: i32) -> (i32, i32) {
    %c0_i32 = arith.constant 0 : i32
    %c0_i32_0 = arith.constant 0 : i32
    %c0_i32_1 = arith.constant 0 : i32
    return %c0_i32, %c0_i32_0 : i32, i32
  }
  func.func @transform_30(%arg0: i32) -> (i32, i32) {
    %c0_i32 = arith.constant 0 : i32
    %c0_i32_0 = arith.constant 0 : i32
    %c0_i32_1 = arith.constant 0 : i32
    return %c0_i32, %c0_i32_0 : i32, i32
  }
  func.func @transform_31(%arg0: i32) -> (i32, i32) {
    %c0_i32 = arith.constant 0 : i32
    %c0_i32_0 = arith.constant 0 : i32
    %c0_i32_1 = arith.constant 0 : i32
    return %c0_i32, %c0_i32_0 : i32, i32
  }
  func.func @transform_32(%arg0: i32) -> (i32, i32) {
    %c0_i32 = arith.constant 0 : i32
    %c0_i32_0 = arith.constant 0 : i32
    %c0_i32_1 = arith.constant 0 : i32
    return %c0_i32, %c0_i32_0 : i32, i32
  }
  func.func @transform_33(%arg0: i32) -> (i32, i32) {
    %c0_i32 = arith.constant 0 : i32
    %c0_i32_0 = arith.constant 0 : i32
    %c0_i32_1 = arith.constant 0 : i32
    return %c0_i32, %c0_i32_0 : i32, i32
  }
  func.func @transform_34(%arg0: i32) -> (i32, i32) {
    %c0_i32 = arith.constant 0 : i32
    %c0_i32_0 = arith.constant 0 : i32
    %c0_i32_1 = arith.constant 0 : i32
    return %c0_i32, %c0_i32_0 : i32, i32
  }
  func.func @transform_35(%arg0: i32) -> (i32, i32) {
    %c0_i32 = arith.constant 0 : i32
    %c0_i32_0 = arith.constant 0 : i32
    %c0_i32_1 = arith.constant 0 : i32
    return %c0_i32, %c0_i32_0 : i32, i32
  }
  func.func @transform_36(%arg0: i32) -> (i32, i32) {
    %c0_i32 = arith.constant 0 : i32
    %c0_i32_0 = arith.constant 0 : i32
    %c0_i32_1 = arith.constant 0 : i32
    return %c0_i32, %c0_i32_0 : i32, i32
  }
  func.func @transform_37(%arg0: i32) -> (i32, i32) {
    %c0_i32 = arith.constant 0 : i32
    %c0_i32_0 = arith.constant 0 : i32
    %c0_i32_1 = arith.constant 0 : i32
    return %c0_i32, %c0_i32_0 : i32, i32
  }
  func.func @transform_38(%arg0: i32) -> (i32, i32) {
    %c0_i32 = arith.constant 0 : i32
    %c0_i32_0 = arith.constant 0 : i32
    %c0_i32_1 = arith.constant 0 : i32
    return %c0_i32, %c0_i32_0 : i32, i32
  }
  func.func @transform_39(%arg0: i32) -> (i32, i32) {
    %c0_i32 = arith.constant 0 : i32
    %c0_i32_0 = arith.constant 0 : i32
    %c0_i32_1 = arith.constant 0 : i32
    return %c0_i32, %c0_i32_0 : i32, i32
  }
  func.func @transform_40(%arg0: i32) -> (i32, i32) {
    %c0_i32 = arith.constant 0 : i32
    %c0_i32_0 = arith.constant 0 : i32
    %c0_i32_1 = arith.constant 0 : i32
    return %c0_i32, %c0_i32_0 : i32, i32
  }
  func.func @transform_41(%arg0: i32) -> (i32, i32) {
    %c0_i32 = arith.constant 0 : i32
    %c0_i32_0 = arith.constant 0 : i32
    %c0_i32_1 = arith.constant 0 : i32
    return %c0_i32, %c0_i32_0 : i32, i32
  }
  func.func @transform_42(%arg0: i32) -> (i32, i32) {
    %c0_i32 = arith.constant 0 : i32
    %c0_i32_0 = arith.constant 0 : i32
    %c0_i32_1 = arith.constant 0 : i32
    return %c0_i32, %c0_i32_0 : i32, i32
  }
  func.func @transform_43(%arg0: i32) -> (i32, i32) {
    %c0_i32 = arith.constant 0 : i32
    %c0_i32_0 = arith.constant 0 : i32
    %c0_i32_1 = arith.constant 0 : i32
    return %c0_i32, %c0_i32_0 : i32, i32
  }
  func.func @transform_44(%arg0: i32) -> (i32, i32) {
    %c0_i32 = arith.constant 0 : i32
    %c0_i32_0 = arith.constant 0 : i32
    %c0_i32_1 = arith.constant 0 : i32
    return %c0_i32, %c0_i32_0 : i32, i32
  }
  func.func @transform_45(%arg0: i32) -> (i32, i32) {
    %c0_i32 = arith.constant 0 : i32
    %c0_i32_0 = arith.constant 0 : i32
    %c0_i32_1 = arith.constant 0 : i32
    return %c0_i32, %c0_i32_0 : i32, i32
  }
  func.func @transform_46(%arg0: i32) -> (i32, i32) {
    %c0_i32 = arith.constant 0 : i32
    %c0_i32_0 = arith.constant 0 : i32
    %c0_i32_1 = arith.constant 0 : i32
    return %c0_i32, %c0_i32_0 : i32, i32
  }
  func.func @transform_47(%arg0: i32) -> (i32, i32, i32) {
    %c0_i32 = arith.constant 0 : i32
    %c0_i32_0 = arith.constant 0 : i32
    %c0_i32_1 = arith.constant 0 : i32
    return %arg0, %c0_i32, %c0_i32_0 : i32, i32, i32
  }
  func.func @transform_48(%arg0: i32) -> (i32, i32, i32) {
    %c0_i32 = arith.constant 0 : i32
    %c0_i32_0 = arith.constant 0 : i32
    %c0_i32_1 = arith.constant 0 : i32
    return %arg0, %c0_i32, %c0_i32_0 : i32, i32, i32
  }
}

</mosaic_0001>

<bundles_post_ra>
// kernel: transformer_reward_predictor_v3.1
= control target key start
LH: loop header
LB: loop body
LE: loop exit
PB: predicated region body
PF: predicated region fallthrough
CT: control target
= control target key end

     0   :  { %s15409_s6 = smov 1   ;;  %s15410_s10 = smov 2   ;;  %s18248_s0 = inlined_call_operand.smem [shape: u32[49], index: -1, kind: input, shape index: {}] }
   0x1   :  { %s15468_s5 = sld [smem:[%s18248_s0]]   ;;  %s15411_s14 = smov 3  }
   0x2   :  { %s15473_s9 = sld [smem:[%s18248_s0 + %s15409_s6]]   ;;  %s15412_s18 = smov 4  }
   0x3   :  { %s15478_s13 = sld [smem:[%s18248_s0 + %s15410_s10]]   ;;  %s15413_s22 = smov 5  }
   0x4   :  { %s15483_s17 = sld [smem:[%s18248_s0 + %s15411_s14]]   ;;  %s15414_s26 = smov 6  }
   0x5   :  { %s15488_s21 = sld [smem:[%s18248_s0 + %s15412_s18]]   ;;  %s15415_s30 = smov 7  }
   0x6   :  { %s15493_s25 = sld [smem:[%s18248_s0 + %s15413_s22]]   ;;  %s15416_s4 = smov 8  }
   0x7   :  { %s15498_s29 = sld [smem:[%s18248_s0 + %s15414_s26]]   ;;  %s15417_s10 = smov 9  }
   0x8   :  { %s15503_s3 = sld [smem:[%s18248_s0 + %s15415_s30]]   ;;  %s15418_s15 = smov 10  }
   0x9   :  { %s15508_s8 = sld [smem:[%s18248_s0 + %s15416_s4]]   ;;  %s15419_s20 = smov 11  }
   0xa   :  { %s15513_s14 = sld [smem:[%s18248_s0 + %s15417_s10]]   ;;  %s15420_s26 = smov 12  }
   0xb   :  { %s15518_s19 = sld [smem:[%s18248_s0 + %s15418_s15]]   ;;  %s15421_s1 = smov 13  }
   0xc   :  { %18505 = sst [smem:[#allocation3_spill]] %s15493_s25  ;;  %s15422_s7 = smov 14  }
   0xd   :  { %18506 = sst [smem:[#allocation4_spill]] %s15498_s29  ;;  %s15423_s15 = smov 15  }
   0xe   :  { %s15523_s24 = sld [smem:[%s18248_s0 + %s15419_s20]]   ;;  %s15424_s22 = smov 16  }
   0xf   :  { %s15528_s30 = sld [smem:[%s18248_s0 + %s15420_s26]]   ;;  %s15425_s28 = smov 17  }
  0x10   :  { %s15533_s6 = sld [smem:[%s18248_s0 + %s15421_s1]]   ;;  %s15455_s16 = smov 47  }
  0x11   :  { %s15538_s12 = sld [smem:[%s18248_s0 + %s15422_s7]]   ;;  %s15426_s7 = smov 18  }
  0x12   :  { %s15543_s20 = sld [smem:[%s18248_s0 + %s15423_s15]]   ;;  %s15427_s15 = smov 19  }
  0x13   :  { %s15548_s27 = sld [smem:[%s18248_s0 + %s15424_s22]]   ;;  %s15428_s22 = smov 20  }
  0x14   :  { %s15553_s4 = sld [smem:[%s18248_s0 + %s15425_s28]]   ;;  %s15429_s28 = smov 21  }
  0x15   :  { %s15558_s29 = sld [smem:[%s18248_s0 + %s15426_s7]]   ;;  %s15430_s7 = smov 22  }
  0x16   :  { %s15563_s25 = sld [smem:[%s18248_s0 + %s15427_s15]]   ;;  %s15431_s15 = smov 23  }
  0x17   :  { %s15456_s23 = smov 48  }
  0x19   :  { %18507 = sst [smem:[#allocation5_spill]] %s15548_s27 }
  0x1a   :  { %18508 = sst [smem:[#allocation6_spill]] %s15553_s4 }
  0x1b   :  { %18509 = sst [smem:[#allocation7_spill]] %s15558_s29 }
  0x1c   :  { %18510 = sst [smem:[#allocation8_spill]] %s15563_s25 }
  0x1d   :  { %s15568_s27 = sld [smem:[%s18248_s0 + %s15428_s22]]   ;;  %s15432_s22 = smov 24  }
  0x1e   :  { %s15573_s4 = sld [smem:[%s18248_s0 + %s15429_s28]]   ;;  %s15433_s28 = smov 25  }
  0x1f   :  { %s15578_s29 = sld [smem:[%s18248_s0 + %s15430_s7]]   ;;  %s15434_s7 = smov 26  }
  0x20   :  { %s15583_s25 = sld [smem:[%s18248_s0 + %s15431_s15]]   ;;  %s15435_s15 = smov 27  }
  0x23   :  { %18511 = sst [smem:[#allocation9_spill]] %s15568_s27 }
  0x24   :  { %18512 = sst [smem:[#allocation10_spill]] %s15573_s4 }
  0x25   :  { %18513 = sst [smem:[#allocation11_spill]] %s15578_s29 }
  0x26   :  { %18514 = sst [smem:[#allocation12_spill]] %s15583_s25 }
  0x27   :  { %s15588_s27 = sld [smem:[%s18248_s0 + %s15432_s22]]   ;;  %s15436_s22 = smov 28  }
  0x28   :  { %s15593_s4 = sld [smem:[%s18248_s0 + %s15433_s28]]   ;;  %s15437_s28 = smov 29  }
  0x29   :  { %s15598_s29 = sld [smem:[%s18248_s0 + %s15434_s7]]   ;;  %s15438_s7 = smov 30  }
  0x2a   :  { %s15603_s25 = sld [smem:[%s18248_s0 + %s15435_s15]]   ;;  %s15439_s15 = smov 31  }
  0x2d   :  { %18515 = sst [smem:[#allocation13_spill]] %s15588_s27 }
  0x2e   :  { %18516 = sst [smem:[#allocation14_spill]] %s15593_s4 }
  0x2f   :  { %18517 = sst [smem:[#allocation15_spill]] %s15598_s29 }
  0x30   :  { %18518 = sst [smem:[#allocation16_spill]] %s15603_s25 }
  0x31   :  { %s15608_s27 = sld [smem:[%s18248_s0 + %s15436_s22]]   ;;  %s15440_s22 = smov 32  }
  0x32   :  { %s15613_s4 = sld [smem:[%s18248_s0 + %s15437_s28]]   ;;  %s15441_s28 = smov 33  }
  0x33   :  { %s15618_s29 = sld [smem:[%s18248_s0 + %s15438_s7]]   ;;  %s15442_s7 = smov 34  }
  0x34   :  { %s15623_s25 = sld [smem:[%s18248_s0 + %s15439_s15]]   ;;  %s15443_s15 = smov 35  }
  0x37   :  { %18519 = sst [smem:[#allocation17_spill]] %s15608_s27 }
  0x38   :  { %18520 = sst [smem:[#allocation18_spill]] %s15613_s4 }
  0x39   :  { %18521 = sst [smem:[#allocation19_spill]] %s15618_s29 }
  0x3a   :  { %18522 = sst [smem:[#allocation20_spill]] %s15623_s25 }
  0x3b   :  { %s15628_s27 = sld [smem:[%s18248_s0 + %s15440_s22]]   ;;  %s15444_s22 = smov 36  }
  0x3c   :  { %s15633_s4 = sld [smem:[%s18248_s0 + %s15441_s28]]   ;;  %s15445_s28 = smov 37  }
  0x3d   :  { %s15638_s29 = sld [smem:[%s18248_s0 + %s15442_s7]]   ;;  %s15446_s7 = smov 38  }
  0x3e   :  { %s15643_s25 = sld [smem:[%s18248_s0 + %s15443_s15]]   ;;  %s15447_s15 = smov 39  }
  0x41   :  { %18523 = sst [smem:[#allocation21_spill]] %s15628_s27 }
  0x42   :  { %18524 = sst [smem:[#allocation22_spill]] %s15633_s4 }
  0x43   :  { %18525 = sst [smem:[#allocation23_spill]] %s15638_s29 }
  0x44   :  { %18526 = sst [smem:[#allocation24_spill]] %s15643_s25 }
  0x45   :  { %s15648_s27 = sld [smem:[%s18248_s0 + %s15444_s22]]   ;;  %s15448_s22 = smov 40  }
  0x46   :  { %s15653_s4 = sld [smem:[%s18248_s0 + %s15445_s28]]   ;;  %s15449_s28 = smov 41  }
  0x47   :  { %s15658_s29 = sld [smem:[%s18248_s0 + %s15446_s7]]   ;;  %s15450_s7 = smov 42  }
  0x48   :  { %s15663_s25 = sld [smem:[%s18248_s0 + %s15447_s15]]   ;;  %s15451_s15 = smov 43  }
  0x4b   :  { %18527 = sst [smem:[#allocation25_spill]] %s15648_s27 }
  0x4c   :  { %18528 = sst [smem:[#allocation26_spill]] %s15653_s4 }
  0x4d   :  { %18529 = sst [smem:[#allocation27_spill]] %s15658_s29 }
  0x4e   :  { %18530 = sst [smem:[#allocation28_spill]] %s15663_s25 }
  0x4f   :  { %s15668_s27 = sld [smem:[%s18248_s0 + %s15448_s22]]   ;;  %s15452_s22 = smov 44  }
  0x50   :  { %s15673_s4 = sld [smem:[%s18248_s0 + %s15449_s28]]   ;;  %s15453_s28 = smov 45  }
  0x51   :  { %s15678_s29 = sld [smem:[%s18248_s0 + %s15450_s7]]   ;;  %s15454_s7 = smov 46  }
  0x52   :  { %s15683_s25 = sld [smem:[%s18248_s0 + %s15451_s15]]  }
  0x55   :  { %18531 = sst [smem:[#allocation29_spill]] %s15668_s27 }
  0x56   :  { %18532 = sst [smem:[#allocation30_spill]] %s15673_s4 }
  0x57   :  { %18533 = sst [smem:[#allocation31_spill]] %s15678_s29 }
  0x58   :  { %18534 = sst [smem:[#allocation32_spill]] %s15683_s25 }
  0x59   :  { %s15688_s27 = sld [smem:[%s18248_s0 + %s15452_s22]]  }
  0x5a   :  { %s15693_s4 = sld [smem:[%s18248_s0 + %s15453_s28]]   ;;  %s15708_s28 = smov 0  }
  0x5b   :  { %s12337_s29 = sld [smem:[%s18248_s0 + %s15454_s7]]  }
  0x5c   :  { %s15701_s25 = sld [smem:[%s18248_s0 + %s15455_s16]]  }
  0x5f   :  { %18535 = sst [smem:[#allocation33_spill]] %s15688_s27 }
  0x60   :  { %s15706_s27 = sld [smem:[%s18248_s0 + %s15456_s23]]  }
  0x61   :  { %v103_v0 = vstv %s12337_s29 }
  0x62   :  { %104 = vst [vmem:[#allocation2] sm:$0x1] %v103_v0 }
  0x63 LB: > { %s12340_s1 = sadd.s32 4294967295, %s15407_s28   ;;  %p12344_p0 = scmp.ge.s32.totalorder %s15407_s28, 1  ;;  %s15407_s28 = sphi %s15708_s28, %s110_s28  }
  0x64   : > { %p1316_p1 = scmp.lt.s32.totalorder %s15407_s28, 3 }
  0x66   : > { %p1317_p2 = pnand %p12344_p0, %p1316_p1 }
  0x68   : > { %1320 = sbr.rel (%p1317_p2) target bundleno = 8270 (0x204e), region = 208 }
  0x6d   : > { %p1432_p3 = scmp.lt.s32.totalorder %s12340_s1, 1  ;;  %vm1497_vm0 = vcmask 130048   ;;  %v15158_v29 = vld [vmem:[%s15513_s14] sm:$0xff]   ;;  %v18258_v62 = vmov 0.0   ;;  %vm15458_vm1 = vmmov 0   ;;  %vm1663_vm2 = vcmask 261120  }
  0x6e   : > { %13549 = vmatprep.subr.bf16.mxu0 %v15158_v29  ;;  %v12348_v44 = vld [vmem:[%s15503_s3] ss:$0 sm:$0xff]  ;;  %13555 = vmatprep.subr.mxu1 %v18258_v62  ;;  %vm2155_vm3 = vcmask 523264   ;;  %vm2903_vm4 = vcmask 64512   ;;  %s18653_s2 = sld [smem:[#allocation5_spill]]  ;;  %vm4269_vm5 = vcmask 31744  }
  0x6f   : > { %s18922_s1 = smov (!%p1432_p3, %s12340_s1), 1  ;;  %13550 = vmatpush3.bf16.msra.mxu0 %v15158_v29  ;;  %v12349_v49 = vld [vmem:[%s15508_s8] ss:$0 sm:$0xff]  ;;  %13563 = vmatprep.mubr.msk.f32.mxu1 %vm15458_vm1, %v18258_v62  ;;  %s18688_s10 = sld [smem:[#allocation3_spill]]  ;;  %vm5379_vm6 = vcmask 1043456   ;;  %vm10895_vm7 = vcmask 516096  }
  0x70   : > { %s12607_s0 = sshll.u32 %s18922_s1, 5  ;;  %13566 = vmatprep.subr.mxu0 %v18258_v62  ;;  %v12350_v63 = vld [vmem:[%s15518_s19] ss:$0 sm:$0xff]  ;;  %s18698_s11 = sld [smem:[#allocation4_spill]]  ;;  %vm12211_vm8 = vcmask 0  }
  0x71   : > { %s1436_s29 = scalar_lea.vmem %s15468_s5, %s12607_s0  ;;  %s18742_s16 = sld [smem:[#allocation8_spill]] }
  0x72   : > { %v1491_v1 = vld [vmem:[%s1436_s29] sm:$0xff]  ;;  %v1493_v2 = vld [vmem:[%s1436_s29 + $0x10] sm:$0xff]  ;;  %v1492_v3 = vld [vmem:[%s1436_s29 + $0x8] sm:$0xff]  ;;  %s18743_s15 = sld [smem:[#allocation6_spill]] }
  0x73   : > { %v1498_v4 = vsel %vm1497_vm0, %v1491_v1, 0.0  ;;  %v1504_v5 = vsel %vm1497_vm0, %v1493_v2, 0.0  ;;  %v1494_v6 = vld [vmem:[%s1436_s29 + $0x18] sm:$0xff]  ;;  %v1501_v7 = vsel %vm1497_vm0, %v1492_v3, 0.0  ;;  %s18744_s18 = sld [smem:[#allocation7_spill]] }
  0x74   : > { %1499 = vadd.xlane.f32.xlu0 %v1498_v4  ;;  %1505 = vadd.xlane.f32.xlu1 %v1504_v5  ;;  %v1507_v8 = vsel %vm1497_vm0, %v1494_v6, 0.0  ;;  %s18746_s23 = sld [smem:[#allocation10_spill]] }
  0x75   : > { %s18747_s22 = sld [smem:[#allocation9_spill]] }
  0x76   : > { %s18749_s26 = sld [smem:[#allocation11_spill]] }
  0x77   : > { %s18750_s0 = sld [smem:[#allocation12_spill]] }
  0x78   : > { %1502 = vadd.xlane.f32.xlu0 %v1501_v7  ;;  %1508 = vadd.xlane.f32.xlu1 %v1507_v8  ;;  %s18751_s29 = sld [smem:[#allocation13_spill]] }
  0xfd   : > { %v1500_v9 = vpop.xlane.xlu0 %1499  ;;  %v1506_v10 = vpop.xlane.xlu1 %1505 }
  0xfe   : > { %v1511_v11 = vmul.f32 0.0625, %v1500_v9  ;;  %v1513_v12 = vmul.f32 0.0625, %v1506_v10 }
 0x100   : > { %v1515_v13 = vsub.f32 %v1491_v1, %v1511_v11  ;;  %v1517_v14 = vsub.f32 %v1493_v2, %v1513_v12  ;;  %v1445_v12 = vld [vmem:[%s15473_s9] sm:$0xff] }
 0x101   : > { %v1503_v15 = vpop.xlane.xlu0 %1502  ;;  %v1509_v16 = vpop.xlane.xlu1 %1508 }
 0x102   : > { %v1512_v17 = vmul.f32 0.0625, %v1503_v15  ;;  %v1514_v18 = vmul.f32 0.0625, %v1509_v16  ;;  %v1519_v19 = vmul.f32 %v1515_v13, %v1515_v13  ;;  %v1521_v20 = vmul.f32 %v1517_v14, %v1517_v14 }
 0x104   : > { %v1516_v21 = vsub.f32 %v1492_v3, %v1512_v17  ;;  %v1518_v22 = vsub.f32 %v1494_v6, %v1514_v18  ;;  %v1523_v23 = vsel %vm1497_vm0, %v1519_v19, 0.0  ;;  %v1529_v24 = vsel %vm1497_vm0, %v1521_v20, 0.0 }
 0x105   : > { %1524 = vadd.xlane.f32.xlu0 %v1523_v23 }
 0x106   : > { %v1520_v25 = vmul.f32 %v1516_v21, %v1516_v21  ;;  %v1522_v26 = vmul.f32 %v1518_v22, %v1518_v22 }
 0x108   : > { %v1526_v27 = vsel %vm1497_vm0, %v1520_v25, 0.0  ;;  %v1532_v28 = vsel %vm1497_vm0, %v1522_v26, 0.0 }
 0x109   : > { %1530 = vadd.xlane.f32.xlu0 %v1529_v24  ;;  %1527 = vadd.xlane.f32.xlu1 %v1526_v27 }
 0x10d   : > { %1533 = vadd.xlane.f32.xlu1 %v1532_v28 }
 0x18e   : > { %v1525_v30 = vpop.xlane.xlu0 %1524 }
 0x18f   : > { %v1535_v31 = vmul.f32 0.0625, %v1525_v30 }
 0x191   : > { %v1539_v32 = vadd.f32 1e-05, %v1535_v31 }
 0x192   : > { %v1528_v33 = vpop.xlane.xlu1 %1527  ;;  %v1531_v34 = vpop.xlane.xlu0 %1530 }
 0x193   : > { %15315 = vrsqrt.f32 %v1539_v32  ;;  %v1536_v35 = vmul.f32 0.0625, %v1528_v33  ;;  %v1537_v36 = vmul.f32 0.0625, %v1531_v34 }
 0x195   : > { %v1540_v37 = vadd.f32 1e-05, %v1536_v35  ;;  %v1541_v38 = vadd.f32 1e-05, %v1537_v36 }
 0x196   : > { %v1534_v39 = vpop.xlane.xlu1 %1533 }
 0x197   : > { %15317 = vrsqrt.f32 %v1540_v37  ;;  %v1538_v40 = vmul.f32 0.0625, %v1534_v39 }
 0x198   : > { %15319 = vrsqrt.f32 %v1541_v38 }
 0x199   : > { %v1542_v41 = vadd.f32 1e-05, %v1538_v40 }
 0x19b   : > { %15321 = vrsqrt.f32 %v1542_v41 }
 0x1a0   : > { %v15316_v42 = vpop.eup %15315 }
 0x1a1   : > { %v1547_v43 = vmul.f32 %v15316_v42, %v1515_v13  ;;  %v1665_v13 = vsel %vm1663_vm2, %v1445_v12, 0 }
 0x1a3   : > { %v1557_v48 = vmul.f32 %v12348_v44, %v1547_v43 }
 0x1a4   : > { %v15318_v45 = vpop.eup %15317 }
 0x1a5   : > { %v15320_v46 = vpop.eup %15319  ;;  %v1548_v47 = vmul.f32 %v15318_v45, %v1516_v21  ;;  %v1567_v53 = vadd.f32 %v12349_v49, %v1557_v48 }
 0x1a6   : > { %v1549_v50 = vmul.f32 %v15320_v46, %v1517_v14  ;;  %v15741_v14 = vand.u32 4294901760, %v1665_v13 }
 0x1a7   : > { %v1558_v51 = vmul.f32 %v12348_v44, %v1548_v47 }
 0x1a8   : > { %v15322_v52 = vpop.eup %15321  ;;  %v1559_v56 = vmul.f32 %v12348_v44, %v1549_v50  ;;  %18536 = vst [vmem:[#allocation34_spill] sm:$0xff] %v15741_v14  ;;  %v15744_v19 = vsub.f32 %v1665_v13, %v15741_v14 }
 0x1a9   : > { %v1568_v54 = vadd.f32 %v12349_v49, %v1558_v51  ;;  %v1550_v55 = vmul.f32 %v15322_v52, %v1518_v22 }
 0x1aa   : > { %v1569_v59 = vadd.f32 %v12349_v49, %v1559_v56  ;;  %18537 = vst [vmem:[#allocation35_spill] sm:$0xff] %v15744_v19  ;;  %v15754_v30 = vand.u32 4294901760, %v15744_v19  ;;  %v15160_v56 = vld [vmem:[%s15543_s20 + $0x10] sm:$0xff]  }
 0x1ab   : > { %v1573_v57 = vpack.c.bf16 %v1568_v54, %v1567_v53  ;;  %v1560_v58 = vmul.f32 %v12348_v44, %v1550_v55  ;;  %v15159_v55 = vld [vmem:[%s15543_s20 + $0x18] sm:$0xff]  }
 0x1ac   : > { %18538 = vst [vmem:[#allocation36_spill] sm:$0xff] %v15754_v30  ;;  %v1739_v37 = vsub.f32 %v15744_v19, %v15754_v30 }
 0x1ad   : > { %13551 = vmatprep.mubr.msk.bf16.mxu0 %vm1497_vm0, %v1573_v57  ;;  %v1570_v60 = vadd.f32 %v12349_v49, %v1560_v58  ;;  %v15161_v58 = vld [vmem:[%s15543_s20 + $0x8] sm:$0xff]  }
 0x1ae   : > { %v15783_v44 = vand.u32 4294901760, %v1739_v37 }
 0x1af   : > { %v1574_v61 = vpack.c.bf16 %v1570_v60, %v1569_v59  ;;  %v15162_v59 = vld [vmem:[%s15543_s20] sm:$0xff]  }
 0x1b0   : > { %18539 = vst [vmem:[#allocation37_spill] sm:$0xff] %v15783_v44 }
 0x1b1   : > { %13552 = vmatmul.mubr.msk.bf16.vlgmr.msra.gmra.mxu0 %vm1497_vm0, %v1574_v61 }
 0x1b2   : > { %13574 = vmatprep.mubr.msk.f32.mxu0 %vm15458_vm1, %v18258_v62 }
 0x271   : > { %v13553_v0 = vpop.f32.mrf.mxu0 }
 0x272   : > { %v1637_v1 = vadd.f32 %v13553_v0, %v12350_v63 }
 0x273   : > { %v1628_v2 = vpop.f32.mrf.mxu0 }
 0x274   : > { %v1649_v3 = vmul.f32 0.70710677, %v1637_v1  ;;  %v1629_v4 = vadd.f32 %v12350_v63, %v1628_v2  ;;  %v1645_v16 = vmul.f32 0.5, %v1637_v1 }
 0x275   : > { %v13554_v5 = vpop.f32.mrf.mxu0 }
 0x276   : > { %15323 = verf.f32 %v1649_v3  ;;  %v1647_v6 = vmul.f32 0.70710677, %v1629_v4  ;;  %v1640_v7 = vadd.f32 %v13554_v5, %v12350_v63  ;;  %v1643_v21 = vmul.f32 0.5, %v1629_v4 }
 0x277   : > { %v1631_v8 = vpop.f32.mrf.mxu0 }
 0x278   : > { %15325 = verf.f32 %v1647_v6  ;;  %v1650_v9 = vmul.f32 0.70710677, %v1640_v7  ;;  %v1632_v10 = vadd.f32 %v12350_v63, %v1631_v8  ;;  %v1646_v25 = vmul.f32 0.5, %v1640_v7 }
 0x27a   : > { %15327 = verf.f32 %v1650_v9  ;;  %v1648_v11 = vmul.f32 0.70710677, %v1632_v10  ;;  %v1644_v29 = vmul.f32 0.5, %v1632_v10 }
 0x27c   : > { %15329 = verf.f32 %v1648_v11 }
 0x283   : > { %v15324_v15 = vpop.eup %15323 }
 0x284   : > { %v1657_v17 = vadd.f32 1.0, %v15324_v15 }
 0x285   : > { %v15326_v18 = vpop.eup %15325 }
 0x286   : > { %v15746_v20 = vmul.f32 %v1657_v17, %v1645_v16  ;;  %v1655_v22 = vadd.f32 1.0, %v15326_v18 }
 0x287   : > { %v15328_v23 = vpop.eup %15327 }
 0x288   : > { %v15748_v24 = vmul.f32 %v1655_v22, %v1643_v21  ;;  %v1658_v26 = vadd.f32 1.0, %v15328_v23  ;;  %v15751_v27 = vand.u32 4294901760, %v15746_v20  ;;  %v15163_v23 = vld [vmem:[%s15533_s6 + $0x18] sm:$0xff]  }
 0x289   : > { %v15330_v28 = vpop.eup %15329 }
 0x28a   : > { %v15756_v31 = vmul.f32 %v1658_v26, %v1646_v25  ;;  %v1656_v32 = vadd.f32 1.0, %v15330_v28  ;;  %v15759_v33 = vand.u32 4294901760, %v15748_v24  ;;  %v1779_v34 = vsub.f32 %v15746_v20, %v15751_v27  ;;  %v15165_v25 = vld [vmem:[%s15533_s6 + $0x8] sm:$0xff]   ;;  %v15166_v26 = vld [vmem:[%s15533_s6] sm:$0xff]   ;;  %v1456_v28 = vld [vmem:[%s15483_s17 + $0x30] sm:$0xff] }
 0x28c   : > { %v15763_v35 = vmul.f32 %v1656_v32, %v1644_v29  ;;  %v15766_v36 = vand.u32 4294901760, %v15756_v31  ;;  %v1780_v40 = vand.u32 4294901760, %v1779_v34  ;;  %v1793_v41 = vsub.f32 %v15748_v24, %v15759_v33  ;;  %v1455_v29 = vld [vmem:[%s15483_s17 + $0x28] sm:$0xff] }
 0x28d   : > { %v2276_v60 = vpack.c.bf16 %v15756_v31, %v15746_v20  ;;  %v15864_v32 = vand.u32 4294901760, %v1456_v28 }
 0x28e   : > { %13556 = vmatpush3.msra.mxu1 %v15766_v36  ;;  %v15772_v38 = vand.u32 4294901760, %v15763_v35  ;;  %v1772_v39 = vsub.f32 %v15756_v31, %v15766_v36  ;;  %v1781_v46 = vsub.f32 %v1779_v34, %v1780_v40  ;;  %v1794_v48 = vand.u32 4294901760, %v1793_v41 }
 0x28f   : > { %13557 = vmatprep.subr.mxu1 %v18258_v62  ;;  %v2275_v57 = vpack.c.bf16 %v15763_v35, %v15748_v24  ;;  %v15164_v24 = vld [vmem:[%s15533_s6 + $0x10] sm:$0xff]   ;;  %18542 = vst [vmem:[#allocation40_spill] sm:$0xff] %v15864_v32 }
 0x290   : > { %13558 = vmatpush3.msra.mxu1 %v15751_v27  ;;  %v1773_v42 = vand.u32 4294901760, %v1772_v39  ;;  %v1786_v43 = vsub.f32 %v15763_v35, %v15772_v38  ;;  %v1782_v51 = vand.u32 4294901760, %v1781_v46  ;;  %v1795_v52 = vsub.f32 %v1793_v41, %v1794_v48  ;;  %v1453_v35 = vld [vmem:[%s15483_s17 + $0x18] sm:$0xff] }
 0x291   : > { %13559 = vmatprep.subr.mxu1 %v18258_v62  ;;  %v15872_v37 = vand.u32 4294901760, %v1453_v35 }
 0x292   : > { %13560 = vmatpush3.msra.mxu1 %v15772_v38  ;;  %v1774_v45 = vsub.f32 %v1772_v39, %v1773_v42  ;;  %v1787_v47 = vand.u32 4294901760, %v1786_v43  ;;  %v1796_v54 = vand.u32 4294901760, %v1795_v52 }
 0x293   : > { %13561 = vmatprep.subr.mxu1 %v18258_v62  ;;  %18545 = vst [vmem:[#allocation43_spill] sm:$0xff] %v15872_v37 }
 0x294   : > { %13562 = vmatpush3.msra.mxu1 %v15759_v33  ;;  %v1775_v49 = vand.u32 4294901760, %v1774_v45  ;;  %v1788_v50 = vsub.f32 %v1786_v43, %v1787_v47 }
 0x295   : > { %13577 = vmatprep.subr.mxu1 %v18258_v62  ;;  %13564 = vmatmul.mubr.f32.vlgmr.msra.gmra.mxu1 %v15783_v44 }
 0x296   : > { %13567 = vmatpush3.msra.mxu0 %v1775_v49  ;;  %13578 = vmatpush3.msra.mxu1 %v1772_v39  ;;  %v1789_v53 = vand.u32 4294901760, %v1788_v50  ;;  %v15878_v39 = vsub.f32 %v1456_v28, %v15864_v32 }
 0x297   : > { %13568 = vmatprep.subr.mxu0 %v18258_v62  ;;  %13579 = vmatprep.subr.mxu1 %v18258_v62 }
 0x298   : > { %13569 = vmatpush3.msra.mxu0 %v1782_v51  ;;  %13580 = vmatpush3.msra.mxu1 %v1779_v34  ;;  %v1454_v34 = vld [vmem:[%s15483_s17 + $0x20] sm:$0xff]  ;;  %18547 = vst [vmem:[#allocation45_spill] sm:$0xff] %v15878_v39  ;;  %v15893_v45 = vand.u32 4294901760, %v15878_v39 }
 0x299   : > { %13570 = vmatprep.subr.mxu0 %v18258_v62  ;;  %13581 = vmatprep.subr.mxu1 %v18258_v62 }
 0x29a   : > { %13571 = vmatpush3.msra.mxu0 %v1789_v53  ;;  %13582 = vmatpush3.msra.mxu1 %v1786_v43  ;;  %18552 = vst [vmem:[#allocation50_spill] sm:$0xff] %v15893_v45  ;;  %v2476_v49 = vsub.f32 %v15878_v39, %v15893_v45 }
 0x29b   : > { %13572 = vmatprep.subr.mxu0 %v18258_v62  ;;  %13583 = vmatprep.subr.mxu1 %v18258_v62 }
 0x29c   : > { %13573 = vmatpush3.msra.mxu0 %v1796_v54  ;;  %13584 = vmatpush3.msra.mxu1 %v1793_v41  ;;  %v15912_v53 = vand.u32 4294901760, %v2476_v49 }
 0x29d   : > { %13575 = vmatmul.mubr.f32.vlgmr.msra.gmra.mxu0 %v15741_v14  ;;  %13585 = vmatprep.mubr.msk.f32.mxu1 %vm15458_vm1, %v18258_v62 }
 0x29e   : > { %13588 = vmatprep.subr.mxu0 %v18258_v62  ;;  %13599 = vmatprep.subr.mxu1 %v18258_v62  ;;  %18557 = vst [vmem:[#allocation55_spill] sm:$0xff] %v15912_v53 }
 0x29f   : > { %13586 = vmatmul.mubr.f32.vlgmr.msra.gmra.mxu1 %v15744_v19  ;;  %13589 = vmatpush3.msra.mxu0 %v15766_v36 }
 0x2a0   : > { %13600 = vmatpush3.msra.mxu1 %v1773_v42  ;;  %13590 = vmatprep.subr.mxu0 %v18258_v62  ;;  %v15887_v42 = vsub.f32 %v1453_v35, %v15872_v37 }
 0x2a1   : > { %13601 = vmatprep.subr.mxu1 %v18258_v62  ;;  %13591 = vmatpush3.msra.mxu0 %v15751_v27 }
 0x2a2   : > { %13602 = vmatpush3.msra.mxu1 %v1780_v40  ;;  %13592 = vmatprep.subr.mxu0 %v18258_v62  ;;  %18550 = vst [vmem:[#allocation48_spill] sm:$0xff] %v15887_v42  ;;  %v15908_v51 = vand.u32 4294901760, %v15887_v42 }
 0x2a3   : > { %13603 = vmatprep.subr.mxu1 %v18258_v62  ;;  %13593 = vmatpush3.msra.mxu0 %v15772_v38 }
 0x2a4   : > { %13604 = vmatpush3.msra.mxu1 %v1787_v47  ;;  %13594 = vmatprep.subr.mxu0 %v18258_v62  ;;  %18555 = vst [vmem:[#allocation53_spill] sm:$0xff] %v15908_v51 }
 0x2a5   : > { %13605 = vmatprep.subr.mxu1 %v18258_v62  ;;  %13595 = vmatpush3.msra.mxu0 %v15759_v33 }
 0x2a6   : > { %13596 = vmatprep.mubr.msk.f32.mxu0 %vm15458_vm1, %v18258_v62  ;;  %13606 = vmatpush3.msra.mxu1 %v1794_v48 }
 0x2a7   : > { %13597 = vmatmul.mubr.f32.vlgmr.msra.gmra.mxu0 %v15754_v30  ;;  %13610 = vmatprep.subr.mxu0 %v18258_v62 }
 0x2a8   : > { %13607 = vmatprep.mubr.msk.f32.mxu1 %vm15458_vm1, %v18258_v62  ;;  %13611 = vmatpush3.msra.mxu0 %v15766_v36  ;;  %v15870_v36 = vand.u32 4294901760, %v1454_v34 }
 0x2a9   : > { %13608 = vmatmul.mubr.f32.vlgmr.msra.gmra.mxu1 %v15741_v14  ;;  %13612 = vmatprep.subr.mxu0 %v18258_v62 }
 0x2aa   : > { %13613 = vmatpush3.msra.mxu0 %v15751_v27  ;;  %13618 = vmatprep.mubr.msk.f32.mxu0 %vm15458_vm1, %v18258_v62  ;;  %v1457_v27 = vld [vmem:[%s15483_s17 + $0x38] sm:$0xff]  ;;  %18544 = vst [vmem:[#allocation42_spill] sm:$0xff] %v15870_v36  ;;  %v15884_v41 = vsub.f32 %v1454_v34, %v15870_v36 }
 0x2ab   : > { %13614 = vmatprep.subr.mxu0 %v18258_v62  ;;  %13621 = vmatprep.subr.bf16.mxu1 %v18258_v62  ;;  %v15862_v31 = vand.u32 4294901760, %v1457_v27 }
 0x2ac   : > { %13615 = vmatpush3.msra.mxu0 %v15772_v38  ;;  %13629 = vmatprep.mubr.msk.bf16.mxu1 %vm15458_vm1, %v18258_v62  ;;  %18549 = vst [vmem:[#allocation47_spill] sm:$0xff] %v15884_v41  ;;  %v15899_v47 = vand.u32 4294901760, %v15884_v41 }
 0x2ad   : > { %13616 = vmatprep.subr.mxu0 %v18258_v62  ;;  %13622 = vmatpush3.bf16.msra.mxu1 %v15163_v23  ;;  %18541 = vst [vmem:[#allocation39_spill] sm:$0xff] %v15862_v31  ;;  %v15875_v38 = vsub.f32 %v1457_v27, %v15862_v31  ;;  %v12356_v27 = vld [vmem:[%s15538_s12] ss:$0 sm:$0xff] }
 0x2ae   : > { %13617 = vmatpush3.msra.mxu0 %v15759_v33  ;;  %13623 = vmatprep.subr.bf16.mxu1 %v18258_v62  ;;  %v15866_v33 = vand.u32 4294901760, %v1455_v29  ;;  %18554 = vst [vmem:[#allocation52_spill] sm:$0xff] %v15899_v47  ;;  %v2490_v54 = vsub.f32 %v15884_v41, %v15899_v47 }
 0x2af   : > { %13619 = vmatmul.mubr.f32.vlgmr.msra.gmra.mxu0 %v15741_v14  ;;  %13633 = vmatprep.subr.bf16.mxu0 %v15159_v55  ;;  %18546 = vst [vmem:[#allocation44_spill] sm:$0xff] %v15875_v38  ;;  %v15890_v43 = vand.u32 4294901760, %v15875_v38 }
 0x2b0   : > { %13634 = vmatpush3.bf16.msra.mxu0 %v15159_v55  ;;  %13641 = vmatprep.mubr.msk.bf16.mxu0 %vm2155_vm3, %v2275_v57  ;;  %18543 = vst [vmem:[#allocation41_spill] sm:$0xff] %v15866_v33  ;;  %v15881_v40 = vsub.f32 %v1455_v29, %v15866_v33  ;;  %v15923_v57 = vand.u32 4294901760, %v2490_v54 }
 0x2b1   : > { %13635 = vmatprep.subr.bf16.mxu0 %v15160_v56  ;;  %13624 = vmatpush3.bf16.msra.mxu1 %v15164_v24  ;;  %18551 = vst [vmem:[#allocation49_spill] sm:$0xff] %v15890_v43  ;;  %v2469_v48 = vsub.f32 %v15875_v38, %v15890_v43 }
 0x2b2   : > { %13625 = vmatprep.subr.bf16.mxu1 %v18258_v62  ;;  %18548 = vst [vmem:[#allocation46_spill] sm:$0xff] %v15881_v40  ;;  %v15896_v46 = vand.u32 4294901760, %v15881_v40  ;;  %18559 = vst [vmem:[#allocation57_spill] sm:$0xff] %v15923_v57 }
 0x2b3   : > { %v15910_v52 = vand.u32 4294901760, %v2469_v48 }
 0x2b4   : > { %13636 = vmatpush3.bf16.msra.mxu0 %v15160_v56  ;;  %18553 = vst [vmem:[#allocation51_spill] sm:$0xff] %v15896_v46  ;;  %v2483_v50 = vsub.f32 %v15881_v40, %v15896_v46  ;;  %v2497_v56 = vsub.f32 %v15887_v42, %v15908_v51 }
 0x2b5   : > { %13637 = vmatprep.subr.bf16.mxu0 %v15161_v58  ;;  %13626 = vmatpush3.bf16.msra.mxu1 %v15165_v25  ;;  %18556 = vst [vmem:[#allocation54_spill] sm:$0xff] %v15910_v52 }
 0x2b6   : > { %13627 = vmatprep.subr.bf16.mxu1 %v18258_v62  ;;  %v15917_v55 = vand.u32 4294901760, %v2483_v50 }
 0x2b8   : > { %13638 = vmatpush3.bf16.msra.mxu0 %v15161_v58  ;;  %18558 = vst [vmem:[#allocation56_spill] sm:$0xff] %v15917_v55  ;;  %v15927_v58 = vand.u32 4294901760, %v2497_v56 }
 0x2b9   : > { %13639 = vmatprep.subr.bf16.mxu0 %v15162_v59  ;;  %13628 = vmatpush3.bf16.msra.mxu1 %v15166_v26 }
 0x2ba   : > { %13645 = vmatprep.subr.mxu1 %v18258_v62  ;;  %18560 = vst [vmem:[#allocation58_spill] sm:$0xff] %v15927_v58 }
 0x2bc   : > { %13640 = vmatpush3.bf16.msra.mxu0 %v15162_v59 }
 0x2bd   : > { %13664 = vmatprep.subr.mxu0 %v18258_v62 }
 0x2bf   : > { %13642 = vmatmul.mubr.msk.bf16.vlgmr.msra.gmra.mxu0 %vm2155_vm3, %v2276_v60 }
 0x2c0   : > { %13680 = vmatprep.mubr.msk.f32.mxu0 %vm15458_vm1, %v18258_v62  ;;  %13665 = vmatpush3.msra.mxu0 %v15910_v52 }
 0x2c1   : > { %13666 = vmatprep.subr.mxu0 %v18258_v62 }
 0x2c2   : > { %13667 = vmatpush3.msra.mxu0 %v15912_v53 }
 0x2c3   : > { %13668 = vmatprep.subr.mxu0 %v18258_v62 }
 0x2c4   : > { %13669 = vmatpush3.msra.mxu0 %v15917_v55 }
 0x2c5   : > { %13670 = vmatprep.subr.mxu0 %v18258_v62 }
 0x2c6   : > { %13671 = vmatpush3.msra.mxu0 %v15923_v57 }
 0x2c7   : > { %13672 = vmatprep.subr.mxu0 %v18258_v62 }
 0x2c8   : > { %13673 = vmatpush3.msra.mxu0 %v15927_v58 }
 0x2c9   : > { %13674 = vmatprep.subr.mxu0 %v18258_v62 }
 0x355   : > { %v1742_v61 = vpop.f32.mrf.mxu1 }
 0x357   : > { %v13565_v63 = vpop.f32.mrf.mxu1 }
 0x35d   : > { %v1833_v0 = vpop.f32.mrf.mxu0 }
 0x35e   : > { %v1834_v4 = vadd.f32 %v1833_v0, %v1742_v61  ;;  %v12354_v0 = vld [vmem:[%s15523_s24] ss:$0 sm:$0xff] }
 0x35f   : > { %v13576_v1 = vpop.f32.mrf.mxu0  ;;  %v1913_v2 = vpop.f32.mrf.mxu1 }
 0x360   : > { %v1914_v6 = vadd.f32 %v1913_v2, %v1834_v4  ;;  %v12355_v2 = vld [vmem:[%s15528_s30] ss:$0 sm:$0xff] }
 0x361   : > { %v13587_v3 = vpop.f32.mrf.mxu1 }
 0x367   : > { %v1990_v5 = vpop.f32.mrf.mxu0 }
 0x368   : > { %v1991_v9 = vadd.f32 %v1990_v5, %v1914_v6  ;;  %v1452_v6 = vld [vmem:[%s15483_s17 + $0x10] sm:$0xff] }
 0x369   : > { %v13598_v7 = vpop.f32.mrf.mxu0  ;;  %v2073_v8 = vpop.f32.mrf.mxu1 }
 0x36a   : > { %v2074_v11 = vadd.f32 %v2073_v8, %v1991_v9  ;;  %v15950_v7 = vand.u32 4294901760, %v1452_v6  ;;  %v1451_v8 = vld [vmem:[%s15483_s17 + $0x8] sm:$0xff] }
 0x36b   : > { %v13609_v10 = vpop.f32.mrf.mxu1 }
 0x36c   : > { %18561 = vst [vmem:[#allocation59_spill] sm:$0xff] %v15950_v7  ;;  %v15954_v9 = vsub.f32 %v1452_v6, %v15950_v7  ;;  %v15956_v10 = vand.u32 4294901760, %v1451_v8 }
 0x36e   : > { %18562 = vst [vmem:[#allocation60_spill] sm:$0xff] %v15954_v9  ;;  %18563 = vst [vmem:[#allocation61_spill] sm:$0xff] %v15956_v10 }
 0x36f   : > { %v2148_v12 = vpop.f32.mrf.mxu0 }
 0x370   : > { %v15845_v13 = vadd.f32 %v2148_v12, %v2074_v11  ;;  %v1450_v11 = vld [vmem:[%s15483_s17] sm:$0xff]  ;;  %v15962_v12 = vand.u32 4294901760, %v15954_v9 }
 0x371   : > { %v13620_v15 = vpop.f32.mrf.mxu0 }
 0x372   : > { %18540 = vst [vmem:[#allocation38_spill] sm:$0xff] %v15845_v13  ;;  %v2156_v16 = vsel %vm2155_vm3, %v15845_v13, 0.0  ;;  %18564 = vst [vmem:[#allocation62_spill] sm:$0xff] %v15962_v12  ;;  %v15965_v15 = vsub.f32 %v1451_v8, %v15956_v10 }
 0x373   : > { %2157 = vadd.xlane.f32.xlu0 %v2156_v16  ;;  %v15967_v16 = vand.u32 4294901760, %v1450_v11 }
 0x374   : > { %18565 = vst [vmem:[#allocation63_spill] sm:$0xff] %v15965_v15 }
 0x375   : > { %18566 = vst [vmem:[#allocation64_spill] sm:$0xff] %v15967_v16 }
 0x3fc   : > { %v2158_v17 = vpop.xlane.xlu0 %2157 }
 0x3fd   : > { %v2160_v18 = vmul.f32 0.015625, %v2158_v17  ;;  %v2504_v17 = vsub.f32 %v15954_v9, %v15962_v12 }
 0x3ff   : > { %v2161_v20 = vsub.f32 %v15845_v13, %v2160_v18  ;;  %v15974_v18 = vand.u32 4294901760, %v15965_v15 }
 0x401   : > { %v2162_v21 = vmul.f32 %v2161_v20, %v2161_v20  ;;  %18567 = vst [vmem:[#allocation65_spill] sm:$0xff] %v15974_v18 }
 0x403   : > { %v2163_v22 = vsel %vm2155_vm3, %v2162_v21, 0.0  ;;  %v15981_v21 = vand.u32 4294901760, %v2504_v17 }
 0x404   : > { %2164 = vadd.xlane.f32.xlu1 %v2163_v22  ;;  %v2511_v22 = vsub.f32 %v15965_v15, %v15974_v18 }
 0x405   : > { %18569 = vst [vmem:[#allocation67_spill] sm:$0xff] %v15981_v21  ;;  %13675 = vmatpush3.msra.mxu0 %v15981_v21  ;;  %v1463_v21 = vld [vmem:[%s15488_s21 + $0x28] sm:$0xff] }
 0x406   : > { %v15989_v24 = vand.u32 4294901760, %v2511_v22  ;;  %13676 = vmatprep.subr.mxu0 %v18258_v62 }
 0x408   : > { %18571 = vst [vmem:[#allocation69_spill] sm:$0xff] %v15989_v24  ;;  %13677 = vmatpush3.msra.mxu0 %v15989_v24 }
 0x409   : > { %13678 = vmatprep.subr.mxu0 %v18258_v62 }
 0x48d   : > { %v2165_v59 = vpop.xlane.xlu1 %2164 }
 0x48e   : > { %v2166_v60 = vmul.f32 0.015625, %v2165_v59 }
 0x490   : > { %v2167_v61 = vadd.f32 1e-05, %v2166_v60 }
 0x492   : > { %15331 = vrsqrt.f32 %v2167_v61  ;;  %v1446_v61 = vld [vmem:[%s15478_s13] sm:$0xff] }
 0x49f   : > { %v15332_v63 = vpop.eup %15331 }
 0x4a0   : > { %v2169_v1 = vmul.f32 %v15332_v63, %v2161_v20  ;;  %v15977_v20 = vsub.f32 %v1450_v11, %v15967_v16  ;;  %v2905_v63 = vsel %vm2903_vm4, %v1446_v61, 0 }
 0x4a2   : > { %v2176_v3 = vmul.f32 %v12354_v0, %v2169_v1  ;;  %18568 = vst [vmem:[#allocation66_spill] sm:$0xff] %v15977_v20  ;;  %v15986_v23 = vand.u32 4294901760, %v15977_v20  ;;  %v16080_v0 = vand.u32 4294901760, %v2905_v63 }
 0x4a4   : > { %v2183_v4 = vadd.f32 %v12355_v2, %v2176_v3  ;;  %18570 = vst [vmem:[#allocation68_spill] sm:$0xff] %v15986_v23  ;;  %v2518_v25 = vsub.f32 %v15977_v20, %v15986_v23  ;;  %18573 = vst [vmem:[#allocation71_spill] sm:$0xff] %v16080_v0  ;;  %v16083_v1 = vsub.f32 %v2905_v63, %v16080_v0 }
 0x4a6   : > { %v2192_v5 = vpack.c.bf16 %v2183_v4, %v2183_v4  ;;  %v15995_v26 = vand.u32 4294901760, %v2518_v25  ;;  %18574 = vst [vmem:[#allocation72_spill] sm:$0xff] %v16083_v1  ;;  %v16087_v2 = vand.u32 4294901760, %v16083_v1 }
 0x4a8   : > { %13630 = vmatmul.mubr.msk.bf16.vlgmr.msra.gmra.mxu1 %vm2155_vm3, %v2192_v5  ;;  %18572 = vst [vmem:[#allocation70_spill] sm:$0xff] %v15995_v26  ;;  %13679 = vmatpush3.msra.mxu0 %v15995_v26  ;;  %18575 = vst [vmem:[#allocation73_spill] sm:$0xff] %v16087_v2  ;;  %v2985_v3 = vsub.f32 %v16083_v1, %v16087_v2  ;;  %v16094_v5 = vpop.f32.mrf.mxu0  ;;  %v1464_v26 = vld [vmem:[%s15488_s21 + $0x30] sm:$0xff] }
 0x4a9   : > { %13646 = vmatpush3.msra.mxu1 %v15862_v31  ;;  %13661 = vmatprep.mubr.msk.f32.mxu1 %vm15458_vm1, %v18258_v62  ;;  %v16293_v24 = vand.u32 4294901760, %v1464_v26 }
 0x4aa   : > { %13647 = vmatprep.subr.mxu1 %v18258_v62  ;;  %13702 = vmatprep.subr.mxu0 %v18258_v62  ;;  %v16091_v4 = vand.u32 4294901760, %v2985_v3  ;;  %v16096_v6 = vpop.f32.mrf.mxu0 }
 0x4ab   : > { %13648 = vmatpush3.msra.mxu1 %v15864_v32  ;;  %18620 = vst [vmem:[#allocation118_spill] sm:$0xff] %v16293_v24  ;;  %v16309_v55 = vsub.f32 %v1464_v26, %v16293_v24 }
 0x4ac   : > { %13649 = vmatprep.subr.mxu1 %v18258_v62  ;;  %18576 = vst [vmem:[#allocation74_spill] sm:$0xff] %v16091_v4  ;;  %v16098_v8 = vpop.f32.mrf.mxu0 }
 0x4ad   : > { %13650 = vmatpush3.msra.mxu1 %v15866_v33  ;;  %18624 = vst [vmem:[#allocation122_spill] sm:$0xff] %v16309_v55  ;;  %v16323_v26 = vand.u32 4294901760, %v16309_v55 }
 0x4ae   : > { %13651 = vmatprep.subr.mxu1 %v18258_v62  ;;  %v16100_v11 = vpop.f32.mrf.mxu0 }
 0x4af   : > { %13652 = vmatpush3.msra.mxu1 %v15870_v36  ;;  %18627 = vst [vmem:[#allocation125_spill] sm:$0xff] %v16323_v26 }
 0x4b0   : > { %13653 = vmatprep.subr.mxu1 %v18258_v62 }
 0x4b1   : > { %13654 = vmatpush3.msra.mxu1 %v15872_v37 }
 0x4b2   : > { %13655 = vmatprep.subr.mxu1 %v18258_v62 }
 0x4b3   : > { %13656 = vmatpush3.msra.mxu1 %v15950_v7 }
 0x4b4   : > { %13657 = vmatprep.subr.mxu1 %v18258_v62 }
 0x4b5   : > { %13658 = vmatpush3.msra.mxu1 %v15956_v10 }
 0x4b6   : > { %13659 = vmatprep.subr.mxu1 %v18258_v62 }
 0x4b7   : > { %13660 = vmatpush3.msra.mxu1 %v15967_v16 }
 0x4b8   : > { %13683 = vmatprep.subr.mxu1 %v18258_v62 }
 0x568   : > { %v2261_v28 = vpop.f32.mrf.mxu1 }
 0x569   : > { %v2262_v29 = vadd.f32 %v12356_v27, %v2261_v28 }
 0x56a   : > { %v13631_v34 = vpop.f32.mrf.mxu1 }
 0x56b   : > { %v2364_v35 = vsel %vm2155_vm3, %v2262_v29, 0 }
 0x56c   : > { %v16002_v48 = vand.u32 4294901760, %v2364_v35  ;;  %v2264_v49 = vpop.f32.mrf.mxu1 }
 0x56e   : > { %v2440_v50 = vsub.f32 %v2364_v35, %v16002_v48  ;;  %v13632_v54 = vpop.f32.mrf.mxu1  ;;  %13681 = vmatmul.mubr.f32.vlgmr.msra.gmra.mxu0 %v16002_v48  ;;  %v1447_v35 = vld [vmem:[%s15478_s13 + $0x8] sm:$0xff] }
 0x56f   : > { %13703 = vmatpush3.msra.mxu0 %v15862_v31  ;;  %13718 = vmatprep.mubr.msk.f32.mxu0 %vm15458_vm1, %v18258_v62 }
 0x570   : > { %v2441_v56 = vand.u32 4294901760, %v2440_v50  ;;  %13704 = vmatprep.subr.mxu0 %v18258_v62 }
 0x571   : > { %13705 = vmatpush3.msra.mxu0 %v15864_v32 }
 0x572   : > { %13706 = vmatprep.subr.mxu0 %v18258_v62  ;;  %v2442_v59 = vsub.f32 %v2440_v50, %v2441_v56 }
 0x573   : > { %13707 = vmatpush3.msra.mxu0 %v15866_v33 }
 0x574   : > { %13708 = vmatprep.subr.mxu0 %v18258_v62  ;;  %v2443_v60 = vand.u32 4294901760, %v2442_v59 }
 0x575   : > { %13709 = vmatpush3.msra.mxu0 %v15870_v36 }
 0x576   : > { %13710 = vmatprep.subr.mxu0 %v18258_v62  ;;  %13662 = vmatmul.mubr.f32.vlgmr.msra.gmra.mxu1 %v2443_v60 }
 0x577   : > { %13684 = vmatpush3.msra.mxu1 %v15875_v38  ;;  %13711 = vmatpush3.msra.mxu0 %v15872_v37 }
 0x578   : > { %13685 = vmatprep.subr.mxu1 %v18258_v62  ;;  %13712 = vmatprep.subr.mxu0 %v18258_v62 }
 0x579   : > { %13686 = vmatpush3.msra.mxu1 %v15878_v39  ;;  %13713 = vmatpush3.msra.mxu0 %v15950_v7 }
 0x57a   : > { %13687 = vmatprep.subr.mxu1 %v18258_v62  ;;  %13714 = vmatprep.subr.mxu0 %v18258_v62 }
 0x57b   : > { %13688 = vmatpush3.msra.mxu1 %v15881_v40  ;;  %13715 = vmatpush3.msra.mxu0 %v15956_v10  ;;  %v1467_v40 = vld [vmem:[%s15488_s21 + $0x48] sm:$0xff] }
 0x57c   : > { %13689 = vmatprep.subr.mxu1 %v18258_v62  ;;  %13716 = vmatprep.subr.mxu0 %v18258_v62 }
 0x57d   : > { %13690 = vmatpush3.msra.mxu1 %v15884_v41  ;;  %13717 = vmatpush3.msra.mxu0 %v15967_v16 }
 0x57e   : > { %13691 = vmatprep.subr.mxu1 %v18258_v62  ;;  %13719 = vmatmul.mubr.f32.vlgmr.msra.gmra.mxu0 %v2441_v56  ;;  %v1449_v56 = vld [vmem:[%s15478_s13 + $0x18] sm:$0xff] }
 0x57f   : > { %13740 = vmatprep.subr.mxu0 %v18258_v62  ;;  %13692 = vmatpush3.msra.mxu1 %v15887_v42  ;;  %v2914_v61 = vsel %vm2903_vm4, %v1449_v56, 0 }
 0x580   : > { %13741 = vmatpush3.msra.mxu0 %v15862_v31  ;;  %13693 = vmatprep.subr.mxu1 %v18258_v62 }
 0x581   : > { %13742 = vmatprep.subr.mxu0 %v18258_v62  ;;  %13694 = vmatpush3.msra.mxu1 %v15954_v9 }
 0x582   : > { %13743 = vmatpush3.msra.mxu0 %v15864_v32  ;;  %13695 = vmatprep.subr.mxu1 %v18258_v62 }
 0x583   : > { %13744 = vmatprep.subr.mxu0 %v18258_v62  ;;  %13696 = vmatpush3.msra.mxu1 %v15965_v15 }
 0x584   : > { %13745 = vmatpush3.msra.mxu0 %v15866_v33  ;;  %13697 = vmatprep.subr.mxu1 %v18258_v62 }
 0x585   : > { %13746 = vmatprep.subr.mxu0 %v18258_v62  ;;  %13698 = vmatpush3.msra.mxu1 %v15977_v20 }
 0x586   : > { %13699 = vmatprep.mubr.msk.f32.mxu1 %vm15458_vm1, %v18258_v62  ;;  %13747 = vmatpush3.msra.mxu0 %v15870_v36 }
 0x587   : > { %13700 = vmatmul.mubr.f32.vlgmr.msra.gmra.mxu1 %v2440_v50  ;;  %13721 = vmatprep.subr.mxu1 %v18258_v62  ;;  %v2908_v50 = vsel %vm2903_vm4, %v1447_v35, 0 }
 0x588   : > { %13748 = vmatprep.subr.mxu0 %v18258_v62  ;;  %13722 = vmatpush3.msra.mxu1 %v15890_v43  ;;  %v16107_v59 = vand.u32 4294901760, %v2908_v50 }
 0x589   : > { %13749 = vmatpush3.msra.mxu0 %v15872_v37  ;;  %13723 = vmatprep.subr.mxu1 %v18258_v62 }
 0x58a   : > { %13750 = vmatprep.subr.mxu0 %v18258_v62  ;;  %13724 = vmatpush3.msra.mxu1 %v15893_v45  ;;  %18577 = vst [vmem:[#allocation75_spill] sm:$0xff] %v16107_v59 }
 0x58b   : > { %13751 = vmatpush3.msra.mxu0 %v15950_v7  ;;  %13725 = vmatprep.subr.mxu1 %v18258_v62 }
 0x58c   : > { %13752 = vmatprep.subr.mxu0 %v18258_v62  ;;  %13726 = vmatpush3.msra.mxu1 %v15896_v46 }
 0x58d   : > { %13753 = vmatpush3.msra.mxu0 %v15956_v10  ;;  %13727 = vmatprep.subr.mxu1 %v18258_v62  ;;  %v1466_v10 = vld [vmem:[%s15488_s21 + $0x40] sm:$0xff] }
 0x58e   : > { %13754 = vmatprep.subr.mxu0 %v18258_v62  ;;  %13728 = vmatpush3.msra.mxu1 %v15899_v47  ;;  %v16258_v36 = vand.u32 4294901760, %v1466_v10 }
 0x58f   : > { %13755 = vmatpush3.msra.mxu0 %v15967_v16  ;;  %13756 = vmatprep.mubr.msk.f32.mxu0 %vm15458_vm1, %v18258_v62 }
 0x590   : > { %13729 = vmatprep.subr.mxu1 %v18258_v62  ;;  %13757 = vmatmul.mubr.f32.vlgmr.msra.gmra.mxu0 %v16002_v48  ;;  %18612 = vst [vmem:[#allocation110_spill] sm:$0xff] %v16258_v36 }
 0x591   : > { %13730 = vmatpush3.msra.mxu1 %v15908_v51  ;;  %13737 = vmatprep.mubr.msk.f32.mxu1 %vm15458_vm1, %v18258_v62 }
 0x592   : > { %13731 = vmatprep.subr.mxu1 %v18258_v62  ;;  %13769 = vmatprep.mubr.f32.mxu0 %v16080_v0 }
 0x593   : > { %13732 = vmatpush3.msra.mxu1 %v15962_v12 }
 0x594   : > { %13733 = vmatprep.subr.mxu1 %v18258_v62 }
 0x595   : > { %13734 = vmatpush3.msra.mxu1 %v15974_v18  ;;  %v1473_v18 = vld [vmem:[%s15488_s21 + $0x78] sm:$0xff] }
 0x596   : > { %13735 = vmatprep.subr.mxu1 %v18258_v62 }
 0x597   : > { %13736 = vmatpush3.msra.mxu1 %v15986_v23 }
 0x598   : > { %13738 = vmatmul.mubr.f32.vlgmr.msra.gmra.mxu1 %v16002_v48  ;;  %v1448_v48 = vld [vmem:[%s15478_s13 + $0x10] sm:$0xff] }
 0x599   : > { %13761 = vmatprep.mubr.f32.mxu1 %v16091_v4  ;;  %v2911_v54 = vsel %vm2903_vm4, %v1448_v48, 0 }
 0x59a   : > { %v16109_v60 = vand.u32 4294901760, %v2911_v54 }
 0x59c   : > { %18578 = vst [vmem:[#allocation76_spill] sm:$0xff] %v16109_v60  ;;  %v16118_v35 = vsub.f32 %v2911_v54, %v16109_v60 }
 0x59e   : > { %18581 = vst [vmem:[#allocation79_spill] sm:$0xff] %v16118_v35  ;;  %v16127_v56 = vand.u32 4294901760, %v16118_v35 }
 0x5a0   : > { %18584 = vst [vmem:[#allocation82_spill] sm:$0xff] %v16127_v56 }
 0x62e   : > { %v2556_v17 = vpop.f32.mrf.mxu0 }
 0x630   : > { %v13682_v22 = vpop.f32.mrf.mxu0 }
 0x631   : > { %v16113_v22 = vsub.f32 %v2908_v50, %v16107_v59 }
 0x633   : > { %18579 = vst [vmem:[#allocation77_spill] sm:$0xff] %v16113_v22 }
 0x636   : > { %v2445_v25 = vpop.f32.mrf.mxu1 }
 0x637   : > { %v2557_v3 = vadd.f32 %v2556_v17, %v2445_v25 }
 0x638   : > { %v13663_v27 = vpop.f32.mrf.mxu1 }
 0x639   : > { %v16115_v27 = vand.u32 4294901760, %v2914_v61 }
 0x63b   : > { %18580 = vst [vmem:[#allocation78_spill] sm:$0xff] %v16115_v27  ;;  %v16124_v62 = vsub.f32 %v2914_v61, %v16115_v27 }
 0x63d   : > { %18583 = vst [vmem:[#allocation81_spill] sm:$0xff] %v16124_v62 }
 0x63e   : > { %v2725_v28 = vpop.f32.mrf.mxu0 }
 0x640   : > { %v13720_v29 = vpop.f32.mrf.mxu0 }
 0x647   : > { %v2644_v34 = vpop.f32.mrf.mxu1 }
 0x648   : > { %v2645_v48 = vadd.f32 %v2644_v34, %v2557_v3  ;;  %v3005_v34 = vsub.f32 %v16118_v35, %v16127_v56 }
 0x649   : > { %v13701_v49 = vpop.f32.mrf.mxu1 }
 0x64a   : > { %v16121_v49 = vand.u32 4294901760, %v16113_v22  ;;  %v2726_v17 = vadd.f32 %v2725_v28, %v2645_v48  ;;  %v16141_v48 = vand.u32 4294901760, %v3005_v34 }
 0x64c   : > { %18582 = vst [vmem:[#allocation80_spill] sm:$0xff] %v16121_v49  ;;  %v2995_v23 = vsub.f32 %v16113_v22, %v16121_v49  ;;  %18587 = vst [vmem:[#allocation85_spill] sm:$0xff] %v16141_v48 }
 0x64e   : > { %v16137_v12 = vand.u32 4294901760, %v2995_v23 }
 0x650   : > { %v2899_v63 = vpop.f32.mrf.mxu0  ;;  %18586 = vst [vmem:[#allocation84_spill] sm:$0xff] %v16137_v12 }
 0x652   : > { %v13758_v29 = vpop.f32.mrf.mxu0 }
 0x653   : > { %v16132_v29 = vand.u32 4294901760, %v16124_v62 }
 0x655   : > { %18585 = vst [vmem:[#allocation83_spill] sm:$0xff] %v16132_v29  ;;  %v3015_v28 = vsub.f32 %v16124_v62, %v16132_v29 }
 0x657   : > { %v16146_v51 = vand.u32 4294901760, %v3015_v28 }
 0x658   : > { %v2820_v25 = vpop.f32.mrf.mxu1 }
 0x659   : > { %v2821_v50 = vadd.f32 %v2820_v25, %v2726_v17  ;;  %v16143_v25 = vand.u32 4294901760, %v1473_v18  ;;  %18589 = vst [vmem:[#allocation87_spill] sm:$0xff] %v16146_v51 }
 0x65a   : > { %v13739_v54 = vpop.f32.mrf.mxu1 }
 0x65b   : > { %v2900_v3 = vadd.f32 %v2899_v63, %v2821_v50  ;;  %18588 = vst [vmem:[#allocation86_spill] sm:$0xff] %v16143_v25  ;;  %v16150_v63 = vsub.f32 %v1473_v18, %v16143_v25 }
 0x65d   : > { %v2947_v61 = vand.u32 4294901760, %v2900_v3  ;;  %18590 = vst [vmem:[#allocation88_spill] sm:$0xff] %v16150_v63  ;;  %v16155_v34 = vand.u32 4294901760, %v16150_v63 }
 0x65f   : > { %v3054_v17 = vsub.f32 %v2900_v3, %v2947_v61  ;;  %13759 = vmatprep.subr.mxu1 %v2947_v61  ;;  %18591 = vst [vmem:[#allocation89_spill] sm:$0xff] %v16155_v34  ;;  %v3620_v18 = vsub.f32 %v16150_v63, %v16155_v34 }
 0x660   : > { %13760 = vmatpush3.msra.mxu1 %v2947_v61 }
 0x661   : > { %13762 = vmatmul.mubr.f32.vlgmr.msra.gmra.mxu1 %v16137_v12  ;;  %13775 = vmatprep.subr.mxu1 %v3054_v17  ;;  %v3055_v54 = vand.u32 4294901760, %v3054_v17  ;;  %v16167_v3 = vand.u32 4294901760, %v3620_v18 }
 0x662   : > { %13776 = vmatpush3.msra.mxu1 %v3054_v17  ;;  %13764 = vmatprep.mubr.f32.mxu1 %v16141_v48 }
 0x663   : > { %13791 = vmatprep.subr.mxu1 %v3055_v54  ;;  %v3056_v23 = vsub.f32 %v3054_v17, %v3055_v54  ;;  %18592 = vst [vmem:[#allocation90_spill] sm:$0xff] %v16167_v3  ;;  %v1471_v17 = vld [vmem:[%s15488_s21 + $0x68] sm:$0xff] }
 0x665   : > { %13765 = vmatmul.mubr.f32.gmra.mxu1 %v16146_v51  ;;  %v3057_v50 = vand.u32 4294901760, %v3056_v23  ;;  %v16190_v23 = vand.u32 4294901760, %v1471_v17 }
 0x666   : > { %13777 = vmatprep.mubr.f32.mxu1 %v16083_v1 }
 0x667   : > { %13767 = vmatprep.subr.mxu0 %v3057_v50  ;;  %18595 = vst [vmem:[#allocation93_spill] sm:$0xff] %v16190_v23 }
 0x668   : > { %13768 = vmatpush3.msra.mxu0 %v3057_v50  ;;  %v1470_v50 = vld [vmem:[%s15488_s21 + $0x60] sm:$0xff] }
 0x669   : > { %13770 = vmatmul.mubr.f32.vlgmr.msra.gmra.mxu0 %v16107_v59  ;;  %13778 = vmatmul.mubr.f32.vlgmr.msra.gmra.mxu1 %v16113_v22  ;;  %v16201_v47 = vand.u32 4294901760, %v1470_v50 }
 0x66a   : > { %13783 = vmatprep.subr.mxu0 %v2947_v61  ;;  %13792 = vmatpush3.msra.mxu1 %v3055_v54 }
 0x66b   : > { %13784 = vmatpush3.msra.mxu0 %v2947_v61  ;;  %13772 = vmatprep.mubr.f32.mxu0 %v16109_v60  ;;  %18598 = vst [vmem:[#allocation96_spill] sm:$0xff] %v16201_v47  ;;  %v16212_v43 = vsub.f32 %v1470_v50, %v16201_v47 }
 0x66c   : > { %13799 = vmatprep.subr.mxu0 %v2947_v61  ;;  %13780 = vmatprep.mubr.f32.mxu1 %v16118_v35  ;;  %v1459_v35 = vld [vmem:[%s15488_s21 + $0x8] sm:$0xff] }
 0x66d   : > { %13773 = vmatmul.mubr.f32.gmra.mxu0 %v16115_v27  ;;  %13781 = vmatmul.mubr.f32.gmra.mxu1 %v16124_v62  ;;  %18600 = vst [vmem:[#allocation98_spill] sm:$0xff] %v16212_v43  ;;  %v16224_v42 = vand.u32 4294901760, %v16212_v43 }
 0x66e   : > { %13785 = vmatprep.mubr.f32.mxu0 %v16087_v2  ;;  %13793 = vmatprep.mubr.f32.mxu1 %v16080_v0  ;;  %v1460_v2 = vld [vmem:[%s15488_s21 + $0x10] sm:$0xff] }
 0x66f   : > { %13807 = vmatprep.subr.mxu1 %v16143_v25  ;;  %18603 = vst [vmem:[#allocation101_spill] sm:$0xff] %v16224_v42  ;;  %v3641_v39 = vsub.f32 %v16212_v43, %v16224_v42  ;;  %v16360_v62 = vand.u32 4294901760, %v1460_v2 }
 0x671   : > { %13786 = vmatmul.mubr.f32.vlgmr.msra.gmra.mxu0 %v16121_v49  ;;  %13794 = vmatmul.mubr.f32.vlgmr.msra.gmra.mxu1 %v16107_v59  ;;  %18637 = vst [vmem:[#allocation135_spill] sm:$0xff] %v16360_v62 }
 0x672   : > { %13800 = vmatpush3.msra.mxu0 %v2947_v61  ;;  %13788 = vmatprep.mubr.f32.mxu0 %v16127_v56  ;;  %v1472_v61 = vld [vmem:[%s15488_s21 + $0x70] sm:$0xff] }
 0x673   : > { %13796 = vmatprep.mubr.f32.mxu1 %v16109_v60  ;;  %13845 = vmatprep.subr.mxu0 %v16167_v3  ;;  %v16184_v28 = vand.u32 4294901760, %v1472_v61 }
 0x674   : > { %13808 = vmatpush3.msra.mxu1 %v16143_v25 }
 0x675   : > { %13789 = vmatmul.mubr.f32.gmra.mxu0 %v16132_v29  ;;  %13797 = vmatmul.mubr.f32.gmra.mxu1 %v16115_v27  ;;  %18593 = vst [vmem:[#allocation91_spill] sm:$0xff] %v16184_v28  ;;  %v16188_v54 = vsub.f32 %v1472_v61, %v16184_v28  ;;  %v1469_v61 = vld [vmem:[%s15488_s21 + $0x58] sm:$0xff] }
 0x676   : > { %13801 = vmatprep.mubr.f32.mxu0 %v16080_v0  ;;  %13809 = vmatprep.subr.mxu1 %v16184_v28  ;;  %v16214_v20 = vand.u32 4294901760, %v1469_v61  ;;  %v1461_v29 = vld [vmem:[%s15488_s21 + $0x18] sm:$0xff] }
 0x677   : > { %18594 = vst [vmem:[#allocation92_spill] sm:$0xff] %v16188_v54  ;;  %13810 = vmatpush3.msra.mxu1 %v16184_v28  ;;  %v16196_v18 = vand.u32 4294901760, %v16188_v54  ;;  %v16342_v49 = vand.u32 4294901760, %v1461_v29 }
 0x678   : > { %13811 = vmatprep.subr.mxu1 %v16190_v23  ;;  %18601 = vst [vmem:[#allocation99_spill] sm:$0xff] %v16214_v20  ;;  %v16227_v41 = vsub.f32 %v1469_v61, %v16214_v20  ;;  %v16242_v61 = vand.u32 4294901760, %v1467_v40 }
 0x679   : > { %13802 = vmatmul.mubr.f32.vlgmr.msra.gmra.mxu0 %v16107_v59  ;;  %18596 = vst [vmem:[#allocation94_spill] sm:$0xff] %v16196_v18  ;;  %13812 = vmatpush3.msra.mxu1 %v16190_v23  ;;  %v3627_v46 = vsub.f32 %v16188_v54, %v16196_v18  ;;  %18632 = vst [vmem:[#allocation130_spill] sm:$0xff] %v16342_v49  ;;  %v1458_v59 = vld [vmem:[%s15488_s21] sm:$0xff] }
 0x67a   : > { %13804 = vmatprep.mubr.f32.mxu0 %v16109_v60  ;;  %13846 = vmatpush3.msra.mxu0 %v16167_v3  ;;  %v16199_v3 = vsub.f32 %v1471_v17, %v16190_v23  ;;  %v1468_v17 = vld [vmem:[%s15488_s21 + $0x50] sm:$0xff]  ;;  %18604 = vst [vmem:[#allocation102_spill] sm:$0xff] %v16227_v41  ;;  %v16240_v38 = vand.u32 4294901760, %v16227_v41  ;;  %18608 = vst [vmem:[#allocation106_spill] sm:$0xff] %v16242_v61  ;;  %v16256_v37 = vsub.f32 %v1467_v40, %v16242_v61 }
 0x67b   : > { %13813 = vmatprep.subr.mxu1 %v16201_v47  ;;  %v16219_v15 = vand.u32 4294901760, %v3627_v46  ;;  %v16230_v50 = vand.u32 4294901760, %v1468_v17  ;;  %v16274_v40 = vsub.f32 %v1466_v10, %v16258_v36  ;;  %v16377_v60 = vand.u32 4294901760, %v1459_v35 }
 0x67c   : > { %18597 = vst [vmem:[#allocation95_spill] sm:$0xff] %v16199_v3  ;;  %v16209_v45 = vand.u32 4294901760, %v16199_v3  ;;  %13814 = vmatpush3.msra.mxu1 %v16201_v47  ;;  %18607 = vst [vmem:[#allocation105_spill] sm:$0xff] %v16240_v38  ;;  %v3648_v7 = vsub.f32 %v16227_v41, %v16240_v38  ;;  %v16271_v33 = vand.u32 4294901760, %v16256_v37 }
 0x67d   : > { %13805 = vmatmul.mubr.f32.gmra.mxu0 %v16115_v27  ;;  %18602 = vst [vmem:[#allocation100_spill] sm:$0xff] %v16219_v15  ;;  %13815 = vmatprep.subr.mxu1 %v16214_v20  ;;  %18605 = vst [vmem:[#allocation103_spill] sm:$0xff] %v16230_v50  ;;  %v16246_v16 = vsub.f32 %v1468_v17, %v16230_v50  ;;  %v16288_v10 = vand.u32 4294901760, %v16274_v40  ;;  %v16394_v51 = vsub.f32 %v1459_v35, %v16377_v60 }
 0x67e   : > { %18599 = vst [vmem:[#allocation97_spill] sm:$0xff] %v16209_v45  ;;  %v3634_v9 = vsub.f32 %v16199_v3, %v16209_v45  ;;  %13816 = vmatpush3.msra.mxu1 %v16214_v20  ;;  %13847 = vmatprep.subr.mxu0 %v16219_v15  ;;  %18611 = vst [vmem:[#allocation109_spill] sm:$0xff] %v16256_v37 }
 0x67f   : > { %13848 = vmatpush3.msra.mxu0 %v16219_v15  ;;  %18609 = vst [vmem:[#allocation107_spill] sm:$0xff] %v16246_v16  ;;  %13817 = vmatprep.subr.mxu1 %v16230_v50  ;;  %v16263_v17 = vand.u32 4294901760, %v16246_v16  ;;  %v1465_v15 = vld [vmem:[%s15488_s21 + $0x38] sm:$0xff]  ;;  %18615 = vst [vmem:[#allocation113_spill] sm:$0xff] %v16271_v33  ;;  %v3669_v57 = vsub.f32 %v16274_v40, %v16288_v10  ;;  %v16407_v48 = vand.u32 4294901760, %v16394_v51 }
 0x680   : > { %v16235_v46 = vand.u32 4294901760, %v3634_v9  ;;  %v16251_v9 = vand.u32 4294901760, %v3641_v39  ;;  %13818 = vmatpush3.msra.mxu1 %v16230_v50  ;;  %v16268_v39 = vand.u32 4294901760, %v3648_v7  ;;  %18616 = vst [vmem:[#allocation114_spill] sm:$0xff] %v16274_v40  ;;  %v16276_v32 = vand.u32 4294901760, %v1465_v15  ;;  %18618 = vst [vmem:[#allocation116_spill] sm:$0xff] %v16288_v10 }
 0x681   : > { %18613 = vst [vmem:[#allocation111_spill] sm:$0xff] %v16263_v17  ;;  %13819 = vmatprep.subr.mxu1 %v16242_v61  ;;  %v3662_v7 = vsub.f32 %v16256_v37, %v16271_v33  ;;  %18640 = vst [vmem:[#allocation138_spill] sm:$0xff] %v16377_v60 }
 0x682   : > { %18606 = vst [vmem:[#allocation104_spill] sm:$0xff] %v16235_v46  ;;  %13849 = vmatprep.subr.mxu0 %v16235_v46  ;;  %18610 = vst [vmem:[#allocation108_spill] sm:$0xff] %v16251_v9  ;;  %13820 = vmatpush3.msra.mxu1 %v16242_v61  ;;  %v16291_v31 = vsub.f32 %v1465_v15, %v16276_v32 }
 0x683   : > { %13850 = vmatpush3.msra.mxu0 %v16235_v46  ;;  %18614 = vst [vmem:[#allocation112_spill] sm:$0xff] %v16268_v39  ;;  %18617 = vst [vmem:[#allocation115_spill] sm:$0xff] %v16276_v32  ;;  %v3655_v46 = vsub.f32 %v16246_v16, %v16263_v17  ;;  %13821 = vmatprep.subr.mxu1 %v16258_v36  ;;  %v16301_v58 = vand.u32 4294901760, %v3662_v7  ;;  %v16318_v7 = vand.u32 4294901760, %v3669_v57 }
 0x684   : > { %13851 = vmatprep.subr.mxu0 %v16251_v9  ;;  %18619 = vst [vmem:[#allocation117_spill] sm:$0xff] %v16291_v31  ;;  %13822 = vmatpush3.msra.mxu1 %v16258_v36  ;;  %v16306_v15 = vand.u32 4294901760, %v16291_v31  ;;  %18644 = vst [vmem:[#allocation142_spill] sm:$0xff] %v16394_v51 }
 0x685   : > { %13852 = vmatpush3.msra.mxu0 %v16251_v9  ;;  %v16297_v9 = vand.u32 4294901760, %v3655_v46  ;;  %13823 = vmatprep.subr.mxu1 %v16276_v32  ;;  %18622 = vst [vmem:[#allocation120_spill] sm:$0xff] %v16301_v58  ;;  %v16313_v46 = vand.u32 4294901760, %v1463_v21  ;;  %18626 = vst [vmem:[#allocation124_spill] sm:$0xff] %v16318_v7 }
 0x686   : > { %13853 = vmatprep.subr.mxu0 %v16268_v39  ;;  %18623 = vst [vmem:[#allocation121_spill] sm:$0xff] %v16306_v15  ;;  %13824 = vmatpush3.msra.mxu1 %v16276_v32  ;;  %v3676_v53 = vsub.f32 %v16291_v31, %v16306_v15  ;;  %18647 = vst [vmem:[#allocation145_spill] sm:$0xff] %v16407_v48 }
 0x687   : > { %13854 = vmatpush3.msra.mxu0 %v16268_v39  ;;  %18621 = vst [vmem:[#allocation119_spill] sm:$0xff] %v16297_v9  ;;  %18625 = vst [vmem:[#allocation123_spill] sm:$0xff] %v16313_v46  ;;  %v1462_v39 = vld [vmem:[%s15488_s21 + $0x20] sm:$0xff]  ;;  %13825 = vmatprep.subr.mxu1 %v16293_v24  ;;  %v16330_v13 = vsub.f32 %v1463_v21, %v16313_v46 }
 0x688   : > { %13855 = vmatprep.subr.mxu0 %v16297_v9  ;;  %v16325_v52 = vand.u32 4294901760, %v1462_v39  ;;  %13826 = vmatpush3.msra.mxu1 %v16293_v24  ;;  %v16335_v57 = vand.u32 4294901760, %v3676_v53 }
 0x689   : > { %13856 = vmatpush3.msra.mxu0 %v16297_v9  ;;  %18629 = vst [vmem:[#allocation127_spill] sm:$0xff] %v16330_v13  ;;  %13827 = vmatprep.subr.mxu1 %v16313_v46  ;;  %v3683_v9 = vsub.f32 %v16309_v55, %v16323_v26  ;;  %v16347_v21 = vand.u32 4294901760, %v16330_v13 }
 0x68a   : > { %18628 = vst [vmem:[#allocation126_spill] sm:$0xff] %v16325_v52  ;;  %13857 = vmatprep.subr.mxu0 %v16301_v58  ;;  %18630 = vst [vmem:[#allocation128_spill] sm:$0xff] %v16335_v57  ;;  %v16340_v56 = vsub.f32 %v1462_v39, %v16325_v52  ;;  %13828 = vmatpush3.msra.mxu1 %v16313_v46  ;;  %v16358_v39 = vsub.f32 %v1461_v29, %v16342_v49 }
 0x68b   : > { %13858 = vmatpush3.msra.mxu0 %v16301_v58  ;;  %18633 = vst [vmem:[#allocation131_spill] sm:$0xff] %v16347_v21  ;;  %13829 = vmatprep.subr.mxu1 %v16325_v52  ;;  %v16352_v53 = vand.u32 4294901760, %v3683_v9  ;;  %v3690_v27 = vsub.f32 %v16330_v13, %v16347_v21 }
 0x68c   : > { %18631 = vst [vmem:[#allocation129_spill] sm:$0xff] %v16340_v56  ;;  %13859 = vmatprep.subr.mxu0 %v16318_v7  ;;  %v16355_v58 = vand.u32 4294901760, %v16340_v56  ;;  %18636 = vst [vmem:[#allocation134_spill] sm:$0xff] %v16358_v39  ;;  %13830 = vmatpush3.msra.mxu1 %v16325_v52  ;;  %v16372_v29 = vand.u32 4294901760, %v16358_v39 }
 0x68d   : > { %13860 = vmatpush3.msra.mxu0 %v16318_v7  ;;  %18634 = vst [vmem:[#allocation132_spill] sm:$0xff] %v16352_v53  ;;  %13831 = vmatprep.subr.mxu1 %v16342_v49  ;;  %v16375_v7 = vsub.f32 %v1460_v2, %v16360_v62  ;;  %v16381_v22 = vand.u32 4294901760, %v3690_v27  ;;  %v16398_v27 = vand.u32 4294901760, %v1458_v59 }
 0x68e   : > { %18635 = vst [vmem:[#allocation133_spill] sm:$0xff] %v16355_v58  ;;  %13861 = vmatprep.subr.mxu0 %v16335_v57  ;;  %v3697_v9 = vsub.f32 %v16340_v56, %v16355_v58  ;;  %18638 = vst [vmem:[#allocation136_spill] sm:$0xff] %v16372_v29  ;;  %13832 = vmatpush3.msra.mxu1 %v16342_v49  ;;  %v3704_v1 = vsub.f32 %v16358_v39, %v16372_v29 }
 0x68f   : > { %13862 = vmatpush3.msra.mxu0 %v16335_v57  ;;  %18639 = vst [vmem:[#allocation137_spill] sm:$0xff] %v16375_v7  ;;  %18641 = vst [vmem:[#allocation139_spill] sm:$0xff] %v16381_v22  ;;  %13833 = vmatprep.subr.mxu1 %v16360_v62  ;;  %v16391_v2 = vand.u32 4294901760, %v16375_v7  ;;  %v16412_v35 = vsub.f32 %v1458_v59, %v16398_v27 }
 0x690   : > { %13863 = vmatprep.subr.mxu0 %v16352_v53  ;;  %v16386_v57 = vand.u32 4294901760, %v3697_v9  ;;  %13834 = vmatpush3.msra.mxu1 %v16360_v62  ;;  %18645 = vst [vmem:[#allocation143_spill] sm:$0xff] %v16398_v27  ;;  %v16402_v9 = vand.u32 4294901760, %v3704_v1  ;;  %v3718_v1 = vsub.f32 %v16394_v51, %v16407_v48  ;;  %v12362_v51 = vld [vmem:[%s18653_s2] ss:$0 sm:$0xff]  ;;  %s18752_s2 = sld [smem:[#allocation16_spill]] }
 0x691   : > { %13864 = vmatpush3.msra.mxu0 %v16352_v53  ;;  %18643 = vst [vmem:[#allocation141_spill] sm:$0xff] %v16391_v2  ;;  %13835 = vmatprep.subr.mxu1 %v16377_v60  ;;  %v3711_v53 = vsub.f32 %v16375_v7, %v16391_v2  ;;  %18648 = vst [vmem:[#allocation146_spill] sm:$0xff] %v16412_v35  ;;  %v16423_v12 = vand.u32 4294901760, %v16412_v35 }
 0x692   : > { %18642 = vst [vmem:[#allocation140_spill] sm:$0xff] %v16386_v57  ;;  %13865 = vmatprep.subr.mxu0 %v16381_v22  ;;  %18646 = vst [vmem:[#allocation144_spill] sm:$0xff] %v16402_v9  ;;  %13836 = vmatpush3.msra.mxu1 %v16377_v60  ;;  %v16427_v59 = vand.u32 4294901760, %v3718_v1 }
 0x693   : > { %13866 = vmatpush3.msra.mxu0 %v16381_v22  ;;  %13837 = vmatprep.subr.mxu1 %v16398_v27  ;;  %v16416_v22 = vand.u32 4294901760, %v3711_v53  ;;  %18650 = vst [vmem:[#allocation148_spill] sm:$0xff] %v16423_v12  ;;  %v3725_v53 = vsub.f32 %v16412_v35, %v16423_v12 }
 0x694   : > { %13867 = vmatprep.subr.mxu0 %v16386_v57  ;;  %13838 = vmatpush3.msra.mxu1 %v16398_v27  ;;  %18651 = vst [vmem:[#allocation149_spill] sm:$0xff] %v16427_v59 }
 0x695   : > { %13868 = vmatpush3.msra.mxu0 %v16386_v57  ;;  %18649 = vst [vmem:[#allocation147_spill] sm:$0xff] %v16416_v22  ;;  %13883 = vmatprep.subr.mxu1 %v16150_v63  ;;  %v16434_v57 = vand.u32 4294901760, %v3725_v53 }
 0x696   : > { %13869 = vmatprep.subr.mxu0 %v16402_v9 }
 0x697   : > { %13870 = vmatpush3.msra.mxu0 %v16402_v9  ;;  %18652 = vst [vmem:[#allocation150_spill] sm:$0xff] %v16434_v57 }
 0x698   : > { %13871 = vmatprep.subr.mxu0 %v16416_v22 }
 0x699   : > { %13872 = vmatpush3.msra.mxu0 %v16416_v22 }
 0x69a   : > { %13873 = vmatprep.subr.mxu0 %v16427_v59 }
 0x69b   : > { %13874 = vmatpush3.msra.mxu0 %v16427_v59 }
 0x69c   : > { %13875 = vmatprep.subr.mxu0 %v16434_v57 }
 0x69d   : > { %13876 = vmatpush3.msra.mxu0 %v16434_v57 }
 0x69e   : > { %13921 = vmatprep.subr.mxu0 %v16143_v25 }
 0x721   : > { %v13763_v1 = vpop.f32.mrf.mxu1 }
 0x723   : > { %v2988_v9 = vpop.f32.mrf.mxu1 }
 0x725   : > { %v13766_v0 = vpop.f32.mrf.mxu1 }
 0x727   : > { %v3008_v4 = vpop.f32.mrf.mxu1 }
 0x729   : > { %v13771_v30 = vpop.f32.mrf.mxu0  ;;  %v13779_v19 = vpop.f32.mrf.mxu1 }
 0x72a   : > { %v3101_v53 = vadd.f32 %v13771_v30, %v13763_v1 }
 0x72b   : > { %v3094_v14 = vpop.f32.mrf.mxu0  ;;  %v3186_v22 = vpop.f32.mrf.mxu1 }
 0x72c   : > { %v3095_v59 = vadd.f32 %v3094_v14, %v2988_v9  ;;  %v3194_v57 = vadd.f32 %v13779_v19, %v3101_v53  ;;  %v16442_v9 = vadd.f32 %v12362_v51, %v16100_v11 }
 0x72d   : > { %v13774_v44 = vpop.f32.mrf.mxu0  ;;  %v13782_v12 = vpop.f32.mrf.mxu1 }
 0x72e   : > { %v3113_v21 = vadd.f32 %v13774_v44, %v13766_v0  ;;  %v3187_v10 = vadd.f32 %v3186_v22, %v3095_v59 }
 0x72f   : > { %v3106_v48 = vpop.f32.mrf.mxu0  ;;  %v3200_v2 = vpop.f32.mrf.mxu1 }
 0x730   : > { %v3107_v33 = vadd.f32 %v3106_v48, %v3008_v4  ;;  %v3208_v42 = vadd.f32 %v13782_v12, %v3113_v21  ;;  %v16445_v4 = vadd.f32 %v12362_v51, %v16096_v6 }
 0x731   : > { %v13787_v29 = vpop.f32.mrf.mxu0  ;;  %v13795_v58 = vpop.f32.mrf.mxu1 }
 0x732   : > { %v3290_v17 = vadd.f32 %v13787_v29, %v3194_v57  ;;  %v3201_v35 = vadd.f32 %v3200_v2, %v3107_v33  ;;  %v16449_v33 = vadd.f32 %v16098_v8, %v12362_v51 }
 0x733   : > { %v3281_v26 = vpop.f32.mrf.mxu0  ;;  %v3379_v15 = vpop.f32.mrf.mxu1 }
 0x734   : > { %v3282_v45 = vadd.f32 %v3281_v26, %v3187_v10  ;;  %v3386_v30 = vadd.f32 %v13795_v58, %v3290_v17 }
 0x735   : > { %v13790_v38 = vpop.f32.mrf.mxu0  ;;  %v13798_v34 = vpop.f32.mrf.mxu1 }
 0x736   : > { %v3306_v1 = vadd.f32 %v13790_v38, %v3208_v42  ;;  %v3380_v19 = vadd.f32 %v3379_v15, %v3282_v45 }
 0x737   : > { %v3297_v18 = vpop.f32.mrf.mxu0  ;;  %v3391_v53 = vpop.f32.mrf.mxu1 }
 0x738   : > { %v3298_v44 = vadd.f32 %v3297_v18, %v3201_v35  ;;  %v3398_v12 = vadd.f32 %v13798_v34, %v3306_v1  ;;  %v16455_v18 = vadd.f32 %v16094_v5, %v12362_v51 }
 0x739   : > { %v13803_v14 = vpop.f32.mrf.mxu0 }
 0x73a   : > { %v3476_v0 = vadd.f32 %v13803_v14, %v3386_v30  ;;  %v3392_v42 = vadd.f32 %v3391_v53, %v3298_v44 }
 0x73b   : > { %v3469_v22 = vpop.f32.mrf.mxu0 }
 0x73c   : > { %v3492_v48 = vmul.f32 %v3476_v0, %v16442_v9  ;;  %v3470_v10 = vadd.f32 %v3469_v22, %v3380_v19 }
 0x73d   : > { %v13806_v38 = vpop.f32.mrf.mxu0 }
 0x73e   : > { %v16451_v58 = vand.u32 4294901760, %v3492_v48  ;;  %v3491_v45 = vmul.f32 %v3470_v10, %v16445_v4  ;;  %v3488_v11 = vadd.f32 %v13806_v38, %v3398_v12  ;;  %v18655_v10 = vld [vmem:[#allocation146_spill] sm:$0xff]  ;;  %v18656_v38 = vld [vmem:[#allocation89_spill] sm:$0xff] }
 0x73f   : > { %v3481_v17 = vpop.f32.mrf.mxu0 }
 0x740   : > { %v16458_v6 = vsub.f32 %v3492_v48, %v16451_v58  ;;  %v16460_v34 = vand.u32 4294901760, %v3491_v45  ;;  %v3494_v15 = vmul.f32 %v3488_v11, %v16449_v33  ;;  %v3482_v8 = vadd.f32 %v3481_v17, %v3392_v42  ;;  %v18654_v48 = vld [vmem:[#allocation142_spill] sm:$0xff]  ;;  %v18659_v11 = vld [vmem:[#allocation101_spill] sm:$0xff] }
 0x741   : > { %v18657_v42 = vld [vmem:[#allocation94_spill] sm:$0xff]  ;;  %v18660_v17 = vld [vmem:[#allocation105_spill] sm:$0xff] }
 0x742   : > { %v3588_v26 = vand.u32 4294901760, %v16458_v6  ;;  %v3577_v57 = vsub.f32 %v3491_v45, %v16460_v34  ;;  %v16465_v21 = vand.u32 4294901760, %v3494_v15  ;;  %v3493_v29 = vmul.f32 %v3482_v8, %v16455_v18  ;;  %13877 = vmatprep.mubr.f32.mxu0 %v16460_v34  ;;  %v18658_v45 = vld [vmem:[#allocation97_spill] sm:$0xff] }
 0x743   : > { %13878 = vmatmul.mubr.f32.vlgmr.msra.gmra.mxu0 %v16451_v58  ;;  %v18664_v8 = vld [vmem:[#allocation121_spill] sm:$0xff] }
 0x744   : > { %v16471_v51 = vsub.f32 %v3494_v15, %v16465_v21  ;;  %v16473_v5 = vand.u32 4294901760, %v3493_v29  ;;  %13922 = vmatpush3.msra.mxu0 %v16143_v25  ;;  %v3578_v2 = vand.u32 4294901760, %v3577_v57  ;;  %v3589_v35 = vsub.f32 %v16458_v6, %v3588_v26  ;;  %v18663_v15 = vld [vmem:[#allocation116_spill] sm:$0xff] }
 0x745   : > { %13923 = vmatprep.subr.mxu0 %v16184_v28 }
 0x746   : > { %v16481_v59 = vsub.f32 %v3493_v29, %v16473_v5  ;;  %13924 = vmatpush3.msra.mxu0 %v16184_v28  ;;  %13880 = vmatprep.mubr.f32.mxu0 %v16473_v5  ;;  %v3579_v30 = vsub.f32 %v3577_v57, %v3578_v2  ;;  %v3608_v1 = vand.u32 4294901760, %v16471_v51  ;;  %v3590_v44 = vand.u32 4294901760, %v3589_v35  ;;  %v18667_v29 = vld [vmem:[#allocation133_spill] sm:$0xff] }
 0x747   : > { %13925 = vmatprep.subr.mxu0 %v16190_v23  ;;  %13881 = vmatmul.mubr.f32.gmra.mxu0 %v16465_v21  ;;  %v18670_v35 = vmov 0.0  }
 0x748   : > { %13926 = vmatpush3.msra.mxu0 %v16190_v23  ;;  %13953 = vmatprep.mubr.f32.mxu0 %v3578_v2  ;;  %v3580_v14 = vand.u32 4294901760, %v3579_v30  ;;  %v3598_v19 = vand.u32 4294901760, %v16481_v59  ;;  %v3609_v53 = vsub.f32 %v16471_v51, %v3608_v1  ;;  %v18669_v2 = vld [vmem:[#allocation141_spill] sm:$0xff]  ;;  %v18672_v30 = vld [vmem:[#allocation148_spill] sm:$0xff] }
 0x749   : > { %13927 = vmatprep.subr.mxu0 %v16201_v47 }
 0x74a   : > { %13928 = vmatpush3.msra.mxu0 %v16201_v47  ;;  %13839 = vmatprep.mubr.f32.mxu1 %v3580_v14  ;;  %v3599_v0 = vsub.f32 %v16481_v59, %v3598_v19  ;;  %v3610_v12 = vand.u32 4294901760, %v3609_v53 }
 0x74b   : > { %13929 = vmatprep.subr.mxu0 %v16214_v20  ;;  %13840 = vmatmul.mubr.f32.vlgmr.msra.gmra.mxu1 %v3590_v44 }
 0x74c   : > { %13884 = vmatpush3.msra.mxu1 %v16150_v63  ;;  %13930 = vmatpush3.msra.mxu0 %v16214_v20  ;;  %v3600_v22 = vand.u32 4294901760, %v3599_v0 }
 0x74d   : > { %13885 = vmatprep.subr.mxu1 %v16188_v54  ;;  %13931 = vmatprep.subr.mxu0 %v16230_v50 }
 0x74e   : > { %13886 = vmatpush3.msra.mxu1 %v16188_v54  ;;  %13932 = vmatpush3.msra.mxu0 %v16230_v50 }
 0x74f   : > { %13842 = vmatprep.mubr.f32.mxu1 %v3600_v22  ;;  %13887 = vmatprep.subr.mxu1 %v16199_v3 }
 0x750   : > { %13933 = vmatprep.subr.mxu0 %v16242_v61  ;;  %13843 = vmatmul.mubr.f32.gmra.mxu1 %v3610_v12 }
 0x751   : > { %13888 = vmatpush3.msra.mxu1 %v16199_v3  ;;  %13934 = vmatpush3.msra.mxu0 %v16242_v61 }
 0x752   : > { %13889 = vmatprep.subr.mxu1 %v16212_v43  ;;  %13915 = vmatprep.mubr.f32.mxu1 %v3577_v57  ;;  %v18666_v57 = vld [vmem:[#allocation131_spill] sm:$0xff] }
 0x753   : > { %13935 = vmatprep.subr.mxu0 %v16258_v36  ;;  %13890 = vmatpush3.msra.mxu1 %v16212_v43 }
 0x754   : > { %13936 = vmatpush3.msra.mxu0 %v16258_v36  ;;  %13891 = vmatprep.subr.mxu1 %v16227_v41 }
 0x755   : > { %13937 = vmatprep.subr.mxu0 %v16276_v32  ;;  %13892 = vmatpush3.msra.mxu1 %v16227_v41 }
 0x756   : > { %13938 = vmatpush3.msra.mxu0 %v16276_v32  ;;  %13893 = vmatprep.subr.mxu1 %v16246_v16 }
 0x757   : > { %13939 = vmatprep.subr.mxu0 %v16293_v24  ;;  %13894 = vmatpush3.msra.mxu1 %v16246_v16 }
 0x758   : > { %13940 = vmatpush3.msra.mxu0 %v16293_v24  ;;  %13895 = vmatprep.subr.mxu1 %v16256_v37 }
 0x759   : > { %13941 = vmatprep.subr.mxu0 %v16313_v46  ;;  %13896 = vmatpush3.msra.mxu1 %v16256_v37 }
 0x75a   : > { %13942 = vmatpush3.msra.mxu0 %v16313_v46  ;;  %13897 = vmatprep.subr.mxu1 %v16274_v40 }
 0x75b   : > { %13943 = vmatprep.subr.mxu0 %v16325_v52  ;;  %13898 = vmatpush3.msra.mxu1 %v16274_v40 }
 0x75c   : > { %13944 = vmatpush3.msra.mxu0 %v16325_v52  ;;  %13899 = vmatprep.subr.mxu1 %v16291_v31 }
 0x75d   : > { %13945 = vmatprep.subr.mxu0 %v16342_v49  ;;  %13900 = vmatpush3.msra.mxu1 %v16291_v31 }
 0x75e   : > { %13946 = vmatpush3.msra.mxu0 %v16342_v49  ;;  %13901 = vmatprep.subr.mxu1 %v16309_v55 }
 0x75f   : > { %13947 = vmatprep.subr.mxu0 %v16360_v62  ;;  %13902 = vmatpush3.msra.mxu1 %v16309_v55 }
 0x760   : > { %13948 = vmatpush3.msra.mxu0 %v16360_v62  ;;  %13903 = vmatprep.subr.mxu1 %v16330_v13 }
 0x761   : > { %13949 = vmatprep.subr.mxu0 %v16377_v60  ;;  %13904 = vmatpush3.msra.mxu1 %v16330_v13 }
 0x762   : > { %13950 = vmatpush3.msra.mxu0 %v16377_v60  ;;  %13905 = vmatprep.subr.mxu1 %v16340_v56 }
 0x763   : > { %13951 = vmatprep.subr.mxu0 %v16398_v27  ;;  %13906 = vmatpush3.msra.mxu1 %v16340_v56 }
 0x764   : > { %13952 = vmatpush3.msra.mxu0 %v16398_v27  ;;  %13907 = vmatprep.subr.mxu1 %v16358_v39 }
 0x765   : > { %13954 = vmatmul.mubr.f32.vlgmr.msra.gmra.mxu0 %v3588_v26  ;;  %13997 = vmatprep.subr.mxu0 %v16143_v25  ;;  %v18665_v26 = vld [vmem:[#allocation125_spill] sm:$0xff] }
 0x766   : > { %13908 = vmatpush3.msra.mxu1 %v16358_v39  ;;  %13956 = vmatprep.mubr.f32.mxu0 %v3598_v19 }
 0x767   : > { %13998 = vmatpush3.msra.mxu0 %v16143_v25  ;;  %13909 = vmatprep.subr.mxu1 %v16375_v7 }
 0x768   : > { %13999 = vmatprep.subr.mxu0 %v16184_v28  ;;  %13910 = vmatpush3.msra.mxu1 %v16375_v7 }
 0x769   : > { %14000 = vmatpush3.msra.mxu0 %v16184_v28  ;;  %13911 = vmatprep.subr.mxu1 %v18654_v48 }
 0x76a   : > { %13957 = vmatmul.mubr.f32.gmra.mxu0 %v3608_v1  ;;  %14001 = vmatprep.subr.mxu0 %v16190_v23 }
 0x76b   : > { %13912 = vmatpush3.msra.mxu1 %v18654_v48  ;;  %14002 = vmatpush3.msra.mxu0 %v16190_v23 }
 0x76c   : > { %14029 = vmatprep.mubr.f32.mxu0 %v16460_v34  ;;  %13913 = vmatprep.subr.mxu1 %v18655_v10 }
 0x76d   : > { %14003 = vmatprep.subr.mxu0 %v16201_v47  ;;  %13914 = vmatpush3.msra.mxu1 %v18655_v10 }
 0x76e   : > { %14004 = vmatpush3.msra.mxu0 %v16201_v47  ;;  %13916 = vmatmul.mubr.f32.vlgmr.msra.gmra.mxu1 %v16458_v6  ;;  %v18661_v6 = vld [vmem:[#allocation111_spill] sm:$0xff] }
 0x76f   : > { %13959 = vmatprep.subr.mxu1 %v18656_v38  ;;  %14005 = vmatprep.subr.mxu0 %v16214_v20 }
 0x770   : > { %13918 = vmatprep.mubr.f32.mxu1 %v16481_v59  ;;  %13960 = vmatpush3.msra.mxu1 %v18656_v38  ;;  %v18671_v59 = vld [vmem:[#allocation145_spill] sm:$0xff] }
 0x771   : > { %14006 = vmatpush3.msra.mxu0 %v16214_v20  ;;  %13961 = vmatprep.subr.mxu1 %v18657_v42 }
 0x772   : > { %14007 = vmatprep.subr.mxu0 %v16230_v50  ;;  %13962 = vmatpush3.msra.mxu1 %v18657_v42 }
 0x773   : > { %14008 = vmatpush3.msra.mxu0 %v16230_v50  ;;  %13919 = vmatmul.mubr.f32.gmra.mxu1 %v16471_v51  ;;  %v18668_v51 = vld [vmem:[#allocation136_spill] sm:$0xff] }
 0x774   : > { %13963 = vmatprep.subr.mxu1 %v18658_v45  ;;  %14009 = vmatprep.subr.mxu0 %v16242_v61 }
 0x775   : > { %13964 = vmatpush3.msra.mxu1 %v18658_v45  ;;  %13991 = vmatprep.mubr.f32.mxu1 %v16460_v34  ;;  %v18662_v34 = vld [vmem:[#allocation113_spill] sm:$0xff] }
 0x776   : > { %14010 = vmatpush3.msra.mxu0 %v16242_v61  ;;  %13965 = vmatprep.subr.mxu1 %v18659_v11 }
 0x777   : > { %14011 = vmatprep.subr.mxu0 %v16258_v36  ;;  %13966 = vmatpush3.msra.mxu1 %v18659_v11 }
 0x778   : > { %14012 = vmatpush3.msra.mxu0 %v16258_v36  ;;  %13967 = vmatprep.subr.mxu1 %v18660_v17 }
 0x779   : > { %14013 = vmatprep.subr.mxu0 %v16276_v32  ;;  %13968 = vmatpush3.msra.mxu1 %v18660_v17 }
 0x77a   : > { %14014 = vmatpush3.msra.mxu0 %v16276_v32  ;;  %13969 = vmatprep.subr.mxu1 %v18661_v6 }
 0x77b   : > { %14015 = vmatprep.subr.mxu0 %v16293_v24  ;;  %13970 = vmatpush3.msra.mxu1 %v18661_v6 }
 0x77c   : > { %14016 = vmatpush3.msra.mxu0 %v16293_v24  ;;  %13971 = vmatprep.subr.mxu1 %v18662_v34 }
 0x77d   : > { %14017 = vmatprep.subr.mxu0 %v16313_v46  ;;  %13972 = vmatpush3.msra.mxu1 %v18662_v34 }
 0x77e   : > { %14018 = vmatpush3.msra.mxu0 %v16313_v46  ;;  %13973 = vmatprep.subr.mxu1 %v18663_v15 }
 0x77f   : > { %14019 = vmatprep.subr.mxu0 %v16325_v52  ;;  %13974 = vmatpush3.msra.mxu1 %v18663_v15 }
 0x780   : > { %14020 = vmatpush3.msra.mxu0 %v16325_v52  ;;  %13975 = vmatprep.subr.mxu1 %v18664_v8 }
 0x781   : > { %14021 = vmatprep.subr.mxu0 %v16342_v49  ;;  %13976 = vmatpush3.msra.mxu1 %v18664_v8 }
 0x782   : > { %14022 = vmatpush3.msra.mxu0 %v16342_v49  ;;  %13977 = vmatprep.subr.mxu1 %v18665_v26 }
 0x783   : > { %14023 = vmatprep.subr.mxu0 %v16360_v62  ;;  %13978 = vmatpush3.msra.mxu1 %v18665_v26 }
 0x784   : > { %14024 = vmatpush3.msra.mxu0 %v16360_v62  ;;  %13979 = vmatprep.subr.mxu1 %v18666_v57 }
 0x785   : > { %14025 = vmatprep.subr.mxu0 %v16377_v60  ;;  %13980 = vmatpush3.msra.mxu1 %v18666_v57 }
 0x786   : > { %14026 = vmatpush3.msra.mxu0 %v16377_v60  ;;  %13981 = vmatprep.subr.mxu1 %v18667_v29  ;;  %v1475_v60 = vld [vmem:[%s18698_s11] sm:$0xff] }
 0x787   : > { %14027 = vmatprep.subr.mxu0 %v16398_v27  ;;  %13982 = vmatpush3.msra.mxu1 %v18667_v29 }
 0x788   : > { %14028 = vmatpush3.msra.mxu0 %v16398_v27  ;;  %13983 = vmatprep.subr.mxu1 %v18668_v51 }
 0x789   : > { %14030 = vmatmul.mubr.f32.vlgmr.msra.gmra.mxu0 %v16451_v58  ;;  %13984 = vmatpush3.msra.mxu1 %v18668_v51 }
 0x78a   : > { %14032 = vmatprep.mubr.f32.mxu0 %v16473_v5  ;;  %13985 = vmatprep.subr.mxu1 %v18669_v2 }
 0x78b   : > { %13986 = vmatpush3.msra.mxu1 %v18669_v2  ;;  %14046 = vmatprep.subr.mxu0 %v18670_v35 }
 0x78c   : > { %13987 = vmatprep.subr.mxu1 %v18671_v59 }
 0x78d   : > { %14033 = vmatmul.mubr.f32.gmra.mxu0 %v16465_v21  ;;  %13988 = vmatpush3.msra.mxu1 %v18671_v59 }
 0x78e   : > { %13989 = vmatprep.subr.mxu1 %v18672_v30  ;;  %14054 = vmatprep.mubr.msk.f32.mxu0 %vm15458_vm1, %v18670_v35 }
 0x78f   : > { %13990 = vmatpush3.msra.mxu1 %v18672_v30 }
 0x790   : > { %13992 = vmatmul.mubr.f32.vlgmr.msra.gmra.mxu1 %v16451_v58  ;;  %14035 = vmatprep.subr.mxu1 %v18670_v35 }
 0x791   : > { %13994 = vmatprep.mubr.f32.mxu1 %v16473_v5 }
 0x794   : > { %13995 = vmatmul.mubr.f32.gmra.mxu1 %v16465_v21 }
 0x795   : > { %14043 = vmatprep.mubr.msk.f32.mxu1 %vm15458_vm1, %v18670_v35 }
 0x803   : > { %v13879_v1 = vpop.f32.mrf.mxu0 }
 0x805   : > { %v3763_v14 = vpop.f32.mrf.mxu0 }
 0x807   : > { %v13882_v44 = vpop.f32.mrf.mxu0 }
 0x809   : > { %v3775_v53 = vpop.f32.mrf.mxu0 }
 0x80b   : > { %v13841_v19 = vpop.f32.mrf.mxu1 }
 0x80c   : > { %v3770_v29 = vadd.f32 %v13879_v1, %v13841_v19 }
 0x80d   : > { %v3582_v0 = vpop.f32.mrf.mxu1 }
 0x80e   : > { %v3764_v21 = vadd.f32 %v3763_v14, %v3582_v0 }
 0x810   : > { %v13844_v22 = vpop.f32.mrf.mxu1 }
 0x811   : > { %v3782_v15 = vadd.f32 %v13882_v44, %v13844_v22 }
 0x812   : > { %v3602_v30 = vpop.f32.mrf.mxu1 }
 0x813   : > { %v3776_v17 = vadd.f32 %v3775_v53, %v3602_v30 }
 0x825   : > { %v13955_v12 = vpop.f32.mrf.mxu0 }
 0x827   : > { %v3995_v59 = vpop.f32.mrf.mxu0 }
 0x82a   : > { %v13958_v2 = vpop.f32.mrf.mxu0 }
 0x82c   : > { %v4011_v5 = vpop.f32.mrf.mxu0 }
 0x82e   : > { %v13917_v58 = vpop.f32.mrf.mxu1 }
 0x82f   : > { %v3893_v26 = vadd.f32 %v13917_v58, %v3770_v29 }
 0x830   : > { %v3885_v51 = vpop.f32.mrf.mxu1 }
 0x831   : > { %v3886_v34 = vadd.f32 %v3885_v51, %v3764_v21  ;;  %v4004_v45 = vadd.f32 %v13955_v12, %v3893_v26 }
 0x833   : > { %v13920_v57 = vpop.f32.mrf.mxu1  ;;  %v3996_v7 = vadd.f32 %v3995_v59, %v3886_v34 }
 0x834   : > { %v3907_v11 = vadd.f32 %v13920_v57, %v3782_v15 }
 0x835   : > { %v3899_v6 = vpop.f32.mrf.mxu1 }
 0x836   : > { %v3900_v10 = vadd.f32 %v3899_v6, %v3776_v17  ;;  %v4020_v13 = vadd.f32 %v13958_v2, %v3907_v11 }
 0x838   : > { %v4012_v0 = vadd.f32 %v4011_v5, %v3900_v10 }
 0x849   : > { %v14031_v8 = vpop.f32.mrf.mxu0 }
 0x84b   : > { %v4243_v42 = vpop.f32.mrf.mxu0 }
 0x84d   : > { %v14034_v1 = vpop.f32.mrf.mxu0 }
 0x84f   : > { %v4255_v15 = vpop.f32.mrf.mxu0 }
 0x850   : > { %v13993_v38 = vpop.f32.mrf.mxu1 }
 0x851   : > { %v4145_v48 = vadd.f32 %v13993_v38, %v4004_v45 }
 0x852   : > { %v4138_v39 = vpop.f32.mrf.mxu1 }
 0x853   : > { %v4139_v56 = vadd.f32 %v4138_v39, %v3996_v7  ;;  %v4250_v55 = vadd.f32 %v14031_v8, %v4145_v48 }
 0x854   : > { %v13996_v19 = vpop.f32.mrf.mxu1 }
 0x855   : > { %v4244_v14 = vadd.f32 %v4243_v42, %v4139_v56  ;;  %v4157_v29 = vadd.f32 %v13996_v19, %v4020_v13  ;;  %v4266_v26 = vmul.f32 0.25, %v4250_v55 }
 0x856   : > { %v4150_v44 = vpop.f32.mrf.mxu1 }
 0x857   : > { %v4265_v51 = vmul.f32 0.25, %v4244_v14  ;;  %v4262_v22 = vadd.f32 %v14034_v1, %v4157_v29  ;;  %v4151_v30 = vadd.f32 %v4150_v44, %v4012_v0  ;;  %v4271_v7 = vsel %vm4269_vm5, %v4266_v26, -inf }
 0x859   : > { %v4268_v57 = vmul.f32 0.25, %v4262_v22  ;;  %v4256_v53 = vadd.f32 %v4255_v15, %v4151_v30  ;;  %v4270_v45 = vsel %vm4269_vm5, %v4265_v51, -inf }
 0x85a   : > { %v4274_v13 = vmax.f32 %v4270_v45, %v4271_v7 }
 0x85b   : > { %v4267_v38 = vmul.f32 0.25, %v4256_v53  ;;  %v4273_v56 = vsel %vm4269_vm5, %v4268_v57, -inf }
 0x85d   : > { %v4272_v39 = vsel %vm4269_vm5, %v4267_v38, -inf }
 0x85e   : > { %v4275_v48 = vmax.f32 %v4272_v39, %v4273_v56 }
 0x860   : > { %v4276_v10 = vmax.f32 %v4274_v13, %v4275_v48 }
 0x862   : > { %4277 = vmax.xlane.f32.xlu0 %v4276_v10 }
 0x8eb   : > { %v4278_v42 = vpop.xlane.xlu0 %4277 }
 0x8ec   : > { %v4279_v11 = vrot.slane %v4278_v42, 4 }
 0x8ee   : > { %v4280_v17 = vmax.f32 %v4278_v42, %v4279_v11 }
 0x8f0   : > { %v4281_v55 = vrot.slane %v4280_v17, 2 }
 0x8f2   : > { %v4282_v6 = vmax.f32 %v4280_v17, %v4281_v55  ;;  %v18673_v17 = vld [vmem:[#allocation37_spill] sm:$0xff] }
 0x8f4   : > { %v4283_v34 = vrot.slane %v4282_v6, 1 }
 0x8f6   : > { %v4284_v8 = vmax.f32 %v4282_v6, %v4283_v34 }
 0x8f8   : > { %15097 = vpush %v4284_v8 }
 0x929   : > { %s15098_s7 = spop %15097 }
 0x92a   : > { %v4286_v2 = vstv %s15098_s7  ;;  %s18753_s7 = sld [smem:[#allocation14_spill]] }
 0x92b   : > { %v4287_v59 = vsub.f32 %v4265_v51, %v4286_v2  ;;  %v4288_v12 = vsub.f32 %v4266_v26, %v4286_v2  ;;  %v4289_v58 = vsub.f32 %v4267_v38, %v4286_v2  ;;  %v4290_v5 = vsub.f32 %v4268_v57, %v4286_v2  ;;  %v18674_v2 = vld [vmem:[#allocation34_spill] sm:$0xff] }
 0x92d   : > { %v4291_v21 = vmul.f32 1.442695, %v4287_v59  ;;  %v4293_v1 = vmul.f32 1.442695, %v4288_v12  ;;  %v4295_v19 = vmul.f32 1.442695, %v4289_v58 }
 0x92e   : > { %v4297_v14 = vmul.f32 1.442695, %v4290_v5  ;;  %v18675_v59 = vld [vmem:[#allocation35_spill] sm:$0xff]  ;;  %v18676_v12 = vld [vmem:[#allocation36_spill] sm:$0xff]  ;;  %v18677_v58 = vld [vmem:[#allocation74_spill] sm:$0xff] }
 0x92f   : > { %15333 = vpow2.f32 %v4291_v21  ;;  %v18678_v5 = vld [vmem:[#allocation71_spill] sm:$0xff] }
 0x930   : > { %15335 = vpow2.f32 %v4293_v1 }
 0x931   : > { %15337 = vpow2.f32 %v4295_v19 }
 0x932   : > { %15339 = vpow2.f32 %v4297_v14 }
 0x93c   : > { %v16644_v29 = vpop.eup %15333 }
 0x93d   : > { %v16646_v0 = vpop.eup %15335  ;;  %v16654_v51 = vand.u32 4294901760, %v16644_v29 }
 0x93e   : > { %v16648_v44 = vpop.eup %15337  ;;  %v16651_v22 = vand.u32 4294901760, %v16646_v0 }
 0x93f   : > { %v16656_v30 = vpop.eup %15339  ;;  %v16659_v15 = vand.u32 4294901760, %v16648_v44  ;;  %v4425_v45 = vsub.f32 %v16644_v29, %v16654_v51 }
 0x940   : > { %v16662_v26 = vand.u32 4294901760, %v16656_v30  ;;  %v4418_v57 = vsub.f32 %v16646_v0, %v16651_v22 }
 0x941   : > { %v4411_v53 = vsub.f32 %v16648_v44, %v16659_v15  ;;  %v4426_v10 = vand.u32 4294901760, %v4425_v45 }
 0x942   : > { %14036 = vmatpush3.msra.mxu1 %v16662_v26  ;;  %v4404_v38 = vsub.f32 %v16656_v30, %v16662_v26  ;;  %v4419_v56 = vand.u32 4294901760, %v4418_v57 }
 0x943   : > { %14037 = vmatprep.subr.mxu1 %v18670_v35  ;;  %v4412_v7 = vand.u32 4294901760, %v4411_v53  ;;  %v4427_v6 = vsub.f32 %v4425_v45, %v4426_v10 }
 0x944   : > { %14038 = vmatpush3.msra.mxu1 %v16659_v15  ;;  %v4405_v39 = vand.u32 4294901760, %v4404_v38  ;;  %v4420_v11 = vsub.f32 %v4418_v57, %v4419_v56 }
 0x945   : > { %14039 = vmatprep.subr.mxu1 %v18670_v35  ;;  %v4413_v48 = vsub.f32 %v4411_v53, %v4412_v7  ;;  %v4428_v8 = vand.u32 4294901760, %v4427_v6  ;;  %v18680_v6 = vld [vmem:[#allocation85_spill] sm:$0xff] }
 0x946   : > { %14040 = vmatpush3.msra.mxu1 %v16651_v22  ;;  %v4406_v13 = vsub.f32 %v4404_v38, %v4405_v39  ;;  %v4421_v34 = vand.u32 4294901760, %v4420_v11  ;;  %v18679_v11 = vld [vmem:[#allocation84_spill] sm:$0xff] }
 0x947   : > { %14041 = vmatprep.subr.mxu1 %v18670_v35  ;;  %v4414_v55 = vand.u32 4294901760, %v4413_v48 }
 0x948   : > { %14042 = vmatpush3.msra.mxu1 %v16654_v51  ;;  %v4407_v42 = vand.u32 4294901760, %v4406_v13 }
 0x949   : > { %14057 = vmatprep.subr.mxu1 %v18670_v35  ;;  %14044 = vmatmul.mubr.f32.vlgmr.msra.gmra.mxu1 %v18673_v17 }
 0x94a   : > { %14047 = vmatpush3.msra.mxu0 %v4407_v42  ;;  %14058 = vmatpush3.msra.mxu1 %v4404_v38 }
 0x94b   : > { %14048 = vmatprep.subr.mxu0 %v18670_v35  ;;  %14059 = vmatprep.subr.mxu1 %v18670_v35 }
 0x94c   : > { %14049 = vmatpush3.msra.mxu0 %v4414_v55  ;;  %14060 = vmatpush3.msra.mxu1 %v4411_v53 }
 0x94d   : > { %14050 = vmatprep.subr.mxu0 %v18670_v35  ;;  %14061 = vmatprep.subr.mxu1 %v18670_v35 }
 0x94e   : > { %14051 = vmatpush3.msra.mxu0 %v4421_v34  ;;  %14062 = vmatpush3.msra.mxu1 %v4418_v57 }
 0x94f   : > { %14052 = vmatprep.subr.mxu0 %v18670_v35  ;;  %14063 = vmatprep.subr.mxu1 %v18670_v35 }
 0x950   : > { %14053 = vmatpush3.msra.mxu0 %v4428_v8  ;;  %14064 = vmatpush3.msra.mxu1 %v4425_v45  ;;  %v18681_v8 = vld [vmem:[#allocation87_spill] sm:$0xff] }
 0x951   : > { %14055 = vmatmul.mubr.f32.vlgmr.msra.gmra.mxu0 %v18674_v2  ;;  %14065 = vmatprep.mubr.msk.f32.mxu1 %vm15458_vm1, %v18670_v35 }
 0x952   : > { %14068 = vmatprep.subr.mxu0 %v18670_v35  ;;  %14079 = vmatprep.subr.mxu1 %v18670_v35 }
 0x953   : > { %14066 = vmatmul.mubr.f32.vlgmr.msra.gmra.mxu1 %v18675_v59  ;;  %14069 = vmatpush3.msra.mxu0 %v16662_v26 }
 0x954   : > { %14080 = vmatpush3.msra.mxu1 %v4405_v39  ;;  %14070 = vmatprep.subr.mxu0 %v18670_v35 }
 0x955   : > { %14081 = vmatprep.subr.mxu1 %v18670_v35  ;;  %14071 = vmatpush3.msra.mxu0 %v16659_v15 }
 0x956   : > { %14082 = vmatpush3.msra.mxu1 %v4412_v7  ;;  %14072 = vmatprep.subr.mxu0 %v18670_v35 }
 0x957   : > { %14083 = vmatprep.subr.mxu1 %v18670_v35  ;;  %14073 = vmatpush3.msra.mxu0 %v16651_v22 }
 0x958   : > { %14084 = vmatpush3.msra.mxu1 %v4419_v56  ;;  %14074 = vmatprep.subr.mxu0 %v18670_v35 }
 0x959   : > { %14085 = vmatprep.subr.mxu1 %v18670_v35  ;;  %14075 = vmatpush3.msra.mxu0 %v16654_v51 }
 0x95a   : > { %14076 = vmatprep.mubr.msk.f32.mxu0 %vm15458_vm1, %v18670_v35  ;;  %14086 = vmatpush3.msra.mxu1 %v4426_v10 }
 0x95b   : > { %14077 = vmatmul.mubr.f32.vlgmr.msra.gmra.mxu0 %v18676_v12  ;;  %14090 = vmatprep.subr.mxu0 %v18670_v35 }
 0x95c   : > { %14087 = vmatprep.mubr.msk.f32.mxu1 %vm15458_vm1, %v18670_v35  ;;  %14091 = vmatpush3.msra.mxu0 %v16662_v26 }
 0x95d   : > { %14088 = vmatmul.mubr.f32.vlgmr.msra.gmra.mxu1 %v18674_v2  ;;  %14092 = vmatprep.subr.mxu0 %v18670_v35 }
 0x95e   : > { %14093 = vmatpush3.msra.mxu0 %v16659_v15  ;;  %14098 = vmatprep.mubr.msk.f32.mxu0 %vm15458_vm1, %v18670_v35 }
 0x95f   : > { %14094 = vmatprep.subr.mxu0 %v18670_v35  ;;  %14103 = vmatprep.mubr.f32.mxu1 %v18677_v58 }
 0x960   : > { %14095 = vmatpush3.msra.mxu0 %v16651_v22 }
 0x961   : > { %14096 = vmatprep.subr.mxu0 %v18670_v35 }
 0x962   : > { %14097 = vmatpush3.msra.mxu0 %v16654_v51 }
 0x963   : > { %14099 = vmatmul.mubr.f32.vlgmr.msra.gmra.mxu0 %v18674_v2 }
 0x964   : > { %14111 = vmatprep.mubr.f32.mxu0 %v18678_v5 }
 0xa09   : > { %v4374_v21 = vpop.f32.mrf.mxu1 }
 0xa0b   : > { %v14045_v1 = vpop.f32.mrf.mxu1 }
 0xa0c   : > { %v18683_v1 = vld [vmem:[#allocation75_spill] sm:$0xff] }
 0xa11   : > { %v4465_v19 = vpop.f32.mrf.mxu0 }
 0xa12   : > { %v4466_v57 = vadd.f32 %v4465_v19, %v4374_v21  ;;  %v18682_v21 = vld [vmem:[#allocation72_spill] sm:$0xff]  ;;  %v18684_v19 = vld [vmem:[#allocation77_spill] sm:$0xff] }
 0xa13   : > { %v14056_v14 = vpop.f32.mrf.mxu0  ;;  %v4545_v15 = vpop.f32.mrf.mxu1 }
 0xa14   : > { %v4546_v38 = vadd.f32 %v4545_v15, %v4466_v57  ;;  %v18685_v14 = vld [vmem:[#allocation76_spill] sm:$0xff]  ;;  %v18686_v15 = vld [vmem:[#allocation79_spill] sm:$0xff]  ;;  %v18689_v57 = vld [vmem:[#allocation81_spill] sm:$0xff] }
 0xa15   : > { %v14067_v26 = vpop.f32.mrf.mxu1 }
 0xa16   : > { %v18687_v26 = vld [vmem:[#allocation78_spill] sm:$0xff] }
 0xa1b   : > { %v4622_v53 = vpop.f32.mrf.mxu0 }
 0xa1c   : > { %v4623_v22 = vadd.f32 %v4622_v53, %v4546_v38  ;;  %v18690_v53 = vld [vmem:[#allocation73_spill] sm:$0xff]  ;;  %v18691_v38 = vld [vmem:[#allocation80_spill] sm:$0xff] }
 0xa1d   : > { %v14078_v45 = vpop.f32.mrf.mxu0  ;;  %v4705_v7 = vpop.f32.mrf.mxu1 }
 0xa1e   : > { %v4706_v56 = vadd.f32 %v4705_v7, %v4623_v22  ;;  %v18692_v45 = vld [vmem:[#allocation82_spill] sm:$0xff]  ;;  %v18693_v7 = vld [vmem:[#allocation83_spill] sm:$0xff] }
 0xa1f   : > { %v14089_v39 = vpop.f32.mrf.mxu1  ;;  %v1474_v22 = vld [vmem:[%s18688_s10] sm:$0xf]  ;;  %s18754_s10 = sld [smem:[#allocation15_spill]] }
 0xa20   : > { %v5381_v39 = vsel %vm5379_vm6, %v1474_v22, 0 }
 0xa23   : > { %v4780_v13 = vpop.f32.mrf.mxu0 }
 0xa24   : > { %v4781_v51 = vadd.f32 %v4780_v13, %v4706_v56  ;;  %v16745_v56 = vand.u32 4294901760, %v5381_v39 }
 0xa25   : > { %v14100_v48 = vpop.f32.mrf.mxu0 }
 0xa26   : > { %v4815_v10 = vand.u32 4294901760, %v4781_v51  ;;  %18694 = vst [vmem:[#allocation37_spill] sm:$0xff] %v16745_v56  ;;  %v16748_v13 = vsub.f32 %v5381_v39, %v16745_v56 }
 0xa28   : > { %v4922_v42 = vsub.f32 %v4781_v51, %v4815_v10  ;;  %14101 = vmatprep.subr.mxu1 %v4815_v10  ;;  %18695 = vst [vmem:[#allocation34_spill] sm:$0xff] %v16748_v13 }
 0xa29   : > { %14102 = vmatpush3.msra.mxu1 %v4815_v10 }
 0xa2a   : > { %14104 = vmatmul.mubr.f32.vlgmr.msra.gmra.mxu1 %v18679_v11  ;;  %14117 = vmatprep.subr.mxu1 %v4922_v42  ;;  %v4923_v55 = vand.u32 4294901760, %v4922_v42 }
 0xa2b   : > { %14118 = vmatpush3.msra.mxu1 %v4922_v42  ;;  %14106 = vmatprep.mubr.f32.mxu1 %v18680_v6 }
 0xa2c   : > { %14133 = vmatprep.subr.mxu1 %v4923_v55  ;;  %v4924_v34 = vsub.f32 %v4922_v42, %v4923_v55 }
 0xa2e   : > { %14107 = vmatmul.mubr.f32.gmra.mxu1 %v18681_v8  ;;  %v4925_v58 = vand.u32 4294901760, %v4924_v34 }
 0xa2f   : > { %14119 = vmatprep.mubr.f32.mxu1 %v18682_v21 }
 0xa30   : > { %14109 = vmatprep.subr.mxu0 %v4925_v58 }
 0xa31   : > { %14110 = vmatpush3.msra.mxu0 %v4925_v58 }
 0xa32   : > { %14112 = vmatmul.mubr.f32.vlgmr.msra.gmra.mxu0 %v18683_v1  ;;  %14120 = vmatmul.mubr.f32.vlgmr.msra.gmra.mxu1 %v18684_v19 }
 0xa33   : > { %14125 = vmatprep.subr.mxu0 %v4815_v10  ;;  %14134 = vmatpush3.msra.mxu1 %v4923_v55 }
 0xa34   : > { %14126 = vmatpush3.msra.mxu0 %v4815_v10  ;;  %14114 = vmatprep.mubr.f32.mxu0 %v18685_v14 }
 0xa35   : > { %14141 = vmatprep.subr.mxu0 %v4815_v10  ;;  %14122 = vmatprep.mubr.f32.mxu1 %v18686_v15 }
 0xa36   : > { %14115 = vmatmul.mubr.f32.gmra.mxu0 %v18687_v26  ;;  %14123 = vmatmul.mubr.f32.gmra.mxu1 %v18689_v57 }
 0xa37   : > { %14127 = vmatprep.mubr.f32.mxu0 %v18690_v53  ;;  %14135 = vmatprep.mubr.f32.mxu1 %v18678_v5 }
 0xa38   : > { %14149 = vmatprep.subr.mxu1 %v16745_v56 }
 0xa3a   : > { %14128 = vmatmul.mubr.f32.vlgmr.msra.gmra.mxu0 %v18691_v38  ;;  %14136 = vmatmul.mubr.f32.vlgmr.msra.gmra.mxu1 %v18683_v1 }
 0xa3b   : > { %14142 = vmatpush3.msra.mxu0 %v4815_v10  ;;  %14130 = vmatprep.mubr.f32.mxu0 %v18692_v45 }
 0xa3c   : > { %14138 = vmatprep.mubr.f32.mxu1 %v18685_v14  ;;  %14150 = vmatpush3.msra.mxu1 %v16745_v56 }
 0xa3d   : > { %14165 = vmatprep.subr.mxu1 %v16748_v13 }
 0xa3e   : > { %14131 = vmatmul.mubr.f32.gmra.mxu0 %v18693_v7  ;;  %14139 = vmatmul.mubr.f32.gmra.mxu1 %v18687_v26 }
 0xa3f   : > { %14143 = vmatprep.mubr.f32.mxu0 %v18678_v5  ;;  %v16753_v5 = vand.u32 4294901760, %v16748_v13 }
 0xa41   : > { %18696 = vst [vmem:[#allocation35_spill] sm:$0xff] %v16753_v5  ;;  %v5523_v51 = vsub.f32 %v16748_v13, %v16753_v5 }
 0xa42   : > { %14144 = vmatmul.mubr.f32.vlgmr.msra.gmra.mxu0 %v18683_v1 }
 0xa43   : > { %14146 = vmatprep.mubr.f32.mxu0 %v18685_v14  ;;  %v16758_v48 = vand.u32 4294901760, %v5523_v51 }
 0xa45   : > { %18697 = vst [vmem:[#allocation36_spill] sm:$0xff] %v16758_v48  ;;  %14157 = vmatprep.subr.mxu0 %v16758_v48 }
 0xa46   : > { %14147 = vmatmul.mubr.f32.gmra.mxu0 %v18687_v26 }
 0xa47   : > { %14158 = vmatpush3.msra.mxu0 %v16758_v48 }
 0xa48   : > { %14173 = vmatprep.subr.mxu0 %v16745_v56 }
 0xaea   : > { %v14105_v10 = vpop.f32.mrf.mxu1 }
 0xaec   : > { %v4856_v42 = vpop.f32.mrf.mxu1 }
 0xaee   : > { %v14108_v11 = vpop.f32.mrf.mxu1 }
 0xaf0   : > { %v4876_v55 = vpop.f32.mrf.mxu1 }
 0xaf2   : > { %v14113_v6 = vpop.f32.mrf.mxu0  ;;  %v14121_v34 = vpop.f32.mrf.mxu1 }
 0xaf3   : > { %v4969_v19 = vadd.f32 %v14113_v6, %v14105_v10 }
 0xaf4   : > { %v4962_v8 = vpop.f32.mrf.mxu0  ;;  %v5054_v58 = vpop.f32.mrf.mxu1 }
 0xaf5   : > { %v4963_v26 = vadd.f32 %v4962_v8, %v4856_v42  ;;  %v5062_v38 = vadd.f32 %v14121_v34, %v4969_v19 }
 0xaf6   : > { %v14116_v21 = vpop.f32.mrf.mxu0  ;;  %v14124_v1 = vpop.f32.mrf.mxu1 }
 0xaf7   : > { %v4981_v45 = vadd.f32 %v14116_v21, %v14108_v11  ;;  %v5055_v39 = vadd.f32 %v5054_v58, %v4963_v26 }
 0xaf8   : > { %v4974_v14 = vpop.f32.mrf.mxu0  ;;  %v5068_v15 = vpop.f32.mrf.mxu1 }
 0xaf9   : > { %v4975_v51 = vadd.f32 %v4974_v14, %v4876_v55  ;;  %v5076_v40 = vadd.f32 %v14124_v1, %v4981_v45 }
 0xafa   : > { %v14129_v57 = vpop.f32.mrf.mxu0  ;;  %v14137_v53 = vpop.f32.mrf.mxu1 }
 0xafb   : > { %v5158_v48 = vadd.f32 %v14129_v57, %v5062_v38  ;;  %v5069_v43 = vadd.f32 %v5068_v15, %v4975_v51 }
 0xafc   : > { %v5149_v7 = vpop.f32.mrf.mxu0  ;;  %v5247_v22 = vpop.f32.mrf.mxu1 }
 0xafd   : > { %v5150_v37 = vadd.f32 %v5149_v7, %v5055_v39  ;;  %v5254_v3 = vadd.f32 %v14137_v53, %v5158_v48 }
 0xafe   : > { %v14132_v31 = vpop.f32.mrf.mxu0  ;;  %v14140_v41 = vpop.f32.mrf.mxu1 }
 0xaff   : > { %v5174_v10 = vadd.f32 %v14132_v31, %v5076_v40  ;;  %v5248_v54 = vadd.f32 %v5247_v22, %v5150_v37 }
 0xb00   : > { %v5165_v16 = vpop.f32.mrf.mxu0  ;;  %v5259_v63 = vpop.f32.mrf.mxu1 }
 0xb01   : > { %v5166_v42 = vadd.f32 %v5165_v16, %v5069_v43  ;;  %v5266_v11 = vadd.f32 %v14140_v41, %v5174_v10 }
 0xb02   : > { %v14145_v6 = vpop.f32.mrf.mxu0 }
 0xb03   : > { %v5344_v8 = vadd.f32 %v14145_v6, %v5254_v3  ;;  %v5260_v55 = vadd.f32 %v5259_v63, %v5166_v42 }
 0xb04   : > { %v5337_v34 = vpop.f32.mrf.mxu0 }
 0xb05   : > { %15341 = vrcp.f32 %v5344_v8  ;;  %v5338_v21 = vadd.f32 %v5337_v34, %v5248_v54 }
 0xb06   : > { %v14148_v58 = vpop.f32.mrf.mxu0 }
 0xb07   : > { %15343 = vrcp.f32 %v5338_v21  ;;  %v5356_v19 = vadd.f32 %v14148_v58, %v5266_v11 }
 0xb08   : > { %v5349_v1 = vpop.f32.mrf.mxu0 }
 0xb09   : > { %15345 = vrcp.f32 %v5356_v19  ;;  %v5350_v14 = vadd.f32 %v5349_v1, %v5260_v55 }
 0xb0b   : > { %15347 = vrcp.f32 %v5350_v14 }
 0xb12   : > { %v15342_v15 = vpop.eup %15341 }
 0xb13   : > { %v5362_v31 = vmul.f32 %v15342_v15, %v16646_v0 }
 0xb14   : > { %v15344_v40 = vpop.eup %15343 }
 0xb15   : > { %v5360_v37 = vmul.f32 %v15344_v40, %v16644_v29  ;;  %v5371_v43 = vsel %vm4269_vm5, %v5362_v31, 0 }
 0xb16   : > { %v15346_v16 = vpop.eup %15345  ;;  %v5459_v41 = vand.u32 4294901760, %v5371_v43 }
 0xb17   : > { %v5368_v3 = vsel %vm4269_vm5, %v5360_v37, 0  ;;  %v5366_v63 = vmul.f32 %v15346_v16, %v16656_v30 }
 0xb18   : > { %v15348_v54 = vpop.eup %15347  ;;  %v5449_v48 = vand.u32 4294901760, %v5368_v3  ;;  %v5460_v26 = vsub.f32 %v5371_v43, %v5459_v41 }
 0xb19   : > { %v5364_v57 = vmul.f32 %v15348_v54, %v16648_v44  ;;  %v5377_v53 = vsel %vm4269_vm5, %v5366_v63, 0 }
 0xb1a   : > { %14159 = vmatprep.mubr.f32.mxu0 %v5449_v48  ;;  %v5479_v0 = vand.u32 4294901760, %v5377_v53  ;;  %v5450_v38 = vsub.f32 %v5368_v3, %v5449_v48  ;;  %v5461_v45 = vand.u32 4294901760, %v5460_v26 }
 0xb1b   : > { %14160 = vmatmul.mubr.f32.vlgmr.msra.gmra.mxu0 %v5459_v41  ;;  %v5374_v29 = vsel %vm4269_vm5, %v5364_v57, 0 }
 0xb1c   : > { %v5469_v7 = vand.u32 4294901760, %v5374_v29  ;;  %v5451_v22 = vand.u32 4294901760, %v5450_v38  ;;  %14174 = vmatpush3.msra.mxu0 %v16745_v56  ;;  %v5480_v39 = vsub.f32 %v5377_v53, %v5479_v0  ;;  %v5462_v30 = vsub.f32 %v5460_v26, %v5461_v45 }
 0xb1d   : > { %14189 = vmatprep.subr.mxu0 %v16745_v56 }
 0xb1e   : > { %14162 = vmatprep.mubr.f32.mxu0 %v5469_v7  ;;  %v5452_v51 = vsub.f32 %v5450_v38, %v5451_v22  ;;  %v5470_v44 = vsub.f32 %v5374_v29, %v5469_v7  ;;  %v5481_v10 = vand.u32 4294901760, %v5480_v39  ;;  %v5463_v8 = vand.u32 4294901760, %v5462_v30 }
 0xb1f   : > { %14163 = vmatmul.mubr.f32.gmra.mxu0 %v5479_v0 }
 0xb20   : > { %14175 = vmatprep.mubr.f32.mxu0 %v5451_v22  ;;  %v5453_v6 = vand.u32 4294901760, %v5452_v51  ;;  %v5471_v42 = vand.u32 4294901760, %v5470_v44  ;;  %v5482_v34 = vsub.f32 %v5480_v39, %v5481_v10 }
 0xb22   : > { %14151 = vmatprep.mubr.f32.mxu1 %v5453_v6  ;;  %v5472_v11 = vsub.f32 %v5470_v44, %v5471_v42  ;;  %v5483_v58 = vand.u32 4294901760, %v5482_v34 }
 0xb23   : > { %14152 = vmatmul.mubr.f32.vlgmr.msra.gmra.mxu1 %v5463_v8  ;;  %14176 = vmatmul.mubr.f32.vlgmr.msra.gmra.mxu0 %v5461_v45 }
 0xb24   : > { %14178 = vmatprep.mubr.f32.mxu0 %v5471_v42  ;;  %v5473_v21 = vand.u32 4294901760, %v5472_v11  ;;  %14166 = vmatpush3.msra.mxu1 %v16748_v13 }
 0xb25   : > { %14190 = vmatpush3.msra.mxu0 %v16745_v56  ;;  %14181 = vmatprep.subr.mxu1 %v16753_v5  ;;  %v1476_v56 = vld [vmem:[%s18698_s11 + $0x8] sm:$0xff] }
 0xb26   : > { %14154 = vmatprep.mubr.f32.mxu1 %v5473_v21  ;;  %14208 = vmatprep.subr.mxu0 %v18670_v35 }
 0xb27   : > { %14155 = vmatmul.mubr.f32.gmra.mxu1 %v5483_v58  ;;  %14179 = vmatmul.mubr.f32.gmra.mxu0 %v5481_v10 }
 0xb28   : > { %14167 = vmatprep.mubr.f32.mxu1 %v5450_v38  ;;  %14191 = vmatprep.mubr.f32.mxu0 %v5449_v48 }
 0xb2b   : > { %14168 = vmatmul.mubr.f32.vlgmr.msra.gmra.mxu1 %v5460_v26  ;;  %14192 = vmatmul.mubr.f32.vlgmr.msra.gmra.mxu0 %v5459_v41 }
 0xb2c   : > { %14170 = vmatprep.mubr.f32.mxu1 %v5470_v44  ;;  %14194 = vmatprep.mubr.f32.mxu0 %v5469_v7 }
 0xb2d   : > { %14182 = vmatpush3.msra.mxu1 %v16753_v5  ;;  %v17075_v5 = vand.u32 4294901760, %v1476_v56 }
 0xb2e   : > { %14197 = vmatprep.subr.mxu1 %v18670_v35 }
 0xb2f   : > { %14171 = vmatmul.mubr.f32.gmra.mxu1 %v5480_v39  ;;  %14195 = vmatmul.mubr.f32.gmra.mxu0 %v5479_v0 }
 0xb30   : > { %14183 = vmatprep.mubr.f32.mxu1 %v5449_v48  ;;  %14216 = vmatprep.mubr.msk.f32.mxu0 %vm15458_vm1, %v18670_v35 }
 0xb33   : > { %14184 = vmatmul.mubr.f32.vlgmr.msra.gmra.mxu1 %v5459_v41 }
 0xb34   : > { %14186 = vmatprep.mubr.f32.mxu1 %v5469_v7 }
 0xb37   : > { %14187 = vmatmul.mubr.f32.gmra.mxu1 %v5479_v0 }
 0xb38   : > { %14205 = vmatprep.mubr.msk.f32.mxu1 %vm15458_vm1, %v18670_v35 }
 0xbdb   : > { %v14161_v55 = vpop.f32.mrf.mxu0 }
 0xbdd   : > { %v5561_v19 = vpop.f32.mrf.mxu0 }
 0xbdf   : > { %v14164_v1 = vpop.f32.mrf.mxu0 }
 0xbe1   : > { %v5573_v14 = vpop.f32.mrf.mxu0 }
 0xbe3   : > { %v14153_v15 = vpop.f32.mrf.mxu1  ;;  %v14177_v31 = vpop.f32.mrf.mxu0 }
 0xbe4   : > { %v5568_v48 = vadd.f32 %v14161_v55, %v14153_v15 }
 0xbe5   : > { %v5455_v40 = vpop.f32.mrf.mxu1  ;;  %v5748_v37 = vpop.f32.mrf.mxu0 }
 0xbe6   : > { %v5562_v26 = vadd.f32 %v5561_v19, %v5455_v40 }
 0xbe7   : > { %v14156_v43 = vpop.f32.mrf.mxu1  ;;  %v14180_v16 = vpop.f32.mrf.mxu0 }
 0xbe8   : > { %v5580_v38 = vadd.f32 %v14164_v1, %v14156_v43 }
 0xbe9   : > { %v5475_v3 = vpop.f32.mrf.mxu1  ;;  %v5764_v63 = vpop.f32.mrf.mxu0 }
 0xbea   : > { %v5574_v7 = vadd.f32 %v5573_v14, %v5475_v3 }
 0xbeb   : > { %v14169_v54 = vpop.f32.mrf.mxu1  ;;  %v14193_v53 = vpop.f32.mrf.mxu0 }
 0xbec   : > { %v5661_v57 = vadd.f32 %v14169_v54, %v5568_v48 }
 0xbed   : > { %v5653_v41 = vpop.f32.mrf.mxu1  ;;  %v5936_v30 = vpop.f32.mrf.mxu0 }
 0xbee   : > { %v5654_v45 = vadd.f32 %v5653_v41, %v5562_v26  ;;  %v5757_v39 = vadd.f32 %v14177_v31, %v5661_v57 }
 0xbef   : > { %v14172_v0 = vpop.f32.mrf.mxu1  ;;  %v14196_v21 = vpop.f32.mrf.mxu0 }
 0xbf0   : > { %v5675_v22 = vadd.f32 %v14172_v0, %v5580_v38  ;;  %v5749_v6 = vadd.f32 %v5748_v37, %v5654_v45 }
 0xbf1   : > { %v5667_v29 = vpop.f32.mrf.mxu1  ;;  %v5948_v54 = vpop.f32.mrf.mxu0 }
 0xbf2   : > { %v5668_v44 = vadd.f32 %v5667_v29, %v5574_v7  ;;  %v5773_v11 = vadd.f32 %v14180_v16, %v5675_v22 }
 0xbf3   : > { %v14185_v51 = vpop.f32.mrf.mxu1 }
 0xbf4   : > { %v5853_v10 = vadd.f32 %v14185_v51, %v5757_v39  ;;  %v5765_v15 = vadd.f32 %v5764_v63, %v5668_v44  ;;  %v1490_v44 = vld [vmem:[%s18698_s11 + $0x78] sm:$0xff] }
 0xbf5   : > { %v5846_v42 = vpop.f32.mrf.mxu1 }
 0xbf6   : > { %v5943_v8 = vadd.f32 %v14193_v53, %v5853_v10  ;;  %v5847_v34 = vadd.f32 %v5846_v42, %v5749_v6  ;;  %v1489_v10 = vld [vmem:[%s18698_s11 + $0x70] sm:$0xff]  ;;  %v16826_v6 = vand.u32 4294901760, %v1490_v44  ;;  %v1488_v42 = vld [vmem:[%s18698_s11 + $0x68] sm:$0xff] }
 0xbf7   : > { %v14188_v58 = vpop.f32.mrf.mxu1 }
 0xbf8   : > { %v5959_v55 = vmul.f32 %v5943_v8, %v16442_v9  ;;  %v5937_v19 = vadd.f32 %v5936_v30, %v5847_v34  ;;  %v5865_v1 = vadd.f32 %v14188_v58, %v5773_v11  ;;  %v16834_v8 = vand.u32 4294901760, %v1489_v10  ;;  %v1487_v34 = vld [vmem:[%s18698_s11 + $0x60] sm:$0xff]  ;;  %v1486_v58 = vld [vmem:[%s18698_s11 + $0x58] sm:$0xff] }
 0xbf9   : > { %v5858_v40 = vpop.f32.mrf.mxu1  ;;  %v16841_v11 = vsub.f32 %v1490_v44, %v16826_v6 }
 0xbfa   : > { %v16784_v14 = vand.u32 4294901760, %v5959_v55  ;;  %v5958_v31 = vmul.f32 %v5937_v19, %v16445_v4  ;;  %v5955_v43 = vadd.f32 %v14196_v21, %v5865_v1  ;;  %v5859_v3 = vadd.f32 %v5858_v40, %v5765_v15  ;;  %v1485_v19 = vld [vmem:[%s18698_s11 + $0x50] sm:$0xff] }
 0xbfb   : > { %v16843_v21 = vand.u32 4294901760, %v1488_v42  ;;  %v16859_v1 = vand.u32 4294901760, %v16841_v11  ;;  %v16864_v40 = vand.u32 4294901760, %v1486_v58 }
 0xbfc   : > { %v16787_v37 = vand.u32 4294901760, %v5958_v31  ;;  %v5961_v48 = vmul.f32 %v5955_v43, %v16449_v33  ;;  %v5949_v16 = vadd.f32 %v5948_v54, %v5859_v3  ;;  %v16791_v41 = vsub.f32 %v5959_v55, %v16784_v14 }
 0xbfd   : > { %v16852_v55 = vand.u32 4294901760, %v1487_v34  ;;  %18699 = vst [vmem:[#allocation74_spill] sm:$0xff] %v16859_v1  ;;  %v16862_v15 = vsub.f32 %v1488_v42, %v16843_v21  ;;  %v16876_v3 = vand.u32 4294901760, %v1485_v19  ;;  %v6542_v54 = vsub.f32 %v16841_v11, %v16859_v1 }
 0xbfe   : > { %v16793_v9 = vand.u32 4294901760, %v5961_v48  ;;  %v5960_v63 = vmul.f32 %v5949_v16, %v16455_v18  ;;  %v16797_v26 = vsub.f32 %v5958_v31, %v16787_v37  ;;  %v6082_v0 = vand.u32 4294901760, %v16791_v41 }
 0xbff   : > { %v16874_v43 = vsub.f32 %v1487_v34, %v16852_v55  ;;  %v16889_v16 = vsub.f32 %v1486_v58, %v16864_v40 }
 0xc00   : > { %v6067_v4 = vsub.f32 %v5961_v48, %v16793_v9  ;;  %v16800_v57 = vand.u32 4294901760, %v5960_v63  ;;  %14198 = vmatpush3.msra.mxu1 %v16793_v9  ;;  %v6089_v45 = vand.u32 4294901760, %v16797_v26  ;;  %v6083_v22 = vsub.f32 %v16791_v41, %v6082_v0 }
 0xc01   : > { %14199 = vmatprep.subr.mxu1 %v18670_v35  ;;  %v16886_v48 = vand.u32 4294901760, %v16862_v15 }
 0xc02   : > { %v6074_v33 = vsub.f32 %v5960_v63, %v16800_v57  ;;  %14200 = vmatpush3.msra.mxu1 %v16800_v57  ;;  %v6068_v53 = vand.u32 4294901760, %v6067_v4  ;;  %v6090_v30 = vsub.f32 %v16797_v26, %v6089_v45  ;;  %v6084_v51 = vand.u32 4294901760, %v6083_v22 }
 0xc03   : > { %14201 = vmatprep.subr.mxu1 %v18670_v35  ;;  %18701 = vst [vmem:[#allocation84_spill] sm:$0xff] %v16886_v48  ;;  %v16907_v63 = vand.u32 4294901760, %v6542_v54  ;;  %v1480_v54 = vld [vmem:[%s18698_s11 + $0x28] sm:$0xff] }
 0xc04   : > { %14202 = vmatpush3.msra.mxu1 %v16784_v14  ;;  %v6069_v18 = vsub.f32 %v6067_v4, %v6068_v53  ;;  %v6075_v38 = vand.u32 4294901760, %v6074_v33 }
 0xc05   : > { %14203 = vmatprep.subr.mxu1 %v18670_v35  ;;  %18703 = vst [vmem:[#allocation87_spill] sm:$0xff] %v16907_v63 }
 0xc06   : > { %14204 = vmatpush3.msra.mxu1 %v16787_v37  ;;  %v6070_v29 = vand.u32 4294901760, %v6069_v18  ;;  %v6076_v7 = vsub.f32 %v6074_v33, %v6075_v38 }
 0xc07   : > { %14219 = vmatprep.subr.mxu1 %v18670_v35  ;;  %14206 = vmatmul.mubr.f32.vlgmr.msra.gmra.mxu1 %v18673_v17  ;;  %v6091_v17 = vand.u32 4294901760, %v6090_v30  ;;  %v1482_v30 = vld [vmem:[%s18698_s11 + $0x38] sm:$0xff] }
 0xc08   : > { %14209 = vmatpush3.msra.mxu0 %v6070_v29  ;;  %14220 = vmatpush3.msra.mxu1 %v6067_v4  ;;  %v6077_v39 = vand.u32 4294901760, %v6076_v7  ;;  %v16913_v4 = vand.u32 4294901760, %v16889_v16  ;;  %v1483_v7 = vld [vmem:[%s18698_s11 + $0x40] sm:$0xff] }
 0xc09   : > { %14210 = vmatprep.subr.mxu0 %v18670_v35  ;;  %14221 = vmatprep.subr.mxu1 %v18670_v35 }
 0xc0a   : > { %14211 = vmatpush3.msra.mxu0 %v6077_v39  ;;  %14222 = vmatpush3.msra.mxu1 %v6074_v33  ;;  %18704 = vst [vmem:[#allocation72_spill] sm:$0xff] %v16913_v4  ;;  %v16972_v39 = vand.u32 4294901760, %v1483_v7 }
 0xc0b   : > { %14212 = vmatprep.subr.mxu0 %v18670_v35  ;;  %14223 = vmatprep.subr.mxu1 %v18670_v35 }
 0xc0c   : > { %14213 = vmatpush3.msra.mxu0 %v6084_v51  ;;  %14224 = vmatpush3.msra.mxu1 %v16791_v41  ;;  %v16899_v41 = vand.u32 4294901760, %v16874_v43  ;;  %v16981_v44 = vsub.f32 %v1483_v7, %v16972_v39 }
 0xc0d   : > { %14214 = vmatprep.subr.mxu0 %v18670_v35  ;;  %14225 = vmatprep.subr.mxu1 %v18670_v35 }
 0xc0e   : > { %14215 = vmatpush3.msra.mxu0 %v6091_v17  ;;  %14226 = vmatpush3.msra.mxu1 %v16797_v26  ;;  %18702 = vst [vmem:[#allocation85_spill] sm:$0xff] %v16899_v41  ;;  %v6556_v26 = vsub.f32 %v16862_v15, %v16886_v48  ;;  %v16983_v17 = vand.u32 4294901760, %v1482_v30  ;;  %v16991_v34 = vand.u32 4294901760, %v16981_v44 }
 0xc0f   : > { %14227 = vmatprep.mubr.msk.f32.mxu1 %vm15458_vm1, %v18670_v35  ;;  %14230 = vmatprep.subr.mxu0 %v18670_v35 }
 0xc10   : > { %14241 = vmatprep.subr.mxu1 %v18670_v35  ;;  %14217 = vmatmul.mubr.f32.vlgmr.msra.gmra.mxu0 %v18674_v2  ;;  %18712 = vst [vmem:[#allocation80_spill] sm:$0xff] %v16991_v34  ;;  %v16994_v58 = vsub.f32 %v1482_v30, %v16983_v17 }
 0xc11   : > { %14228 = vmatmul.mubr.f32.vlgmr.msra.gmra.mxu1 %v18675_v59  ;;  %14231 = vmatpush3.msra.mxu0 %v16793_v9  ;;  %v16850_v59 = vsub.f32 %v1489_v10, %v16834_v8  ;;  %v1481_v10 = vld [vmem:[%s18698_s11 + $0x30] sm:$0xff] }
 0xc12   : > { %14242 = vmatpush3.msra.mxu1 %v6068_v53  ;;  %14232 = vmatprep.subr.mxu0 %v18670_v35  ;;  %v16929_v53 = vand.u32 4294901760, %v6556_v26  ;;  %v6591_v26 = vsub.f32 %v16981_v44, %v16991_v34 }
 0xc13   : > { %14243 = vmatprep.subr.mxu1 %v18670_v35  ;;  %14233 = vmatpush3.msra.mxu0 %v16800_v57  ;;  %v16871_v31 = vand.u32 4294901760, %v16850_v59 }
 0xc14   : > { %14244 = vmatpush3.msra.mxu1 %v6075_v38  ;;  %14234 = vmatprep.subr.mxu0 %v18670_v35  ;;  %18707 = vst [vmem:[#allocation76_spill] sm:$0xff] %v16929_v53  ;;  %v17017_v7 = vand.u32 4294901760, %v6591_v26 }
 0xc15   : > { %14245 = vmatprep.subr.mxu1 %v18670_v35  ;;  %14235 = vmatpush3.msra.mxu0 %v16784_v14  ;;  %18700 = vst [vmem:[#allocation71_spill] sm:$0xff] %v16871_v31 }
 0xc16   : > { %14246 = vmatpush3.msra.mxu1 %v6082_v0  ;;  %14236 = vmatprep.subr.mxu0 %v18670_v35  ;;  %18715 = vst [vmem:[#allocation151_spill] sm:$0xff] %v17017_v7 }
 0xc17   : > { %14247 = vmatprep.subr.mxu1 %v18670_v35  ;;  %14237 = vmatpush3.msra.mxu0 %v16787_v37 }
 0xc18   : > { %14238 = vmatprep.mubr.msk.f32.mxu0 %vm15458_vm1, %v18670_v35  ;;  %14248 = vmatpush3.msra.mxu1 %v6089_v45  ;;  %v1484_v45 = vld [vmem:[%s18698_s11 + $0x48] sm:$0xff] }
 0xc19   : > { %14239 = vmatmul.mubr.f32.vlgmr.msra.gmra.mxu0 %v18676_v12  ;;  %14252 = vmatprep.subr.mxu0 %v18670_v35  ;;  %v6549_v12 = vsub.f32 %v16850_v59, %v16871_v31  ;;  %v16966_v29 = vand.u32 4294901760, %v1484_v45 }
 0xc1a   : > { %14249 = vmatprep.mubr.msk.f32.mxu1 %vm15458_vm1, %v18670_v35  ;;  %14253 = vmatpush3.msra.mxu0 %v16793_v9  ;;  %v16902_v9 = vsub.f32 %v1485_v19, %v16876_v3  ;;  %v16996_v19 = vand.u32 4294901760, %v1481_v10 }
 0xc1b   : > { %14250 = vmatmul.mubr.f32.vlgmr.msra.gmra.mxu1 %v18674_v2  ;;  %14254 = vmatprep.subr.mxu0 %v18670_v35  ;;  %v16970_v22 = vsub.f32 %v1484_v45, %v16966_v29  ;;  %v1479_v45 = vld [vmem:[%s18698_s11 + $0x20] sm:$0xff] }
 0xc1c   : > { %14255 = vmatpush3.msra.mxu0 %v16800_v57  ;;  %14260 = vmatprep.mubr.msk.f32.mxu0 %vm15458_vm1, %v18670_v35  ;;  %v16918_v57 = vand.u32 4294901760, %v6549_v12  ;;  %v16924_v33 = vand.u32 4294901760, %v16902_v9 }
 0xc1d   : > { %14256 = vmatprep.subr.mxu0 %v18670_v35  ;;  %14263 = vmatprep.subr.mxu1 %v18670_v35  ;;  %v16978_v51 = vand.u32 4294901760, %v16970_v22 }
 0xc1e   : > { %14257 = vmatpush3.msra.mxu0 %v16784_v14  ;;  %14264 = vmatpush3.msra.mxu1 %v16826_v6  ;;  %18705 = vst [vmem:[#allocation75_spill] sm:$0xff] %v16918_v57  ;;  %v6563_v14 = vsub.f32 %v16874_v43, %v16899_v41  ;;  %18706 = vst [vmem:[#allocation77_spill] sm:$0xff] %v16924_v33 }
 0xc1f   : > { %14258 = vmatprep.subr.mxu0 %v18670_v35  ;;  %14265 = vmatprep.subr.mxu1 %v18670_v35  ;;  %18711 = vst [vmem:[#allocation73_spill] sm:$0xff] %v16978_v51  ;;  %v6584_v42 = vsub.f32 %v16970_v22, %v16978_v51 }
 0xc20   : > { %14259 = vmatpush3.msra.mxu0 %v16787_v37  ;;  %14266 = vmatpush3.msra.mxu1 %v16834_v8  ;;  %v6570_v37 = vsub.f32 %v16889_v16, %v16913_v4  ;;  %v16937_v0 = vand.u32 4294901760, %v6563_v14  ;;  %v17006_v14 = vand.u32 4294901760, %v16994_v58 }
 0xc21   : > { %14261 = vmatmul.mubr.f32.vlgmr.msra.gmra.mxu0 %v18674_v2  ;;  %14298 = vmatprep.subr.mxu0 %v18670_v35  ;;  %v6577_v2 = vsub.f32 %v16902_v9, %v16924_v33  ;;  %v17001_v12 = vand.u32 4294901760, %v6584_v42 }
 0xc22   : > { %14299 = vmatpush3.msra.mxu0 %v16907_v63  ;;  %14267 = vmatprep.subr.mxu1 %v18670_v35  ;;  %18708 = vst [vmem:[#allocation79_spill] sm:$0xff] %v16937_v0  ;;  %v16945_v18 = vand.u32 4294901760, %v6570_v37  ;;  %18714 = vst [vmem:[#allocation83_spill] sm:$0xff] %v17006_v14  ;;  %v17009_v37 = vsub.f32 %v1481_v10, %v16996_v19  ;;  %v6598_v30 = vsub.f32 %v16994_v58, %v17006_v14 }
 0xc23   : > { %14300 = vmatprep.subr.mxu0 %v18670_v35  ;;  %14268 = vmatpush3.msra.mxu1 %v16843_v21  ;;  %v16951_v38 = vand.u32 4294901760, %v6577_v2  ;;  %18713 = vst [vmem:[#allocation82_spill] sm:$0xff] %v17001_v12  ;;  %v17012_v2 = vand.u32 4294901760, %v1480_v54  ;;  %v17024_v10 = vand.u32 4294901760, %v1479_v45 }
 0xc24   : > { %14301 = vmatpush3.msra.mxu0 %v16918_v57  ;;  %14269 = vmatprep.subr.mxu1 %v18670_v35  ;;  %18709 = vst [vmem:[#allocation78_spill] sm:$0xff] %v16945_v18  ;;  %v17022_v42 = vand.u32 4294901760, %v17009_v37  ;;  %v17033_v26 = vand.u32 4294901760, %v6598_v30  ;;  %v1477_v57 = vld [vmem:[%s18698_s11 + $0x10] sm:$0xff] }
 0xc25   : > { %14302 = vmatprep.subr.mxu0 %v18670_v35  ;;  %14270 = vmatpush3.msra.mxu1 %v16852_v55  ;;  %18710 = vst [vmem:[#allocation81_spill] sm:$0xff] %v16951_v38  ;;  %v17058_v63 = vand.u32 4294901760, %v1477_v57 }
 0xc26   : > { %14303 = vmatpush3.msra.mxu0 %v16929_v53  ;;  %14271 = vmatprep.subr.mxu1 %v18670_v35  ;;  %18716 = vst [vmem:[#allocation152_spill] sm:$0xff] %v17022_v42  ;;  %18718 = vst [vmem:[#allocation154_spill] sm:$0xff] %v17033_v26 }
 0xc27   : > { %14304 = vmatprep.subr.mxu0 %v18670_v35  ;;  %14272 = vmatpush3.msra.mxu1 %v16864_v40 }
 0xc28   : > { %14305 = vmatpush3.msra.mxu0 %v16937_v0  ;;  %14273 = vmatprep.subr.mxu1 %v18670_v35  ;;  %v17038_v0 = vsub.f32 %v1479_v45, %v17024_v10 }
 0xc29   : > { %14306 = vmatprep.subr.mxu0 %v18670_v35  ;;  %14274 = vmatpush3.msra.mxu1 %v16876_v3 }
 0xc2a   : > { %14307 = vmatpush3.msra.mxu0 %v16945_v18  ;;  %14275 = vmatprep.subr.mxu1 %v18670_v35  ;;  %v1478_v18 = vld [vmem:[%s18698_s11 + $0x18] sm:$0xff]  ;;  %18719 = vst [vmem:[#allocation155_spill] sm:$0xff] %v17038_v0 }
 0xc2b   : > { %14308 = vmatprep.subr.mxu0 %v18670_v35  ;;  %14330 = vmatprep.mubr.msk.f32.mxu0 %vm15458_vm1, %v18670_v35  ;;  %v17040_v53 = vand.u32 4294901760, %v1478_v18 }
 0xc2c   : > { %14309 = vmatpush3.msra.mxu0 %v16951_v38  ;;  %14295 = vmatprep.mubr.msk.f32.mxu1 %vm15458_vm1, %v18670_v35  ;;  %v17028_v38 = vsub.f32 %v1480_v54, %v17012_v2 }
 0xc2d   : > { %14310 = vmatprep.subr.mxu0 %v18670_v35  ;;  %14276 = vmatpush3.msra.mxu1 %v16966_v29  ;;  %v17056_v45 = vsub.f32 %v1478_v18, %v17040_v53 }
 0xc2e   : > { %14277 = vmatprep.subr.mxu1 %v18670_v35  ;;  %14311 = vmatpush3.msra.mxu0 %v17001_v12  ;;  %18717 = vst [vmem:[#allocation153_spill] sm:$0xff] %v17028_v38  ;;  %v6605_v12 = vsub.f32 %v17009_v37, %v17022_v42  ;;  %v17045_v54 = vand.u32 4294901760, %v17028_v38 }
 0xc2f   : > { %14278 = vmatpush3.msra.mxu1 %v16972_v39  ;;  %14312 = vmatprep.subr.mxu0 %v18670_v35  ;;  %18723 = vst [vmem:[#allocation159_spill] sm:$0xff] %v17056_v45  ;;  %v17070_v18 = vand.u32 4294901760, %v17056_v45 }
 0xc30   : > { %14279 = vmatprep.subr.mxu1 %v18670_v35  ;;  %14313 = vmatpush3.msra.mxu0 %v17017_v7  ;;  %18720 = vst [vmem:[#allocation156_spill] sm:$0xff] %v17045_v54  ;;  %v17050_v30 = vand.u32 4294901760, %v6605_v12  ;;  %v17053_v7 = vand.u32 4294901760, %v17038_v0  ;;  %v6612_v13 = vsub.f32 %v17028_v38, %v17045_v54 }
 0xc31   : > { %14280 = vmatpush3.msra.mxu1 %v16983_v17  ;;  %14314 = vmatprep.subr.mxu0 %v18670_v35  ;;  %18724 = vst [vmem:[#allocation160_spill] sm:$0xff] %v17070_v18  ;;  %v6626_v62 = vsub.f32 %v17056_v45, %v17070_v18 }
 0xc32   : > { %14281 = vmatprep.subr.mxu1 %v18670_v35  ;;  %14315 = vmatpush3.msra.mxu0 %v17033_v26  ;;  %18721 = vst [vmem:[#allocation157_spill] sm:$0xff] %v17050_v30  ;;  %18722 = vst [vmem:[#allocation158_spill] sm:$0xff] %v17053_v7  ;;  %v6619_v12 = vsub.f32 %v17038_v0, %v17053_v7  ;;  %v17073_v26 = vsub.f32 %v1477_v57, %v17058_v63  ;;  %v17079_v27 = vand.u32 4294901760, %v6612_v13 }
 0xc33   : > { %14282 = vmatpush3.msra.mxu1 %v16996_v19  ;;  %14316 = vmatprep.subr.mxu0 %v18670_v35  ;;  %v17091_v57 = vsub.f32 %v1476_v56, %v17075_v5  ;;  %v17095_v13 = vand.u32 4294901760, %v1475_v60 }
 0xc34   : > { %14283 = vmatprep.subr.mxu1 %v18670_v35  ;;  %14317 = vmatpush3.msra.mxu0 %v17050_v30  ;;  %18725 = vst [vmem:[#allocation161_spill] sm:$0xff] %v17073_v26  ;;  %18726 = vst [vmem:[#allocation162_spill] sm:$0xff] %v17079_v27  ;;  %v17083_v30 = vand.u32 4294901760, %v6619_v12  ;;  %v17088_v49 = vand.u32 4294901760, %v17073_v26  ;;  %v17099_v12 = vand.u32 4294901760, %v6626_v62 }
 0xc35   : > { %14284 = vmatpush3.msra.mxu1 %v17012_v2  ;;  %14318 = vmatprep.subr.mxu0 %v18670_v35  ;;  %18729 = vst [vmem:[#allocation165_spill] sm:$0xff] %v17091_v57  ;;  %v17104_v46 = vand.u32 4294901760, %v17091_v57  ;;  %v17109_v56 = vsub.f32 %v1475_v60, %v17095_v13 }
 0xc36   : > { %14285 = vmatprep.subr.mxu1 %v18670_v35  ;;  %18727 = vst [vmem:[#allocation163_spill] sm:$0xff] %v17083_v30  ;;  %18728 = vst [vmem:[#allocation164_spill] sm:$0xff] %v17088_v49  ;;  %14319 = vmatpush3.msra.mxu0 %v17079_v27  ;;  %v6633_v52 = vsub.f32 %v17073_v26, %v17088_v49 }
 0xc37   : > { %14286 = vmatpush3.msra.mxu1 %v17024_v10  ;;  %14320 = vmatprep.subr.mxu0 %v18670_v35  ;;  %18730 = vst [vmem:[#allocation166_spill] sm:$0xff] %v17099_v12  ;;  %18731 = vst [vmem:[#allocation167_spill] sm:$0xff] %v17104_v46  ;;  %v6640_v62 = vsub.f32 %v17091_v57, %v17104_v46  ;;  %v17120_v24 = vand.u32 4294901760, %v17109_v56 }
 0xc38   : > { %14287 = vmatprep.subr.mxu1 %v18670_v35  ;;  %14321 = vmatpush3.msra.mxu0 %v17083_v30  ;;  %18732 = vst [vmem:[#allocation168_spill] sm:$0xff] %v17109_v56  ;;  %v17113_v27 = vand.u32 4294901760, %v6633_v52 }
 0xc39   : > { %14288 = vmatpush3.msra.mxu1 %v17040_v53  ;;  %14322 = vmatprep.subr.mxu0 %v18670_v35  ;;  %18734 = vst [vmem:[#allocation170_spill] sm:$0xff] %v17120_v24  ;;  %v17123_v60 = vand.u32 4294901760, %v6640_v62  ;;  %v6647_v52 = vsub.f32 %v17109_v56, %v17120_v24 }
 0xc3a   : > { %14289 = vmatprep.subr.mxu1 %v18670_v35  ;;  %18733 = vst [vmem:[#allocation169_spill] sm:$0xff] %v17113_v27  ;;  %14323 = vmatpush3.msra.mxu0 %v17099_v12 }
 0xc3b   : > { %14290 = vmatpush3.msra.mxu1 %v17058_v63  ;;  %14324 = vmatprep.subr.mxu0 %v18670_v35  ;;  %18735 = vst [vmem:[#allocation171_spill] sm:$0xff] %v17123_v60  ;;  %v17130_v30 = vand.u32 4294901760, %v6647_v52 }
 0xc3c   : > { %14291 = vmatprep.subr.mxu1 %v18670_v35  ;;  %14325 = vmatpush3.msra.mxu0 %v17113_v27 }
 0xc3d   : > { %14292 = vmatpush3.msra.mxu1 %v17075_v5  ;;  %14326 = vmatprep.subr.mxu0 %v18670_v35  ;;  %18736 = vst [vmem:[#allocation172_spill] sm:$0xff] %v17130_v30 }
 0xc3e   : > { %14293 = vmatprep.subr.mxu1 %v18670_v35  ;;  %14327 = vmatpush3.msra.mxu0 %v17123_v60 }
 0xc3f   : > { %14294 = vmatpush3.msra.mxu1 %v17095_v13  ;;  %14328 = vmatprep.subr.mxu0 %v18670_v35 }
 0xc40   : > { %14333 = vmatprep.subr.mxu1 %v18670_v35  ;;  %14329 = vmatpush3.msra.mxu0 %v17130_v30 }
 0xc41   : > { %14368 = vmatprep.subr.mxu0 %v18670_v35 }
 0xcc7   : > { %v6037_v12 = vpop.f32.mrf.mxu1 }
 0xcc9   : > { %v14207_v62 = vpop.f32.mrf.mxu1 }
 0xcd0   : > { %v6128_v32 = vpop.f32.mrf.mxu0 }
 0xcd1   : > { %v6208_v36 = vpop.f32.mrf.mxu1  ;;  %v6129_v50 = vadd.f32 %v6128_v32, %v6037_v12 }
 0xcd2   : > { %v14218_v27 = vpop.f32.mrf.mxu0 }
 0xcd3   : > { %v14229_v61 = vpop.f32.mrf.mxu1  ;;  %v6209_v47 = vadd.f32 %v6208_v36, %v6129_v50 }
 0xcd9   : > { %v6285_v20 = vpop.f32.mrf.mxu0 }
 0xcda   : > { %v6286_v60 = vadd.f32 %v6285_v20, %v6209_v47  ;;  %v18737_v20 = vld [vmem:[#allocation160_spill] sm:$0xff] }
 0xcdb   : > { %v6368_v23 = vpop.f32.mrf.mxu1  ;;  %v14240_v28 = vpop.f32.mrf.mxu0 }
 0xcdc   : > { %v6369_v25 = vadd.f32 %v6368_v23, %v6286_v60  ;;  %v18741_v60 = vld [vmem:[#allocation38_spill] sm:$0xff] }
 0xcdd   : > { %v14251_v52 = vpop.f32.mrf.mxu1  ;;  %v2152_v62 = vmul.f32 0.25, %v18741_v60  ;;  %v7146_v60 = vld [vmem:[%s18742_s16 + $0xe8] sm:$0xff] }
 0xce1   : > { %v6443_v24 = vpop.f32.mrf.mxu0 }
 0xce2   : > { %v6444_v46 = vadd.f32 %v6443_v24, %v6369_v25  ;;  %v18738_v24 = vld [vmem:[#allocation164_spill] sm:$0xff]  ;;  %v18740_v25 = vld [vmem:[#allocation170_spill] sm:$0xff] }
 0xce3   : > { %v14262_v49 = vpop.f32.mrf.mxu0 }
 0xce4   : > { %v17135_v30 = vand.u32 4294901760, %v6444_v46  ;;  %v18739_v49 = vld [vmem:[#allocation167_spill] sm:$0xff] }
 0xce6   : > { %v17138_v18 = vsub.f32 %v6444_v46, %v17135_v30  ;;  %14331 = vmatmul.mubr.f32.vlgmr.msra.gmra.mxu0 %v17135_v30 }
 0xce7   : > { %14369 = vmatpush3.msra.mxu0 %v16826_v6  ;;  %14400 = vmatprep.mubr.msk.f32.mxu0 %vm15458_vm1, %v18670_v35 }
 0xce8   : > { %v6530_v32 = vand.u32 4294901760, %v17138_v18  ;;  %14370 = vmatprep.subr.mxu0 %v18670_v35 }
 0xce9   : > { %14371 = vmatpush3.msra.mxu0 %v16834_v8 }
 0xcea   : > { %v6531_v36 = vsub.f32 %v17138_v18, %v6530_v32  ;;  %14372 = vmatprep.subr.mxu0 %v18670_v35 }
 0xceb   : > { %14373 = vmatpush3.msra.mxu0 %v16843_v21 }
 0xcec   : > { %14374 = vmatprep.subr.mxu0 %v18670_v35  ;;  %v6532_v47 = vand.u32 4294901760, %v6531_v36 }
 0xced   : > { %14375 = vmatpush3.msra.mxu0 %v16852_v55 }
 0xcee   : > { %14376 = vmatprep.subr.mxu0 %v18670_v35  ;;  %14296 = vmatmul.mubr.f32.vlgmr.msra.gmra.mxu1 %v6532_v47 }
 0xcef   : > { %14334 = vmatpush3.msra.mxu1 %v16841_v11  ;;  %14377 = vmatpush3.msra.mxu0 %v16864_v40 }
 0xcf0   : > { %14335 = vmatprep.subr.mxu1 %v18670_v35  ;;  %14378 = vmatprep.subr.mxu0 %v18670_v35 }
 0xcf1   : > { %14336 = vmatpush3.msra.mxu1 %v16850_v59  ;;  %14379 = vmatpush3.msra.mxu0 %v16876_v3 }
 0xcf2   : > { %14337 = vmatprep.subr.mxu1 %v18670_v35  ;;  %14380 = vmatprep.subr.mxu0 %v18670_v35 }
 0xcf3   : > { %14338 = vmatpush3.msra.mxu1 %v16862_v15  ;;  %14381 = vmatpush3.msra.mxu0 %v16966_v29 }
 0xcf4   : > { %14339 = vmatprep.subr.mxu1 %v18670_v35  ;;  %14382 = vmatprep.subr.mxu0 %v18670_v35 }
 0xcf5   : > { %14340 = vmatpush3.msra.mxu1 %v16874_v43  ;;  %14383 = vmatpush3.msra.mxu0 %v16972_v39 }
 0xcf6   : > { %14341 = vmatprep.subr.mxu1 %v18670_v35  ;;  %14384 = vmatprep.subr.mxu0 %v18670_v35 }
 0xcf7   : > { %14342 = vmatpush3.msra.mxu1 %v16889_v16  ;;  %14385 = vmatpush3.msra.mxu0 %v16983_v17 }
 0xcf8   : > { %14343 = vmatprep.subr.mxu1 %v18670_v35  ;;  %14386 = vmatprep.subr.mxu0 %v18670_v35 }
 0xcf9   : > { %14344 = vmatpush3.msra.mxu1 %v16902_v9  ;;  %14387 = vmatpush3.msra.mxu0 %v16996_v19 }
 0xcfa   : > { %14345 = vmatprep.subr.mxu1 %v18670_v35  ;;  %14388 = vmatprep.subr.mxu0 %v18670_v35 }
 0xcfb   : > { %14346 = vmatpush3.msra.mxu1 %v16970_v22  ;;  %14389 = vmatpush3.msra.mxu0 %v17012_v2 }
 0xcfc   : > { %14347 = vmatprep.subr.mxu1 %v18670_v35  ;;  %14390 = vmatprep.subr.mxu0 %v18670_v35 }
 0xcfd   : > { %14348 = vmatpush3.msra.mxu1 %v16981_v44  ;;  %14391 = vmatpush3.msra.mxu0 %v17024_v10 }
 0xcfe   : > { %14349 = vmatprep.subr.mxu1 %v18670_v35  ;;  %14392 = vmatprep.subr.mxu0 %v18670_v35 }
 0xcff   : > { %14350 = vmatpush3.msra.mxu1 %v16994_v58  ;;  %14393 = vmatpush3.msra.mxu0 %v17040_v53 }
 0xd00   : > { %14351 = vmatprep.subr.mxu1 %v18670_v35  ;;  %14394 = vmatprep.subr.mxu0 %v18670_v35 }
 0xd01   : > { %14352 = vmatpush3.msra.mxu1 %v17009_v37  ;;  %14395 = vmatpush3.msra.mxu0 %v17058_v63 }
 0xd02   : > { %14353 = vmatprep.subr.mxu1 %v18670_v35  ;;  %14396 = vmatprep.subr.mxu0 %v18670_v35 }
 0xd03   : > { %14354 = vmatpush3.msra.mxu1 %v17028_v38  ;;  %14397 = vmatpush3.msra.mxu0 %v17075_v5 }
 0xd04   : > { %14355 = vmatprep.subr.mxu1 %v18670_v35  ;;  %14398 = vmatprep.subr.mxu0 %v18670_v35 }
 0xd05   : > { %14356 = vmatpush3.msra.mxu1 %v17038_v0  ;;  %14399 = vmatpush3.msra.mxu0 %v17095_v13 }
 0xd06   : > { %14357 = vmatprep.subr.mxu1 %v18670_v35  ;;  %14401 = vmatmul.mubr.f32.vlgmr.msra.gmra.mxu0 %v6530_v32 }
 0xd07   : > { %14438 = vmatprep.subr.mxu0 %v18670_v35  ;;  %14358 = vmatpush3.msra.mxu1 %v17056_v45 }
 0xd08   : > { %14439 = vmatpush3.msra.mxu0 %v16826_v6  ;;  %14359 = vmatprep.subr.mxu1 %v18670_v35 }
 0xd09   : > { %14440 = vmatprep.subr.mxu0 %v18670_v35  ;;  %14360 = vmatpush3.msra.mxu1 %v17073_v26 }
 0xd0a   : > { %14441 = vmatpush3.msra.mxu0 %v16834_v8  ;;  %14361 = vmatprep.subr.mxu1 %v18670_v35 }
 0xd0b   : > { %14442 = vmatprep.subr.mxu0 %v18670_v35  ;;  %14362 = vmatpush3.msra.mxu1 %v17091_v57 }
 0xd0c   : > { %14443 = vmatpush3.msra.mxu0 %v16843_v21  ;;  %14363 = vmatprep.subr.mxu1 %v18670_v35 }
 0xd0d   : > { %14444 = vmatprep.subr.mxu0 %v18670_v35  ;;  %14364 = vmatpush3.msra.mxu1 %v17109_v56 }
 0xd0e   : > { %14365 = vmatprep.mubr.msk.f32.mxu1 %vm15458_vm1, %v18670_v35  ;;  %14445 = vmatpush3.msra.mxu0 %v16852_v55 }
 0xd0f   : > { %14366 = vmatmul.mubr.f32.vlgmr.msra.gmra.mxu1 %v17138_v18  ;;  %14403 = vmatprep.subr.mxu1 %v18670_v35 }
 0xd10   : > { %14446 = vmatprep.subr.mxu0 %v18670_v35  ;;  %14404 = vmatpush3.msra.mxu1 %v16859_v1 }
 0xd11   : > { %14447 = vmatpush3.msra.mxu0 %v16864_v40  ;;  %14405 = vmatprep.subr.mxu1 %v18670_v35 }
 0xd12   : > { %14448 = vmatprep.subr.mxu0 %v18670_v35  ;;  %14406 = vmatpush3.msra.mxu1 %v16871_v31 }
 0xd13   : > { %14449 = vmatpush3.msra.mxu0 %v16876_v3  ;;  %14407 = vmatprep.subr.mxu1 %v18670_v35 }
 0xd14   : > { %14450 = vmatprep.subr.mxu0 %v18670_v35  ;;  %14408 = vmatpush3.msra.mxu1 %v16886_v48 }
 0xd15   : > { %14451 = vmatpush3.msra.mxu0 %v16966_v29  ;;  %14409 = vmatprep.subr.mxu1 %v18670_v35 }
 0xd16   : > { %14452 = vmatprep.subr.mxu0 %v18670_v35  ;;  %14410 = vmatpush3.msra.mxu1 %v16899_v41 }
 0xd17   : > { %14453 = vmatpush3.msra.mxu0 %v16972_v39  ;;  %14411 = vmatprep.subr.mxu1 %v18670_v35 }
 0xd18   : > { %14454 = vmatprep.subr.mxu0 %v18670_v35  ;;  %14412 = vmatpush3.msra.mxu1 %v16913_v4 }
 0xd19   : > { %14455 = vmatpush3.msra.mxu0 %v16983_v17  ;;  %14413 = vmatprep.subr.mxu1 %v18670_v35 }
 0xd1a   : > { %14456 = vmatprep.subr.mxu0 %v18670_v35  ;;  %14414 = vmatpush3.msra.mxu1 %v16924_v33 }
 0xd1b   : > { %14457 = vmatpush3.msra.mxu0 %v16996_v19  ;;  %14415 = vmatprep.subr.mxu1 %v18670_v35 }
 0xd1c   : > { %14458 = vmatprep.subr.mxu0 %v18670_v35  ;;  %14416 = vmatpush3.msra.mxu1 %v16978_v51 }
 0xd1d   : > { %14459 = vmatpush3.msra.mxu0 %v17012_v2  ;;  %14417 = vmatprep.subr.mxu1 %v18670_v35 }
 0xd1e   : > { %14460 = vmatprep.subr.mxu0 %v18670_v35  ;;  %14418 = vmatpush3.msra.mxu1 %v16991_v34 }
 0xd1f   : > { %14461 = vmatpush3.msra.mxu0 %v17024_v10  ;;  %14419 = vmatprep.subr.mxu1 %v18670_v35 }
 0xd20   : > { %14462 = vmatprep.subr.mxu0 %v18670_v35  ;;  %14420 = vmatpush3.msra.mxu1 %v17006_v14  ;;  %v18745_v14 = vmov 0  }
 0xd21   : > { %14463 = vmatpush3.msra.mxu0 %v17040_v53  ;;  %14421 = vmatprep.subr.mxu1 %v18670_v35 }
 0xd22   : > { %14464 = vmatprep.subr.mxu0 %v18670_v35  ;;  %14422 = vmatpush3.msra.mxu1 %v17022_v42  ;;  %v7124_v42 = vld [vmem:[%s18742_s16 + $0x38] sm:$0xff] }
 0xd23   : > { %14465 = vmatpush3.msra.mxu0 %v17058_v63  ;;  %14423 = vmatprep.subr.mxu1 %v18670_v35 }
 0xd24   : > { %14466 = vmatprep.subr.mxu0 %v18670_v35  ;;  %14424 = vmatpush3.msra.mxu1 %v17045_v54  ;;  %v7120_v54 = vld [vmem:[%s18742_s16 + $0x18] sm:$0xff] }
 0xd25   : > { %14467 = vmatpush3.msra.mxu0 %v17075_v5  ;;  %14425 = vmatprep.subr.mxu1 %v18670_v35 }
 0xd26   : > { %14468 = vmatprep.subr.mxu0 %v18670_v35  ;;  %14426 = vmatpush3.msra.mxu1 %v17053_v7  ;;  %v7123_v7 = vld [vmem:[%s18742_s16 + $0x30] sm:$0xff] }
 0xd27   : > { %14469 = vmatpush3.msra.mxu0 %v17095_v13  ;;  %14470 = vmatprep.mubr.msk.f32.mxu0 %vm15458_vm1, %v18670_v35 }
 0xd28   : > { %14427 = vmatprep.subr.mxu1 %v18670_v35  ;;  %14471 = vmatmul.mubr.f32.vlgmr.msra.gmra.mxu0 %v17135_v30 }
 0xd29   : > { %14428 = vmatpush3.msra.mxu1 %v18737_v20  ;;  %14435 = vmatprep.mubr.msk.f32.mxu1 %vm15458_vm1, %v18670_v35 }
 0xd2a   : > { %14429 = vmatprep.subr.mxu1 %v18670_v35 }
 0xd2b   : > { %14430 = vmatpush3.msra.mxu1 %v18738_v24 }
 0xd2c   : > { %14431 = vmatprep.subr.mxu1 %v18670_v35 }
 0xd2d   : > { %14432 = vmatpush3.msra.mxu1 %v18739_v49 }
 0xd2e   : > { %14433 = vmatprep.subr.mxu1 %v18670_v35 }
 0xd2f   : > { %14434 = vmatpush3.msra.mxu1 %v18740_v25 }
 0xd30   : > { %14436 = vmatmul.mubr.f32.vlgmr.msra.gmra.mxu1 %v17135_v30 }
 0xda6   : > { %v6685_v28 = vpop.f32.mrf.mxu0 }
 0xda8   : > { %v14332_v23 = vpop.f32.mrf.mxu0 }
 0xdae   : > { %v6534_v50 = vpop.f32.mrf.mxu1 }
 0xdaf   : > { %v6535_v52 = vadd.f32 %v6534_v50, %v2152_v62 }
 0xdb0   : > { %v14297_v61 = vpop.f32.mrf.mxu1 }
 0xdb1   : > { %v6686_v36 = vadd.f32 %v6685_v28, %v6535_v52 }
 0xdc6   : > { %v6878_v46 = vpop.f32.mrf.mxu0 }
 0xdc8   : > { %v14402_v27 = vpop.f32.mrf.mxu0 }
 0xdcf   : > { %v6789_v18 = vpop.f32.mrf.mxu1 }
 0xdd0   : > { %v6790_v49 = vadd.f32 %v6789_v18, %v6686_v36  ;;  %v7137_v36 = vld [vmem:[%s18742_s16 + $0xa0] sm:$0xff] }
 0xdd1   : > { %v14367_v12 = vpop.f32.mrf.mxu1 }
 0xdd2   : > { %v6879_v25 = vadd.f32 %v6878_v46, %v6790_v49  ;;  %v7141_v46 = vld [vmem:[%s18742_s16 + $0xc0] sm:$0xff] }
 0xde8   : > { %v7084_v32 = vpop.f32.mrf.mxu0 }
 0xdea   : > { %v14472_v47 = vpop.f32.mrf.mxu0 }
 0xdeb   : > { %v7134_v47 = vld [vmem:[%s18742_s16 + $0x88] sm:$0xff] }
 0xdf0   : > { %v6997_v30 = vpop.f32.mrf.mxu1 }
 0xdf1   : > { %v6998_v23 = vadd.f32 %v6997_v30, %v6879_v25  ;;  %v7142_v25 = vld [vmem:[%s18742_s16 + $0xc8] sm:$0xff] }
 0xdf2   : > { %v14437_v24 = vpop.f32.mrf.mxu1  ;;  %v12397_v52 = vcombine.low %v7142_v25, %v7146_v60 }
 0xdf3   : > { %v7085_v61 = vadd.f32 %v7084_v32, %v6998_v23  ;;  %v7145_v24 = vld [vmem:[%s18742_s16 + $0xe0] sm:$0xff]  ;;  %v12398_v32 = vcombine.high %v7142_v25, %v7146_v60  ;;  %v7138_v23 = vld [vmem:[%s18742_s16 + $0xa8] sm:$0xff] }
 0xdf4   : > { %v12396_v18 = vcombine.high %v7141_v46, %v7145_v24  ;;  %v12395_v62 = vcombine.low %v7141_v46, %v7145_v24  ;;  %v7126_v46 = vld [vmem:[%s18742_s16 + $0x48] sm:$0xff] }
 0xdf5   : > { %v7090_v27 = vsel %vm2155_vm3, %v7085_v61, 0.0  ;;  %7404 = vmatprep.subr.bf16.mxu0 %v12398_v32  ;;  %v7130_v25 = vld [vmem:[%s18742_s16 + $0x68] sm:$0xff]  ;;  %v7121_v32 = vld [vmem:[%s18742_s16 + $0x20] sm:$0xff] }
 0xdf6   : > { %7091 = vadd.xlane.f32.xlu1 %v7090_v27  ;;  %7363 = vmatprep.subr.bf16.mxu1 %v12396_v18  ;;  %v12389_v27 = vcombine.low %v7134_v47, %v7138_v23  ;;  %v12381_v60 = vcombine.low %v7126_v46, %v7130_v25 }
 0xdf7   : > { %7364 = vmatpush1.bf16.msra.mxu1 %v12395_v62  ;;  %7405 = vmatpush1.bf16.msra.mxu0 %v12397_v52  ;;  %v12382_v62 = vcombine.high %v7126_v46, %v7130_v25  ;;  %v7117_v52 = vld [vmem:[%s18742_s16] sm:$0xff]  ;;  %v7148_v25 = vld [vmem:[%s18742_s16 + $0xf8] sm:$0xff] }
 0xe7f   : > { %v7092_v12 = vpop.xlane.xlu1 %7091 }
 0xe80   : > { %v7093_v20 = vmul.f32 0.015625, %v7092_v12  ;;  %v12390_v12 = vcombine.high %v7134_v47, %v7138_v23  ;;  %v12372_v47 = vcombine.high %v7117_v52, %v7121_v32  ;;  %v18474_v23 = vmov 0  }
 0xe81   : > { %7387 = vmatprep.mubr.bf16.mxu1 %v18474_v23  ;;  %7428 = vmatprep.mubr.bf16.mxu0 %v18474_v23  ;;  %v7119_v23 = vld [vmem:[%s18742_s16 + $0x10] sm:$0xff] }
 0xe82   : > { %v17282_v50 = vsub.f32 %v7085_v61, %v7093_v20  ;;  %v7133_v20 = vld [vmem:[%s18742_s16 + $0x80] sm:$0xff]  ;;  %7406 = vmatprep.subr.bf16.mxu0 %v12390_v12 }
 0xe83   : > { %v12388_v30 = vcombine.high %v7133_v20, %v7137_v36  ;;  %v12387_v61 = vcombine.low %v7133_v20, %v7137_v36  ;;  %7407 = vmatpush1.bf16.msra.mxu0 %v12389_v27  ;;  %v7118_v20 = vld [vmem:[%s18742_s16 + $0x8] sm:$0xff]  ;;  %v12371_v36 = vcombine.low %v7117_v52, %v7121_v32  ;;  %v7147_v27 = vld [vmem:[%s18742_s16 + $0xf0] sm:$0xff] }
 0xe84   : > { %v7095_v28 = vmul.f32 %v17282_v50, %v17282_v50  ;;  %7408 = vmatprep.subr.bf16.mxu0 %v12382_v62 }
 0xe85   : > { %7365 = vmatprep.subr.bf16.mxu1 %v12388_v30  ;;  %v7122_v30 = vld [vmem:[%s18742_s16 + $0x28] sm:$0xff] }
 0xe86   : > { %v7096_v49 = vsel %vm2155_vm3, %v7095_v28, 0.0  ;;  %7366 = vmatpush1.bf16.msra.mxu1 %v12387_v61  ;;  %v7125_v28 = vld [vmem:[%s18742_s16 + $0x40] sm:$0xff]  ;;  %v7143_v61 = vld [vmem:[%s18742_s16 + $0xd0] sm:$0xff]  ;;  %v12373_v12 = vcombine.low %v7118_v20, %v7122_v30 }
 0xe87   : > { %7097 = vadd.xlane.f32.xlu0 %v7096_v49  ;;  %v7129_v49 = vld [vmem:[%s18742_s16 + $0x60] sm:$0xff]  ;;  %7409 = vmatpush1.bf16.msra.mxu0 %v12381_v60  ;;  %v12400_v46 = vcombine.high %v7143_v61, %v7147_v27 }
 0xe88   : > { %v12380_v24 = vcombine.high %v7125_v28, %v7129_v49  ;;  %v12379_v18 = vcombine.low %v7125_v28, %v7129_v49  ;;  %v12374_v28 = vcombine.high %v7118_v20, %v7122_v30  ;;  %v12399_v49 = vcombine.low %v7143_v61, %v7147_v27  ;;  %v12370_v61 = vld [vmem:[%s18744_s18] ss:$0 sm:$0xff]  ;;  %s18756_s18 = sld [smem:[#allocation22_spill]] }
 0xe8a   : > { %7367 = vmatprep.subr.bf16.mxu1 %v12380_v24  ;;  %v7144_v24 = vld [vmem:[%s18742_s16 + $0xd8] sm:$0xff]  ;;  %7410 = vmatprep.subr.bf16.mxu0 %v12374_v28  ;;  %v7135_v28 = vld [vmem:[%s18742_s16 + $0x90] sm:$0xff] }
 0xe8b   : > { %7368 = vmatpush1.bf16.msra.mxu1 %v12379_v18  ;;  %v12401_v18 = vcombine.low %v7144_v24, %v7148_v25  ;;  %v12402_v60 = vcombine.high %v7144_v24, %v7148_v25  ;;  %7411 = vmatpush1.bf16.msra.mxu0 %v12373_v12  ;;  %v7136_v24 = vld [vmem:[%s18742_s16 + $0x98] sm:$0xff] }
 0xe8c   : > { %7369 = vmatprep.subr.bf16.mxu1 %v12372_v47  ;;  %v12369_v47 = vld [vmem:[%s18743_s15] ss:$0 sm:$0xff]  ;;  %v7140_v12 = vld [vmem:[%s18742_s16 + $0xb8] sm:$0xff]  ;;  %s18755_s15 = sld [smem:[#allocation17_spill]] }
 0xe8d   : > { %7486 = vmatprep.subr.bf16.mxu0 %v12402_v60 }
 0xe8f   : > { %7370 = vmatpush1.bf16.msra.mxu1 %v12371_v36  ;;  %v7139_v36 = vld [vmem:[%s18742_s16 + $0xb0] sm:$0xff] }
 0xe90   : > { %7445 = vmatprep.subr.bf16.mxu1 %v12400_v46  ;;  %v12392_v60 = vcombine.high %v7135_v28, %v7139_v36 }
 0xf10   : > { %v7098_v62 = vpop.xlane.xlu0 %7097 }
 0xf11   : > { %v7099_v52 = vmul.f32 0.015625, %v7098_v62  ;;  %v12394_v62 = vcombine.high %v7136_v24, %v7140_v12 }
 0xf13   : > { %v7100_v32 = vadd.f32 1e-05, %v7099_v52  ;;  %v7127_v52 = vld [vmem:[%s18742_s16 + $0x50] sm:$0xff] }
 0xf15   : > { %15349 = vrsqrt.f32 %v7100_v32  ;;  %v7131_v32 = vld [vmem:[%s18742_s16 + $0x70] sm:$0xff] }
 0xf22   : > { %v15350_v20 = vpop.eup %15349 }
 0xf23   : > { %v7102_v30 = vmul.f32 %v15350_v20, %v17282_v50  ;;  %v7128_v50 = vld [vmem:[%s18742_s16 + $0x58] sm:$0xff] }
 0xf24   : > { %v7132_v20 = vld [vmem:[%s18742_s16 + $0x78] sm:$0xff] }
 0xf25   : > { %v7109_v27 = vmul.f32 %v12369_v47, %v7102_v30  ;;  %v12391_v47 = vcombine.low %v7135_v28, %v7139_v36  ;;  %v12393_v30 = vcombine.low %v7136_v24, %v7140_v12  ;;  %v12376_v28 = vcombine.high %v7119_v23, %v7123_v7 }
 0xf26   : > { %v12378_v36 = vcombine.high %v7120_v54, %v7124_v42  ;;  %v12375_v24 = vcombine.low %v7119_v23, %v7123_v7  ;;  %v12377_v12 = vcombine.low %v7120_v54, %v7124_v42  ;;  %v15173_v7 = vld [vmem:[%s18746_s23 + $0x30] sm:$0xff]   ;;  %v15175_v54 = vld [vmem:[%s18746_s23 + $0x68] sm:$0xff]  }
 0xf27   : > { %v17316_v46 = vadd.f32 %v12370_v61, %v7109_v27  ;;  %v12384_v61 = vcombine.high %v7127_v52, %v7131_v32  ;;  %v12386_v27 = vcombine.high %v7128_v50, %v7132_v20  ;;  %v15174_v42 = vld [vmem:[%s18746_s23 + $0xb0] sm:$0xff]   ;;  %v15176_v23 = vld [vmem:[%s18746_s23 + $0xe8] sm:$0xff]  }
 0xf29   : > { %v7149_v25 = vpack.c.bf16 %v17316_v46, %v17316_v46 }
 0xf2b   : > { %12403 = vmatmul.mubr.msk.bf16.vlgmr.msra.gmra.mxu1 %vm2155_vm3, %v7149_v25  ;;  %12404 = vmatmul.mubr.msk.bf16.vlgmr.msra.gmra.mxu0 %vm2155_vm3, %v7149_v25 }
 0xf2c   : > { %7446 = vmatpush1.bf16.msra.mxu1 %v12399_v49  ;;  %7487 = vmatpush1.bf16.msra.mxu0 %v12401_v18  ;;  %v12383_v49 = vcombine.low %v7127_v52, %v7131_v32  ;;  %v12385_v18 = vcombine.low %v7128_v50, %v7132_v20  ;;  %v15169_v52 = vld [vmem:[%s18746_s23 + $0x38] sm:$0xff]   ;;  %v15171_v50 = vld [vmem:[%s18746_s23 + $0x70] sm:$0xff]  }
 0xf2d   : > { %7447 = vmatprep.subr.bf16.mxu1 %v12392_v60  ;;  %7488 = vmatprep.subr.bf16.mxu0 %v12394_v62  ;;  %v15167_v60 = vld [vmem:[%s18746_s23 + $0x78] sm:$0xff]   ;;  %v15172_v20 = vld [vmem:[%s18746_s23 + $0xf0] sm:$0xff]  }
 0xf2e   : > { %7469 = vmatprep.mubr.bf16.mxu1 %v18745_v14  ;;  %7510 = vmatprep.mubr.bf16.mxu0 %v18745_v14  ;;  %v15168_v62 = vld [vmem:[%s18746_s23 + $0xf8] sm:$0xff]  }
 0xf2f   : > { %v15170_v32 = vld [vmem:[%s18746_s23 + $0xb8] sm:$0xff]  }
 0xf30   : > { %7448 = vmatpush1.bf16.msra.mxu1 %v12391_v47  ;;  %7489 = vmatpush1.bf16.msra.mxu0 %v12393_v30  ;;  %v15177_v47 = vld [vmem:[%s18746_s23 + $0x28] sm:$0xff]  }
 0xf31   : > { %7449 = vmatprep.subr.bf16.mxu1 %v12384_v61  ;;  %7490 = vmatprep.subr.bf16.mxu0 %v12386_v27  ;;  %v15178_v30 = vld [vmem:[%s18746_s23 + $0xa8] sm:$0xff]   ;;  %v15180_v61 = vld [vmem:[%s18746_s23 + $0xe0] sm:$0xff]  }
 0xf32   : > { %v15181_v27 = vld [vmem:[%s18746_s23 + $0x20] sm:$0xff]  }
 0xf34   : > { %7450 = vmatpush1.bf16.msra.mxu1 %v12383_v49  ;;  %7491 = vmatpush1.bf16.msra.mxu0 %v12385_v18  ;;  %v15182_v49 = vld [vmem:[%s18746_s23 + $0xa0] sm:$0xff]   ;;  %v15183_v18 = vld [vmem:[%s18746_s23 + $0x58] sm:$0xff]  }
 0xf35   : > { %7451 = vmatprep.subr.bf16.mxu1 %v12376_v28  ;;  %7492 = vmatprep.subr.bf16.mxu0 %v12378_v36  ;;  %v15184_v28 = vld [vmem:[%s18746_s23 + $0xd8] sm:$0xff]  }
 0xf36   : > { %v15185_v36 = vld [vmem:[%s18746_s23 + $0x18] sm:$0xff]  }
 0xf38   : > { %7452 = vmatpush1.bf16.msra.mxu1 %v12375_v24  ;;  %7493 = vmatpush1.bf16.msra.mxu0 %v12377_v12  ;;  %v15186_v24 = vld [vmem:[%s18746_s23 + $0x98] sm:$0xff]   ;;  %v15187_v12 = vld [vmem:[%s18746_s23 + $0x50] sm:$0xff]  }
 0xf39   : > { %13078 = vmatprep.subr.bf16.mxu1 %v15167_v60  ;;  %13100 = vmatprep.subr.bf16.mxu0 %v15168_v62  ;;  %v15188_v60 = vld [vmem:[%s18746_s23 + $0xd0] sm:$0xff]  }
 0xf3a   : > { %v15189_v62 = vld [vmem:[%s18746_s23 + $0x10] sm:$0xff]  }
 0xf3b   : > { %12405 = vmatmul.mubr.msk.bf16.vlgmr.msra.gmra.mxu1 %vm2155_vm3, %v7149_v25  ;;  %12406 = vmatmul.mubr.msk.bf16.vlgmr.msra.gmra.mxu0 %vm2155_vm3, %v7149_v25  ;;  %v15179_v25 = vld [vmem:[%s18746_s23 + $0x60] sm:$0xff]  }
 0xf3c   : > { %13079 = vmatpush3.bf16.msra.mxu1 %v15169_v52  ;;  %13101 = vmatpush3.bf16.msra.mxu0 %v15170_v32  ;;  %v15190_v52 = vld [vmem:[%s18746_s23 + $0x90] sm:$0xff]   ;;  %v15191_v32 = vld [vmem:[%s18746_s23 + $0x48] sm:$0xff]  }
 0xf3d   : > { %13080 = vmatprep.subr.bf16.mxu1 %v15171_v50  ;;  %13102 = vmatprep.subr.bf16.mxu0 %v15172_v20  ;;  %v15192_v50 = vld [vmem:[%s18746_s23 + $0xc8] sm:$0xff]  }
 0xf3e   : > { %v15193_v20 = vld [vmem:[%s18746_s23 + $0x8] sm:$0xff]  }
 0xf40   : > { %13081 = vmatpush3.bf16.msra.mxu1 %v15173_v7  ;;  %13103 = vmatpush3.bf16.msra.mxu0 %v15174_v42  ;;  %v15194_v7 = vld [vmem:[%s18746_s23 + $0x88] sm:$0xff]   ;;  %v15195_v42 = vld [vmem:[%s18746_s23 + $0x40] sm:$0xff]  }
 0xf41   : > { %13082 = vmatprep.subr.bf16.mxu1 %v15175_v54  ;;  %13104 = vmatprep.subr.bf16.mxu0 %v15176_v23  ;;  %v15196_v54 = vld [vmem:[%s18746_s23 + $0xc0] sm:$0xff]  }
 0xf42   : > { %v15197_v23 = vld [vmem:[%s18746_s23] sm:$0xff]  }
 0xf44   : > { %13083 = vmatpush3.bf16.msra.mxu1 %v15177_v47  ;;  %13105 = vmatpush3.bf16.msra.mxu0 %v15178_v30  ;;  %v15198_v47 = vld [vmem:[%s18746_s23 + $0x80] sm:$0xff]   ;;  %v15199_v30 = vld [vmem:[%s18746_s23 + $0x178] sm:$0xff]  }
 0xf45   : > { %13084 = vmatprep.subr.bf16.mxu1 %v15179_v25  ;;  %13106 = vmatprep.subr.bf16.mxu0 %v15180_v61  ;;  %v15200_v25 = vld [vmem:[%s18746_s23 + $0x1f8] sm:$0xff]   ;;  %v7152_v61 = vlaneseq }
 0xf48   : > { %13085 = vmatpush3.bf16.msra.mxu1 %v15181_v27  ;;  %13107 = vmatpush3.bf16.msra.mxu0 %v15182_v49  ;;  %v17368_v27 = vshrl.u32 %v7152_v61, 7 }
 0xf49   : > { %13086 = vmatprep.subr.bf16.mxu1 %v15183_v18  ;;  %13108 = vmatprep.subr.bf16.mxu0 %v15184_v28  ;;  %v7150_v28 = vld [vmem:[%s18747_s22] sm:$0xff]  ;;  %s18757_s22 = sld [smem:[#allocation20_spill]] }
 0xf4a   : > { %18748 = vst [vmem:[#allocation38_spill] sm:$0xff] %v17368_v27  ;;  %v17371_v49 = vsub.s32 0, %v17368_v27  ;;  %v18481_v18 = vsub.s32 2, %v17368_v27  ;;  %v18496_v4 = vsub.s32 6, %v17368_v27 }
 0xf4c   : > { %13087 = vmatpush3.bf16.msra.mxu1 %v15185_v36  ;;  %13109 = vmatpush3.bf16.msra.mxu0 %v15186_v24  ;;  %v18486_v36 = vsub.s32 1, %v17368_v27  ;;  %v18485_v24 = vsub.s32 3, %v17368_v27 }
 0xf4d   : > { %13088 = vmatprep.subr.bf16.mxu1 %v15187_v12  ;;  %13110 = vmatprep.subr.bf16.mxu0 %v15188_v60  ;;  %v7155_v12 = vrot.slane %v7150_v28, %v17371_v49  ;;  %v7163_v60 = vrot.slane %v7150_v28, %v18481_v18 }
 0xf50   : > { %13089 = vmatpush3.bf16.msra.mxu1 %v15189_v62  ;;  %13111 = vmatpush3.bf16.msra.mxu0 %v15190_v52 }
 0xf51   : > { %13090 = vmatprep.subr.bf16.mxu1 %v15191_v32  ;;  %13112 = vmatprep.subr.bf16.mxu0 %v15192_v50  ;;  %v7159_v32 = vrot.slane %v7150_v28, %v18486_v36  ;;  %v7167_v50 = vrot.slane %v7150_v28, %v18485_v24  ;;  %v18489_v24 = vsub.s32 5, %v17368_v27 }
 0xf54   : > { %13091 = vmatpush3.bf16.msra.mxu1 %v15193_v20  ;;  %13113 = vmatpush3.bf16.msra.mxu0 %v15194_v7 }
 0xf55   : > { %13092 = vmatprep.subr.bf16.mxu1 %v15195_v42  ;;  %13114 = vmatprep.subr.bf16.mxu0 %v15196_v54 }
 0xf58   : > { %13093 = vmatpush3.bf16.msra.mxu1 %v15197_v23  ;;  %13115 = vmatpush3.bf16.msra.mxu0 %v15198_v47 }
 0xf59   : > { %13122 = vmatprep.subr.bf16.mxu1 %v15199_v30  ;;  %13144 = vmatprep.subr.bf16.mxu0 %v15200_v25 }
 0xfeb   : > { %v7389_v62 = vpop.f32.mrf.mxu1  ;;  %v7430_v52 = vpop.f32.mrf.mxu0 }
 0xfec   : > { %v7390_v20 = vadd.f32 %v7389_v62, %v7155_v12  ;;  %v7431_v7 = vadd.f32 %v7430_v52, %v7163_v60  ;;  %v18490_v12 = vsub.s32 7, %v17368_v27  ;;  %v7175_v52 = vrot.slane %v7150_v28, %v18489_v24 }
 0xfed   : > { %v7391_v42 = vpop.f32.mrf.mxu1  ;;  %v7432_v54 = vpop.f32.mrf.mxu0 }
 0xfee   : > { %v7527_v23 = vmul.f32 0.70710677, %v7390_v20  ;;  %v7529_v47 = vmul.f32 0.70710677, %v7431_v7  ;;  %v7392_v30 = vadd.f32 %v7391_v42, %v7159_v32  ;;  %v7433_v25 = vadd.f32 %v7432_v54, %v7167_v50 }
 0xfef   : > { %v7393_v61 = vpop.f32.mrf.mxu1  ;;  %v7434_v14 = vpop.f32.mrf.mxu0  ;;  %v18497_v50 = vsub.s32 4, %v17368_v27  ;;  %v7519_v24 = vmul.f32 0.5, %v7390_v20  ;;  %v7521_v56 = vmul.f32 0.5, %v7431_v7  ;;  %v7179_v20 = vrot.slane %v7150_v28, %v18496_v4  ;;  %v15201_v7 = vld [vmem:[%s18746_s23 + $0x138] sm:$0xff]  }
 0xff0   : > { %15351 = verf.f32 %v7527_v23  ;;  %v7528_v18 = vmul.f32 0.70710677, %v7392_v30  ;;  %v7530_v33 = vmul.f32 0.70710677, %v7433_v25  ;;  %v7183_v14 = vrot.slane %v7150_v28, %v18490_v12 }
 0xff1   : > { %15353 = verf.f32 %v7529_v47  ;;  %v7394_v34 = vpop.f32.mrf.mxu1  ;;  %v7435_v51 = vpop.f32.mrf.mxu0  ;;  %v7171_v12 = vrot.slane %v7150_v28, %v18497_v50  ;;  %v7520_v57 = vmul.f32 0.5, %v7392_v30  ;;  %v15204_v28 = vld [vmem:[%s18746_s23 + $0x1f0] sm:$0xff]  }
 0xff2   : > { %15355 = verf.f32 %v7528_v18 }
 0xff3   : > { %15357 = verf.f32 %v7530_v33 }
 0xffb   : > { %v7471_v60 = vpop.f32.mrf.mxu1  ;;  %v7512_v62 = vpop.f32.mrf.mxu0 }
 0xffd   : > { %v15352_v32 = vpop.eup %15351  ;;  %v7473_v34 = vpop.f32.mrf.mxu1 }
 0xffe   : > { %v7514_v51 = vpop.f32.mrf.mxu0  ;;  %v15354_v42 = vpop.eup %15353  ;;  %v7543_v18 = vadd.f32 1.0, %v15352_v32  ;;  %v7474_v33 = vadd.f32 %v7473_v34, %v7175_v52  ;;  %v7522_v34 = vmul.f32 0.5, %v7433_v25  ;;  %v15206_v25 = vld [vmem:[%s18746_s23 + $0x1b0] sm:$0xff]  }
 0xfff   : > { %v7515_v54 = vadd.f32 %v7514_v51, %v7183_v14  ;;  %v7475_v23 = vpop.f32.mrf.mxu1  ;;  %v15356_v61 = vpop.eup %15355  ;;  %v7545_v36 = vadd.f32 1.0, %v15354_v42 }
0x1000   : > { %v7516_v47 = vpop.f32.mrf.mxu0  ;;  %v15358_v41 = vpop.eup %15357  ;;  %v7532_v48 = vmul.f32 0.70710677, %v7474_v33  ;;  %v7544_v52 = vadd.f32 1.0, %v15356_v61  ;;  %v7551_v14 = vmul.f32 %v7543_v18, %v7519_v24  ;;  %v15202_v24 = vld [vmem:[%s18746_s23 + $0x1b8] sm:$0xff]   ;;  %v15209_v18 = vld [vmem:[%s18746_s23 + $0x128] sm:$0xff]  }
0x1001   : > { %v7476_v31 = vpop.f32.mrf.mxu1  ;;  %v7534_v32 = vmul.f32 0.70710677, %v7515_v54  ;;  %v7546_v51 = vadd.f32 1.0, %v15358_v41  ;;  %v7553_v42 = vmul.f32 %v7545_v36, %v7521_v56  ;;  %v17397_v47 = vadd.f32 %v7471_v60, %v7171_v12  ;;  %v15207_v12 = vld [vmem:[%s18746_s23 + $0x168] sm:$0xff]  }
0x1002   : > { %v7517_v1 = vpop.f32.mrf.mxu0  ;;  %15359 = verf.f32 %v7532_v48  ;;  %v7552_v23 = vmul.f32 %v7544_v52, %v7520_v57  ;;  %v7687_v30 = vpack.c.bf16 %v7551_v14, %v7551_v14  ;;  %v15203_v48 = vld [vmem:[%s18746_s23 + $0x170] sm:$0xff]   ;;  %v17401_v56 = vadd.f32 %v7512_v62, %v7179_v20  ;;  %v15208_v62 = vld [vmem:[%s18746_s23 + $0x1e8] sm:$0xff]   ;;  %v15211_v52 = vld [vmem:[%s18746_s23 + $0x160] sm:$0xff]  }
0x1003   : > { %15361 = verf.f32 %v7534_v32  ;;  %v7554_v31 = vmul.f32 %v7546_v51, %v7522_v34  ;;  %v7689_v41 = vpack.c.bf16 %v7553_v42, %v7553_v42  ;;  %v15205_v57 = vld [vmem:[%s18746_s23 + $0x130] sm:$0xff]   ;;  %v7531_v36 = vmul.f32 0.70710677, %v17397_v47  ;;  %v15210_v32 = vld [vmem:[%s18746_s23 + $0x1a8] sm:$0xff]   ;;  %v15212_v34 = vld [vmem:[%s18746_s23 + $0x1e0] sm:$0xff]  }
0x1004   : > { %v7688_v1 = vpack.c.bf16 %v7552_v23, %v7552_v23  ;;  %v7533_v60 = vmul.f32 0.70710677, %v17401_v56  ;;  %v7524_v42 = vmul.f32 0.5, %v7474_v33  ;;  %v7526_v23 = vmul.f32 0.5, %v7515_v54  ;;  %v15217_v54 = vld [vmem:[%s18746_s23 + $0x118] sm:$0xff]  }
0x1005   : > { %v7690_v61 = vpack.c.bf16 %v7554_v31, %v7554_v31  ;;  %15363 = verf.f32 %v7531_v36  ;;  %v15213_v31 = vld [vmem:[%s18746_s23 + $0x120] sm:$0xff]   ;;  %v15220_v36 = vld [vmem:[%s18746_s23 + $0x1d0] sm:$0xff]  }
0x1006   : > { %8118 = vmatprep.mubr.bf16.mxu1 %v7688_v1  ;;  %15365 = verf.f32 %v7533_v60  ;;  %v15223_v60 = vld [vmem:[%s18746_s23 + $0x148] sm:$0xff]  }
0x1007   : > { %8158 = vmatprep.mubr.bf16.mxu0 %v7690_v61  ;;  %8119 = vmatmul.mubr.bf16.vlgmr.msra.gmra.mxu1 %v7687_v30 }
0x1008   : > { %8159 = vmatmul.mubr.bf16.vlgmr.msra.gmra.mxu0 %v7689_v41  ;;  %13123 = vmatpush3.bf16.msra.mxu1 %v15201_v7  ;;  %v15214_v7 = vld [vmem:[%s18746_s23 + $0x1a0] sm:$0xff]   ;;  %v15216_v41 = vld [vmem:[%s18746_s23 + $0x1d8] sm:$0xff]  }
0x1009   : > { %13145 = vmatpush3.bf16.msra.mxu0 %v15202_v24  ;;  %13124 = vmatprep.subr.bf16.mxu1 %v15203_v48  ;;  %v15215_v24 = vld [vmem:[%s18746_s23 + $0x158] sm:$0xff]  }
0x100a   : > { %13146 = vmatprep.subr.bf16.mxu0 %v15204_v28  ;;  %v15218_v28 = vld [vmem:[%s18746_s23 + $0x198] sm:$0xff]  }
0x100c   : > { %13125 = vmatpush3.bf16.msra.mxu1 %v15205_v57  ;;  %v15219_v57 = vld [vmem:[%s18746_s23 + $0x150] sm:$0xff]  }
0x100d   : > { %13147 = vmatpush3.bf16.msra.mxu0 %v15206_v25  ;;  %13126 = vmatprep.subr.bf16.mxu1 %v15207_v12  ;;  %v15221_v25 = vld [vmem:[%s18746_s23 + $0x110] sm:$0xff]  }
0x100e   : > { %13148 = vmatprep.subr.bf16.mxu0 %v15208_v62  ;;  %v15222_v12 = vld [vmem:[%s18746_s23 + $0x190] sm:$0xff]  }
0x100f   : > { %v15360_v14 = vpop.eup %15359 }
0x1010   : > { %v15362_v51 = vpop.eup %15361  ;;  %v7548_v20 = vadd.f32 1.0, %v15360_v14  ;;  %13127 = vmatpush3.bf16.msra.mxu1 %v15209_v18  ;;  %v15224_v18 = vld [vmem:[%s18746_s23 + $0x1c8] sm:$0xff]  }
0x1011   : > { %v7550_v1 = vadd.f32 1.0, %v15362_v51  ;;  %13149 = vmatpush3.bf16.msra.mxu0 %v15210_v32  ;;  %13128 = vmatprep.subr.bf16.mxu1 %v15211_v52  ;;  %v15225_v52 = vld [vmem:[%s18746_s23 + $0x108] sm:$0xff]   ;;  %v15227_v51 = vld [vmem:[%s18746_s23 + $0x140] sm:$0xff]  }
0x1012   : > { %v7556_v30 = vmul.f32 %v7548_v20, %v7524_v42  ;;  %13150 = vmatprep.subr.bf16.mxu0 %v15212_v34  ;;  %v15364_v62 = vpop.eup %15363  ;;  %v15226_v34 = vld [vmem:[%s18746_s23 + $0x188] sm:$0xff]   ;;  %v15228_v20 = vld [vmem:[%s18746_s23 + $0x1c0] sm:$0xff]  }
0x1013   : > { %v7558_v61 = vmul.f32 %v7550_v1, %v7526_v23  ;;  %v15366_v32 = vpop.eup %15365  ;;  %v7547_v14 = vadd.f32 1.0, %v15364_v62  ;;  %v7523_v23 = vmul.f32 0.5, %v17397_v47  ;;  %v15229_v1 = vld [vmem:[%s18746_s23 + $0x100] sm:$0xff]  }
0x1014   : > { %v7692_v48 = vpack.c.bf16 %v7556_v30, %v7556_v30  ;;  %13129 = vmatpush3.bf16.msra.mxu1 %v15213_v31  ;;  %v7549_v42 = vadd.f32 1.0, %v15366_v32  ;;  %v7525_v31 = vmul.f32 0.5, %v17401_v56  ;;  %v15230_v30 = vld [vmem:[%s18746_s23 + $0x180] sm:$0xff]  }
0x1015   : > { %v7694_v33 = vpack.c.bf16 %v7558_v61, %v7558_v61  ;;  %13151 = vmatpush3.bf16.msra.mxu0 %v15214_v7  ;;  %13130 = vmatprep.subr.bf16.mxu1 %v15215_v24  ;;  %v7555_v7 = vmul.f32 %v7547_v14, %v7523_v23 }
0x1016   : > { %8198 = vmatprep.mubr.bf16.mxu1 %v7692_v48  ;;  %13152 = vmatprep.subr.bf16.mxu0 %v15216_v41  ;;  %v7557_v61 = vmul.f32 %v7549_v42, %v7525_v31 }
0x1017   : > { %8238 = vmatprep.mubr.bf16.mxu0 %v7694_v33  ;;  %v7691_v24 = vpack.c.bf16 %v7555_v7, %v7555_v7 }
0x1018   : > { %13131 = vmatpush3.bf16.msra.mxu1 %v15217_v54  ;;  %v7693_v48 = vpack.c.bf16 %v7557_v61, %v7557_v61 }
0x1019   : > { %13153 = vmatpush3.bf16.msra.mxu0 %v15218_v28  ;;  %13132 = vmatprep.subr.bf16.mxu1 %v15219_v57 }
0x101a   : > { %13154 = vmatprep.subr.bf16.mxu0 %v15220_v36 }
0x101c   : > { %13133 = vmatpush3.bf16.msra.mxu1 %v15221_v25 }
0x101d   : > { %13155 = vmatpush3.bf16.msra.mxu0 %v15222_v12  ;;  %13134 = vmatprep.subr.bf16.mxu1 %v15223_v60  ;;  %v12407_v12 = vld [vmem:[%s18749_s26] ss:$0 sm:$0xff]  ;;  %s18758_s26 = sld [smem:[#allocation18_spill]] }
0x101e   : > { %13156 = vmatprep.subr.bf16.mxu0 %v15224_v18 }
0x1020   : > { %13135 = vmatpush3.bf16.msra.mxu1 %v15225_v52 }
0x1021   : > { %13157 = vmatpush3.bf16.msra.mxu0 %v15226_v34  ;;  %13136 = vmatprep.subr.bf16.mxu1 %v15227_v51 }
0x1022   : > { %13158 = vmatprep.subr.bf16.mxu0 %v15228_v20 }
0x1024   : > { %13137 = vmatpush3.bf16.msra.mxu1 %v15229_v1 }
0x1025   : > { %13159 = vmatpush3.bf16.msra.mxu0 %v15230_v30  ;;  %14473 = vmatprep.subr.bf16.mxu1 %v18670_v35 }
0x1026   : > { %14485 = vmatprep.subr.bf16.mxu0 %v18670_v35 }
0x1027   : > { %8199 = vmatmul.mubr.bf16.vlgmr.msra.gmra.mxu1 %v7691_v24 }
0x1028   : > { %8239 = vmatmul.mubr.bf16.vlgmr.msra.gmra.mxu0 %v7693_v48  ;;  %14481 = vmatprep.mubr.msk.bf16.mxu1 %vm15458_vm1, %v18670_v35 }
0x1029   : > { %14493 = vmatprep.mubr.msk.bf16.mxu0 %vm15458_vm1, %v18670_v35 }
0x10c7   : > { %v13094_v47 = vpop.f32.mrf.mxu1 }
0x10c8   : > { %v13116_v56 = vpop.f32.mrf.mxu0 }
0x10c9   : > { %v13095_v41 = vpop.f32.mrf.mxu1 }
0x10ca   : > { %v13117_v33 = vpop.f32.mrf.mxu0  ;;  %v13096_v25 = vadd.f32 %v13095_v41, %v13094_v47 }
0x10cb   : > { %v13097_v54 = vpop.f32.mrf.mxu1  ;;  %v13118_v18 = vadd.f32 %v13117_v33, %v13116_v56 }
0x10cc   : > { %v13119_v28 = vpop.f32.mrf.mxu0  ;;  %v8121_v60 = vadd.f32 %v13096_v25, %v12407_v12  ;;  %v12472_v25 = vld [vmem:[%s18750_s0] ss:$0 sm:$0xff]  ;;  %s18759_s0 = sld [smem:[#allocation19_spill]] }
0x10cd   : > { %v13098_v57 = vpop.f32.mrf.mxu1  ;;  %v12473_v12 = vld [vmem:[%s18751_s29] ss:$0 sm:$0xff]  ;;  %s18772_s29 = sld [smem:[#allocation21_spill]] }
0x10ce   : > { %v13120_v36 = vpop.f32.mrf.mxu0  ;;  %v8161_v14 = vadd.f32 %v13118_v18, %v8121_v60 }
0x10e7   : > { %v13138_v62 = vpop.f32.mrf.mxu1 }
0x10e8   : > { %v13160_v32 = vpop.f32.mrf.mxu0 }
0x10e9   : > { %v13139_v52 = vpop.f32.mrf.mxu1 }
0x10ea   : > { %v13140_v34 = vadd.f32 %v13139_v52, %v13138_v62  ;;  %v13161_v51 = vpop.f32.mrf.mxu0 }
0x10eb   : > { %v13141_v42 = vpop.f32.mrf.mxu1  ;;  %v13162_v23 = vadd.f32 %v13161_v51, %v13160_v32 }
0x10ec   : > { %v8201_v20 = vadd.f32 %v13140_v34, %v8161_v14  ;;  %v13163_v31 = vpop.f32.mrf.mxu0  ;;  %v15231_v42 = vld [vmem:[%s18752_s2 + $0x18] sm:$0xff]  }
0x10ed   : > { %v13142_v1 = vpop.f32.mrf.mxu1  ;;  %14474 = vmatpush3.bf16.msra.mxu1 %v15231_v42  ;;  %v15234_v31 = vld [vmem:[%s18752_s2] sm:$0xff]  }
0x10ee   : > { %v8241_v7 = vadd.f32 %v13162_v23, %v8201_v20  ;;  %v13164_v30 = vpop.f32.mrf.mxu0  ;;  %14475 = vmatprep.subr.bf16.mxu1 %v18670_v35  ;;  %v15232_v20 = vld [vmem:[%s18752_s2 + $0x10] sm:$0xff]   ;;  %v15233_v23 = vld [vmem:[%s18752_s2 + $0x8] sm:$0xff]  }
0x10f0   : > { %v8246_v61 = vadd.f32 %v8241_v7, %v17316_v46 }
0x10f1   : > { %14476 = vmatpush3.bf16.msra.mxu1 %v15232_v20 }
0x10f2   : > { %v8249_v24 = vsel %vm2155_vm3, %v8246_v61, 0.0  ;;  %14477 = vmatprep.subr.bf16.mxu1 %v18670_v35 }
0x10f3   : > { %8250 = vadd.xlane.f32.xlu1 %v8249_v24  ;;  %v12474_v24 = vld [vmem:[%s18753_s7] ss:$0 sm:$0xff]  ;;  %s18826_s7 = sld [smem:[#allocation23_spill]] }
0x10f5   : > { %14478 = vmatpush3.bf16.msra.mxu1 %v15233_v23  ;;  %v15235_v23 = vld [vmem:[%s18756_s18 + $0x18] sm:$0xff]  }
0x10f6   : > { %14479 = vmatprep.subr.bf16.mxu1 %v18670_v35 }
0x10f9   : > { %14480 = vmatpush3.bf16.msra.mxu1 %v15234_v31  ;;  %v15236_v31 = vld [vmem:[%s18756_s18 + $0x10] sm:$0xff]   ;;  %v12489_v26 = vld [vmem:[%s18826_s7] ss:$0 sm:$0xff]  ;;  %s18906_s7 = sld [smem:[#allocation28_spill]] }
0x10fa   : > { %14497 = vmatprep.subr.bf16.mxu1 %v18670_v35 }
0x117c   : > { %v8251_v48 = vpop.xlane.xlu1 %8250 }
0x117d   : > { %v8252_v47 = vmul.f32 0.015625, %v8251_v48 }
0x117f   : > { %v8253_v56 = vsub.f32 %v8246_v61, %v8252_v47  ;;  %v12475_v47 = vld [vmem:[%s18754_s10] ss:$0 sm:$0xff]  ;;  %s12347_s10 = sshll.u32 %s18922_s1, 3 }
0x1181   : > { %v8254_v41 = vmul.f32 %v8253_v56, %v8253_v56 }
0x1183   : > { %v8255_v33 = vsel %vm2155_vm3, %v8254_v41, 0.0 }
0x1184   : > { %8256 = vadd.xlane.f32.xlu0 %v8255_v33 }
0x120d   : > { %v8257_v54 = vpop.xlane.xlu0 %8256 }
0x120e   : > { %v8258_v28 = vmul.f32 0.015625, %v8257_v54  ;;  %v12476_v54 = vld [vmem:[%s18755_s15] ss:$0 sm:$0xff]  ;;  %s1443_s15 = scalar_lea.vmem %s15706_s27, %s12347_s10  ;;  %s18907_s10 = sld [smem:[#allocation27_spill]] }
0x1210   : > { %v8259_v57 = vadd.f32 1e-05, %v8258_v28 }
0x1212   : > { %15367 = vrsqrt.f32 %v8259_v57 }
0x121f   : > { %v15368_v36 = vpop.eup %15367 }
0x1220   : > { %v8261_v46 = vmul.f32 %v15368_v36, %v8253_v56 }
0x1222   : > { %v8268_v60 = vmul.f32 %v12472_v25, %v8261_v46 }
0x1224   : > { %v8275_v62 = vadd.f32 %v12473_v12, %v8268_v60 }
0x1226   : > { %v8278_v18 = vsel %vm2155_vm3, %v8275_v62, 0.0 }
0x1227   : > { %8279 = vadd.xlane.f32.xlu1 %v8278_v18 }
0x12b0   : > { %v8280_v32 = vpop.xlane.xlu1 %8279 }
0x12b1   : > { %v8281_v52 = vmul.f32 0.015625, %v8280_v32 }
0x12b3   : > { %v8282_v14 = vsub.f32 %v8275_v62, %v8281_v52 }
0x12b5   : > { %v8283_v34 = vmul.f32 %v8282_v14, %v8282_v14 }
0x12b7   : > { %v8284_v51 = vsel %vm2155_vm3, %v8283_v34, 0.0 }
0x12b8   : > { %8285 = vadd.xlane.f32.xlu0 %v8284_v51 }
0x1341   : > { %v8286_v1 = vpop.xlane.xlu0 %8285 }
0x1342   : > { %v8287_v7 = vmul.f32 0.015625, %v8286_v1  ;;  %v15237_v1 = vld [vmem:[%s18756_s18 + $0x8] sm:$0xff]  }
0x1344   : > { %v8288_v30 = vadd.f32 1e-05, %v8287_v7  ;;  %v15239_v7 = vld [vmem:[%s18757_s22 + $0x18] sm:$0xff]  }
0x1345   : > { %14486 = vmatpush3.bf16.msra.mxu0 %v15239_v7  ;;  %v18767_v7 = vld [vmem:[#allocation69_spill] sm:$0xff] }
0x1346   : > { %15369 = vrsqrt.f32 %v8288_v30  ;;  %v15238_v30 = vld [vmem:[%s18756_s18] sm:$0xff]   ;;  %14487 = vmatprep.subr.bf16.mxu0 %v18670_v35 }
0x1353   : > { %v15370_v61 = vpop.eup %15369 }
0x1354   : > { %v8290_v48 = vmul.f32 %v15370_v61, %v8282_v14  ;;  %v15240_v61 = vld [vmem:[%s18757_s22 + $0x10] sm:$0xff]  }
0x1355   : > { %14488 = vmatpush3.bf16.msra.mxu0 %v15240_v61  ;;  %v18769_v61 = vld [vmem:[#allocation70_spill] sm:$0xff] }
0x1356   : > { %v8297_v56 = vmul.f32 %v12474_v24, %v8290_v48  ;;  %v15241_v24 = vld [vmem:[%s18757_s22 + $0x8] sm:$0xff]   ;;  %14489 = vmatprep.subr.bf16.mxu0 %v18670_v35  ;;  %v15242_v48 = vld [vmem:[%s18757_s22] sm:$0xff]  }
0x1358   : > { %v8304_v41 = vadd.f32 %v12475_v47, %v8297_v56 }
0x1359   : > { %14490 = vmatpush3.bf16.msra.mxu0 %v15241_v24  ;;  %v18770_v24 = vld [vmem:[#allocation40_spill] sm:$0xff] }
0x135a   : > { %v8313_v33 = vpack.c.bf16 %v8304_v41, %v8304_v41  ;;  %14491 = vmatprep.subr.bf16.mxu0 %v18670_v35 }
0x135c   : > { %14482 = vmatmul.mubr.msk.bf16.vlgmr.msra.gmra.mxu1 %vm2155_vm3, %v8313_v33 }
0x135d   : > { %14505 = vmatprep.mubr.msk.bf16.mxu1 %vm15458_vm1, %v18670_v35  ;;  %14498 = vmatpush3.bf16.msra.mxu1 %v15235_v23  ;;  %v18765_v23 = vld [vmem:[#allocation58_spill] sm:$0xff] }
0x135e   : > { %14499 = vmatprep.subr.bf16.mxu1 %v18670_v35  ;;  %14492 = vmatpush3.bf16.msra.mxu0 %v15242_v48  ;;  %v18771_v48 = vld [vmem:[#allocation41_spill] sm:$0xff] }
0x135f   : > { %14509 = vmatprep.subr.mxu0 %v18670_v35 }
0x1361   : > { %14500 = vmatpush3.bf16.msra.mxu1 %v15236_v31 }
0x1362   : > { %14501 = vmatprep.subr.bf16.mxu1 %v18670_v35 }
0x1365   : > { %14502 = vmatpush3.bf16.msra.mxu1 %v15237_v1  ;;  %v18766_v1 = vld [vmem:[#allocation67_spill] sm:$0xff] }
0x1366   : > { %14503 = vmatprep.subr.bf16.mxu1 %v18670_v35 }
0x1369   : > { %14504 = vmatpush3.bf16.msra.mxu1 %v15238_v30  ;;  %v18768_v30 = vld [vmem:[#allocation39_spill] sm:$0xff] }
0x136a   : > { %14528 = vmatprep.subr.mxu1 %v18670_v35 }
0x141c   : > { %v8382_v28 = vpop.f32.mrf.mxu1 }
0x141d   : > { %v8383_v57 = vadd.f32 %v12476_v54, %v8382_v28  ;;  %v12482_v54 = vld [vmem:[%s18758_s26] ss:$0 sm:$0xff]  ;;  %s18903_s26 = sld [smem:[#allocation26_spill]] }
0x141e   : > { %v14483_v36 = vpop.f32.mrf.mxu1 }
0x141f   : > { %v8389_v25 = vmul.f32 0.70710677, %v8383_v57  ;;  %v8388_v62 = vmul.f32 0.5, %v8383_v57  ;;  %v12483_v57 = vld [vmem:[%s18759_s0] ss:$0 sm:$0xff]  ;;  %s18904_s0 = sld [smem:[#allocation24_spill]] }
0x1420   : > { %v8385_v46 = vpop.f32.mrf.mxu1 }
0x1421   : > { %15371 = verf.f32 %v8389_v25 }
0x1422   : > { %v14484_v12 = vpop.f32.mrf.mxu1 }
0x142e   : > { %v15372_v60 = vpop.eup %15371 }
0x142f   : > { %v8391_v18 = vadd.f32 1.0, %v15372_v60 }
0x1431   : > { %v8392_v32 = vmul.f32 %v8391_v18, %v8388_v62  ;;  %v18760_v18 = vld [vmem:[#allocation54_spill] sm:$0xff] }
0x1433   : > { %v8395_v52 = vsel %vm2155_vm3, %v8392_v32, 0.0 }
0x1434   : > { %8396 = vadd.xlane.f32.xlu1 %v8395_v52  ;;  %v18761_v52 = vld [vmem:[#allocation55_spill] sm:$0xff] }
0x14bd   : > { %v8397_v14 = vpop.xlane.xlu1 %8396 }
0x14be   : > { %v8398_v34 = vmul.f32 0.015625, %v8397_v14 }
0x14c0   : > { %v8399_v51 = vsub.f32 %v8392_v32, %v8398_v34  ;;  %v18762_v34 = vld [vmem:[#allocation56_spill] sm:$0xff] }
0x14c2   : > { %v8400_v42 = vmul.f32 %v8399_v51, %v8399_v51 }
0x14c4   : > { %v8401_v20 = vsel %vm2155_vm3, %v8400_v42, 0.0  ;;  %v18763_v42 = vld [vmem:[#allocation57_spill] sm:$0xff] }
0x14c5   : > { %8402 = vadd.xlane.f32.xlu0 %v8401_v20 }
0x154e   : > { %v8403_v47 = vpop.xlane.xlu0 %8402 }
0x154f   : > { %v8404_v56 = vmul.f32 0.015625, %v8403_v47  ;;  %v18773_v47 = vld [vmem:[#allocation42_spill] sm:$0xff] }
0x1551   : > { %v8405_v41 = vadd.f32 1e-05, %v8404_v56  ;;  %v18774_v56 = vld [vmem:[#allocation43_spill] sm:$0xff] }
0x1553   : > { %15373 = vrsqrt.f32 %v8405_v41  ;;  %v18775_v41 = vld [vmem:[#allocation59_spill] sm:$0xff] }
0x1560   : > { %v15374_v33 = vpop.eup %15373 }
0x1561   : > { %v8407_v28 = vmul.f32 %v15374_v33, %v8399_v51  ;;  %v18776_v33 = vld [vmem:[#allocation61_spill] sm:$0xff] }
0x1563   : > { %v8414_v36 = vmul.f32 %v12482_v54, %v8407_v28  ;;  %v18777_v54 = vld [vmem:[#allocation64_spill] sm:$0xff] }
0x1565   : > { %v8421_v25 = vadd.f32 %v12483_v57, %v8414_v36 }
0x1567   : > { %v8422_v46 = vsel %vm2155_vm3, %v8421_v25, 0.0  ;;  %v8515_v12 = vpack.c.bf16 %v8421_v25, %v8421_v25 }
0x1568   : > { %v8423_v60 = vrot.slane %v8422_v46, 4 }
0x1569   : > { %14506 = vmatmul.mubr.msk.bf16.vlgmr.msra.gmra.mxu1 %vm2155_vm3, %v8515_v12 }
0x156a   : > { %v8424_v62 = vadd.f32 %v8423_v60, %v8422_v46  ;;  %14529 = vmatpush3.msra.mxu1 %v18760_v18  ;;  %14544 = vmatprep.mubr.msk.f32.mxu1 %vm15458_vm1, %v18670_v35  ;;  %v8439_v46 = vld [vmem:[%s18772_s29] sm:$0x1]  ;;  %s18905_s29 = sld [smem:[#allocation25_spill]] }
0x156b   : > { %14530 = vmatprep.subr.mxu1 %v18670_v35 }
0x156c   : > { %v8425_v32 = vrot.slane %v8424_v62, 2  ;;  %14531 = vmatpush3.msra.mxu1 %v18761_v52 }
0x156d   : > { %14532 = vmatprep.subr.mxu1 %v18670_v35 }
0x156e   : > { %v8426_v14 = vadd.f32 %v8425_v32, %v8424_v62  ;;  %14533 = vmatpush3.msra.mxu1 %v18762_v34 }
0x156f   : > { %14534 = vmatprep.subr.mxu1 %v18670_v35 }
0x1570   : > { %v8427_v51 = vrot.slane %v8426_v14, 1  ;;  %14535 = vmatpush3.msra.mxu1 %v18763_v42 }
0x1571   : > { %14536 = vmatprep.subr.mxu1 %v18670_v35 }
0x1572   : > { %v17494_v20 = vadd.f32 %v8427_v51, %v8426_v14  ;;  %14537 = vmatpush3.msra.mxu1 %v18765_v23 }
0x1573   : > { %14538 = vmatprep.subr.mxu1 %v18670_v35 }
0x1574   : > { %18764 = vst [vmem:[#allocation54_spill] sm:$0xff] %v17494_v20  ;;  %v8438_v31 = vpack.c.bf16 %v17494_v20, %v17494_v20  ;;  %14539 = vmatpush3.msra.mxu1 %v18766_v1  ;;  %v18779_v1 = vld [vmem:[#allocation45_spill] sm:$0xff] }
0x1575   : > { %14540 = vmatprep.subr.mxu1 %v18670_v35 }
0x1576   : > { %14494 = vmatmul.mubr.msk.bf16.vlgmr.msra.gmra.mxu0 %vm2155_vm3, %v8438_v31  ;;  %14541 = vmatpush3.msra.mxu1 %v18767_v7  ;;  %v18778_v31 = vld [vmem:[#allocation44_spill] sm:$0xff]  ;;  %v18780_v7 = vld [vmem:[#allocation46_spill] sm:$0xff] }
0x1577   : > { %14510 = vmatpush3.msra.mxu0 %v18768_v30  ;;  %14542 = vmatprep.subr.mxu1 %v18670_v35 }
0x1578   : > { %14511 = vmatprep.subr.mxu0 %v18670_v35  ;;  %14543 = vmatpush3.msra.mxu1 %v18769_v61  ;;  %v18781_v61 = vld [vmem:[#allocation47_spill] sm:$0xff] }
0x1579   : > { %14512 = vmatpush3.msra.mxu0 %v18770_v24  ;;  %14566 = vmatprep.subr.mxu1 %v18670_v35 }
0x157a   : > { %14513 = vmatprep.subr.mxu0 %v18670_v35  ;;  %14525 = vmatprep.mubr.msk.f32.mxu0 %vm15458_vm1, %v18670_v35 }
0x157b   : > { %14514 = vmatpush3.msra.mxu0 %v18771_v48 }
0x157c   : > { %14515 = vmatprep.subr.mxu0 %v18670_v35 }
0x157d   : > { %14516 = vmatpush3.msra.mxu0 %v18773_v47 }
0x157e   : > { %14517 = vmatprep.subr.mxu0 %v18670_v35 }
0x157f   : > { %14518 = vmatpush3.msra.mxu0 %v18774_v56 }
0x1580   : > { %14519 = vmatprep.subr.mxu0 %v18670_v35 }
0x1581   : > { %14520 = vmatpush3.msra.mxu0 %v18775_v41 }
0x1582   : > { %14521 = vmatprep.subr.mxu0 %v18670_v35 }
0x1583   : > { %14522 = vmatpush3.msra.mxu0 %v18776_v33 }
0x1584   : > { %14523 = vmatprep.subr.mxu0 %v18670_v35 }
0x1585   : > { %14524 = vmatpush3.msra.mxu0 %v18777_v54 }
0x1586   : > { %14547 = vmatprep.subr.mxu0 %v18670_v35 }
0x1629   : > { %v17525_v28 = vpop.f32.mrf.mxu1 }
0x162a   : > { %v17677_v38 = vadd.f32 %v12489_v26, %v17525_v28  ;;  %v18831_v28 = vld [vmem:[#allocation102_spill] sm:$0xff] }
0x162b   : > { %v14507_v57 = vpop.f32.mrf.mxu1 }
0x162c   : > { %v18782_v57 = vld [vmem:[#allocation48_spill] sm:$0xff] }
0x162d   : > { %v8587_v36 = vpop.f32.mrf.mxu1 }
0x162e   : > { %v18783_v36 = vld [vmem:[#allocation60_spill] sm:$0xff] }
0x162f   : > { %v14508_v25 = vpop.f32.mrf.mxu1 }
0x1630   : > { %v18784_v25 = vld [vmem:[#allocation63_spill] sm:$0xff] }
0x1636   : > { %v8501_v12 = vpop.f32.mrf.mxu0 }
0x1637   : > { %v8502_v60 = vadd.f32 %v8501_v12, %v8439_v46  ;;  %v18792_v46 = vld [vmem:[#allocation90_spill] sm:$0xff]  ;;  %v18794_v12 = vld [vmem:[#allocation100_spill] sm:$0xff] }
0x1638   : > { %v14495_v62 = vpop.f32.mrf.mxu0 }
0x1639   : > { %v8591_v18 = vsel %vm2155_vm3, %v8502_v60, 0  ;;  %v18795_v60 = vld [vmem:[#allocation68_spill] sm:$0xff] }
0x163a   : > { %v17529_v32 = vand.u32 4294901760, %v8591_v18  ;;  %v8504_v52 = vpop.f32.mrf.mxu0  ;;  %v18796_v62 = vld [vmem:[#allocation104_spill] sm:$0xff] }
0x163b   : > { %v18798_v52 = vld [vmem:[#allocation86_spill] sm:$0xff] }
0x163c   : > { %v8667_v14 = vsub.f32 %v8591_v18, %v17529_v32  ;;  %v14496_v34 = vpop.f32.mrf.mxu0  ;;  %14545 = vmatmul.mubr.f32.vlgmr.msra.gmra.mxu1 %v17529_v32  ;;  %v18797_v18 = vld [vmem:[#allocation108_spill] sm:$0xff] }
0x163d   : > { %14567 = vmatpush3.msra.mxu1 %v18768_v30  ;;  %14582 = vmatprep.mubr.msk.f32.mxu1 %vm15458_vm1, %v18670_v35  ;;  %v18800_v34 = vld [vmem:[#allocation91_spill] sm:$0xff] }
0x163e   : > { %v8668_v51 = vand.u32 4294901760, %v8667_v14  ;;  %14568 = vmatprep.subr.mxu1 %v18670_v35 }
0x163f   : > { %14569 = vmatpush3.msra.mxu1 %v18770_v24 }
0x1640   : > { %14570 = vmatprep.subr.mxu1 %v18670_v35  ;;  %v8669_v42 = vsub.f32 %v8667_v14, %v8668_v51 }
0x1641   : > { %14571 = vmatpush3.msra.mxu1 %v18771_v48 }
0x1642   : > { %14572 = vmatprep.subr.mxu1 %v18670_v35  ;;  %v8670_v23 = vand.u32 4294901760, %v8669_v42  ;;  %v18803_v42 = vld [vmem:[#allocation120_spill] sm:$0xff] }
0x1643   : > { %14573 = vmatpush3.msra.mxu1 %v18773_v47 }
0x1644   : > { %14574 = vmatprep.subr.mxu1 %v18670_v35  ;;  %14526 = vmatmul.mubr.f32.vlgmr.msra.gmra.mxu0 %v8670_v23  ;;  %v18804_v23 = vld [vmem:[#allocation96_spill] sm:$0xff] }
0x1645   : > { %14548 = vmatpush3.msra.mxu0 %v18778_v31  ;;  %14575 = vmatpush3.msra.mxu1 %v18774_v56  ;;  %v18805_v31 = vld [vmem:[#allocation124_spill] sm:$0xff] }
0x1646   : > { %14549 = vmatprep.subr.mxu0 %v18670_v35  ;;  %14576 = vmatprep.subr.mxu1 %v18670_v35 }
0x1647   : > { %14550 = vmatpush3.msra.mxu0 %v18779_v1  ;;  %14577 = vmatpush3.msra.mxu1 %v18775_v41  ;;  %v18806_v1 = vld [vmem:[#allocation99_spill] sm:$0xff] }
0x1648   : > { %14551 = vmatprep.subr.mxu0 %v18670_v35  ;;  %14578 = vmatprep.subr.mxu1 %v18670_v35 }
0x1649   : > { %14552 = vmatpush3.msra.mxu0 %v18780_v7  ;;  %14579 = vmatpush3.msra.mxu1 %v18776_v33  ;;  %v18807_v7 = vld [vmem:[#allocation128_spill] sm:$0xff] }
0x164a   : > { %14553 = vmatprep.subr.mxu0 %v18670_v35  ;;  %14580 = vmatprep.subr.mxu1 %v18670_v35 }
0x164b   : > { %14554 = vmatpush3.msra.mxu0 %v18781_v61  ;;  %14581 = vmatpush3.msra.mxu1 %v18777_v54  ;;  %v18808_v61 = vld [vmem:[#allocation103_spill] sm:$0xff] }
0x164c   : > { %14555 = vmatprep.subr.mxu0 %v18670_v35  ;;  %14583 = vmatmul.mubr.f32.vlgmr.msra.gmra.mxu1 %v8668_v51  ;;  %v18801_v51 = vld [vmem:[#allocation119_spill] sm:$0xff] }
0x164d   : > { %14604 = vmatprep.subr.mxu1 %v18670_v35  ;;  %14556 = vmatpush3.msra.mxu0 %v18782_v57  ;;  %v18809_v57 = vld [vmem:[#allocation132_spill] sm:$0xff] }
0x164e   : > { %14605 = vmatpush3.msra.mxu1 %v18768_v30  ;;  %14557 = vmatprep.subr.mxu0 %v18670_v35  ;;  %v18785_v30 = vld [vmem:[#allocation66_spill] sm:$0xff] }
0x164f   : > { %14606 = vmatprep.subr.mxu1 %v18670_v35  ;;  %14558 = vmatpush3.msra.mxu0 %v18783_v36  ;;  %v18810_v36 = vld [vmem:[#allocation106_spill] sm:$0xff] }
0x1650   : > { %14607 = vmatpush3.msra.mxu1 %v18770_v24  ;;  %14559 = vmatprep.subr.mxu0 %v18670_v35  ;;  %v18786_v24 = vld [vmem:[#allocation49_spill] sm:$0xff] }
0x1651   : > { %14608 = vmatprep.subr.mxu1 %v18670_v35  ;;  %14560 = vmatpush3.msra.mxu0 %v18784_v25  ;;  %v18811_v25 = vld [vmem:[#allocation139_spill] sm:$0xff] }
0x1652   : > { %14609 = vmatpush3.msra.mxu1 %v18771_v48  ;;  %14561 = vmatprep.subr.mxu0 %v18670_v35  ;;  %v18787_v48 = vld [vmem:[#allocation50_spill] sm:$0xff] }
0x1653   : > { %14610 = vmatprep.subr.mxu1 %v18670_v35  ;;  %14562 = vmatpush3.msra.mxu0 %v18785_v30  ;;  %v18812_v30 = vld [vmem:[#allocation110_spill] sm:$0xff] }
0x1654   : > { %14563 = vmatprep.mubr.msk.f32.mxu0 %vm15458_vm1, %v18670_v35  ;;  %14611 = vmatpush3.msra.mxu1 %v18773_v47  ;;  %v18788_v47 = vld [vmem:[#allocation51_spill] sm:$0xff] }
0x1655   : > { %14564 = vmatmul.mubr.f32.vlgmr.msra.gmra.mxu0 %v8667_v14  ;;  %14585 = vmatprep.subr.mxu0 %v18670_v35  ;;  %v18799_v14 = vld [vmem:[#allocation112_spill] sm:$0xff] }
0x1656   : > { %14612 = vmatprep.subr.mxu1 %v18670_v35  ;;  %14586 = vmatpush3.msra.mxu0 %v18786_v24  ;;  %v18813_v24 = vld [vmem:[#allocation140_spill] sm:$0xff] }
0x1657   : > { %14613 = vmatpush3.msra.mxu1 %v18774_v56  ;;  %14587 = vmatprep.subr.mxu0 %v18670_v35  ;;  %v18789_v56 = vld [vmem:[#allocation52_spill] sm:$0xff] }
0x1658   : > { %14614 = vmatprep.subr.mxu1 %v18670_v35  ;;  %14588 = vmatpush3.msra.mxu0 %v18787_v48  ;;  %v18814_v48 = vld [vmem:[#allocation115_spill] sm:$0xff] }
0x1659   : > { %14615 = vmatpush3.msra.mxu1 %v18775_v41  ;;  %14589 = vmatprep.subr.mxu0 %v18670_v35  ;;  %v18790_v41 = vld [vmem:[#allocation53_spill] sm:$0xff] }
0x165a   : > { %14616 = vmatprep.subr.mxu1 %v18670_v35  ;;  %14590 = vmatpush3.msra.mxu0 %v18788_v47  ;;  %v18815_v47 = vld [vmem:[#allocation144_spill] sm:$0xff] }
0x165b   : > { %14617 = vmatpush3.msra.mxu1 %v18776_v33  ;;  %14591 = vmatprep.subr.mxu0 %v18670_v35  ;;  %v18791_v33 = vld [vmem:[#allocation62_spill] sm:$0xff] }
0x165c   : > { %14618 = vmatprep.subr.mxu1 %v18670_v35  ;;  %14592 = vmatpush3.msra.mxu0 %v18789_v56  ;;  %v18816_v56 = vld [vmem:[#allocation118_spill] sm:$0xff] }
0x165d   : > { %14619 = vmatpush3.msra.mxu1 %v18777_v54  ;;  %14620 = vmatprep.mubr.msk.f32.mxu1 %vm15458_vm1, %v18670_v35  ;;  %v18793_v54 = vld [vmem:[#allocation65_spill] sm:$0xff] }
0x165e   : > { %14593 = vmatprep.subr.mxu0 %v18670_v35  ;;  %14621 = vmatmul.mubr.f32.vlgmr.msra.gmra.mxu1 %v17529_v32 }
0x165f   : > { %14594 = vmatpush3.msra.mxu0 %v18790_v41  ;;  %14601 = vmatprep.mubr.msk.f32.mxu0 %vm15458_vm1, %v18670_v35  ;;  %v18817_v41 = vld [vmem:[#allocation147_spill] sm:$0xff] }
0x1660   : > { %14595 = vmatprep.subr.mxu0 %v18670_v35  ;;  %14658 = vmatprep.subr.mxu1 %v18670_v35 }
0x1661   : > { %14596 = vmatpush3.msra.mxu0 %v18791_v33  ;;  %14659 = vmatpush3.msra.mxu1 %v18792_v46  ;;  %v18818_v33 = vld [vmem:[#allocation123_spill] sm:$0xff]  ;;  %v18819_v46 = vld [vmem:[#allocation149_spill] sm:$0xff] }
0x1662   : > { %14597 = vmatprep.subr.mxu0 %v18670_v35  ;;  %14660 = vmatprep.subr.mxu1 %v18670_v35 }
0x1663   : > { %14598 = vmatpush3.msra.mxu0 %v18793_v54  ;;  %14661 = vmatpush3.msra.mxu1 %v18794_v12  ;;  %v18820_v54 = vld [vmem:[#allocation126_spill] sm:$0xff] }
0x1664   : > { %14599 = vmatprep.subr.mxu0 %v18670_v35  ;;  %14662 = vmatprep.subr.mxu1 %v18670_v35  ;;  %v18821_v12 = vld [vmem:[#allocation150_spill] sm:$0xff] }
0x1665   : > { %14600 = vmatpush3.msra.mxu0 %v18795_v60  ;;  %14663 = vmatpush3.msra.mxu1 %v18796_v62  ;;  %v18822_v60 = vld [vmem:[#allocation130_spill] sm:$0xff]  ;;  %v18823_v62 = vld [vmem:[#allocation135_spill] sm:$0xff] }
0x1666   : > { %14602 = vmatmul.mubr.f32.vlgmr.msra.gmra.mxu0 %v17529_v32  ;;  %14664 = vmatprep.subr.mxu1 %v18670_v35  ;;  %v18802_v32 = vld [vmem:[#allocation93_spill] sm:$0xff] }
0x1667   : > { %14665 = vmatpush3.msra.mxu1 %v18797_v18  ;;  %14623 = vmatprep.subr.mxu0 %v18670_v35  ;;  %v18824_v18 = vld [vmem:[#allocation138_spill] sm:$0xff] }
0x1668   : > { %14666 = vmatprep.subr.mxu1 %v18670_v35  ;;  %14624 = vmatpush3.msra.mxu0 %v18798_v52 }
0x1669   : > { %14667 = vmatpush3.msra.mxu1 %v18799_v14  ;;  %14625 = vmatprep.subr.mxu0 %v18670_v35  ;;  %v18825_v14 = vld [vmem:[#allocation143_spill] sm:$0xff] }
0x166a   : > { %14668 = vmatprep.subr.mxu1 %v18670_v35  ;;  %14626 = vmatpush3.msra.mxu0 %v18800_v34 }
0x166b   : > { %14669 = vmatpush3.msra.mxu1 %v18801_v51  ;;  %14627 = vmatprep.subr.mxu0 %v18670_v35 }
0x166c   : > { %14670 = vmatprep.subr.mxu1 %v18670_v35  ;;  %14628 = vmatpush3.msra.mxu0 %v18802_v32 }
0x166d   : > { %14671 = vmatpush3.msra.mxu1 %v18803_v42  ;;  %14629 = vmatprep.subr.mxu0 %v18670_v35 }
0x166e   : > { %14672 = vmatprep.subr.mxu1 %v18670_v35  ;;  %14630 = vmatpush3.msra.mxu0 %v18804_v23 }
0x166f   : > { %14673 = vmatpush3.msra.mxu1 %v18805_v31  ;;  %14631 = vmatprep.subr.mxu0 %v18670_v35 }
0x1670   : > { %14674 = vmatprep.subr.mxu1 %v18670_v35  ;;  %14632 = vmatpush3.msra.mxu0 %v18806_v1 }
0x1671   : > { %14675 = vmatpush3.msra.mxu1 %v18807_v7  ;;  %14633 = vmatprep.subr.mxu0 %v18670_v35 }
0x1672   : > { %14676 = vmatprep.subr.mxu1 %v18670_v35  ;;  %14634 = vmatpush3.msra.mxu0 %v18808_v61 }
0x1673   : > { %14677 = vmatpush3.msra.mxu1 %v18809_v57  ;;  %14635 = vmatprep.subr.mxu0 %v18670_v35 }
0x1674   : > { %14678 = vmatprep.subr.mxu1 %v18670_v35  ;;  %14636 = vmatpush3.msra.mxu0 %v18810_v36 }
0x1675   : > { %14679 = vmatpush3.msra.mxu1 %v18811_v25  ;;  %14637 = vmatprep.subr.mxu0 %v18670_v35 }
0x1676   : > { %14680 = vmatprep.subr.mxu1 %v18670_v35  ;;  %14638 = vmatpush3.msra.mxu0 %v18812_v30 }
0x1677   : > { %14681 = vmatpush3.msra.mxu1 %v18813_v24  ;;  %14639 = vmatprep.subr.mxu0 %v18670_v35 }
0x1678   : > { %14682 = vmatprep.subr.mxu1 %v18670_v35  ;;  %14640 = vmatpush3.msra.mxu0 %v18814_v48 }
0x1679   : > { %14683 = vmatpush3.msra.mxu1 %v18815_v47  ;;  %14641 = vmatprep.subr.mxu0 %v18670_v35 }
0x167a   : > { %14684 = vmatprep.subr.mxu1 %v18670_v35  ;;  %14642 = vmatpush3.msra.mxu0 %v18816_v56 }
0x167b   : > { %14685 = vmatpush3.msra.mxu1 %v18817_v41  ;;  %14643 = vmatprep.subr.mxu0 %v18670_v35 }
0x167c   : > { %14686 = vmatprep.subr.mxu1 %v18670_v35  ;;  %14644 = vmatpush3.msra.mxu0 %v18818_v33 }
0x167d   : > { %14687 = vmatpush3.msra.mxu1 %v18819_v46  ;;  %14645 = vmatprep.subr.mxu0 %v18670_v35 }
0x167e   : > { %14688 = vmatprep.subr.mxu1 %v18670_v35  ;;  %14646 = vmatpush3.msra.mxu0 %v18820_v54 }
0x167f   : > { %14689 = vmatpush3.msra.mxu1 %v18821_v12  ;;  %14647 = vmatprep.subr.mxu0 %v18670_v35 }
0x1680   : > { %14690 = vmatprep.mubr.msk.f32.mxu1 %vm15458_vm1, %v18670_v35  ;;  %14728 = vmatprep.subr.mxu1 %v18670_v35 }
0x1681   : > { %14648 = vmatpush3.msra.mxu0 %v18822_v60  ;;  %14655 = vmatprep.mubr.msk.f32.mxu0 %vm15458_vm1, %v18670_v35 }
0x1682   : > { %14649 = vmatprep.subr.mxu0 %v18670_v35 }
0x1683   : > { %14650 = vmatpush3.msra.mxu0 %v18823_v62 }
0x1684   : > { %14651 = vmatprep.subr.mxu0 %v18670_v35 }
0x1685   : > { %14652 = vmatpush3.msra.mxu0 %v18824_v18 }
0x1686   : > { %14653 = vmatprep.subr.mxu0 %v18670_v35 }
0x1687   : > { %14654 = vmatpush3.msra.mxu0 %v18825_v14 }
0x1688   : > { %14693 = vmatprep.subr.mxu0 %v18670_v35 }
0x16fc   : > { %v8783_v51 = vpop.f32.mrf.mxu1 }
0x16fe   : > { %v14546_v42 = vpop.f32.mrf.mxu1 }
0x1704   : > { %v8672_v31 = vpop.f32.mrf.mxu0 }
0x1705   : > { %v8784_v46 = vadd.f32 %v8783_v51, %v8672_v31  ;;  %v18832_v51 = vld [vmem:[#allocation107_spill] sm:$0xff]  ;;  %v18833_v31 = vld [vmem:[#allocation109_spill] sm:$0xff] }
0x1706   : > { %v14527_v7 = vpop.f32.mrf.mxu0 }
0x170c   : > { %v8952_v57 = vpop.f32.mrf.mxu1 }
0x170e   : > { %v14584_v25 = vpop.f32.mrf.mxu1 }
0x1715   : > { %v8871_v24 = vpop.f32.mrf.mxu0 }
0x1716   : > { %v8872_v4 = vadd.f32 %v8871_v24, %v8784_v46  ;;  %v18835_v24 = vld [vmem:[#allocation117_spill] sm:$0xff]  ;;  %v18837_v46 = vld [vmem:[#allocation127_spill] sm:$0xff] }
0x1717   : > { %v14565_v47 = vpop.f32.mrf.mxu0 }
0x1718   : > { %v8953_v50 = vadd.f32 %v8952_v57, %v8872_v4  ;;  %v18834_v57 = vld [vmem:[#allocation114_spill] sm:$0xff] }
0x171e   : > { %v9126_v41 = vpop.f32.mrf.mxu1 }
0x1720   : > { %v14622_v12 = vpop.f32.mrf.mxu1 }
0x1721   : > { %v18838_v12 = vld [vmem:[#allocation129_spill] sm:$0xff] }
0x1726   : > { %v9047_v27 = vpop.f32.mrf.mxu0 }
0x1727   : > { %v9048_v20 = vadd.f32 %v9047_v27, %v8953_v50  ;;  %v18828_v27 = vld [vmem:[#allocation92_spill] sm:$0xff]  ;;  %v18829_v50 = vld [vmem:[#allocation95_spill] sm:$0xff] }
0x1728   : > { %v14603_v45 = vpop.f32.mrf.mxu0 }
0x1729   : > { %v9127_v0 = vadd.f32 %v9126_v41, %v9048_v20  ;;  %v18827_v45 = vld [vmem:[#allocation88_spill] sm:$0xff]  ;;  %v18830_v20 = vld [vmem:[#allocation98_spill] sm:$0xff] }
0x172a   : > { %v18836_v41 = vld [vmem:[#allocation122_spill] sm:$0xff] }
0x172b   : > { %v9133_v42 = vrot.slane %v9127_v0, %v17371_v49 }
0x172d   : > { %v9134_v7 = vmul.f32 %v9133_v42, %v17677_v38  ;;  %v18839_v42 = vld [vmem:[#allocation134_spill] sm:$0xff] }
0x172f   : > { %v17681_v25 = vand.u32 4294901760, %v9134_v7 }
0x1731   : > { %v17684_v47 = vsub.f32 %v9134_v7, %v17681_v25  ;;  %14691 = vmatmul.mubr.f32.vlgmr.msra.gmra.mxu1 %v17681_v25  ;;  %v18840_v7 = vld [vmem:[#allocation137_spill] sm:$0xff] }
0x1732   : > { %14729 = vmatpush3.msra.mxu1 %v18798_v52  ;;  %14760 = vmatprep.mubr.msk.f32.mxu1 %vm15458_vm1, %v18670_v35 }
0x1733   : > { %v9218_v4 = vand.u32 4294901760, %v17684_v47  ;;  %14730 = vmatprep.subr.mxu1 %v18670_v35 }
0x1734   : > { %14731 = vmatpush3.msra.mxu1 %v18800_v34 }
0x1735   : > { %14732 = vmatprep.subr.mxu1 %v18670_v35  ;;  %v9219_v0 = vsub.f32 %v17684_v47, %v9218_v4 }
0x1736   : > { %14733 = vmatpush3.msra.mxu1 %v18802_v32 }
0x1737   : > { %14734 = vmatprep.subr.mxu1 %v18670_v35  ;;  %v9220_v26 = vand.u32 4294901760, %v9219_v0  ;;  %v18841_v0 = vld [vmem:[#allocation142_spill] sm:$0xff] }
0x1738   : > { %14735 = vmatpush3.msra.mxu1 %v18804_v23 }
0x1739   : > { %14736 = vmatprep.subr.mxu1 %v18670_v35  ;;  %14656 = vmatmul.mubr.f32.vlgmr.msra.gmra.mxu0 %v9220_v26  ;;  %v18860_v26 = vld [vmem:[#allocation37_spill] sm:$0xff] }
0x173a   : > { %14694 = vmatpush3.msra.mxu0 %v18827_v45  ;;  %14737 = vmatpush3.msra.mxu1 %v18806_v1 }
0x173b   : > { %14695 = vmatprep.subr.mxu0 %v18670_v35  ;;  %14738 = vmatprep.subr.mxu1 %v18670_v35 }
0x173c   : > { %14696 = vmatpush3.msra.mxu0 %v18828_v27  ;;  %14739 = vmatpush3.msra.mxu1 %v18808_v61 }
0x173d   : > { %14697 = vmatprep.subr.mxu0 %v18670_v35  ;;  %14740 = vmatprep.subr.mxu1 %v18670_v35 }
0x173e   : > { %14698 = vmatpush3.msra.mxu0 %v18829_v50  ;;  %14741 = vmatpush3.msra.mxu1 %v18810_v36 }
0x173f   : > { %14699 = vmatprep.subr.mxu0 %v18670_v35  ;;  %14742 = vmatprep.subr.mxu1 %v18670_v35 }
0x1740   : > { %14700 = vmatpush3.msra.mxu0 %v18830_v20  ;;  %14743 = vmatpush3.msra.mxu1 %v18812_v30 }
0x1741   : > { %14701 = vmatprep.subr.mxu0 %v18670_v35  ;;  %14744 = vmatprep.subr.mxu1 %v18670_v35 }
0x1742   : > { %14702 = vmatpush3.msra.mxu0 %v18831_v28  ;;  %14745 = vmatpush3.msra.mxu1 %v18814_v48 }
0x1743   : > { %14703 = vmatprep.subr.mxu0 %v18670_v35  ;;  %14746 = vmatprep.subr.mxu1 %v18670_v35 }
0x1744   : > { %14704 = vmatpush3.msra.mxu0 %v18832_v51  ;;  %14747 = vmatpush3.msra.mxu1 %v18816_v56 }
0x1745   : > { %14705 = vmatprep.subr.mxu0 %v18670_v35  ;;  %14748 = vmatprep.subr.mxu1 %v18670_v35 }
0x1746   : > { %14706 = vmatpush3.msra.mxu0 %v18833_v31  ;;  %14749 = vmatpush3.msra.mxu1 %v18818_v33 }
0x1747   : > { %14707 = vmatprep.subr.mxu0 %v18670_v35  ;;  %14750 = vmatprep.subr.mxu1 %v18670_v35 }
0x1748   : > { %14708 = vmatpush3.msra.mxu0 %v18834_v57  ;;  %14751 = vmatpush3.msra.mxu1 %v18820_v54 }
0x1749   : > { %14709 = vmatprep.subr.mxu0 %v18670_v35  ;;  %14752 = vmatprep.subr.mxu1 %v18670_v35 }
0x174a   : > { %14710 = vmatpush3.msra.mxu0 %v18835_v24  ;;  %14753 = vmatpush3.msra.mxu1 %v18822_v60 }
0x174b   : > { %14711 = vmatprep.subr.mxu0 %v18670_v35  ;;  %14754 = vmatprep.subr.mxu1 %v18670_v35 }
0x174c   : > { %14712 = vmatpush3.msra.mxu0 %v18836_v41  ;;  %14755 = vmatpush3.msra.mxu1 %v18823_v62 }
0x174d   : > { %14713 = vmatprep.subr.mxu0 %v18670_v35  ;;  %14756 = vmatprep.subr.mxu1 %v18670_v35 }
0x174e   : > { %14714 = vmatpush3.msra.mxu0 %v18837_v46  ;;  %14757 = vmatpush3.msra.mxu1 %v18824_v18 }
0x174f   : > { %14715 = vmatprep.subr.mxu0 %v18670_v35  ;;  %14758 = vmatprep.subr.mxu1 %v18670_v35 }
0x1750   : > { %14716 = vmatpush3.msra.mxu0 %v18838_v12  ;;  %14759 = vmatpush3.msra.mxu1 %v18825_v14 }
0x1751   : > { %14717 = vmatprep.subr.mxu0 %v18670_v35  ;;  %14761 = vmatmul.mubr.f32.vlgmr.msra.gmra.mxu1 %v9218_v4  ;;  %v18859_v4 = vld [vmem:[#allocation148_spill] sm:$0xff] }
0x1752   : > { %14798 = vmatprep.subr.mxu1 %v18670_v35  ;;  %14718 = vmatpush3.msra.mxu0 %v18839_v42 }
0x1753   : > { %14799 = vmatpush3.msra.mxu1 %v18798_v52  ;;  %14719 = vmatprep.subr.mxu0 %v18670_v35  ;;  %v18842_v52 = vld [vmem:[#allocation146_spill] sm:$0xff] }
0x1754   : > { %14800 = vmatprep.subr.mxu1 %v18670_v35  ;;  %14720 = vmatpush3.msra.mxu0 %v18840_v7 }
0x1755   : > { %14801 = vmatpush3.msra.mxu1 %v18800_v34  ;;  %14721 = vmatprep.subr.mxu0 %v18670_v35  ;;  %v18843_v34 = vld [vmem:[#allocation89_spill] sm:$0xff] }
0x1756   : > { %14802 = vmatprep.subr.mxu1 %v18670_v35  ;;  %14722 = vmatpush3.msra.mxu0 %v18841_v0 }
0x1757   : > { %14803 = vmatpush3.msra.mxu1 %v18802_v32  ;;  %14723 = vmatprep.subr.mxu0 %v18670_v35  ;;  %v18844_v32 = vld [vmem:[#allocation94_spill] sm:$0xff] }
0x1758   : > { %14804 = vmatprep.subr.mxu1 %v18670_v35  ;;  %14724 = vmatpush3.msra.mxu0 %v18842_v52 }
0x1759   : > { %14725 = vmatprep.mubr.msk.f32.mxu0 %vm15458_vm1, %v18670_v35  ;;  %14805 = vmatpush3.msra.mxu1 %v18804_v23  ;;  %v18845_v23 = vld [vmem:[#allocation97_spill] sm:$0xff] }
0x175a   : > { %14726 = vmatmul.mubr.f32.vlgmr.msra.gmra.mxu0 %v17684_v47  ;;  %14763 = vmatprep.subr.mxu0 %v18670_v35  ;;  %v18857_v47 = vld [vmem:[#allocation35_spill] sm:$0xff] }
0x175b   : > { %14806 = vmatprep.subr.mxu1 %v18670_v35  ;;  %14764 = vmatpush3.msra.mxu0 %v18843_v34 }
0x175c   : > { %14807 = vmatpush3.msra.mxu1 %v18806_v1  ;;  %14765 = vmatprep.subr.mxu0 %v18670_v35  ;;  %v18846_v1 = vld [vmem:[#allocation101_spill] sm:$0xff] }
0x175d   : > { %14808 = vmatprep.subr.mxu1 %v18670_v35  ;;  %14766 = vmatpush3.msra.mxu0 %v18844_v32 }
0x175e   : > { %14809 = vmatpush3.msra.mxu1 %v18808_v61  ;;  %14767 = vmatprep.subr.mxu0 %v18670_v35  ;;  %v18847_v61 = vld [vmem:[#allocation105_spill] sm:$0xff] }
0x175f   : > { %14810 = vmatprep.subr.mxu1 %v18670_v35  ;;  %14768 = vmatpush3.msra.mxu0 %v18845_v23 }
0x1760   : > { %14811 = vmatpush3.msra.mxu1 %v18810_v36  ;;  %14769 = vmatprep.subr.mxu0 %v18670_v35  ;;  %v18848_v36 = vld [vmem:[#allocation111_spill] sm:$0xff] }
0x1761   : > { %14812 = vmatprep.subr.mxu1 %v18670_v35  ;;  %14770 = vmatpush3.msra.mxu0 %v18846_v1 }
0x1762   : > { %14813 = vmatpush3.msra.mxu1 %v18812_v30  ;;  %14771 = vmatprep.subr.mxu0 %v18670_v35  ;;  %v18849_v30 = vld [vmem:[#allocation113_spill] sm:$0xff] }
0x1763   : > { %14814 = vmatprep.subr.mxu1 %v18670_v35  ;;  %14772 = vmatpush3.msra.mxu0 %v18847_v61 }
0x1764   : > { %14815 = vmatpush3.msra.mxu1 %v18814_v48  ;;  %14773 = vmatprep.subr.mxu0 %v18670_v35  ;;  %v18850_v48 = vld [vmem:[#allocation116_spill] sm:$0xff] }
0x1765   : > { %14816 = vmatprep.subr.mxu1 %v18670_v35  ;;  %14774 = vmatpush3.msra.mxu0 %v18848_v36 }
0x1766   : > { %14817 = vmatpush3.msra.mxu1 %v18816_v56  ;;  %14775 = vmatprep.subr.mxu0 %v18670_v35  ;;  %v18851_v56 = vld [vmem:[#allocation121_spill] sm:$0xff] }
0x1767   : > { %14818 = vmatprep.subr.mxu1 %v18670_v35  ;;  %14776 = vmatpush3.msra.mxu0 %v18849_v30 }
0x1768   : > { %14819 = vmatpush3.msra.mxu1 %v18818_v33  ;;  %14777 = vmatprep.subr.mxu0 %v18670_v35  ;;  %v18852_v33 = vld [vmem:[#allocation125_spill] sm:$0xff] }
0x1769   : > { %14820 = vmatprep.subr.mxu1 %v18670_v35  ;;  %14778 = vmatpush3.msra.mxu0 %v18850_v48 }
0x176a   : > { %14821 = vmatpush3.msra.mxu1 %v18820_v54  ;;  %14779 = vmatprep.subr.mxu0 %v18670_v35  ;;  %v18853_v54 = vld [vmem:[#allocation131_spill] sm:$0xff] }
0x176b   : > { %14822 = vmatprep.subr.mxu1 %v18670_v35  ;;  %14780 = vmatpush3.msra.mxu0 %v18851_v56 }
0x176c   : > { %14823 = vmatpush3.msra.mxu1 %v18822_v60  ;;  %14781 = vmatprep.subr.mxu0 %v18670_v35  ;;  %v18854_v60 = vld [vmem:[#allocation133_spill] sm:$0xff] }
0x176d   : > { %14824 = vmatprep.subr.mxu1 %v18670_v35  ;;  %14782 = vmatpush3.msra.mxu0 %v18852_v33 }
0x176e   : > { %14825 = vmatpush3.msra.mxu1 %v18823_v62  ;;  %14783 = vmatprep.subr.mxu0 %v18670_v35  ;;  %v18855_v62 = vld [vmem:[#allocation136_spill] sm:$0xff] }
0x176f   : > { %14826 = vmatprep.subr.mxu1 %v18670_v35  ;;  %14784 = vmatpush3.msra.mxu0 %v18853_v54 }
0x1770   : > { %14827 = vmatpush3.msra.mxu1 %v18824_v18  ;;  %14785 = vmatprep.subr.mxu0 %v18670_v35  ;;  %v18856_v18 = vld [vmem:[#allocation141_spill] sm:$0xff] }
0x1771   : > { %14828 = vmatprep.subr.mxu1 %v18670_v35  ;;  %14786 = vmatpush3.msra.mxu0 %v18854_v60 }
0x1772   : > { %14829 = vmatpush3.msra.mxu1 %v18825_v14  ;;  %14830 = vmatprep.mubr.msk.f32.mxu1 %vm15458_vm1, %v18670_v35  ;;  %v18858_v14 = vld [vmem:[#allocation145_spill] sm:$0xff] }
0x1773   : > { %14787 = vmatprep.subr.mxu0 %v18670_v35  ;;  %14831 = vmatmul.mubr.f32.vlgmr.msra.gmra.mxu1 %v17681_v25 }
0x1774   : > { %14788 = vmatpush3.msra.mxu0 %v18855_v62  ;;  %14795 = vmatprep.mubr.msk.f32.mxu0 %vm15458_vm1, %v18670_v35 }
0x1775   : > { %14789 = vmatprep.subr.mxu0 %v18670_v35  ;;  %14853 = vmatprep.subr.mxu1 %v18670_v35 }
0x1776   : > { %14790 = vmatpush3.msra.mxu0 %v18856_v18  ;;  %14854 = vmatpush3.msra.mxu1 %v18857_v47 }
0x1777   : > { %14791 = vmatprep.subr.mxu0 %v18670_v35  ;;  %14855 = vmatprep.mubr.msk.f32.mxu1 %vm15458_vm1, %v18670_v35 }
0x1778   : > { %14792 = vmatpush3.msra.mxu0 %v18858_v14  ;;  %14863 = vmatprep.subr.mxu1 %v18670_v35 }
0x1779   : > { %14793 = vmatprep.subr.mxu0 %v18670_v35 }
0x177a   : > { %14794 = vmatpush3.msra.mxu0 %v18859_v4 }
0x177b   : > { %14796 = vmatmul.mubr.f32.vlgmr.msra.gmra.mxu0 %v17681_v25  ;;  %14833 = vmatprep.subr.mxu0 %v18670_v35 }
0x177c   : > { %14834 = vmatpush3.msra.mxu0 %v18860_v26  ;;  %14835 = vmatprep.mubr.msk.f32.mxu0 %vm15458_vm1, %v18670_v35 }
0x177d   : > { %14838 = vmatprep.subr.mxu0 %v18670_v35 }
0x17f1   : > { %v9373_v45 = vpop.f32.mrf.mxu1 }
0x17f3   : > { %v14692_v27 = vpop.f32.mrf.mxu1 }
0x17f9   : > { %v9222_v50 = vpop.f32.mrf.mxu0 }
0x17fa   : > { %v9374_v41 = vadd.f32 %v9373_v45, %v9222_v50 }
0x17fb   : > { %v14657_v20 = vpop.f32.mrf.mxu0 }
0x1811   : > { %v9566_v28 = vpop.f32.mrf.mxu1 }
0x1813   : > { %v14762_v51 = vpop.f32.mrf.mxu1 }
0x181a   : > { %v9477_v31 = vpop.f32.mrf.mxu0 }
0x181b   : > { %v9478_v46 = vadd.f32 %v9477_v31, %v9374_v41  ;;  %v18861_v41 = vld [vmem:[#allocation36_spill] sm:$0xff] }
0x181c   : > { %v14727_v57 = vpop.f32.mrf.mxu0 }
0x181d   : > { %v9567_v12 = vadd.f32 %v9566_v28, %v9478_v46  ;;  %v18863_v46 = vld [vmem:[#allocation87_spill] sm:$0xff] }
0x1833   : > { %v9772_v24 = vpop.f32.mrf.mxu1 }
0x1835   : > { %v14832_v25 = vpop.f32.mrf.mxu1 }
0x1836   : > { %v18862_v25 = vld [vmem:[#allocation34_spill] sm:$0xff] }
0x183b   : > { %v9685_v42 = vpop.f32.mrf.mxu0 }
0x183c   : > { %v9686_v7 = vadd.f32 %v9685_v42, %v9567_v12  ;;  %v18865_v12 = vld [vmem:[#allocation76_spill] sm:$0xff]  ;;  %v18866_v42 = vld [vmem:[#allocation79_spill] sm:$0xff] }
0x183d   : > { %v14797_v0 = vpop.f32.mrf.mxu0 }
0x183e   : > { %v9773_v52 = vadd.f32 %v9772_v24, %v9686_v7  ;;  %v18867_v7 = vld [vmem:[#allocation78_spill] sm:$0xff]  ;;  %v18868_v0 = vld [vmem:[#allocation81_spill] sm:$0xff] }
0x1840   : > { %v9776_v34 = vmul.f32 0.25, %v9773_v52  ;;  %v18869_v52 = vld [vmem:[#allocation82_spill] sm:$0xff] }
0x1842   : > { %v9777_v32 = vsel %vm4269_vm5, %v9776_v34, -inf }
0x1843   : > { %v9778_v23 = vrot.slane %v9777_v32, 4 }
0x1845   : > { %v9779_v1 = vmax.f32 %v9777_v32, %v9778_v23  ;;  %v18871_v32 = vld [vmem:[#allocation154_spill] sm:$0xff]  ;;  %v18872_v23 = vld [vmem:[#allocation157_spill] sm:$0xff] }
0x1847   : > { %v9780_v61 = vrot.slane %v9779_v1, 2 }
0x1849   : > { %v9781_v36 = vmax.f32 %v9779_v1, %v9780_v61  ;;  %v18873_v1 = vld [vmem:[#allocation162_spill] sm:$0xff]  ;;  %v18874_v61 = vld [vmem:[#allocation163_spill] sm:$0xff] }
0x184b   : > { %v9782_v30 = vrot.slane %v9781_v36, 1 }
0x184d   : > { %v9783_v48 = vmax.f32 %v9781_v36, %v9782_v30  ;;  %v18875_v36 = vld [vmem:[#allocation166_spill] sm:$0xff]  ;;  %v18876_v30 = vld [vmem:[#allocation169_spill] sm:$0xff] }
0x184f   : > { %v9784_v56 = vsub.f32 %v9776_v34, %v9783_v48  ;;  %v18870_v34 = vld [vmem:[#allocation151_spill] sm:$0xff] }
0x1850   : > { %v18877_v48 = vld [vmem:[#allocation171_spill] sm:$0xff] }
0x1851   : > { %v9785_v33 = vmul.f32 1.442695, %v9784_v56  ;;  %v18878_v56 = vld [vmem:[#allocation172_spill] sm:$0xff] }
0x1853   : > { %15375 = vpow2.f32 %v9785_v33 }
0x1860   : > { %v15376_v54 = vpop.eup %15375 }
0x1861   : > { %v9787_v60 = vsel %vm4269_vm5, %v15376_v54, 0.0 }
0x1862   : > { %v9788_v62 = vrot.slane %v9787_v60, 4 }
0x1864   : > { %v9789_v18 = vadd.f32 %v9788_v62, %v9787_v60 }
0x1866   : > { %v9790_v47 = vrot.slane %v9789_v18, 2 }
0x1868   : > { %v9791_v14 = vadd.f32 %v9790_v47, %v9789_v18 }
0x186a   : > { %v9792_v4 = vrot.slane %v9791_v14, 1 }
0x186c   : > { %v9793_v45 = vadd.f32 %v9792_v4, %v9791_v14 }
0x186e   : > { %15377 = vrcp.f32 %v9793_v45 }
0x187b   : > { %v15378_v27 = vpop.eup %15377 }
0x187c   : > { %v9795_v50 = vmul.f32 %v15378_v27, %v15376_v54 }
0x187e   : > { %v9797_v20 = vsel %vm4269_vm5, %v9795_v50, 0  ;;  %12213 = vst.msk [vmem:[%s1443_s15] sm:$0xff] %vm4269_vm5, %v9795_v50  ;;  %s18916_s15 = sld [smem:[#allocation29_spill]] }
0x187f   : > { %v9865_v28 = vand.u32 4294901760, %v9797_v20 }
0x1881   : > { %v9866_v51 = vsub.f32 %v9797_v20, %v9865_v28  ;;  %14856 = vmatmul.mubr.f32.vlgmr.msra.gmra.mxu1 %v9865_v28 }
0x1882   : > { %14864 = vmatpush3.msra.mxu1 %v16826_v6  ;;  %14895 = vmatprep.mubr.msk.f32.mxu1 %vm15458_vm1, %v18670_v35 }
0x1883   : > { %v9867_v31 = vand.u32 4294901760, %v9866_v51  ;;  %14865 = vmatprep.subr.mxu1 %v18670_v35 }
0x1884   : > { %14866 = vmatpush3.msra.mxu1 %v16834_v8 }
0x1885   : > { %v9868_v57 = vsub.f32 %v9866_v51, %v9867_v31  ;;  %14867 = vmatprep.subr.mxu1 %v18670_v35 }
0x1886   : > { %14868 = vmatpush3.msra.mxu1 %v16843_v21 }
0x1887   : > { %v9869_v24 = vand.u32 4294901760, %v9868_v57  ;;  %14869 = vmatprep.subr.mxu1 %v18670_v35 }
0x1888   : > { %14870 = vmatpush3.msra.mxu1 %v16852_v55 }
0x1889   : > { %14836 = vmatmul.mubr.f32.vlgmr.msra.gmra.mxu0 %v9869_v24  ;;  %14871 = vmatprep.subr.mxu1 %v18670_v35 }
0x188a   : > { %14839 = vmatpush3.msra.mxu0 %v18861_v41  ;;  %14840 = vmatprep.mubr.msk.f32.mxu0 %vm15458_vm1, %v18670_v35 }
0x188b   : > { %14843 = vmatprep.subr.mxu0 %v18670_v35  ;;  %14872 = vmatpush3.msra.mxu1 %v16864_v40 }
0x188c   : > { %14873 = vmatprep.subr.mxu1 %v18670_v35 }
0x188d   : > { %14841 = vmatmul.mubr.f32.vlgmr.msra.gmra.mxu0 %v9865_v28  ;;  %14874 = vmatpush3.msra.mxu1 %v16876_v3 }
0x188e   : > { %14844 = vmatpush3.msra.mxu0 %v18862_v25  ;;  %14845 = vmatprep.mubr.msk.f32.mxu0 %vm15458_vm1, %v18670_v35 }
0x188f   : > { %14848 = vmatprep.subr.mxu0 %v18670_v35  ;;  %14875 = vmatprep.subr.mxu1 %v18670_v35 }
0x1890   : > { %14876 = vmatpush3.msra.mxu1 %v16966_v29 }
0x1891   : > { %14846 = vmatmul.mubr.f32.vlgmr.msra.gmra.mxu0 %v9866_v51  ;;  %14877 = vmatprep.subr.mxu1 %v18670_v35 }
0x1892   : > { %14849 = vmatpush3.msra.mxu0 %v18860_v26  ;;  %14850 = vmatprep.mubr.msk.f32.mxu0 %vm15458_vm1, %v18670_v35 }
0x1893   : > { %14858 = vmatprep.subr.mxu0 %v18670_v35  ;;  %14878 = vmatpush3.msra.mxu1 %v16972_v39 }
0x1894   : > { %14879 = vmatprep.subr.mxu1 %v18670_v35 }
0x1895   : > { %14851 = vmatmul.mubr.f32.vlgmr.msra.gmra.mxu0 %v9867_v31  ;;  %14880 = vmatpush3.msra.mxu1 %v16983_v17 }
0x1896   : > { %14859 = vmatpush3.msra.mxu0 %v18860_v26  ;;  %14860 = vmatprep.mubr.msk.f32.mxu0 %vm15458_vm1, %v18670_v35  ;;  %v18864_v26 = vld [vmem:[#allocation75_spill] sm:$0xff] }
0x1897   : > { %14898 = vmatprep.subr.mxu0 %v18670_v35  ;;  %14881 = vmatprep.subr.mxu1 %v18670_v35 }
0x1898   : > { %14882 = vmatpush3.msra.mxu1 %v16996_v19 }
0x1899   : > { %14861 = vmatmul.mubr.f32.vlgmr.msra.gmra.mxu0 %v9865_v28  ;;  %14883 = vmatprep.subr.mxu1 %v18670_v35 }
0x189a   : > { %14899 = vmatpush3.msra.mxu0 %v18863_v46  ;;  %14884 = vmatpush3.msra.mxu1 %v17012_v2 }
0x189b   : > { %14900 = vmatprep.subr.mxu0 %v18670_v35  ;;  %14885 = vmatprep.subr.mxu1 %v18670_v35 }
0x189c   : > { %14901 = vmatpush3.msra.mxu0 %v18864_v26  ;;  %14886 = vmatpush3.msra.mxu1 %v17024_v10 }
0x189d   : > { %14902 = vmatprep.subr.mxu0 %v18670_v35  ;;  %14887 = vmatprep.subr.mxu1 %v18670_v35 }
0x189e   : > { %14903 = vmatpush3.msra.mxu0 %v18865_v12  ;;  %14930 = vmatprep.mubr.msk.f32.mxu0 %vm15458_vm1, %v18670_v35 }
0x189f   : > { %14904 = vmatprep.subr.mxu0 %v18670_v35  ;;  %14888 = vmatpush3.msra.mxu1 %v17040_v53 }
0x18a0   : > { %14905 = vmatpush3.msra.mxu0 %v18866_v42  ;;  %14889 = vmatprep.subr.mxu1 %v18670_v35 }
0x18a1   : > { %14906 = vmatprep.subr.mxu0 %v18670_v35  ;;  %14890 = vmatpush3.msra.mxu1 %v17058_v63 }
0x18a2   : > { %14907 = vmatpush3.msra.mxu0 %v18867_v7  ;;  %14891 = vmatprep.subr.mxu1 %v18670_v35 }
0x18a3   : > { %14908 = vmatprep.subr.mxu0 %v18670_v35  ;;  %14892 = vmatpush3.msra.mxu1 %v17075_v5 }
0x18a4   : > { %14909 = vmatpush3.msra.mxu0 %v18868_v0  ;;  %14893 = vmatprep.subr.mxu1 %v18670_v35 }
0x18a5   : > { %14910 = vmatprep.subr.mxu0 %v18670_v35  ;;  %14894 = vmatpush3.msra.mxu1 %v17095_v13 }
0x18a6   : > { %14911 = vmatpush3.msra.mxu0 %v18869_v52  ;;  %14933 = vmatprep.subr.mxu1 %v18670_v35 }
0x18a7   : > { %14912 = vmatprep.subr.mxu0 %v18670_v35 }
0x18a8   : > { %14913 = vmatpush3.msra.mxu0 %v18870_v34 }
0x18a9   : > { %14914 = vmatprep.subr.mxu0 %v18670_v35 }
0x18aa   : > { %14915 = vmatpush3.msra.mxu0 %v18871_v32 }
0x18ab   : > { %14916 = vmatprep.subr.mxu0 %v18670_v35 }
0x18ac   : > { %14917 = vmatpush3.msra.mxu0 %v18872_v23 }
0x18ad   : > { %14918 = vmatprep.subr.mxu0 %v18670_v35 }
0x18ae   : > { %14919 = vmatpush3.msra.mxu0 %v18873_v1 }
0x18af   : > { %14920 = vmatprep.subr.mxu0 %v18670_v35 }
0x18b0   : > { %14921 = vmatpush3.msra.mxu0 %v18874_v61 }
0x18b1   : > { %14922 = vmatprep.subr.mxu0 %v18670_v35 }
0x18b2   : > { %14923 = vmatpush3.msra.mxu0 %v18875_v36 }
0x18b3   : > { %14924 = vmatprep.subr.mxu0 %v18670_v35 }
0x18b4   : > { %14925 = vmatpush3.msra.mxu0 %v18876_v30 }
0x18b5   : > { %14926 = vmatprep.subr.mxu0 %v18670_v35 }
0x18b6   : > { %14927 = vmatpush3.msra.mxu0 %v18877_v48 }
0x18b7   : > { %14928 = vmatprep.subr.mxu0 %v18670_v35 }
0x18b8   : > { %14929 = vmatpush3.msra.mxu0 %v18878_v56 }
0x18b9   : > { %14968 = vmatprep.subr.mxu0 %v18670_v35 }
0x1941   : > { %v10169_v33 = vpop.f32.mrf.mxu1 }
0x1943   : > { %v14857_v54 = vpop.f32.mrf.mxu1 }
0x1949   : > { %v9871_v60 = vpop.f32.mrf.mxu0 }
0x194b   : > { %v14837_v62 = vpop.f32.mrf.mxu0 }
0x194d   : > { %v9947_v18 = vpop.f32.mrf.mxu0 }
0x194e   : > { %v9948_v4 = vadd.f32 %v9947_v18, %v9871_v60 }
0x194f   : > { %v14842_v47 = vpop.f32.mrf.mxu0 }
0x1951   : > { %v10021_v14 = vpop.f32.mrf.mxu0 }
0x1952   : > { %v10022_v27 = vadd.f32 %v10021_v14, %v9948_v4 }
0x1953   : > { %v14847_v45 = vpop.f32.mrf.mxu0 }
0x1955   : > { %v10095_v50 = vpop.f32.mrf.mxu0 }
0x1956   : > { %v10096_v20 = vadd.f32 %v10095_v50, %v10022_v27 }
0x1957   : > { %v14852_v28 = vpop.f32.mrf.mxu0 }
0x1958   : > { %v10170_v51 = vadd.f32 %v10169_v33, %v10096_v20 }
0x1959   : > { %v10241_v31 = vpop.f32.mrf.mxu0 }
0x195a   : > { %v10242_v57 = vadd.f32 %v10241_v31, %v10170_v51 }
0x195b   : > { %v14862_v24 = vpop.f32.mrf.mxu0 }
0x195c   : > { %v10245_v41 = vmul.f32 %v10242_v57, %v17677_v38  ;;  %v10935_v24 = vld [vmem:[%s18903_s26 + $0xc0] sm:$0xff] }
0x195e   : > { %v10246_v25 = vrot.slane %v10245_v41, 4 }
0x1960   : > { %v10247_v46 = vadd.f32 %v10246_v25, %v10245_v41  ;;  %v10939_v41 = vld [vmem:[%s18903_s26 + $0xe0] sm:$0xff]  ;;  %v10936_v25 = vld [vmem:[%s18903_s26 + $0xc8] sm:$0xff] }
0x1962   : > { %v10248_v26 = vrot.slane %v10247_v46, 2 }
0x1964   : > { %v10249_v12 = vadd.f32 %v10248_v26, %v10247_v46  ;;  %v12520_v46 = vcombine.high %v10935_v24, %v10939_v41  ;;  %v10940_v26 = vld [vmem:[%s18903_s26 + $0xe8] sm:$0xff] }
0x1966   : > { %v10250_v42 = vrot.slane %v10249_v12, 1 }
0x1968   : > { %v10251_v7 = vadd.f32 %v10250_v42, %v10249_v12  ;;  %v12519_v12 = vcombine.low %v10935_v24, %v10939_v41  ;;  %v12521_v42 = vcombine.low %v10936_v25, %v10940_v26 }
0x196a   : > { %v17927_v0 = vand.u32 4294901760, %v10251_v7 }
0x196c   : > { %v17930_v52 = vsub.f32 %v10251_v7, %v17927_v0  ;;  %14931 = vmatmul.mubr.f32.vlgmr.msra.gmra.mxu0 %v17927_v0  ;;  %v12522_v7 = vcombine.high %v10936_v25, %v10940_v26  ;;  %v10917_v26 = vld [vmem:[%s18903_s26 + $0x30] sm:$0xff] }
0x196d   : > { %14969 = vmatpush3.msra.mxu0 %v16826_v6  ;;  %15000 = vmatprep.mubr.msk.f32.mxu0 %vm15458_vm1, %v18670_v35 }
0x196e   : > { %14970 = vmatprep.subr.mxu0 %v18670_v35  ;;  %v10335_v38 = vand.u32 4294901760, %v17930_v52 }
0x196f   : > { %14971 = vmatpush3.msra.mxu0 %v16834_v8 }
0x1970   : > { %14972 = vmatprep.subr.mxu0 %v18670_v35  ;;  %v10336_v34 = vsub.f32 %v17930_v52, %v10335_v38 }
0x1971   : > { %14973 = vmatpush3.msra.mxu0 %v16843_v21 }
0x1972   : > { %14974 = vmatprep.subr.mxu0 %v18670_v35  ;;  %v10337_v32 = vand.u32 4294901760, %v10336_v34 }
0x1973   : > { %14975 = vmatpush3.msra.mxu0 %v16852_v55 }
0x1974   : > { %14976 = vmatprep.subr.mxu0 %v18670_v35  ;;  %14896 = vmatmul.mubr.f32.vlgmr.msra.gmra.mxu1 %v10337_v32  ;;  %v10932_v32 = vld [vmem:[%s18903_s26 + $0xa8] sm:$0xff] }
0x1975   : > { %14934 = vmatpush3.msra.mxu1 %v16841_v11  ;;  %14977 = vmatpush3.msra.mxu0 %v16864_v40  ;;  %v18879_v11 = vld [vmem:[#allocation153_spill] sm:$0xff] }
0x1976   : > { %14935 = vmatprep.subr.mxu1 %v18670_v35  ;;  %14978 = vmatprep.subr.mxu0 %v18670_v35 }
0x1977   : > { %14936 = vmatpush3.msra.mxu1 %v16850_v59  ;;  %14979 = vmatpush3.msra.mxu0 %v16876_v3  ;;  %v18880_v59 = vld [vmem:[#allocation155_spill] sm:$0xff] }
0x1978   : > { %14937 = vmatprep.subr.mxu1 %v18670_v35  ;;  %14980 = vmatprep.subr.mxu0 %v18670_v35 }
0x1979   : > { %14938 = vmatpush3.msra.mxu1 %v16862_v15  ;;  %14981 = vmatpush3.msra.mxu0 %v16966_v29  ;;  %v18881_v15 = vld [vmem:[#allocation159_spill] sm:$0xff] }
0x197a   : > { %14939 = vmatprep.subr.mxu1 %v18670_v35  ;;  %14982 = vmatprep.subr.mxu0 %v18670_v35 }
0x197b   : > { %14940 = vmatpush3.msra.mxu1 %v16874_v43  ;;  %14983 = vmatpush3.msra.mxu0 %v16972_v39  ;;  %v18882_v43 = vld [vmem:[#allocation161_spill] sm:$0xff] }
0x197c   : > { %14941 = vmatprep.subr.mxu1 %v18670_v35  ;;  %14984 = vmatprep.subr.mxu0 %v18670_v35 }
0x197d   : > { %14942 = vmatpush3.msra.mxu1 %v16889_v16  ;;  %14985 = vmatpush3.msra.mxu0 %v16983_v17  ;;  %v18883_v16 = vld [vmem:[#allocation165_spill] sm:$0xff] }
0x197e   : > { %14943 = vmatprep.subr.mxu1 %v18670_v35  ;;  %14986 = vmatprep.subr.mxu0 %v18670_v35 }
0x197f   : > { %14944 = vmatpush3.msra.mxu1 %v16902_v9  ;;  %14987 = vmatpush3.msra.mxu0 %v16996_v19  ;;  %v18890_v9 = vld [vmem:[#allocation77_spill] sm:$0xff] }
0x1980   : > { %14945 = vmatprep.subr.mxu1 %v18670_v35  ;;  %14988 = vmatprep.subr.mxu0 %v18670_v35 }
0x1981   : > { %14946 = vmatpush3.msra.mxu1 %v16970_v22  ;;  %14989 = vmatpush3.msra.mxu0 %v17012_v2  ;;  %v18892_v22 = vld [vmem:[#allocation80_spill] sm:$0xff] }
0x1982   : > { %14947 = vmatprep.subr.mxu1 %v18670_v35  ;;  %14990 = vmatprep.subr.mxu0 %v18670_v35 }
0x1983   : > { %14948 = vmatpush3.msra.mxu1 %v16981_v44  ;;  %14991 = vmatpush3.msra.mxu0 %v17024_v10  ;;  %v18894_v44 = vld [vmem:[#allocation152_spill] sm:$0xff] }
0x1984   : > { %14949 = vmatprep.subr.mxu1 %v18670_v35  ;;  %14992 = vmatprep.subr.mxu0 %v18670_v35 }
0x1985   : > { %14950 = vmatpush3.msra.mxu1 %v16994_v58  ;;  %14993 = vmatpush3.msra.mxu0 %v17040_v53  ;;  %v18899_v58 = vld [vmem:[#allocation164_spill] sm:$0xff] }
0x1986   : > { %14951 = vmatprep.subr.mxu1 %v18670_v35  ;;  %14994 = vmatprep.subr.mxu0 %v18670_v35 }
0x1987   : > { %14952 = vmatpush3.msra.mxu1 %v17009_v37  ;;  %14995 = vmatpush3.msra.mxu0 %v17058_v63  ;;  %v18901_v37 = vld [vmem:[#allocation170_spill] sm:$0xff] }
0x1988   : > { %14953 = vmatprep.subr.mxu1 %v18670_v35  ;;  %14996 = vmatprep.subr.mxu0 %v18670_v35 }
0x1989   : > { %14954 = vmatpush3.msra.mxu1 %v18879_v11  ;;  %14997 = vmatpush3.msra.mxu0 %v17075_v5 }
0x198a   : > { %14955 = vmatprep.subr.mxu1 %v18670_v35  ;;  %14998 = vmatprep.subr.mxu0 %v18670_v35 }
0x198b   : > { %14956 = vmatpush3.msra.mxu1 %v18880_v59  ;;  %14999 = vmatpush3.msra.mxu0 %v17095_v13 }
0x198c   : > { %14957 = vmatprep.subr.mxu1 %v18670_v35  ;;  %15001 = vmatmul.mubr.f32.vlgmr.msra.gmra.mxu0 %v10335_v38  ;;  %v10928_v38 = vld [vmem:[%s18903_s26 + $0x88] sm:$0xff] }
0x198d   : > { %15038 = vmatprep.subr.mxu0 %v18670_v35  ;;  %14958 = vmatpush3.msra.mxu1 %v18881_v15  ;;  %v12513_v59 = vcombine.low %v10928_v38, %v10932_v32  ;;  %v12514_v15 = vcombine.high %v10928_v38, %v10932_v32 }
0x198e   : > { %15039 = vmatpush3.msra.mxu0 %v16826_v6  ;;  %14959 = vmatprep.subr.mxu1 %v18670_v35  ;;  %v18884_v6 = vld [vmem:[#allocation168_spill] sm:$0xff] }
0x198f   : > { %15040 = vmatprep.subr.mxu0 %v18670_v35  ;;  %14960 = vmatpush3.msra.mxu1 %v18882_v43  ;;  %v10919_v43 = vld [vmem:[%s18903_s26 + $0x40] sm:$0xff] }
0x1990   : > { %15041 = vmatpush3.msra.mxu0 %v16834_v8  ;;  %14961 = vmatprep.subr.mxu1 %v18670_v35  ;;  %v18885_v8 = vld [vmem:[#allocation74_spill] sm:$0xff] }
0x1991   : > { %15042 = vmatprep.subr.mxu0 %v18670_v35  ;;  %14962 = vmatpush3.msra.mxu1 %v18883_v16  ;;  %v10923_v16 = vld [vmem:[%s18903_s26 + $0x60] sm:$0xff] }
0x1992   : > { %15043 = vmatpush3.msra.mxu0 %v16843_v21  ;;  %14963 = vmatprep.subr.mxu1 %v18670_v35  ;;  %v18886_v21 = vld [vmem:[#allocation71_spill] sm:$0xff] }
0x1993   : > { %15044 = vmatprep.subr.mxu0 %v18670_v35  ;;  %14964 = vmatpush3.msra.mxu1 %v18884_v6  ;;  %v10920_v6 = vld [vmem:[%s18903_s26 + $0x48] sm:$0xff] }
0x1994   : > { %14965 = vmatprep.mubr.msk.f32.mxu1 %vm15458_vm1, %v18670_v35  ;;  %15045 = vmatpush3.msra.mxu0 %v16852_v55  ;;  %v18887_v55 = vld [vmem:[#allocation84_spill] sm:$0xff] }
0x1995   : > { %14966 = vmatmul.mubr.f32.vlgmr.msra.gmra.mxu1 %v17930_v52  ;;  %15003 = vmatprep.subr.mxu1 %v18670_v35  ;;  %v10931_v52 = vld [vmem:[%s18903_s26 + $0xa0] sm:$0xff] }
0x1996   : > { %15046 = vmatprep.subr.mxu0 %v18670_v35  ;;  %15004 = vmatpush3.msra.mxu1 %v18885_v8  ;;  %v12504_v8 = vcombine.high %v10919_v43, %v10923_v16 }
0x1997   : > { %15047 = vmatpush3.msra.mxu0 %v16864_v40  ;;  %15005 = vmatprep.subr.mxu1 %v18670_v35  ;;  %v18888_v40 = vld [vmem:[#allocation85_spill] sm:$0xff] }
0x1998   : > { %15048 = vmatprep.subr.mxu0 %v18670_v35  ;;  %15006 = vmatpush3.msra.mxu1 %v18886_v21  ;;  %v10924_v21 = vld [vmem:[%s18903_s26 + $0x68] sm:$0xff] }
0x1999   : > { %15049 = vmatpush3.msra.mxu0 %v16876_v3  ;;  %15007 = vmatprep.subr.mxu1 %v18670_v35  ;;  %v18889_v3 = vld [vmem:[#allocation72_spill] sm:$0xff] }
0x199a   : > { %15050 = vmatprep.subr.mxu0 %v18670_v35  ;;  %15008 = vmatpush3.msra.mxu1 %v18887_v55  ;;  %v12503_v55 = vcombine.low %v10919_v43, %v10923_v16  ;;  %v15247_v43 = vld [vmem:[%s18906_s7 + $0x70] sm:$0xff]  }
0x199b   : > { %15051 = vmatpush3.msra.mxu0 %v16966_v29  ;;  %15009 = vmatprep.subr.mxu1 %v18670_v35  ;;  %v18891_v29 = vld [vmem:[#allocation73_spill] sm:$0xff]  ;;  %v15248_v16 = vld [vmem:[%s18906_s7 + $0xf0] sm:$0xff]  }
0x199c   : > { %15052 = vmatprep.subr.mxu0 %v18670_v35  ;;  %15010 = vmatpush3.msra.mxu1 %v18888_v40  ;;  %v12505_v40 = vcombine.low %v10920_v6, %v10924_v21 }
0x199d   : > { %15053 = vmatpush3.msra.mxu0 %v16972_v39  ;;  %15011 = vmatprep.subr.mxu1 %v18670_v35  ;;  %v18893_v39 = vld [vmem:[#allocation83_spill] sm:$0xff] }
0x199e   : > { %15054 = vmatprep.subr.mxu0 %v18670_v35  ;;  %15012 = vmatpush3.msra.mxu1 %v18889_v3  ;;  %v12506_v3 = vcombine.high %v10920_v6, %v10924_v21  ;;  %v15249_v6 = vld [vmem:[%s18906_s7 + $0x30] sm:$0xff]   ;;  %v15251_v21 = vld [vmem:[%s18906_s7 + $0x68] sm:$0xff]  }
0x199f   : > { %15055 = vmatpush3.msra.mxu0 %v16983_v17  ;;  %15013 = vmatprep.subr.mxu1 %v18670_v35  ;;  %v18895_v17 = vld [vmem:[#allocation156_spill] sm:$0xff] }
0x19a0   : > { %15056 = vmatprep.subr.mxu0 %v18670_v35  ;;  %15014 = vmatpush3.msra.mxu1 %v18890_v9  ;;  %v10911_v9 = vld [vmem:[%s18903_s26] sm:$0xff] }
0x19a1   : > { %15057 = vmatpush3.msra.mxu0 %v16996_v19  ;;  %15015 = vmatprep.subr.mxu1 %v18670_v35  ;;  %v18900_v19 = vld [vmem:[#allocation167_spill] sm:$0xff] }
0x19a2   : > { %15058 = vmatprep.subr.mxu0 %v18670_v35  ;;  %15016 = vmatpush3.msra.mxu1 %v18891_v29  ;;  %v10915_v29 = vld [vmem:[%s18903_s26 + $0x20] sm:$0xff] }
0x19a3   : > { %15059 = vmatpush3.msra.mxu0 %v17012_v2  ;;  %15017 = vmatprep.subr.mxu1 %v18670_v35 }
0x19a4   : > { %15060 = vmatprep.subr.mxu0 %v18670_v35  ;;  %15018 = vmatpush3.msra.mxu1 %v18892_v22  ;;  %v10912_v22 = vld [vmem:[%s18903_s26 + $0x8] sm:$0xff] }
0x19a5   : > { %15061 = vmatpush3.msra.mxu0 %v17024_v10  ;;  %15019 = vmatprep.subr.mxu1 %v18670_v35 }
0x19a6   : > { %15062 = vmatprep.subr.mxu0 %v18670_v35  ;;  %15020 = vmatpush3.msra.mxu1 %v18893_v39  ;;  %v12496_v39 = vcombine.high %v10911_v9, %v10915_v29 }
0x19a7   : > { %15063 = vmatpush3.msra.mxu0 %v17040_v53  ;;  %15021 = vmatprep.subr.mxu1 %v18670_v35  ;;  %v18896_v53 = vld [vmem:[#allocation158_spill] sm:$0xff] }
0x19a8   : > { %15064 = vmatprep.subr.mxu0 %v18670_v35  ;;  %15022 = vmatpush3.msra.mxu1 %v18894_v44  ;;  %v10916_v44 = vld [vmem:[%s18903_s26 + $0x28] sm:$0xff] }
0x19a9   : > { %15065 = vmatpush3.msra.mxu0 %v17058_v63  ;;  %15023 = vmatprep.subr.mxu1 %v18670_v35  ;;  %v18897_v63 = vld [vmem:[#allocation160_spill] sm:$0xff] }
0x19aa   : > { %15066 = vmatprep.subr.mxu0 %v18670_v35  ;;  %15024 = vmatpush3.msra.mxu1 %v18895_v17  ;;  %v12495_v17 = vcombine.low %v10911_v9, %v10915_v29  ;;  %v15255_v9 = vld [vmem:[%s18906_s7 + $0x60] sm:$0xff]  }
0x19ab   : > { %15067 = vmatpush3.msra.mxu0 %v17075_v5  ;;  %15025 = vmatprep.subr.mxu1 %v18670_v35  ;;  %v18898_v5 = vmov 0   ;;  %v15256_v29 = vld [vmem:[%s18906_s7 + $0xe0] sm:$0xff]  }
0x19ac   : > { %15068 = vmatprep.subr.mxu0 %v18670_v35  ;;  %15026 = vmatpush3.msra.mxu1 %v18896_v53  ;;  %v12497_v53 = vcombine.low %v10912_v22, %v10916_v44 }
0x19ad   : > { %15069 = vmatpush3.msra.mxu0 %v17095_v13  ;;  %15070 = vmatprep.mubr.msk.f32.mxu0 %vm15458_vm1, %v18670_v35  ;;  %v18902_v13 = vld [vmem:[#allocation54_spill] sm:$0xff] }
0x19ae   : > { %15027 = vmatprep.subr.mxu1 %v18670_v35  ;;  %15071 = vmatmul.mubr.f32.vlgmr.msra.gmra.mxu0 %v17927_v0  ;;  %v8429_v23 = vmul.f32 0.125, %v18902_v13  ;;  %v10942_v13 = vld [vmem:[%s18903_s26 + $0xf8] sm:$0xff] }
0x19af   : > { %15028 = vmatpush3.msra.mxu1 %v18897_v63  ;;  %15035 = vmatprep.mubr.msk.f32.mxu1 %vm15458_vm1, %v18670_v35  ;;  %v12498_v63 = vcombine.high %v10912_v22, %v10916_v44  ;;  %v15257_v22 = vld [vmem:[%s18906_s7 + $0x20] sm:$0xff]   ;;  %v15259_v44 = vld [vmem:[%s18906_s7 + $0x58] sm:$0xff]  }
0x19b0   : > { %15029 = vmatprep.subr.mxu1 %v18670_v35  ;;  %11222 = vmatprep.mubr.bf16.mxu0 %v18898_v5 }
0x19b1   : > { %15030 = vmatpush3.msra.mxu1 %v18899_v58  ;;  %11198 = vmatprep.subr.bf16.mxu0 %v12522_v7  ;;  %v10937_v58 = vld [vmem:[%s18903_s26 + $0xd0] sm:$0xff] }
0x19b2   : > { %15031 = vmatprep.subr.mxu1 %v18670_v35  ;;  %11199 = vmatpush1.bf16.msra.mxu0 %v12521_v42  ;;  %v10918_v42 = vld [vmem:[%s18903_s26 + $0x38] sm:$0xff] }
0x19b3   : > { %15032 = vmatpush3.msra.mxu1 %v18900_v19  ;;  %11200 = vmatprep.subr.bf16.mxu0 %v12514_v15  ;;  %v10941_v19 = vld [vmem:[%s18903_s26 + $0xf0] sm:$0xff]  ;;  %v15246_v15 = vld [vmem:[%s18906_s7 + $0xb8] sm:$0xff]  }
0x19b4   : > { %15033 = vmatprep.subr.mxu1 %v18670_v35 }
0x19b5   : > { %15034 = vmatpush3.msra.mxu1 %v18901_v37  ;;  %v10938_v37 = vld [vmem:[%s18903_s26 + $0xd8] sm:$0xff] }
0x19b6   : > { %15036 = vmatmul.mubr.f32.vlgmr.msra.gmra.mxu1 %v17927_v0  ;;  %11157 = vmatprep.subr.bf16.mxu1 %v12520_v46  ;;  %v10927_v0 = vld [vmem:[%s18903_s26 + $0x80] sm:$0xff]  ;;  %v10913_v46 = vld [vmem:[%s18903_s26 + $0x10] sm:$0xff] }
0x19b7   : > { %11181 = vmatprep.mubr.bf16.mxu1 %v18898_v5  ;;  %11158 = vmatpush1.bf16.msra.mxu1 %v12519_v12  ;;  %v12512_v34 = vcombine.high %v10927_v0, %v10931_v52  ;;  %v12511_v11 = vcombine.low %v10927_v0, %v10931_v52  ;;  %v10914_v12 = vld [vmem:[%s18903_s26 + $0x18] sm:$0xff]  ;;  %v12500_v52 = vcombine.high %v10913_v46, %v10917_v26 }
0x19b8   : > { %11201 = vmatpush1.bf16.msra.mxu0 %v12513_v59  ;;  %v12502_v38 = vcombine.high %v10914_v12, %v10918_v42  ;;  %v12501_v32 = vcombine.low %v10914_v12, %v10918_v42  ;;  %v15245_v59 = vld [vmem:[%s18906_s7 + $0x38] sm:$0xff]  }
0x19b9   : > { %11159 = vmatprep.subr.bf16.mxu1 %v12512_v34  ;;  %11202 = vmatprep.subr.bf16.mxu0 %v12506_v3  ;;  %v12499_v34 = vcombine.low %v10913_v46, %v10917_v26  ;;  %v15254_v3 = vld [vmem:[%s18906_s7 + $0xa8] sm:$0xff]  }
0x19bb   : > { %11160 = vmatpush1.bf16.msra.mxu1 %v12511_v11  ;;  %v15244_v11 = vld [vmem:[%s18906_s7 + $0xf8] sm:$0xff]  }
0x19bc   : > { %11161 = vmatprep.subr.bf16.mxu1 %v12504_v8  ;;  %11203 = vmatpush1.bf16.msra.mxu0 %v12505_v40  ;;  %v15250_v8 = vld [vmem:[%s18906_s7 + $0xb0] sm:$0xff]   ;;  %v15253_v40 = vld [vmem:[%s18906_s7 + $0x28] sm:$0xff]  }
0x19bd   : > { %11204 = vmatprep.subr.bf16.mxu0 %v12498_v63  ;;  %v15262_v63 = vld [vmem:[%s18906_s7 + $0x98] sm:$0xff]  }
0x19bf   : > { %11162 = vmatpush1.bf16.msra.mxu1 %v12503_v55  ;;  %v15252_v55 = vld [vmem:[%s18906_s7 + $0xe8] sm:$0xff]  }
0x19c0   : > { %11163 = vmatprep.subr.bf16.mxu1 %v12496_v39  ;;  %11205 = vmatpush1.bf16.msra.mxu0 %v12497_v53  ;;  %v15258_v39 = vld [vmem:[%s18906_s7 + $0xa0] sm:$0xff]   ;;  %v15261_v53 = vld [vmem:[%s18906_s7 + $0x18] sm:$0xff]  }
0x19c3   : > { %11164 = vmatpush1.bf16.msra.mxu1 %v12495_v17  ;;  %v15260_v17 = vld [vmem:[%s18906_s7 + $0xd8] sm:$0xff]  }
0x1a2c   : > { %v10490_v2 = vpop.f32.mrf.mxu0 }
0x1a2e   : > { %v14932_v10 = vpop.f32.mrf.mxu0 }
0x1a2f   : > { %v12524_v10 = vcombine.high %v10937_v58, %v10941_v19 }
0x1a31   : > { %11239 = vmatprep.subr.bf16.mxu1 %v12524_v10  ;;  %v15267_v10 = vld [vmem:[%s18906_s7 + $0x48] sm:$0xff]  }
0x1a34   : > { %v10339_v1 = vpop.f32.mrf.mxu1 }
0x1a35   : > { %v10340_v61 = vadd.f32 %v10339_v1, %v8429_v23  ;;  %v12525_v23 = vcombine.low %v10938_v37, %v10942_v13  ;;  %v12526_v1 = vcombine.high %v10938_v37, %v10942_v13  ;;  %v15265_v37 = vld [vmem:[%s18906_s7 + $0x10] sm:$0xff]   ;;  %v15268_v13 = vld [vmem:[%s18906_s7 + $0xc8] sm:$0xff]  }
0x1a36   : > { %v14897_v36 = vpop.f32.mrf.mxu1 }
0x1a37   : > { %v10491_v30 = vadd.f32 %v10490_v2, %v10340_v61  ;;  %v12523_v2 = vcombine.low %v10937_v58, %v10941_v19  ;;  %11280 = vmatprep.subr.bf16.mxu0 %v12526_v1  ;;  %v15263_v58 = vld [vmem:[%s18906_s7 + $0x50] sm:$0xff]   ;;  %v15270_v1 = vld [vmem:[%s18906_s7 + $0x88] sm:$0xff]  }
0x1a38   : > { %v15264_v19 = vld [vmem:[%s18906_s7 + $0xd0] sm:$0xff]  }
0x1a4c   : > { %v10683_v48 = vpop.f32.mrf.mxu0 }
0x1a4e   : > { %v15002_v56 = vpop.f32.mrf.mxu0 }
0x1a4f   : > { %v10893_v56 = vld [vmem:[%s18904_s0] sm:$0x1]  ;;  %s18917_s0 = sld [smem:[#allocation32_spill]] }
0x1a55   : > { %v10594_v33 = vpop.f32.mrf.mxu1 }
0x1a56   : > { %v10595_v18 = vadd.f32 %v10594_v33, %v10491_v30 }
0x1a57   : > { %v14967_v54 = vpop.f32.mrf.mxu1 }
0x1a58   : > { %v10684_v47 = vadd.f32 %v10683_v48, %v10595_v18  ;;  %v10894_v54 = vld [vmem:[%s18905_s29] sm:$0x1]  ;;  %v10933_v18 = vld [vmem:[%s18903_s26 + $0xb0] sm:$0xff]  ;;  %s18918_s29 = sld [smem:[#allocation30_spill]] }
0x1a6e   : > { %v10889_v60 = vpop.f32.mrf.mxu0 }
0x1a70   : > { %v15072_v62 = vpop.f32.mrf.mxu0 }
0x1a71   : > { %v10929_v62 = vld [vmem:[%s18903_s26 + $0x90] sm:$0xff] }
0x1a76   : > { %v10802_v14 = vpop.f32.mrf.mxu1 }
0x1a77   : > { %v10803_v4 = vadd.f32 %v10802_v14, %v10684_v47  ;;  %v10930_v47 = vld [vmem:[%s18903_s26 + $0x98] sm:$0xff] }
0x1a78   : > { %v15037_v45 = vpop.f32.mrf.mxu1  ;;  %v10934_v14 = vld [vmem:[%s18903_s26 + $0xb8] sm:$0xff] }
0x1a79   : > { %v10890_v27 = vadd.f32 %v10889_v60, %v10803_v4  ;;  %v12517_v24 = vcombine.low %v10930_v47, %v10934_v14 }
0x1a7b   : > { %v10896_v50 = vsel %vm10895_vm7, %v10890_v27, 0.0 }
0x1a7c   : > { %10897 = vadd.xlane.f32.xlu1 %v10896_v50  ;;  %v12518_v50 = vcombine.high %v10930_v47, %v10934_v14 }
0x1b05   : > { %v10898_v20 = vpop.xlane.xlu1 %10897 }
0x1b06   : > { %v10899_v28 = vmul.f32 0.015625, %v10898_v20  ;;  %v10921_v20 = vld [vmem:[%s18903_s26 + $0x50] sm:$0xff] }
0x1b08   : > { %v18076_v51 = vsub.f32 %v10890_v27, %v10899_v28  ;;  %v12516_v27 = vcombine.high %v10929_v62, %v10933_v18  ;;  %v10925_v28 = vld [vmem:[%s18903_s26 + $0x70] sm:$0xff] }
0x1b09   : > { %v12508_v41 = vcombine.high %v10921_v20, %v10925_v28  ;;  %v12507_v7 = vcombine.low %v10921_v20, %v10925_v28 }
0x1b0a   : > { %v10901_v31 = vmul.f32 %v18076_v51, %v18076_v51 }
0x1b0c   : > { %v10902_v57 = vsel %vm10895_vm7, %v10901_v31, 0.0  ;;  %v10926_v31 = vld [vmem:[%s18903_s26 + $0x78] sm:$0xff] }
0x1b0d   : > { %10903 = vadd.xlane.f32.xlu0 %v10902_v57  ;;  %v12515_v57 = vcombine.low %v10929_v62, %v10933_v18  ;;  %v18908_v62 = vld [vmem:[#allocation38_spill] sm:$0xff] }
0x1b0e   : > { %v18909_v18 = vsub.s32 2, %v18908_v62  ;;  %v18911_v20 = vsub.s32 3, %v18908_v62 }
0x1b96   : > { %v10904_v61 = vpop.xlane.xlu0 %10903 }
0x1b97   : > { %v10905_v36 = vmul.f32 0.015625, %v10904_v61  ;;  %v15271_v61 = vld [vmem:[%s18906_s7 + $0x40] sm:$0xff]  }
0x1b99   : > { %v10906_v30 = vadd.f32 1e-05, %v10905_v36  ;;  %v15272_v36 = vld [vmem:[%s18906_s7 + $0xc0] sm:$0xff]  }
0x1b9b   : > { %15379 = vrsqrt.f32 %v10906_v30  ;;  %v15273_v30 = vld [vmem:[%s18906_s7] sm:$0xff]  }
0x1ba8   : > { %v15380_v48 = vpop.eup %15379 }
0x1ba9   : > { %v10908_v33 = vmul.f32 %v15380_v48, %v18076_v51  ;;  %v10922_v51 = vld [vmem:[%s18903_s26 + $0x58] sm:$0xff]  ;;  %v15274_v48 = vld [vmem:[%s18906_s7 + $0x80] sm:$0xff]  }
0x1baa   : > { %v12510_v25 = vcombine.high %v10922_v51, %v10926_v31  ;;  %v12509_v0 = vcombine.low %v10922_v51, %v10926_v31 }
0x1bab   : > { %v10909_v60 = vmul.f32 %v10908_v33, %v10893_v56  ;;  %v15275_v56 = vld [vmem:[%s18906_s7 + $0x178] sm:$0xff]  }
0x1bac   : > { %v15276_v33 = vld [vmem:[%s18906_s7 + $0x1f8] sm:$0xff]  }
0x1bad   : > { %v18108_v4 = vadd.f32 %v10909_v60, %v10894_v54  ;;  %v10944_v54 = vld [vmem:[%s18907_s10] sm:$0xff]  ;;  %s18919_s10 = sld [smem:[#allocation31_spill]] }
0x1bae   : > { %v11109_v60 = vrot.slane %v10944_v54, %v17371_v49  ;;  %v11117_v47 = vrot.slane %v10944_v54, %v18909_v18  ;;  %v11121_v28 = vrot.slane %v10944_v54, %v18911_v20 }
0x1baf   : > { %v10943_v45 = vpack.c.bf16 %v18108_v4, %v18108_v4 }
0x1bb1   : > { %12527 = vmatmul.mubr.msk.bf16.vlgmr.msra.gmra.mxu1 %vm2155_vm3, %v10943_v45  ;;  %12528 = vmatmul.mubr.msk.bf16.vlgmr.msra.gmra.mxu0 %vm2155_vm3, %v10943_v45 }
0x1bb2   : > { %11240 = vmatpush1.bf16.msra.mxu1 %v12523_v2  ;;  %11281 = vmatpush1.bf16.msra.mxu0 %v12525_v23  ;;  %v15266_v2 = vld [vmem:[%s18906_s7 + $0x90] sm:$0xff]   ;;  %v15269_v23 = vld [vmem:[%s18906_s7 + $0x8] sm:$0xff]  }
0x1bb3   : > { %11241 = vmatprep.subr.bf16.mxu1 %v12516_v27  ;;  %11282 = vmatprep.subr.bf16.mxu0 %v12518_v50  ;;  %v18910_v27 = vsub.s32 1, %v18908_v62 }
0x1bb4   : > { %11263 = vmatprep.mubr.bf16.mxu1 %v18898_v5  ;;  %11304 = vmatprep.mubr.bf16.mxu0 %v18898_v5  ;;  %v15243_v5 = vld [vmem:[%s18906_s7 + $0x78] sm:$0xff]  }
0x1bb5   : > { %v11113_v50 = vrot.slane %v10944_v54, %v18910_v27  ;;  %v15279_v27 = vld [vmem:[%s18906_s7 + $0x170] sm:$0xff]  }
0x1bb6   : > { %11242 = vmatpush1.bf16.msra.mxu1 %v12515_v57  ;;  %11283 = vmatpush1.bf16.msra.mxu0 %v12517_v24 }
0x1bb7   : > { %11243 = vmatprep.subr.bf16.mxu1 %v12508_v41  ;;  %11284 = vmatprep.subr.bf16.mxu0 %v12510_v25 }
0x1bba   : > { %11244 = vmatpush1.bf16.msra.mxu1 %v12507_v7  ;;  %11285 = vmatpush1.bf16.msra.mxu0 %v12509_v0 }
0x1bbb   : > { %11245 = vmatprep.subr.bf16.mxu1 %v12500_v52  ;;  %11286 = vmatprep.subr.bf16.mxu0 %v12502_v38 }
0x1bbe   : > { %11246 = vmatpush1.bf16.msra.mxu1 %v12499_v34  ;;  %11287 = vmatpush1.bf16.msra.mxu0 %v12501_v32  ;;  %v18912_v32 = vsub.s32 5, %v18908_v62 }
0x1bbf   : > { %13451 = vmatprep.subr.bf16.mxu1 %v15243_v5  ;;  %13473 = vmatprep.subr.bf16.mxu0 %v15244_v11  ;;  %v18913_v11 = vsub.s32 7, %v18908_v62 }
0x1bc0   : > { %v11129_v5 = vrot.slane %v10944_v54, %v18912_v32 }
0x1bc1   : > { %12529 = vmatmul.mubr.msk.bf16.vlgmr.msra.gmra.mxu1 %vm2155_vm3, %v10943_v45  ;;  %12530 = vmatmul.mubr.msk.bf16.vlgmr.msra.gmra.mxu0 %vm2155_vm3, %v10943_v45 }
0x1bc2   : > { %13452 = vmatpush3.bf16.msra.mxu1 %v15245_v59  ;;  %13474 = vmatpush3.bf16.msra.mxu0 %v15246_v15  ;;  %v11137_v59 = vrot.slane %v10944_v54, %v18913_v11  ;;  %v15291_v11 = vld [vmem:[%s18906_s7 + $0x158] sm:$0xff]  }
0x1bc3   : > { %13453 = vmatprep.subr.bf16.mxu1 %v15247_v43  ;;  %13475 = vmatprep.subr.bf16.mxu0 %v15248_v16 }
0x1bc6   : > { %13454 = vmatpush3.bf16.msra.mxu1 %v15249_v6  ;;  %13476 = vmatpush3.bf16.msra.mxu0 %v15250_v8 }
0x1bc7   : > { %13455 = vmatprep.subr.bf16.mxu1 %v15251_v21  ;;  %13477 = vmatprep.subr.bf16.mxu0 %v15252_v55 }
0x1bca   : > { %13456 = vmatpush3.bf16.msra.mxu1 %v15253_v40  ;;  %13478 = vmatpush3.bf16.msra.mxu0 %v15254_v3 }
0x1bcb   : > { %13457 = vmatprep.subr.bf16.mxu1 %v15255_v9  ;;  %13479 = vmatprep.subr.bf16.mxu0 %v15256_v29 }
0x1bce   : > { %13458 = vmatpush3.bf16.msra.mxu1 %v15257_v22  ;;  %13480 = vmatpush3.bf16.msra.mxu0 %v15258_v39 }
0x1bcf   : > { %13459 = vmatprep.subr.bf16.mxu1 %v15259_v44  ;;  %13481 = vmatprep.subr.bf16.mxu0 %v15260_v17  ;;  %v18914_v44 = vsub.s32 4, %v18908_v62 }
0x1bd1   : > { %v11125_v17 = vrot.slane %v10944_v54, %v18914_v44 }
0x1bd2   : > { %13460 = vmatpush3.bf16.msra.mxu1 %v15261_v53  ;;  %13482 = vmatpush3.bf16.msra.mxu0 %v15262_v63 }
0x1bd3   : > { %13461 = vmatprep.subr.bf16.mxu1 %v15263_v58  ;;  %13483 = vmatprep.subr.bf16.mxu0 %v15264_v19 }
0x1bd6   : > { %13462 = vmatpush3.bf16.msra.mxu1 %v15265_v37  ;;  %13484 = vmatpush3.bf16.msra.mxu0 %v15266_v2 }
0x1bd7   : > { %13463 = vmatprep.subr.bf16.mxu1 %v15267_v10  ;;  %13485 = vmatprep.subr.bf16.mxu0 %v15268_v13 }
0x1bda   : > { %13464 = vmatpush3.bf16.msra.mxu1 %v15269_v23  ;;  %13486 = vmatpush3.bf16.msra.mxu0 %v15270_v1 }
0x1bdb   : > { %13465 = vmatprep.subr.bf16.mxu1 %v15271_v61  ;;  %13487 = vmatprep.subr.bf16.mxu0 %v15272_v36  ;;  %v18915_v36 = vsub.s32 6, %v18908_v62  ;;  %v15281_v62 = vld [vmem:[%s18906_s7 + $0x130] sm:$0xff]  }
0x1bde   : > { %13466 = vmatpush3.bf16.msra.mxu1 %v15273_v30  ;;  %13488 = vmatpush3.bf16.msra.mxu0 %v15274_v48  ;;  %v11133_v30 = vrot.slane %v10944_v54, %v18915_v36  ;;  %v15280_v54 = vld [vmem:[%s18906_s7 + $0x1f0] sm:$0xff]  }
0x1bdf   : > { %13495 = vmatprep.subr.bf16.mxu1 %v15275_v56  ;;  %13517 = vmatprep.subr.bf16.mxu0 %v15276_v33 }
0x1c71   : > { %v11183_v14 = vpop.f32.mrf.mxu1  ;;  %v11224_v45 = vpop.f32.mrf.mxu0 }
0x1c72   : > { %v11184_v51 = vadd.f32 %v11183_v14, %v11109_v60  ;;  %v11225_v31 = vadd.f32 %v11224_v45, %v11117_v47  ;;  %v15277_v60 = vld [vmem:[%s18906_s7 + $0x138] sm:$0xff]  }
0x1c73   : > { %v11185_v57 = vpop.f32.mrf.mxu1  ;;  %v11226_v24 = vpop.f32.mrf.mxu0  ;;  %v15278_v45 = vld [vmem:[%s18906_s7 + $0x1b8] sm:$0xff]  }
0x1c74   : > { %v11321_v41 = vmul.f32 0.70710677, %v11184_v51  ;;  %v11323_v25 = vmul.f32 0.70710677, %v11225_v31  ;;  %v11186_v46 = vadd.f32 %v11185_v57, %v11113_v50  ;;  %v11227_v26 = vadd.f32 %v11226_v24, %v11121_v28  ;;  %v15284_v24 = vld [vmem:[%s18906_s7 + $0x1e8] sm:$0xff]  }
0x1c75   : > { %v11187_v49 = vpop.f32.mrf.mxu1  ;;  %v11228_v12 = vpop.f32.mrf.mxu0  ;;  %v11313_v39 = vmul.f32 0.5, %v11184_v51  ;;  %v11315_v19 = vmul.f32 0.5, %v11225_v31  ;;  %v15282_v51 = vld [vmem:[%s18906_s7 + $0x1b0] sm:$0xff]   ;;  %v15283_v31 = vld [vmem:[%s18906_s7 + $0x168] sm:$0xff]  }
0x1c76   : > { %15381 = verf.f32 %v11321_v41  ;;  %v11322_v42 = vmul.f32 0.70710677, %v11186_v46  ;;  %v11324_v52 = vmul.f32 0.70710677, %v11227_v26  ;;  %v11314_v37 = vmul.f32 0.5, %v11186_v46  ;;  %v15285_v41 = vld [vmem:[%s18906_s7 + $0x128] sm:$0xff]  }
0x1c77   : > { %15383 = verf.f32 %v11323_v25  ;;  %v11188_v7 = vpop.f32.mrf.mxu1  ;;  %v11229_v0 = vpop.f32.mrf.mxu0  ;;  %v11316_v23 = vmul.f32 0.5, %v11227_v26  ;;  %v15286_v25 = vld [vmem:[%s18906_s7 + $0x1a8] sm:$0xff]   ;;  %v15287_v46 = vld [vmem:[%s18906_s7 + $0x160] sm:$0xff]  }
0x1c78   : > { %15385 = verf.f32 %v11322_v42  ;;  %v15288_v49 = vld [vmem:[%s18906_s7 + $0x1e0] sm:$0xff]  }
0x1c79   : > { %15387 = verf.f32 %v11324_v52  ;;  %v15289_v52 = vld [vmem:[%s18906_s7 + $0x120] sm:$0xff]  }
0x1c81   : > { %v11265_v38 = vpop.f32.mrf.mxu1  ;;  %v11306_v34 = vpop.f32.mrf.mxu0 }
0x1c82   : > { %v18177_v47 = vadd.f32 %v11265_v38, %v11125_v17  ;;  %v18181_v20 = vadd.f32 %v11306_v34, %v11133_v30  ;;  %v15290_v34 = vld [vmem:[%s18906_s7 + $0x1a0] sm:$0xff]   ;;  %v15302_v17 = vld [vmem:[%s18906_s7 + $0x188] sm:$0xff]  }
0x1c83   : > { %v15382_v15 = vpop.eup %15381  ;;  %v11267_v43 = vpop.f32.mrf.mxu1 }
0x1c84   : > { %v11308_v16 = vpop.f32.mrf.mxu0  ;;  %v15384_v6 = vpop.eup %15383  ;;  %v11337_v8 = vadd.f32 1.0, %v15382_v15  ;;  %v11268_v21 = vadd.f32 %v11267_v43, %v11129_v5  ;;  %v11325_v28 = vmul.f32 0.70710677, %v18177_v47  ;;  %v11327_v57 = vmul.f32 0.70710677, %v18181_v20  ;;  %v15292_v15 = vld [vmem:[%s18906_s7 + $0x1d8] sm:$0xff]  }
0x1c85   : > { %v11309_v55 = vadd.f32 %v11308_v16, %v11137_v59  ;;  %v11269_v40 = vpop.f32.mrf.mxu1  ;;  %v15386_v9 = vpop.eup %15385  ;;  %v11339_v29 = vadd.f32 1.0, %v15384_v6  ;;  %v15293_v16 = vld [vmem:[%s18906_s7 + $0x118] sm:$0xff]  }
0x1c86   : > { %v11310_v3 = vpop.f32.mrf.mxu0  ;;  %v15388_v22 = vpop.eup %15387  ;;  %v11326_v53 = vmul.f32 0.70710677, %v11268_v21  ;;  %v11338_v10 = vadd.f32 1.0, %v15386_v9  ;;  %v11345_v13 = vmul.f32 %v11337_v8, %v11313_v39  ;;  %v11318_v42 = vmul.f32 0.5, %v11268_v21  ;;  %v15294_v6 = vld [vmem:[%s18906_s7 + $0x198] sm:$0xff]   ;;  %v15295_v8 = vld [vmem:[%s18906_s7 + $0x150] sm:$0xff]  }
0x1c87   : > { %v11270_v63 = vpop.f32.mrf.mxu1  ;;  %v11328_v2 = vmul.f32 0.70710677, %v11309_v55  ;;  %v11340_v1 = vadd.f32 1.0, %v15388_v22  ;;  %v11347_v61 = vmul.f32 %v11339_v29, %v11315_v19  ;;  %v11320_v0 = vmul.f32 0.5, %v11309_v55  ;;  %v15296_v21 = vld [vmem:[%s18906_s7 + $0x1d0] sm:$0xff]   ;;  %v15299_v3 = vld [vmem:[%s18906_s7 + $0x148] sm:$0xff]  }
0x1c88   : > { %v11311_v58 = vpop.f32.mrf.mxu0  ;;  %15389 = verf.f32 %v11326_v53  ;;  %v11346_v48 = vmul.f32 %v11338_v10, %v11314_v37  ;;  %v11481_v18 = vpack.c.bf16 %v11345_v13, %v11345_v13  ;;  %v15297_v55 = vld [vmem:[%s18906_s7 + $0x110] sm:$0xff]   ;;  %v15300_v29 = vld [vmem:[%s18906_s7 + $0x1c8] sm:$0xff]   ;;  %v15303_v53 = vld [vmem:[%s18906_s7 + $0x140] sm:$0xff]   ;;  %v11317_v19 = vmul.f32 0.5, %v18177_v47 }
0x1c89   : > { %15391 = verf.f32 %v11328_v2  ;;  %v11348_v56 = vmul.f32 %v11340_v1, %v11316_v23  ;;  %v11483_v50 = vpack.c.bf16 %v11347_v61, %v11347_v61  ;;  %v15298_v40 = vld [vmem:[%s18906_s7 + $0x190] sm:$0xff]   ;;  %v15301_v39 = vld [vmem:[%s18906_s7 + $0x108] sm:$0xff]   ;;  %v15304_v58 = vld [vmem:[%s18906_s7 + $0x1c0] sm:$0xff]   ;;  %v11319_v37 = vmul.f32 0.5, %v18181_v20 }
0x1c8a   : > { %v11482_v33 = vpack.c.bf16 %v11346_v48, %v11346_v48  ;;  %15393 = verf.f32 %v11325_v28  ;;  %v15305_v2 = vld [vmem:[%s18906_s7 + $0x100] sm:$0xff]  }
0x1c8b   : > { %v11484_v14 = vpack.c.bf16 %v11348_v56, %v11348_v56  ;;  %15395 = verf.f32 %v11327_v57  ;;  %v15306_v13 = vld [vmem:[%s18906_s7 + $0x180] sm:$0xff]  }
0x1c8c   : > { %11906 = vmatprep.mubr.bf16.mxu1 %v11482_v33 }
0x1c8d   : > { %11946 = vmatprep.mubr.bf16.mxu0 %v11484_v14  ;;  %11907 = vmatmul.mubr.bf16.vlgmr.msra.gmra.mxu1 %v11481_v18 }
0x1c8e   : > { %11947 = vmatmul.mubr.bf16.vlgmr.msra.gmra.mxu0 %v11483_v50  ;;  %13496 = vmatpush3.bf16.msra.mxu1 %v15277_v60 }
0x1c8f   : > { %13518 = vmatpush3.bf16.msra.mxu0 %v15278_v45  ;;  %13497 = vmatprep.subr.bf16.mxu1 %v15279_v27  ;;  %v11489_v45 = vld [vmem:[%s18916_s15] sm:$0x1]  ;;  %s18920_s15 = sld [smem:[#allocation33_spill]] }
0x1c90   : > { %13519 = vmatprep.subr.bf16.mxu0 %v15280_v54 }
0x1c92   : > { %13498 = vmatpush3.bf16.msra.mxu1 %v15281_v62 }
0x1c93   : > { %13520 = vmatpush3.bf16.msra.mxu0 %v15282_v51  ;;  %13499 = vmatprep.subr.bf16.mxu1 %v15283_v31 }
0x1c94   : > { %13521 = vmatprep.subr.bf16.mxu0 %v15284_v24 }
0x1c95   : > { %v15390_v26 = vpop.eup %15389 }
0x1c96   : > { %v15392_v12 = vpop.eup %15391  ;;  %v11342_v7 = vadd.f32 1.0, %v15390_v26  ;;  %13500 = vmatpush3.bf16.msra.mxu1 %v15285_v41 }
0x1c97   : > { %v11344_v38 = vadd.f32 1.0, %v15392_v12  ;;  %13522 = vmatpush3.bf16.msra.mxu0 %v15286_v25  ;;  %13501 = vmatprep.subr.bf16.mxu1 %v15287_v46  ;;  %v15394_v9 = vpop.eup %15393 }
0x1c98   : > { %v11350_v32 = vmul.f32 %v11342_v7, %v11318_v42  ;;  %13523 = vmatprep.subr.bf16.mxu0 %v15288_v49  ;;  %v15396_v22 = vpop.eup %15395  ;;  %v11341_v44 = vadd.f32 1.0, %v15394_v9  ;;  %v15311_v9 = vld [vmem:[%s15693_s4 + $0x18] sm:$0xff]  }
0x1c99   : > { %v11352_v5 = vmul.f32 %v11344_v38, %v11320_v0  ;;  %v11343_v63 = vadd.f32 1.0, %v15396_v22  ;;  %v15313_v22 = vld [vmem:[%s15693_s4 + $0x8] sm:$0xff]  }
0x1c9a   : > { %v11486_v59 = vpack.c.bf16 %v11350_v32, %v11350_v32  ;;  %13502 = vmatpush3.bf16.msra.mxu1 %v15289_v52  ;;  %v11349_v10 = vmul.f32 %v11341_v44, %v11317_v19  ;;  %v15307_v32 = vld [vmem:[%s18917_s0 + $0x18] sm:$0xff]   ;;  %v12061_v44 = vld [vmem:[%s18920_s15] sm:$0x1] }
0x1c9b   : > { %v11488_v43 = vpack.c.bf16 %v11352_v5, %v11352_v5  ;;  %13524 = vmatpush3.bf16.msra.mxu0 %v15290_v34  ;;  %13503 = vmatprep.subr.bf16.mxu1 %v15291_v11  ;;  %v11351_v23 = vmul.f32 %v11343_v63, %v11319_v37  ;;  %v15308_v5 = vld [vmem:[%s18917_s0 + $0x10] sm:$0xff]   ;;  %v15310_v11 = vld [vmem:[%s18917_s0] sm:$0xff]  }
0x1c9c   : > { %11986 = vmatprep.mubr.bf16.mxu1 %v11486_v59  ;;  %13525 = vmatprep.subr.bf16.mxu0 %v15292_v15  ;;  %v11485_v1 = vpack.c.bf16 %v11349_v10, %v11349_v10 }
0x1c9d   : > { %12026 = vmatprep.mubr.bf16.mxu0 %v11488_v43  ;;  %v11487_v61 = vpack.c.bf16 %v11351_v23, %v11351_v23 }
0x1c9e   : > { %13504 = vmatpush3.bf16.msra.mxu1 %v15293_v16 }
0x1c9f   : > { %13526 = vmatpush3.bf16.msra.mxu0 %v15294_v6  ;;  %13505 = vmatprep.subr.bf16.mxu1 %v15295_v8  ;;  %v12035_v6 = vld [vmem:[%s18918_s29] sm:$0x1]  ;;  %s1439_s29 = scalar_lea.vmem %s15701_s25, %s18922_s1 }
0x1ca0   : > { %13527 = vmatprep.subr.bf16.mxu0 %v15296_v21  ;;  %v12036_v21 = vld [vmem:[%s18919_s10] sm:$0x1] }
0x1ca2   : > { %13506 = vmatpush3.bf16.msra.mxu1 %v15297_v55 }
0x1ca3   : > { %13528 = vmatpush3.bf16.msra.mxu0 %v15298_v40  ;;  %13507 = vmatprep.subr.bf16.mxu1 %v15299_v3 }
0x1ca4   : > { %13529 = vmatprep.subr.bf16.mxu0 %v15300_v29  ;;  %v15312_v29 = vld [vmem:[%s15693_s4 + $0x10] sm:$0xff]  }
0x1ca6   : > { %13508 = vmatpush3.bf16.msra.mxu1 %v15301_v39  ;;  %v15314_v39 = vld [vmem:[%s15693_s4] sm:$0xff]  }
0x1ca7   : > { %13530 = vmatpush3.bf16.msra.mxu0 %v15302_v17  ;;  %13509 = vmatprep.subr.bf16.mxu1 %v15303_v53 }
0x1ca8   : > { %13531 = vmatprep.subr.bf16.mxu0 %v15304_v58 }
0x1caa   : > { %13510 = vmatpush3.bf16.msra.mxu1 %v15305_v2 }
0x1cab   : > { %13532 = vmatpush3.bf16.msra.mxu0 %v15306_v13  ;;  %15073 = vmatprep.subr.bf16.mxu1 %v18670_v35 }
0x1cac   : > { %15085 = vmatprep.subr.bf16.mxu0 %v18670_v35 }
0x1cad   : > { %11987 = vmatmul.mubr.bf16.vlgmr.msra.gmra.mxu1 %v11485_v1 }
0x1cae   : > { %12027 = vmatmul.mubr.bf16.vlgmr.msra.gmra.mxu0 %v11487_v61  ;;  %15081 = vmatprep.mubr.msk.bf16.mxu1 %vm15458_vm1, %v18670_v35 }
0x1caf   : > { %15093 = vmatprep.mubr.msk.bf16.mxu0 %vm15458_vm1, %v18670_v35  ;;  %15074 = vmatpush3.bf16.msra.mxu1 %v15307_v32 }
0x1cb0   : > { %15075 = vmatprep.subr.bf16.mxu1 %v18670_v35  ;;  %15086 = vmatpush3.bf16.msra.mxu0 %v15311_v9 }
0x1cb1   : > { %15087 = vmatprep.subr.bf16.mxu0 %v18670_v35 }
0x1cb3   : > { %15076 = vmatpush3.bf16.msra.mxu1 %v15308_v5 }
0x1cb4   : > { %15077 = vmatprep.subr.bf16.mxu1 %v18670_v35  ;;  %15088 = vmatpush3.bf16.msra.mxu0 %v15312_v29 }
0x1cb5   : > { %15089 = vmatprep.subr.bf16.mxu0 %v18670_v35 }
0x1cb8   : > { %15090 = vmatpush3.bf16.msra.mxu0 %v15313_v22 }
0x1cb9   : > { %15091 = vmatprep.subr.bf16.mxu0 %v18670_v35 }
0x1cbc   : > { %15092 = vmatpush3.bf16.msra.mxu0 %v15314_v39 }
0x1d4d   : > { %v13467_v36 = vpop.f32.mrf.mxu1 }
0x1d4e   : > { %v13489_v30 = vpop.f32.mrf.mxu0 }
0x1d4f   : > { %v13468_v48 = vpop.f32.mrf.mxu1 }
0x1d50   : > { %v13490_v56 = vpop.f32.mrf.mxu0  ;;  %v13469_v14 = vadd.f32 %v13468_v48, %v13467_v36 }
0x1d51   : > { %v13470_v33 = vpop.f32.mrf.mxu1  ;;  %v13491_v20 = vadd.f32 %v13490_v56, %v13489_v30 }
0x1d52   : > { %v13492_v60 = vpop.f32.mrf.mxu0  ;;  %v11909_v27 = vadd.f32 %v13469_v14, %v11489_v45 }
0x1d53   : > { %v13471_v18 = vpop.f32.mrf.mxu1 }
0x1d54   : > { %v13493_v47 = vpop.f32.mrf.mxu0  ;;  %v11949_v28 = vadd.f32 %v13491_v20, %v11909_v27 }
0x1d6d   : > { %v13511_v50 = vpop.f32.mrf.mxu1 }
0x1d6e   : > { %v13533_v54 = vpop.f32.mrf.mxu0 }
0x1d6f   : > { %v13512_v62 = vpop.f32.mrf.mxu1 }
0x1d70   : > { %v13513_v51 = vadd.f32 %v13512_v62, %v13511_v50  ;;  %v13534_v31 = vpop.f32.mrf.mxu0 }
0x1d71   : > { %v13514_v57 = vpop.f32.mrf.mxu1  ;;  %v13535_v41 = vadd.f32 %v13534_v31, %v13533_v54 }
0x1d72   : > { %v11989_v24 = vadd.f32 %v13513_v51, %v11949_v28  ;;  %v13536_v25 = vpop.f32.mrf.mxu0 }
0x1d73   : > { %v13515_v46 = vpop.f32.mrf.mxu1 }
0x1d74   : > { %v12029_v26 = vadd.f32 %v13535_v41, %v11989_v24  ;;  %v13537_v49 = vpop.f32.mrf.mxu0 }
0x1d76   : > { %v12034_v12 = vadd.f32 %v12029_v26, %v18108_v4  ;;  %v15309_v4 = vld [vmem:[%s18917_s0 + $0x8] sm:$0xff]  }
0x1d77   : > { %15078 = vmatpush3.bf16.msra.mxu1 %v15309_v4 }
0x1d78   : > { %v12037_v42 = vsel %vm10895_vm7, %v12034_v12, 0.0  ;;  %15079 = vmatprep.subr.bf16.mxu1 %v18670_v35  ;;  %v12143_v35 = vld [vmem:[#allocation2] sm:$0x1] }
0x1d79   : > { %12038 = vadd.xlane.f32.xlu1 %v12037_v42 }
0x1d7b   : > { %15080 = vmatpush3.bf16.msra.mxu1 %v15310_v11 }
0x1e02   : > { %v12039_v7 = vpop.xlane.xlu1 %12038 }
0x1e03   : > { %v12040_v0 = vmul.f32 0.015625, %v12039_v7 }
0x1e05   : > { %v12041_v52 = vsub.f32 %v12034_v12, %v12040_v0 }
0x1e07   : > { %v12042_v38 = vmul.f32 %v12041_v52, %v12041_v52 }
0x1e09   : > { %v12043_v34 = vsel %vm10895_vm7, %v12042_v38, 0.0 }
0x1e0a   : > { %12044 = vadd.xlane.f32.xlu0 %v12043_v34 }
0x1e93   : > { %v12045_v59 = vpop.xlane.xlu0 %12044 }
0x1e94   : > { %v12046_v15 = vmul.f32 0.015625, %v12045_v59 }
0x1e96   : > { %v12047_v43 = vadd.f32 1e-05, %v12046_v15 }
0x1e98   : > { %15397 = vrsqrt.f32 %v12047_v43 }
0x1ea5   : > { %v15398_v16 = vpop.eup %15397 }
0x1ea6   : > { %v12049_v8 = vmul.f32 %v15398_v16, %v12041_v52 }
0x1ea8   : > { %v12050_v55 = vmul.f32 %v12049_v8, %v12035_v6 }
0x1eaa   : > { %v12051_v40 = vadd.f32 %v12050_v55, %v12036_v21 }
0x1eac   : > { %v12060_v3 = vpack.c.bf16 %v12051_v40, %v12051_v40 }
0x1eae   : > { %15082 = vmatmul.mubr.msk.bf16.vlgmr.msra.gmra.mxu1 %vm2155_vm3, %v12060_v3 }
0x1f6e   : > { %v12123_v17 = vpop.f32.mrf.mxu1 }
0x1f6f   : > { %v12124_v53 = vadd.f32 %v12123_v17, %v12061_v44 }
0x1f70   : > { %v15083_v63 = vpop.f32.mrf.mxu1 }
0x1f71   : > { %v12130_v58 = vmul.f32 0.70710677, %v12124_v53  ;;  %v12129_v10 = vmul.f32 0.5, %v12124_v53 }
0x1f72   : > { %v12126_v19 = vpop.f32.mrf.mxu1 }
0x1f73   : > { %15399 = verf.f32 %v12130_v58 }
0x1f74   : > { %v15084_v37 = vpop.f32.mrf.mxu1 }
0x1f80   : > { %v15400_v2 = vpop.eup %15399 }
0x1f81   : > { %v12132_v13 = vadd.f32 1.0, %v15400_v2 }
0x1f83   : > { %v12133_v23 = vmul.f32 %v12132_v13, %v12129_v10 }
0x1f85   : > { %v12142_v1 = vpack.c.bf16 %v12133_v23, %v12133_v23 }
0x1f87   : > { %15094 = vmatmul.mubr.msk.bf16.vlgmr.msra.gmra.mxu0 %vm2155_vm3, %v12142_v1 }
0x2047   : > { %v12205_v61 = vpop.f32.mrf.mxu0 }
0x2048   : > { %v12206_v36 = vadd.f32 %v12205_v61, %v12143_v35 }
0x2049   : > { %v15095_v30 = vpop.f32.mrf.mxu0 }
0x204a   : > { %12212 = vst.msk [vmem:[%s1439_s29] sm:$0x1] %vm12211_vm8, %v12206_v36 }
0x204b   : > { %v12208_v48 = vpop.f32.mrf.mxu0 }
0x204d   : > { %v15096_v56 = vpop.f32.mrf.mxu0 }
0x204e PF: > { %s110_s28 = sadd.s32 1, %s15407_s28  }
0x204f   : > { %p107_p4 = scmp.ge.s32.totalorder %s110_s28, 4  }
0x2051   :  { %109 = sbr.rel (!%p107_p4) target bundleno = 99 (0x63), region = 298 }

</bundles_post_ra>
